<compile_context>
chip_gen: v6e
topology: v6e:2x2x1
jax: 0.10.0
libtpu: 0.0.40
codegen_flags: <defaults>
</compile_context>

<pallas_src>
import math
import functools

import jax
import jax.numpy as jnp
from jax.experimental import pallas as pl
from jax.experimental.pallas import tpu as pltpu


def _round_up(x, m):
    return ((x + m - 1) // m) * m


def _tpu_generation():
    try:
        kind = jax.devices()[0].device_kind.lower()
    except Exception:
        return 6
    if 'v7' in kind:
        return 7
    if 'v6' in kind:
        return 6
    return 5


_GEN = _tpu_generation()
# v7x has 64 MiB physical VMEM per TC; v5e/v6e have 128 MiB.
_VMEM_LIMIT = (48 if _GEN >= 7 else 64) * 1024 * 1024
_VMEM_BUDGET = _VMEM_LIMIT // 2
# v5e MXU is 128x128; v6e/v7x are 256x256.
_ATTN_TILE = 128 if _GEN <= 5 else 256


def _pick_tm(m, row_bytes, fixed_bytes=0, cap=1024):
    """Largest row tile (multiple of 8, <= cap) whose VMEM footprint fits."""
    tm = _round_up(min(m, cap), 8)
    while tm > 8 and tm * row_bytes + fixed_bytes > _VMEM_BUDGET:
        tm = max(8, _round_up(tm // 2, 8))
    return tm


# ---------------------------------------------------------------------------
# Pallas kernels
# ---------------------------------------------------------------------------

def _matmul_kernel(a_ref, b_ref, bias_ref, o_ref, *, activation):
    """Single-K-step bf16 matmul with fused bias + activation (no scratch)."""
    out = jnp.dot(a_ref[...], b_ref[...], preferred_element_type=jnp.float32)
    out = out + bias_ref[...]
    if activation == 'relu':
        out = jnp.maximum(out, 0.0)
    o_ref[...] = out.astype(o_ref.dtype)


def _matmul_acc_kernel(a_ref, b_ref, bias_ref, o_ref, acc_ref, *, activation):
    """K-tiled matmul with an f32 VMEM accumulator (only used for K > 1024)."""
    @pl.when(pl.program_id(2) == 0)
    def _():
        acc_ref[...] = jnp.zeros_like(acc_ref)

    acc_ref[...] += jnp.dot(a_ref[...], b_ref[...],
                            preferred_element_type=jnp.float32)

    @pl.when(pl.program_id(2) == pl.num_programs(2) - 1)
    def _():
        out = acc_ref[...] + bias_ref[...]
        if activation == 'relu':
            out = jnp.maximum(out, 0.0)
        o_ref[...] = out.astype(o_ref.dtype)


def pallas_matmul(a, b, bias=None, activation='none', out_dtype=jnp.float32):
    """(M, K) @ (K, N) [+ bias][+ ReLU] with bf16 MXU operands, f32 accumulate.

    N is never padded: lane-dense tiles when N % 128 == 0, otherwise one
    full-extent block (avoids pad+slice HBM round trips on channels).
    K stays a single step (every matmul in this model has K <= 256).
    M is tiled as large as the generation-aware VMEM budget allows.
    """
    M, K = a.shape
    K2, N = b.shape
    assert K == K2
    a = a.astype(jnp.bfloat16)
    b = b.astype(jnp.bfloat16)
    out_bytes = jnp.dtype(out_dtype).itemsize

    if N % 128 == 0:
        tn = 512
        while N % tn != 0:
            tn //= 2
    else:
        tn = N

    if K <= 1024:
        tk, k_pad = K, K
    else:
        tk = 512
        k_pad = _round_up(K, tk)
        a = jnp.pad(a, ((0, 0), (0, k_pad - K)))
        b = jnp.pad(b, ((0, k_pad - K), (0, 0)))
    k_steps = k_pad // tk

    row_bytes = 2 * tk * 2 + 2 * tn * out_bytes + (tn * 4 if k_steps > 1 else 0)
    fixed = 2 * tk * tn * 2 + 8 * tn
    tm = _pick_tm(M, row_bytes, fixed)
    m_pad = _round_up(M, tm)
    if m_pad != M:
        a = jnp.pad(a, ((0, m_pad - M), (0, 0)))

    if bias is None:
        bias_p = jnp.zeros((1, N), jnp.float32)
    else:
        bias_p = bias.astype(jnp.float32).reshape(1, N)

    if k_steps == 1:
        out = pl.pallas_call(
            functools.partial(_matmul_kernel, activation=activation),
            out_shape=jax.ShapeDtypeStruct((m_pad, N), out_dtype),
            grid=(m_pad // tm, N // tn),
            in_specs=[pl.BlockSpec((tm, tk), lambda i, j: (i, 0)),
                      pl.BlockSpec((tk, tn), lambda i, j: (0, j)),
                      pl.BlockSpec((1, tn), lambda i, j: (0, j))],
            out_specs=pl.BlockSpec((tm, tn), lambda i, j: (i, j)),
            compiler_params=pltpu.CompilerParams(
                dimension_semantics=("parallel", "parallel"),
                vmem_limit_bytes=_VMEM_LIMIT),
        )(a, b, bias_p)
    else:
        out = pl.pallas_call(
            functools.partial(_matmul_acc_kernel, activation=activation),
            out_shape=jax.ShapeDtypeStruct((m_pad, N), out_dtype),
            grid=(m_pad // tm, N // tn, k_steps),
            in_specs=[pl.BlockSpec((tm, tk), lambda i, j, k: (i, k)),
                      pl.BlockSpec((tk, tn), lambda i, j, k: (k, j)),
                      pl.BlockSpec((1, tn), lambda i, j, k: (0, j))],
            out_specs=pl.BlockSpec((tm, tn), lambda i, j, k: (i, j)),
            scratch_shapes=[pltpu.VMEM((tm, tn), jnp.float32)],
            compiler_params=pltpu.CompilerParams(
                dimension_semantics=("parallel", "parallel", "arbitrary"),
                vmem_limit_bytes=_VMEM_LIMIT),
        )(a, b, bias_p)

    if m_pad != M:
        out = out[:M]
    return out


def _conv3x3_kernel(x_ref, w_ref, b_ref, o_ref, *, stride, ho, wq, cout,
                    activation):
    """Direct 3x3 conv: 9-tap in-kernel accumulation, no im2col in HBM.

    x_ref: (s*s, Hq*Wq, Cin) flattened phase planes for one image;
    each tap is a contiguous (Ho*Wq, Cin) window of a phase plane.
    """
    nrows = ho * wq
    acc = jnp.zeros((nrows, cout), jnp.float32)
    for i in range(3):
        for j in range(3):
            ph = (i % stride) * stride + (j % stride)
            start = (i // stride) * wq + (j // stride)
            xs = x_ref[ph, pl.ds(start, nrows), :]
            acc = acc + jnp.dot(xs, w_ref[i * 3 + j],
                                preferred_element_type=jnp.float32)
    out = acc + b_ref[...]
    if activation == 'relu':
        out = jnp.maximum(out, 0.0)
    o_ref[0] = out.astype(o_ref.dtype)


def conv2d(x_nhwc, w, b=None, stride=1, padding=1, activation='none',
           out_dtype=jnp.float32):
    """NHWC conv. 1x1 -> fused Pallas matmul; 3x3 (stride 1 or 2) -> direct
    Pallas kernel (in-kernel 9-tap K loop, input read from HBM exactly once)."""
    B, H, W, Cin = x_nhwc.shape
    kh, kw, _, Cout = w.shape
    if kh == 1 and kw == 1:
        assert stride == 1 and padding == 0
        y = pallas_matmul(x_nhwc.reshape(B * H * W, Cin), w.reshape(Cin, Cout),
                          bias=b, activation=activation, out_dtype=out_dtype)
        return y.reshape(B, H, W, Cout)

    assert kh == 3 and kw == 3 and padding == 1 and stride in (1, 2)
    Ho = (H + 2 * padding - kh) // stride + 1
    Wo = (W + 2 * padding - kw) // stride + 1
    # Extra zero rows at the bottom keep every flattened tap window in-bounds;
    # the extra values only land in discarded output columns.
    extra = 1 if stride == 1 else 2
    xp = jnp.pad(x_nhwc.astype(jnp.bfloat16),
                 ((0, 0), (padding, padding + extra),
                  (padding, padding), (0, 0)))
    Hp, Wp = H + 2 * padding + extra, W + 2 * padding
    if stride == 1:
        s2, Hq, Wq = 1, Hp, Wp
        xflat = xp.reshape(B, Hq * Wq, Cin)
    else:
        assert Hp % 2 == 0 and Wp % 2 == 0
        s2, Hq, Wq = 4, Hp // 2, Wp // 2
        # space-to-depth: 4 phase planes so stride-2 taps become contiguous.
        xflat = xp.reshape(B, Hq, 2, Wq, 2, Cin).transpose(0, 2, 4, 1, 3, 5)
        xflat = xflat.reshape(B * 4, Hq * Wq, Cin)

    wf = w.reshape(9, Cin, Cout).astype(jnp.bfloat16)
    bias_p = (jnp.zeros((1, Cout), jnp.float32) if b is None
              else b.astype(jnp.float32).reshape(1, Cout))

    # TODO(synk): no output-row tiling -- one image per grid step must fit in
    #             VMEM (true for all shapes used by this model).
    out = pl.pallas_call(
        functools.partial(_conv3x3_kernel, stride=stride, ho=Ho, wq=Wq,
                          cout=Cout, activation=activation),
        out_shape=jax.ShapeDtypeStruct((B, Ho * Wq, Cout), out_dtype),
        grid=(B,),
        in_specs=[pl.BlockSpec((s2, Hq * Wq, Cin), lambda bb: (bb, 0, 0)),
                  pl.BlockSpec((9, Cin, Cout), lambda bb: (0, 0, 0)),
                  pl.BlockSpec((1, Cout), lambda bb: (0, 0))],
        out_specs=pl.BlockSpec((1, Ho * Wq, Cout), lambda bb: (bb, 0, 0)),
        compiler_params=pltpu.CompilerParams(
            dimension_semantics=("parallel",),
            vmem_limit_bytes=_VMEM_LIMIT),
    )(xflat, wf, bias_p)
    out = out.reshape(B, Ho, Wq, Cout)
    if Wq != Wo:
        out = out[:, :, :Wo, :]
    return out


def _flash_attn_kernel(q_ref, k_ref, v_ref, o_ref, m_sc, l_sc, acc_sc, *,
                       kv_len, block_k, need_mask, value_f32, exact_div):
    """Online-softmax (flash) attention over KV tiles; stats/acc in f32."""
    ki = pl.program_id(1)

    @pl.when(ki == 0)
    def _():
        m_sc[...] = jnp.full_like(m_sc, -jnp.inf)
        l_sc[...] = jnp.zeros_like(l_sc)
        acc_sc[...] = jnp.zeros_like(acc_sc)

    s = jax.lax.dot_general(q_ref[0], k_ref[0], (((1,), (1,)), ((), ())),
                            preferred_element_type=jnp.float32)
    if need_mask:  # only emitted when the KV length is actually padded
        col = jax.lax.broadcasted_iota(jnp.int32, s.shape, 1) + ki * block_k
        s = jnp.where(col < kv_len, s, -1e30)

    m_prev = m_sc[...]
    m_new = jnp.maximum(m_prev, jnp.max(s, axis=-1, keepdims=True))
    alpha = jnp.exp(m_prev - m_new)
    p = jnp.exp(s - m_new)
    l_sc[...] = alpha * l_sc[...] + jnp.sum(p, axis=-1, keepdims=True)
    v = v_ref[0]
    if value_f32:
        pv = jnp.dot(p, v.astype(jnp.float32),
                     preferred_element_type=jnp.float32)
    else:
        pv = jnp.dot(p.astype(v.dtype), v, preferred_element_type=jnp.float32)
    acc_sc[...] = alpha * acc_sc[...] + pv
    m_sc[...] = m_new

    @pl.when(ki == pl.num_programs(1) - 1)
    def _():
        if exact_div:
            inv = 1.0 / l_sc[...]
        else:
            inv = pl.reciprocal(l_sc[...], approx=True)
        o_ref[0] = (acc_sc[...] * inv).astype(o_ref.dtype)


def pallas_attention(q, k, v, scale=1.0, value_f32=False,
                     out_dtype=jnp.float32):
    """softmax(q @ k^T * scale) @ v with q:(B,N,C), k:(B,M,C), v:(B,M,Dv).

    Flash-style KV tiling.  V keeps its true last dim (no 128-lane padding in
    HBM); the softmax scale is folded into q; the grid is flattened to
    (B*Nq, Kv) so the parallel axis splits evenly across v7x's 2 TensorCores.
    value_f32=True keeps P@V unquantized + exact normalizer (Dv=2 paths).
    """
    B, N, C = q.shape
    M = k.shape[1]
    Dv = v.shape[-1]
    if scale != 1.0:
        q = q * scale
    q = q.astype(jnp.bfloat16)
    k = k.astype(jnp.bfloat16)
    v = v.astype(jnp.float32 if value_f32 else jnp.bfloat16)

    tq = min(_ATTN_TILE, _round_up(N, 8))
    tk = min(_ATTN_TILE, _round_up(M, 8))
    n_pad = _round_up(N, tq)
    m_pad = _round_up(M, tk)
    if n_pad != N:
        q = jnp.pad(q, ((0, 0), (0, n_pad - N), (0, 0)))
    if m_pad != M:
        k = jnp.pad(k, ((0, 0), (0, m_pad - M), (0, 0)))
        v = jnp.pad(v, ((0, 0), (0, m_pad - M), (0, 0)))
    nq = n_pad // tq
    nk = m_pad // tk

    out = pl.pallas_call(
        functools.partial(_flash_attn_kernel, kv_len=M, block_k=tk,
                          need_mask=(m_pad != M), value_f32=value_f32,
                          exact_div=value_f32),
        out_shape=jax.ShapeDtypeStruct((B, n_pad, Dv), out_dtype),
        grid=(B * nq, nk),
        in_specs=[pl.BlockSpec((1, tq, C), lambda t, ki: (t // nq, t % nq, 0)),
                  pl.BlockSpec((1, tk, C), lambda t, ki: (t // nq, ki, 0)),
                  pl.BlockSpec((1, tk, Dv), lambda t, ki: (t // nq, ki, 0))],
        out_specs=pl.BlockSpec((1, tq, Dv), lambda t, ki: (t // nq, t % nq, 0)),
        scratch_shapes=[pltpu.VMEM((tq, 1), jnp.float32),
                        pltpu.VMEM((tq, 1), jnp.float32),
                        pltpu.VMEM((tq, Dv), jnp.float32)],
        compiler_params=pltpu.CompilerParams(
            dimension_semantics=("parallel", "arbitrary"),
            vmem_limit_bytes=_VMEM_LIMIT),
    )(q, k, v)
    if n_pad != N:
        out = out[:, :N, :]
    return out


def _linear_ln_kernel(a_ref, w_ref, g_ref, bt_ref, o_ref, *, eps):
    y = jnp.dot(a_ref[...], w_ref[...], preferred_element_type=jnp.float32)
    mu = jnp.mean(y, axis=-1, keepdims=True)
    var = jnp.mean(jnp.square(y - mu), axis=-1, keepdims=True)
    o_ref[...] = (y - mu) * jax.lax.rsqrt(var + eps) * g_ref[...] + bt_ref[...]


def _linear_ln_res_kernel(a_ref, w_ref, g_ref, bt_ref, r_ref, o_ref, *, eps):
    y = jnp.dot(a_ref[...], w_ref[...], preferred_element_type=jnp.float32)
    mu = jnp.mean(y, axis=-1, keepdims=True)
    var = jnp.mean(jnp.square(y - mu), axis=-1, keepdims=True)
    o_ref[...] = r_ref[...] + ((y - mu) * jax.lax.rsqrt(var + eps)
                               * g_ref[...] + bt_ref[...])


def pallas_linear_ln(x, w, gamma, beta, residual=None, eps=1e-5):
    """LayerNorm(x @ w) [+ residual] fused in one kernel (C fits one tile)."""
    shp = x.shape
    Cin = shp[-1]
    C = w.shape[-1]
    a = x.reshape(-1, Cin).astype(jnp.bfloat16)
    M = a.shape[0]
    row_bytes = 2 * Cin * 2 + 2 * C * 4 + (2 * C * 4 if residual is not None else 0)
    tm = _pick_tm(M, row_bytes, fixed_bytes=2 * Cin * C * 2 + 8 * C)
    m_pad = _round_up(M, tm)
    if m_pad != M:
        a = jnp.pad(a, ((0, m_pad - M), (0, 0)))
    wb = w.astype(jnp.bfloat16)
    g = gamma.reshape(1, C).astype(jnp.float32)
    bt = beta.reshape(1, C).astype(jnp.float32)

    a_spec = pl.BlockSpec((tm, Cin), lambda i: (i, 0))
    w_spec = pl.BlockSpec((Cin, C), lambda i: (0, 0))
    vec_spec = pl.BlockSpec((1, C), lambda i: (0, 0))
    o_spec = pl.BlockSpec((tm, C), lambda i: (i, 0))
    common = dict(
        out_shape=jax.ShapeDtypeStruct((m_pad, C), jnp.float32),
        grid=(m_pad // tm,),
        out_specs=o_spec,
        compiler_params=pltpu.CompilerParams(
            dimension_semantics=("parallel",),
            vmem_limit_bytes=_VMEM_LIMIT),
    )
    if residual is None:
        out = pl.pallas_call(functools.partial(_linear_ln_kernel, eps=eps),
                             in_specs=[a_spec, w_spec, vec_spec, vec_spec],
                             **common)(a, wb, g, bt)
    else:
        r = residual.reshape(-1, C).astype(jnp.float32)
        if m_pad != M:
            r = jnp.pad(r, ((0, m_pad - M), (0, 0)))
        out = pl.pallas_call(functools.partial(_linear_ln_res_kernel, eps=eps),
                             in_specs=[a_spec, w_spec, vec_spec, vec_spec,
                                       o_spec],
                             **common)(a, wb, g, bt, r)
    if m_pad != M:
        out = out[:M]
    return out.reshape(shp[:-1] + (C,))


# ---------------------------------------------------------------------------
# JAX glue: linear, pos-enc, grids
# ---------------------------------------------------------------------------

def linear(x, w, b=None, activation='none', out_dtype=jnp.float32):
    shp = x.shape
    y = pallas_matmul(x.reshape(-1, shp[-1]), w, bias=b, activation=activation,
                      out_dtype=out_dtype)
    return y.reshape(shp[:-1] + (w.shape[-1],))


def position_embedding_sine(b, h, w, num_pos_feats, temperature=10000.0):
    """DETR-style sine embedding (GMFlow PositionEmbeddingSine, normalize=True)."""
    scale = 2.0 * math.pi
    eps = 1e-6
    y_embed = jnp.cumsum(jnp.ones((h, w), jnp.float32), axis=0)
    x_embed = jnp.cumsum(jnp.ones((h, w), jnp.float32), axis=1)
    y_embed = y_embed / (y_embed[-1:, :] + eps) * scale
    x_embed = x_embed / (x_embed[:, -1:] + eps) * scale
    dim_t = jnp.arange(num_pos_feats, dtype=jnp.float32)
    dim_t = temperature ** (2.0 * (dim_t // 2) / num_pos_feats)
    pos_x = x_embed[:, :, None] / dim_t
    pos_y = y_embed[:, :, None] / dim_t
    pos_x = jnp.stack((jnp.sin(pos_x[:, :, 0::2]),
                       jnp.cos(pos_x[:, :, 1::2])), axis=3).reshape(h, w, -1)
    pos_y = jnp.stack((jnp.sin(pos_y[:, :, 0::2]),
                       jnp.cos(pos_y[:, :, 1::2])), axis=3).reshape(h, w, -1)
    pos = jnp.concatenate((pos_y, pos_x), axis=-1)     # (h, w, 2*num_pos_feats)
    pos = jnp.broadcast_to(pos[None], (b, h, w, pos.shape[-1]))
    return pos.transpose(0, 3, 1, 2)                   # NCHW


def coords_grid(h, w):
    ys, xs = jnp.meshgrid(jnp.arange(h, dtype=jnp.float32),
                          jnp.arange(w, dtype=jnp.float32), indexing='ij')
    return jnp.stack([xs, ys], axis=0)                 # (2, h, w): x then y


# ---------------------------------------------------------------------------
# GMFlow sub-modules
# ---------------------------------------------------------------------------

def mimo_unet(params, ev1, ev2):
    # TODO(synk): MIMOUNet source not provided; approximated by a single 3x3 conv residual branch per input.
    def branch(e):
        x = e.transpose(0, 2, 3, 1)
        r = conv2d(x, params['w'], params['b'], stride=1, padding=1)
        return r.transpose(0, 3, 1, 2)
    return [[branch(ev1), branch(ev2)]]


def sk_fuse(events, residuals):
    # TODO(synk): SK (selective-kernel) module source not provided; approximated by additive fusion.
    return events[0] + residuals[0], events[1] + residuals[1]


def backbone(params, x_nchw):
    # TODO(synk): CNNEncoder residual blocks not reproduced; simplified 3x stride-2 conv+ReLU to 1/8 resolution.
    x = x_nchw.transpose(0, 2, 3, 1)
    x = conv2d(x, params['w1'], params['b1'], stride=2, padding=1,
               activation='relu', out_dtype=jnp.bfloat16)
    x = conv2d(x, params['w2'], params['b2'], stride=2, padding=1,
               activation='relu', out_dtype=jnp.bfloat16)
    x = conv2d(x, params['w3'], params['b3'], stride=2, padding=1,
               activation='relu', out_dtype=jnp.float32)
    return x.transpose(0, 3, 1, 2)                     # (B, C, H/8, W/8)


def transformer_layer(p, source, target, no_ffn, self_attn):
    """GMFlow TransformerLayer (single head, global attention, attn_splits=1)."""
    c = source.shape[-1]
    scale = 1.0 / math.sqrt(c)
    if self_attn:
        qkv_w = jnp.concatenate([p['q_w'], p['k_w'], p['v_w']], axis=1)
        qkv = linear(source, qkv_w, out_dtype=jnp.bfloat16)
        q, k, v = jnp.split(qkv, 3, axis=-1)
    else:
        q = linear(source, p['q_w'], out_dtype=jnp.bfloat16)
        kv_w = jnp.concatenate([p['k_w'], p['v_w']], axis=1)
        kv = linear(target, kv_w, out_dtype=jnp.bfloat16)
        k, v = jnp.split(kv, 2, axis=-1)

    message = pallas_attention(q, k, v, scale=scale, out_dtype=jnp.bfloat16)
    if no_ffn:
        # source + norm1(merge(attn)) fused in one kernel
        return pallas_linear_ln(message, p['merge_w'],
                                p['norm1_g'], p['norm1_b'], residual=source)
    message = pallas_linear_ln(message, p['merge_w'],
                               p['norm1_g'], p['norm1_b'])
    x = jnp.concatenate([source, message], axis=-1)
    x = linear(x, p['mlp_w1'], out_dtype=jnp.bfloat16)
    # TODO(synk): exact-erf GELU kept in XLA (bf16 in/out, computed in f32).
    x = jax.nn.gelu(x.astype(jnp.float32), approximate=False).astype(jnp.bfloat16)
    # source + norm2(mlp_w2(gelu)) fused in one kernel
    return pallas_linear_ln(x, p['mlp_w2'], p['norm2_g'], p['norm2_b'],
                            residual=source)


def feature_transformer(params, feature0, feature1):
    b, c, h, w = feature0.shape
    f0 = feature0.reshape(b, c, h * w).transpose(0, 2, 1)
    f1 = feature1.reshape(b, c, h * w).transpose(0, 2, 1)
    concat0 = jnp.concatenate([f0, f1], axis=0)        # (2B, HW, C)
    concat1 = jnp.concatenate([f1, f0], axis=0)
    for layer_p in params['layers']:
        concat0 = transformer_layer(layer_p['self'], concat0, concat0,
                                    no_ffn=True, self_attn=True)
        concat0 = transformer_layer(layer_p['cross'], concat0, concat1,
                                    no_ffn=False, self_attn=False)
        c0a, c0b = jnp.split(concat0, 2, axis=0)
        concat1 = jnp.concatenate([c0b, c0a], axis=0)
    f0o, f1o = jnp.split(concat0, 2, axis=0)
    f0o = f0o.reshape(b, h, w, c).transpose(0, 3, 1, 2)
    f1o = f1o.reshape(b, h, w, c).transpose(0, 3, 1, 2)
    return f0o, f1o


def global_correlation_softmax(feature0, feature1):
    b, c, h, w = feature0.shape
    f0 = feature0.reshape(b, c, h * w).transpose(0, 2, 1)   # (B, HW, C)
    f1 = feature1.reshape(b, c, h * w).transpose(0, 2, 1)   # (B, HW, C)
    grid = coords_grid(h, w)                                # (2, h, w)
    grid_flat = grid.reshape(2, h * w).T                    # (HW, 2)
    grid_b = jnp.broadcast_to(grid_flat[None], (b, h * w, 2))
    # value_f32: coordinate expectation -- keep P@V and the normalizer exact.
    corr = pallas_attention(f0, f1, grid_b, scale=1.0 / math.sqrt(c),
                            value_f32=True)                 # (B, HW, 2)
    correspondence = corr.reshape(b, h, w, 2).transpose(0, 3, 1, 2)
    return correspondence - grid[None]                      # flow (B,2,h,w)


def feature_flow_attention(params, feature0, flow):
    """GMFlow FeatureFlowAttention, global path (prop_radius <= 0)."""
    b, c, h, w = feature0.shape
    q_in = feature0.reshape(b, c, h * w).transpose(0, 2, 1)
    query = linear(q_in, params['q_w'], params['q_b'])
    key = linear(query, params['k_w'], params['k_b'])       # key = k_proj(query)
    value = flow.reshape(b, 2, h * w).transpose(0, 2, 1)
    out = pallas_attention(query, key, value, scale=1.0 / math.sqrt(c),
                           value_f32=True)
    return out.reshape(b, h, w, 2).transpose(0, 3, 1, 2)


def upsample_flow_convex(params, flow, feature, uf):
    """Convex upsampling with learned mask (exact GMFlowRES.upsample_flow)."""
    b, _, h, w = flow.shape
    concat = jnp.concatenate([flow, feature], axis=1).transpose(0, 2, 3, 1)
    x = conv2d(concat, params['w1'], params['b1'], stride=1, padding=1,
               activation='relu')
    mask = conv2d(x, params['w2'], params['b2'], stride=1, padding=0)
    mask = mask.transpose(0, 3, 1, 2)                        # (B, 9*uf*uf, h, w)
    mask = mask.reshape(b, 9, uf * uf, h, w)
    mask = jax.nn.softmax(mask, axis=1)
    flow_s = uf * flow
    fp = jnp.pad(flow_s, ((0, 0), (0, 0), (1, 1), (1, 1)))
    # accumulate over the 9 taps (avoids the (b,2,9,uf,uf,h,w) broadcast blow-up)
    up = jnp.zeros((b, 2, uf * uf, h, w), jnp.float32)
    tap_idx = 0
    for i in range(3):
        for j in range(3):
            tap = fp[:, :, i:i + h, j:j + w]                 # (b,2,h,w)
            up = up + mask[:, tap_idx][:, None] * tap[:, :, None]
            tap_idx += 1
    up = up.reshape(b, 2, uf, uf, h, w).transpose(0, 1, 4, 2, 5, 3)
    return up.reshape(b, 2, uf * h, uf * w)


# ---------------------------------------------------------------------------
# Full forward
# ---------------------------------------------------------------------------

def gmflow_res_forward(params, events1, events2,
                       attn_splits_list, corr_radius_list, prop_radius_list,
                       num_scales=1, feature_channels=32, upsample_factor=8):
    assert len(attn_splits_list) == len(corr_radius_list) == len(prop_radius_list) == num_scales
    # InputPadder('chairs') pads H,W to multiples of 8; inputs are already aligned -> no-op.
    B = events1.shape[0]

    unet_out = mimo_unet(params['unet'], events1, events2)
    img0, img1 = sk_fuse([events1, events2], [unet_out[-1][0], unet_out[-1][1]])

    # extract_feature
    concat = jnp.concatenate([img0, img1], axis=0)
    feat = backbone(params['backbone'], concat)
    feature0_list = [feat[:B]]
    feature1_list = [feat[B:]]

    flow = None
    flow_preds = []
    for scale_idx in range(num_scales):
        feature0 = feature0_list[scale_idx]
        feature1 = feature1_list[scale_idx]
        attn_splits = attn_splits_list[scale_idx]
        corr_radius = corr_radius_list[scale_idx]
        prop_radius = prop_radius_list[scale_idx]
        assert attn_splits == 1 and corr_radius == -1 and prop_radius <= 0, \
            "only global attention/correlation path implemented"
        # TODO(synk): flow_warp + 2x bilinear flow upsample only needed for scale_idx>0 (num_scales=1 here).

        b, c, h, w = feature0.shape
        pos = position_embedding_sine(b, h, w, feature_channels // 2)
        feature0 = feature0 + pos
        feature1 = feature1 + pos

        feature0, feature1 = feature_transformer(params['transformer'],
                                                 feature0, feature1)

        flow_pred = global_correlation_softmax(feature0, feature1)
        flow = flow_pred if flow is None else flow + flow_pred

        flow = feature_flow_attention(params['flow_attn'], feature0, flow)

        if scale_idx == num_scales - 1:
            flow_up = upsample_flow_convex(params['upsampler'], flow, feature0,
                                           uf=upsample_factor)
            flow_preds.append(flow_up)

    map_out = [[m[0], m[1]] for m in unet_out]
    return map_out, flow_preds


# ---------------------------------------------------------------------------
# Deterministic parameter initialization
# ---------------------------------------------------------------------------

def init_params(key, n_first_channels, feature_channels, num_layers, upsample_factor):
    C = feature_channels
    keys = iter(jax.random.split(key, 64))

    def nrm(shape, scale=0.05):
        return scale * jax.random.normal(next(keys), shape, jnp.float32)

    params = {}
    params['unet'] = {'w': nrm((3, 3, n_first_channels, n_first_channels)),
                      'b': jnp.zeros((n_first_channels,), jnp.float32)}
    params['backbone'] = {
        'w1': nrm((3, 3, n_first_channels, 16)), 'b1': jnp.zeros((16,), jnp.float32),
        'w2': nrm((3, 3, 16, 24)),               'b2': jnp.zeros((24,), jnp.float32),
        'w3': nrm((3, 3, 24, C)),                'b3': jnp.zeros((C,), jnp.float32),
    }

    def attn_layer(no_ffn):
        p = {'q_w': nrm((C, C)), 'k_w': nrm((C, C)), 'v_w': nrm((C, C)),
             'merge_w': nrm((C, C)),
             'norm1_g': jnp.ones((C,), jnp.float32),
             'norm1_b': jnp.zeros((C,), jnp.float32)}
        if not no_ffn:
            hid = 2 * C * 4   # ffn_dim_expansion = 4 on concat(source, message)
            p.update({'mlp_w1': nrm((2 * C, hid)), 'mlp_w2': nrm((hid, C)),
                      'norm2_g': jnp.ones((C,), jnp.float32),
                      'norm2_b': jnp.zeros((C,), jnp.float32)})
        return p

    params['transformer'] = {
        'layers': [{'self': attn_layer(True), 'cross': attn_layer(False)}
                   for _ in range(num_layers)]
    }
    params['flow_attn'] = {'q_w': nrm((C, C)), 'q_b': jnp.zeros((C,), jnp.float32),
                           'k_w': nrm((C, C)), 'k_b': jnp.zeros((C,), jnp.float32)}
    uf = upsample_factor
    params['upsampler'] = {'w1': nrm((3, 3, 2 + C, 256)),
                           'b1': jnp.zeros((256,), jnp.float32),
                           'w2': nrm((1, 1, 256, uf * uf * 9)),
                           'b2': jnp.zeros((uf * uf * 9,), jnp.float32)}
    return params


# ---------------------------------------------------------------------------
# Main
# ---------------------------------------------------------------------------

if __name__ == "__main__":
    key = jax.random.PRNGKey(0)
    k1, k2, kp = jax.random.split(key, 3)

    B, Cin, H, W = 2, 4, 32, 32     # events1/events2: NCHW, H,W multiple of 8
    feature_channels = 32
    upsample_factor = 8
    num_layers = 1

    events1 = jax.random.normal(k1, (B, Cin, H, W), jnp.float32)
    events2 = jax.random.normal(k2, (B, Cin, H, W), jnp.float32)
    params = init_params(kp, Cin, feature_channels, num_layers, upsample_factor)

    map_out, flow_preds = gmflow_res_forward(
        params, events1, events2,
        attn_splits_list=[1], corr_radius_list=[-1], prop_radius_list=[-1],
        num_scales=1, feature_channels=feature_channels,
        upsample_factor=upsample_factor)

    flow_up = jax.block_until_ready(flow_preds[0])
    _ = jax.block_until_ready(map_out[0][0])

    assert flow_up.shape == (B, 2, H, W), flow_up.shape
    assert map_out[0][0].shape == (B, Cin, H, W)
    assert bool(jnp.all(jnp.isfinite(flow_up)))
    print("KERNEL_OK")
</pallas_src>

<mosaic_0001>
module attributes {stable_mosaic.version = 11 : i64} {
  func.func @_conv3x3_kernel(%arg0: i32, %arg1: memref<1x1190x4xbf16, #tpu.memory_space<vmem>>, %arg2: memref<9x4x4xbf16, #tpu.memory_space<vmem>>, %arg3: memref<1x4xf32, #tpu.memory_space<vmem>>, %arg4: memref<1x1088x4xf32, #tpu.memory_space<vmem>>) attributes {dimension_semantics = [#tpu.dimension_semantics<parallel>], iteration_bounds = array<i64: 2>, scalar_prefetch = 0 : i64, scratch_operands = 0 : i64, tpu.core_type = #tpu.core_type<tc>, window_params = [{transform_indices = @transform_0, window_bounds = array<i64: 1, 1190, 4>}, {pipeline_mode = #tpu.pipeline_mode<synchronous>, transform_indices = @transform_1, window_bounds = array<i64: 9, 4, 4>}, {pipeline_mode = #tpu.pipeline_mode<synchronous>, transform_indices = @transform_2, window_bounds = array<i64: 1, 4>}, {transform_indices = @transform_3, window_bounds = array<i64: 1, 1088, 4>}]} {
    %cst = arith.constant 0.000000e+00 : f32
    %0 = vector.broadcast %cst : f32 to vector<1088x4xf32>
    %c0 = arith.constant 0 : index
    %c0_0 = arith.constant 0 : index
    %c0_1 = arith.constant 0 : index
    %1 = vector.load %arg1[%c0, %c0_0, %c0_1] : memref<1x1190x4xbf16, #tpu.memory_space<vmem>>, vector<1x1088x4xbf16>
    %2 = vector.shape_cast %1 : vector<1x1088x4xbf16> to vector<1088x4xbf16>
    %c0_2 = arith.constant 0 : index
    %c0_3 = arith.constant 0 : index
    %c0_4 = arith.constant 0 : index
    %3 = vector.load %arg2[%c0_2, %c0_3, %c0_4] : memref<9x4x4xbf16, #tpu.memory_space<vmem>>, vector<1x4x4xbf16>
    %4 = vector.shape_cast %3 : vector<1x4x4xbf16> to vector<4x4xbf16>
    %cst_5 = arith.constant dense<0.000000e+00> : vector<1088x4xf32>
    %5 = tpu.matmul %2, %4, %cst_5 {dimension_numbers = #tpu.dot_dimension_numbers<[1], [0], [0], [1], [0, 0, 1, 1], [], []>} : vector<1088x4xbf16>, vector<4x4xbf16>, vector<1088x4xf32> -> vector<1088x4xf32>
    %6 = arith.addf %0, %5 : vector<1088x4xf32>
    %c0_6 = arith.constant 0 : index
    %c1 = arith.constant 1 : index
    %c0_7 = arith.constant 0 : index
    %7 = vector.load %arg1[%c0_6, %c1, %c0_7] : memref<1x1190x4xbf16, #tpu.memory_space<vmem>>, vector<1x1088x4xbf16>
    %8 = vector.shape_cast %7 : vector<1x1088x4xbf16> to vector<1088x4xbf16>
    %c1_8 = arith.constant 1 : index
    %c0_9 = arith.constant 0 : index
    %c0_10 = arith.constant 0 : index
    %9 = vector.load %arg2[%c1_8, %c0_9, %c0_10] : memref<9x4x4xbf16, #tpu.memory_space<vmem>>, vector<1x4x4xbf16>
    %10 = vector.shape_cast %9 : vector<1x4x4xbf16> to vector<4x4xbf16>
    %cst_11 = arith.constant dense<0.000000e+00> : vector<1088x4xf32>
    %11 = tpu.matmul %8, %10, %cst_11 {dimension_numbers = #tpu.dot_dimension_numbers<[1], [0], [0], [1], [0, 0, 1, 1], [], []>} : vector<1088x4xbf16>, vector<4x4xbf16>, vector<1088x4xf32> -> vector<1088x4xf32>
    %12 = arith.addf %6, %11 : vector<1088x4xf32>
    %c0_12 = arith.constant 0 : index
    %c2 = arith.constant 2 : index
    %c0_13 = arith.constant 0 : index
    %13 = vector.load %arg1[%c0_12, %c2, %c0_13] : memref<1x1190x4xbf16, #tpu.memory_space<vmem>>, vector<1x1088x4xbf16>
    %14 = vector.shape_cast %13 : vector<1x1088x4xbf16> to vector<1088x4xbf16>
    %c2_14 = arith.constant 2 : index
    %c0_15 = arith.constant 0 : index
    %c0_16 = arith.constant 0 : index
    %15 = vector.load %arg2[%c2_14, %c0_15, %c0_16] : memref<9x4x4xbf16, #tpu.memory_space<vmem>>, vector<1x4x4xbf16>
    %16 = vector.shape_cast %15 : vector<1x4x4xbf16> to vector<4x4xbf16>
    %cst_17 = arith.constant dense<0.000000e+00> : vector<1088x4xf32>
    %17 = tpu.matmul %14, %16, %cst_17 {dimension_numbers = #tpu.dot_dimension_numbers<[1], [0], [0], [1], [0, 0, 1, 1], [], []>} : vector<1088x4xbf16>, vector<4x4xbf16>, vector<1088x4xf32> -> vector<1088x4xf32>
    %18 = arith.addf %12, %17 : vector<1088x4xf32>
    %c0_18 = arith.constant 0 : index
    %c34 = arith.constant 34 : index
    %c0_19 = arith.constant 0 : index
    %19 = vector.load %arg1[%c0_18, %c34, %c0_19] : memref<1x1190x4xbf16, #tpu.memory_space<vmem>>, vector<1x1088x4xbf16>
    %20 = vector.shape_cast %19 : vector<1x1088x4xbf16> to vector<1088x4xbf16>
    %c3 = arith.constant 3 : index
    %c0_20 = arith.constant 0 : index
    %c0_21 = arith.constant 0 : index
    %21 = vector.load %arg2[%c3, %c0_20, %c0_21] : memref<9x4x4xbf16, #tpu.memory_space<vmem>>, vector<1x4x4xbf16>
    %22 = vector.shape_cast %21 : vector<1x4x4xbf16> to vector<4x4xbf16>
    %cst_22 = arith.constant dense<0.000000e+00> : vector<1088x4xf32>
    %23 = tpu.matmul %20, %22, %cst_22 {dimension_numbers = #tpu.dot_dimension_numbers<[1], [0], [0], [1], [0, 0, 1, 1], [], []>} : vector<1088x4xbf16>, vector<4x4xbf16>, vector<1088x4xf32> -> vector<1088x4xf32>
    %24 = arith.addf %18, %23 : vector<1088x4xf32>
    %c0_23 = arith.constant 0 : index
    %c35 = arith.constant 35 : index
    %c0_24 = arith.constant 0 : index
    %25 = vector.load %arg1[%c0_23, %c35, %c0_24] : memref<1x1190x4xbf16, #tpu.memory_space<vmem>>, vector<1x1088x4xbf16>
    %26 = vector.shape_cast %25 : vector<1x1088x4xbf16> to vector<1088x4xbf16>
    %c4 = arith.constant 4 : index
    %c0_25 = arith.constant 0 : index
    %c0_26 = arith.constant 0 : index
    %27 = vector.load %arg2[%c4, %c0_25, %c0_26] : memref<9x4x4xbf16, #tpu.memory_space<vmem>>, vector<1x4x4xbf16>
    %28 = vector.shape_cast %27 : vector<1x4x4xbf16> to vector<4x4xbf16>
    %cst_27 = arith.constant dense<0.000000e+00> : vector<1088x4xf32>
    %29 = tpu.matmul %26, %28, %cst_27 {dimension_numbers = #tpu.dot_dimension_numbers<[1], [0], [0], [1], [0, 0, 1, 1], [], []>} : vector<1088x4xbf16>, vector<4x4xbf16>, vector<1088x4xf32> -> vector<1088x4xf32>
    %30 = arith.addf %24, %29 : vector<1088x4xf32>
    %c0_28 = arith.constant 0 : index
    %c36 = arith.constant 36 : index
    %c0_29 = arith.constant 0 : index
    %31 = vector.load %arg1[%c0_28, %c36, %c0_29] : memref<1x1190x4xbf16, #tpu.memory_space<vmem>>, vector<1x1088x4xbf16>
    %32 = vector.shape_cast %31 : vector<1x1088x4xbf16> to vector<1088x4xbf16>
    %c5 = arith.constant 5 : index
    %c0_30 = arith.constant 0 : index
    %c0_31 = arith.constant 0 : index
    %33 = vector.load %arg2[%c5, %c0_30, %c0_31] : memref<9x4x4xbf16, #tpu.memory_space<vmem>>, vector<1x4x4xbf16>
    %34 = vector.shape_cast %33 : vector<1x4x4xbf16> to vector<4x4xbf16>
    %cst_32 = arith.constant dense<0.000000e+00> : vector<1088x4xf32>
    %35 = tpu.matmul %32, %34, %cst_32 {dimension_numbers = #tpu.dot_dimension_numbers<[1], [0], [0], [1], [0, 0, 1, 1], [], []>} : vector<1088x4xbf16>, vector<4x4xbf16>, vector<1088x4xf32> -> vector<1088x4xf32>
    %36 = arith.addf %30, %35 : vector<1088x4xf32>
    %c0_33 = arith.constant 0 : index
    %c68 = arith.constant 68 : index
    %c0_34 = arith.constant 0 : index
    %37 = vector.load %arg1[%c0_33, %c68, %c0_34] : memref<1x1190x4xbf16, #tpu.memory_space<vmem>>, vector<1x1088x4xbf16>
    %38 = vector.shape_cast %37 : vector<1x1088x4xbf16> to vector<1088x4xbf16>
    %c6 = arith.constant 6 : index
    %c0_35 = arith.constant 0 : index
    %c0_36 = arith.constant 0 : index
    %39 = vector.load %arg2[%c6, %c0_35, %c0_36] : memref<9x4x4xbf16, #tpu.memory_space<vmem>>, vector<1x4x4xbf16>
    %40 = vector.shape_cast %39 : vector<1x4x4xbf16> to vector<4x4xbf16>
    %cst_37 = arith.constant dense<0.000000e+00> : vector<1088x4xf32>
    %41 = tpu.matmul %38, %40, %cst_37 {dimension_numbers = #tpu.dot_dimension_numbers<[1], [0], [0], [1], [0, 0, 1, 1], [], []>} : vector<1088x4xbf16>, vector<4x4xbf16>, vector<1088x4xf32> -> vector<1088x4xf32>
    %42 = arith.addf %36, %41 : vector<1088x4xf32>
    %c0_38 = arith.constant 0 : index
    %c69 = arith.constant 69 : index
    %c0_39 = arith.constant 0 : index
    %43 = vector.load %arg1[%c0_38, %c69, %c0_39] : memref<1x1190x4xbf16, #tpu.memory_space<vmem>>, vector<1x1088x4xbf16>
    %44 = vector.shape_cast %43 : vector<1x1088x4xbf16> to vector<1088x4xbf16>
    %c7 = arith.constant 7 : index
    %c0_40 = arith.constant 0 : index
    %c0_41 = arith.constant 0 : index
    %45 = vector.load %arg2[%c7, %c0_40, %c0_41] : memref<9x4x4xbf16, #tpu.memory_space<vmem>>, vector<1x4x4xbf16>
    %46 = vector.shape_cast %45 : vector<1x4x4xbf16> to vector<4x4xbf16>
    %cst_42 = arith.constant dense<0.000000e+00> : vector<1088x4xf32>
    %47 = tpu.matmul %44, %46, %cst_42 {dimension_numbers = #tpu.dot_dimension_numbers<[1], [0], [0], [1], [0, 0, 1, 1], [], []>} : vector<1088x4xbf16>, vector<4x4xbf16>, vector<1088x4xf32> -> vector<1088x4xf32>
    %48 = arith.addf %42, %47 : vector<1088x4xf32>
    %c0_43 = arith.constant 0 : index
    %c70 = arith.constant 70 : index
    %c0_44 = arith.constant 0 : index
    %49 = vector.load %arg1[%c0_43, %c70, %c0_44] : memref<1x1190x4xbf16, #tpu.memory_space<vmem>>, vector<1x1088x4xbf16>
    %50 = vector.shape_cast %49 : vector<1x1088x4xbf16> to vector<1088x4xbf16>
    %c8 = arith.constant 8 : index
    %c0_45 = arith.constant 0 : index
    %c0_46 = arith.constant 0 : index
    %51 = vector.load %arg2[%c8, %c0_45, %c0_46] : memref<9x4x4xbf16, #tpu.memory_space<vmem>>, vector<1x4x4xbf16>
    %52 = vector.shape_cast %51 : vector<1x4x4xbf16> to vector<4x4xbf16>
    %cst_47 = arith.constant dense<0.000000e+00> : vector<1088x4xf32>
    %53 = tpu.matmul %50, %52, %cst_47 {dimension_numbers = #tpu.dot_dimension_numbers<[1], [0], [0], [1], [0, 0, 1, 1], [], []>} : vector<1088x4xbf16>, vector<4x4xbf16>, vector<1088x4xf32> -> vector<1088x4xf32>
    %54 = arith.addf %48, %53 : vector<1088x4xf32>
    %c0_48 = arith.constant 0 : index
    %c0_49 = arith.constant 0 : index
    %55 = vector.load %arg3[%c0_48, %c0_49] : memref<1x4xf32, #tpu.memory_space<vmem>>, vector<1x4xf32>
    %56 = vector.broadcast %55 : vector<1x4xf32> to vector<1088x4xf32>
    %57 = arith.addf %54, %56 : vector<1088x4xf32>
    %c0_50 = arith.constant 0 : index
    %c0_51 = arith.constant 0 : index
    %c0_52 = arith.constant 0 : index
    %58 = vector.load %arg4[%c0_50, %c0_51, %c0_52] : memref<1x1088x4xf32, #tpu.memory_space<vmem>>, vector<1x1088x4xf32>
    %59 = vector.shape_cast %58 : vector<1x1088x4xf32> to vector<1088x4xf32>
    %60 = vector.shape_cast %57 : vector<1088x4xf32> to vector<1x1088x4xf32>
    tpu.vector_store %arg4[%c0_50, %c0_51, %c0_52], %60 {strides = array<i32>} : memref<1x1088x4xf32, #tpu.memory_space<vmem>>, vector<1x1088x4xf32>,
    return
  }
  func.func @transform_0(%arg0: i32) -> (i32, i32, i32) {
    %c0_i32 = arith.constant 0 : i32
    %c0_i32_0 = arith.constant 0 : i32
    %c0_i32_1 = arith.constant 0 : i32
    return %arg0, %c0_i32, %c0_i32_0 : i32, i32, i32
  }
  func.func @transform_1(%arg0: i32) -> (i32, i32, i32) {
    %c0_i32 = arith.constant 0 : i32
    %c0_i32_0 = arith.constant 0 : i32
    %c0_i32_1 = arith.constant 0 : i32
    %c0_i32_2 = arith.constant 0 : i32
    return %c0_i32, %c0_i32_0, %c0_i32_1 : i32, i32, i32
  }
  func.func @transform_2(%arg0: i32) -> (i32, i32) {
    %c0_i32 = arith.constant 0 : i32
    %c0_i32_0 = arith.constant 0 : i32
    %c0_i32_1 = arith.constant 0 : i32
    return %c0_i32, %c0_i32_0 : i32, i32
  }
  func.func @transform_3(%arg0: i32) -> (i32, i32, i32) {
    %c0_i32 = arith.constant 0 : i32
    %c0_i32_0 = arith.constant 0 : i32
    %c0_i32_1 = arith.constant 0 : i32
    return %arg0, %c0_i32, %c0_i32_0 : i32, i32, i32
  }
}

</mosaic_0001>

<bundles_post_ra>
// kernel: tpu_custom_call.1
= control target key start
LH: loop header
LB: loop body
LE: loop exit
PB: predicated region body
PF: predicated region fallthrough
CT: control target
= control target key end

     0   :  { %8 = vsyncpa [#allocation3], 0  ;;  %s15649_s12 = smov 0   ;;  %s20177_s0 = inlined_call_operand.vmem [shape: bf16[2,1190,4], index: 0, kind: input, shape index: {}]   ;;  %s20178_s1 = inlined_call_operand.vmem [shape: bf16[9,4,4], index: 1, kind: input, shape index: {}]   ;;  %s20179_s2 = inlined_call_operand.hbm [shape: f32[1,4], index: 2, kind: input, shape index: {}]   ;;  %s20180_s3 = inlined_call_operand.vmem [shape: f32[2,1088,4], index: 3, kind: output, shape index: {}]  }
   0x1 LB: > { %s12429_s13 = sadd.s32 4294967295, %s15626_s12   ;;  %p12431_p0 = scmp.ge.s32.totalorder %s15626_s12, 1  ;;  %s15626_s12 = sphi %s15649_s12, %s14_s12  }
   0x2   : > { %p113_p1 = scmp.lt.s32.totalorder %s15626_s12, 3  ;;  %p15158_p3 = scmp.eq.s32.totalorder %s12429_s13, 0 }
   0x3   : > { %s15628_s15 = smov [#allocation2]  }
   0x4   : > { %p15657_p2 = pnand %p12431_p0, %p113_p1  ;;  %s129_s16 = sshll.u32 %s15628_s15, 4  ;;  %s130_s16 = int_to_ptr.vmem [resolvable:$true] %s129_s16 }
   0x5   : > { %s15601_s17 = scalar_lea.vmem %s130_s16, 16  ;;  %s15608_s18 = scalar_lea.vmem %s130_s16, 32 }
   0x6   : > { %p15154_p4 = pneg %p15657_p2  ;;  %p15602_p7 = scmp.ne.s32.totalorder %s130_s16, %s15601_s17 }
   0x7   : > { %p15609_p10 = scmp.lt.s32.totalorder %s130_s16, %s130_s16  ;;  %p15610_p11 = scmp.lt.s32.totalorder %s15608_s18, %s15601_s17 }
   0x8   : > { %p15155_p5 = pnand %p15158_p3, %p15154_p4 }
   0x9   : > { %p15611_p12 = por %p15610_p11, %p15609_p10 }
   0xa   : > { %p15592_p6 = pneg %p15155_p5 }
   0xc   : > { %p15604_p8 = pnand %p15602_p7, %p15592_p6 }
   0xe   : > { %p15605_p9 = pneg %p15604_p8 }
  0x10   : > { %p15612_p13 = pnand %p15611_p12, %p15605_p9 }
  0x12   : > { %15615 = shalt.err (!%p15612_p13)
}
  0x13   : > { %15157 = dma.hbm_to_vmem [thread:$0]  (!%p15155_p5), %s20179_s2, 16, %s130_s16, [#allocation3]  }
  0x14   : > { %150 = sbr.rel (%p15657_p2) target bundleno = 1464 (0x5b8), region = 32 }
  0x19   : > { %15621 = dma.done.wait (%p15158_p3), [#allocation3], 16  }
  0x1a   : > { %15623 = vsyncadd (%p15158_p3), [#allocation3], 4294967280  ;;  %p174_p0 = scmp.lt.s32.totalorder %s12429_s13, 1  ;;  %vm1422_vm0 = vcmask 1041408   ;;  %vm668_vm1 = vsmask.f32 7424 }
  0x1b   : > { %v12438_v0 = vld [vmem:[%s20178_s1 + $0x2] sm:$0x3]  ;;  %vm1217_vm2 = vcmask 31744   ;;  %v321_v12 = vld [vmem:[%s20178_s1] sm:$0x3]  ;;  %vm2725_vm3 = vcmask 1046528  }
  0x1c   : > { %s20963_s13 = smov (!%p174_p0, %s12429_s13), 1  ;;  %15139 = vmatprep.subr.msk.bf16.mxu1 %vm1422_vm0, %v12438_v0  ;;  %15138 = vmatprep.subr.msk.bf16.mxu0 %vm1422_vm0, %v12438_v0  ;;  %v1424_v3 = vsel %vm1422_vm0, %v12438_v0, 0  ;;  %v2140_v23 = vsel %vm1422_vm0, %v321_v12, 0  ;;  %v12644_v29 = vld [vmem:[%s20178_s1 + $0x4] sm:$0x3]  ;;  %vm6875_vm5 = vcmask 1045504  }
  0x1d   : > { %s15148_s21 = smul.u32 596, %s20963_s13  ;;  %15137 = vmatpush3.bf16.msra.mxu1 %v1424_v3  ;;  %13895 = vmatpush3.bf16.msra.mxu0 %v1424_v3  ;;  %v3068_v31 = vsel %vm1422_vm0, %v12644_v29, 0  ;;  %vm5328_vm4 = vsmask.f32 6400  ;;  %vm11025_vm6 = vcmask 1044480  }
  0x1e   : > { %15140 = vmatprep.subr.msk.bf16.mxu1 %vm1422_vm0, %v321_v12  ;;  %15141 = vmatprep.subr.msk.bf16.mxu0 %vm1422_vm0, %v12644_v29  ;;  %vm9478_vm7 = vsmask.f32 5376  ;;  %s15149_s22 = smul.u32 1088, %s20963_s13 }
  0x1f   : > { %s15677_s24 = scalar_lea.vmem %s20177_s0, %s15148_s21 }
  0x20   : > { %v185_v1 = vld [vmem:[%s15677_s24] sm:$0xf]  ;;  %v186_v2 = vld [vmem:[%s15677_s24 + $0x4] sm:$0xf]  ;;  %v15170_v5 = vld [vmem:[%s15677_s24 + $0x8] sm:$0xff]   ;;  %s19480_s25 = scalar_lea.vmem %s20180_s3, %s15149_s22 }
  0x21   : > { %v15687_v4 = vcombine.low %v185_v1, %v186_v2  ;;  %v677_v8 = vshll.u32 %v15170_v5, 16  ;;  %v681_v9 = vshrl.u32 %v15170_v5, 16  ;;  %v15171_v10 = vld [vmem:[%s15677_s24 + $0x110] sm:$0xff]   ;;  %v15172_v11 = vld [vmem:[%s15677_s24 + $0x118] sm:$0xff]   ;;  %v15174_v20 = vld [vmem:[%s15677_s24 + $0x120] sm:$0xff]  }
  0x22   : > { %v941_v15 = vshll.u32 %v15171_v10, 16  ;;  %v945_v16 = vshrl.u32 %v15171_v10, 16  ;;  %v949_v17 = vshll.u32 %v15172_v11, 16  ;;  %v953_v18 = vshrl.u32 %v15172_v11, 16  ;;  %v15173_v19 = vld [vmem:[%s15677_s24 + $0x10] sm:$0xff]   ;;  %v15175_v24 = vld [vmem:[%s15677_s24 + $0x18] sm:$0xff]  }
  0x23   : > { %v670_v6 = vshrl.u32 %v15687_v4, 16  ;;  %v672_v7 = vshll.u32 %v15687_v4, 16  ;;  %v679_v14 = vrot.slane %v677_v8, 1  ;;  %v685_v27 = vshll.u32 %v15173_v19, 16  ;;  %v15176_v38 = vld [vmem:[%s15677_s24 + $0x128] sm:$0xff]   ;;  %v15177_v40 = vld [vmem:[%s15677_s24 + $0x20] sm:$0xff]  }
  0x24   : > { %v15702_v25 = vrot.slane %v941_v15, 1  ;;  %v951_v26 = vrot.slane %v949_v17, 1  ;;  %v957_v28 = vshll.u32 %v15174_v20, 16  ;;  %v689_v32 = vshrl.u32 %v15173_v19, 16  ;;  %v15178_v49 = vld [vmem:[%s15677_s24 + $0x130] sm:$0xff]   ;;  %v15179_v52 = vld [vmem:[%s15677_s24 + $0x28] sm:$0xff]  }
  0x25   : > { %v674_v13 = vrot.slane %v672_v7, 1  ;;  %v683_v22 = vor.u32 %v681_v9, %v679_v14  ;;  %v687_v35 = vrot.slane %v685_v27, 1  ;;  %v693_v37 = vshll.u32 %v15175_v24, 16  ;;  %v15180_v60 = vld [vmem:[%s15677_s24 + $0x138] sm:$0xff]   ;;  %v15181_v1 = vld [vmem:[%s15677_s24 + $0x30] sm:$0xff]   ;;  %v15182_v3 = vld [vmem:[%s15677_s24 + $0x140] sm:$0xff]  }
  0x26   : > { %v947_v33 = vor.u32 %v945_v16, %v15702_v25  ;;  %v955_v34 = vor.u32 %v953_v18, %v951_v26  ;;  %v959_v36 = vrot.slane %v957_v28, 1  ;;  %v961_v39 = vshrl.u32 %v15174_v20, 16  ;;  %v15183_v16 = vld [vmem:[%s15677_s24 + $0x38] sm:$0xff]   ;;  %v15184_v17 = vld [vmem:[%s15677_s24 + $0x148] sm:$0xff]  }
  0x27   : > { %v675_v21 = vor.u32 %v674_v13, %v670_v6  ;;  %v688_v42 = vsel %vm668_vm1, %v683_v22, %v687_v35  ;;  %v691_v44 = vor.u32 %v689_v32, %v687_v35  ;;  %v695_v45 = vrot.slane %v693_v37, 1  ;;  %v15186_v32 = vld [vmem:[%s15677_s24 + $0x150] sm:$0xff]   ;;  %v15188_v37 = vld [vmem:[%s15677_s24 + $0x158] sm:$0xff]  }
  0x28   : > { %v952_v41 = vsel %vm668_vm1, %v947_v33, %v951_v26  ;;  %v960_v43 = vsel %vm668_vm1, %v955_v34, %v959_v36  ;;  %v963_v46 = vor.u32 %v961_v39, %v959_v36  ;;  %v965_v47 = vshll.u32 %v15176_v38, 16  ;;  %v15187_v33 = vld [vmem:[%s15677_s24 + $0x48] sm:$0xff]  }
  0x29   : > { %v680_v30 = vsel %vm668_vm1, %v675_v21, %v679_v14  ;;  %13964 = vmatprep.mubr.msk.bf16.mxu1 %vm1217_vm2, %v952_v41  ;;  %v697_v48 = vshrl.u32 %v15175_v24, 16  ;;  %v701_v50 = vshll.u32 %v15177_v40, 16  ;;  %v969_v51 = vshrl.u32 %v15176_v38, 16  ;;  %v15185_v21 = vld [vmem:[%s15677_s24 + $0x40] sm:$0xff]  }
  0x2a   : > { %13896 = vmatprep.mubr.msk.bf16.mxu0 %vm1217_vm2, %v680_v30  ;;  %13965 = vmatmul.mubr.msk.bf16.vlgmr.msra.gmra.mxu1 %vm1217_vm2, %v960_v43  ;;  %v705_v53 = vshrl.u32 %v15177_v40, 16  ;;  %v696_v54 = vsel %vm668_vm1, %v691_v44, %v695_v45  ;;  %v967_v55 = vrot.slane %v965_v47, 1  ;;  %v973_v57 = vshll.u32 %v15178_v49, 16 }
  0x2b   : > { %13897 = vmatmul.mubr.msk.bf16.vlgmr.msra.gmra.mxu0 %vm1217_vm2, %v688_v42  ;;  %14033 = vmatpush3.bf16.msra.mxu1 %v2140_v23  ;;  %v699_v56 = vor.u32 %v697_v48, %v695_v45  ;;  %v703_v58 = vrot.slane %v701_v50, 1  ;;  %v709_v59 = vshll.u32 %v15179_v52, 16  ;;  %v977_v61 = vshrl.u32 %v15178_v49, 16  ;;  %v15189_v49 = vld [vmem:[%s15677_s24 + $0x50] sm:$0xff]  }
  0x2c   : > { %14171 = vmatpush3.bf16.msra.mxu0 %v3068_v31  ;;  %13900 = vmatprep.mubr.msk.bf16.mxu0 %vm1217_vm2, %v696_v54  ;;  %v968_v62 = vsel %vm668_vm1, %v963_v46, %v967_v55  ;;  %v971_v63 = vor.u32 %v969_v51, %v967_v55  ;;  %v975_v0 = vrot.slane %v973_v57, 1  ;;  %v713_v2 = vshrl.u32 %v15179_v52, 16  ;;  %v15190_v52 = vld [vmem:[%s15677_s24 + $0x160] sm:$0xff]  }
  0x2d   : > { %13968 = vmatprep.mubr.msk.bf16.mxu1 %vm1217_vm2, %v968_v62  ;;  %v704_v5 = vsel %vm668_vm1, %v699_v56, %v703_v58  ;;  %v707_v6 = vor.u32 %v705_v53, %v703_v58  ;;  %v711_v7 = vrot.slane %v709_v59, 1  ;;  %v981_v8 = vshll.u32 %v15180_v60, 16  ;;  %v15191_v56 = vld [vmem:[%s15677_s24 + $0x58] sm:$0xff]   ;;  %v15192_v59 = vld [vmem:[%s15677_s24 + $0x168] sm:$0xff]  }
  0x2e   : > { %v976_v9 = vsel %vm668_vm1, %v971_v63, %v975_v0  ;;  %v979_v10 = vor.u32 %v977_v61, %v975_v0  ;;  %v717_v11 = vshll.u32 %v15181_v1, 16  ;;  %v985_v12 = vshrl.u32 %v15180_v60, 16 }
  0x2f   : > { %v712_v13 = vsel %vm668_vm1, %v707_v6, %v711_v7  ;;  %v983_v14 = vrot.slane %v981_v8, 1  ;;  %v989_v15 = vshll.u32 %v15182_v3, 16  ;;  %v721_v19 = vshrl.u32 %v15181_v1, 16 }
  0x30   : > { %v719_v18 = vrot.slane %v717_v11, 1  ;;  %v993_v20 = vshrl.u32 %v15182_v3, 16  ;;  %v715_v23 = vor.u32 %v713_v2, %v711_v7  ;;  %v725_v26 = vshll.u32 %v15183_v16, 16 }
  0x31   : > { %v984_v22 = vsel %vm668_vm1, %v979_v10, %v983_v14  ;;  %v991_v24 = vrot.slane %v989_v15, 1  ;;  %v987_v27 = vor.u32 %v985_v12, %v983_v14  ;;  %v997_v29 = vshll.u32 %v15184_v17, 16  ;;  %v15193_v10 = vld [vmem:[%s15677_s24 + $0x60] sm:$0xff]  }
  0x32   : > { %13969 = vmatmul.mubr.msk.bf16.gmra.mxu1 %vm1217_vm2, %v976_v9  ;;  %v723_v28 = vor.u32 %v721_v19, %v719_v18  ;;  %v727_v30 = vrot.slane %v725_v26, 1  ;;  %v729_v35 = vshrl.u32 %v15183_v16, 16  ;;  %v733_v36 = vshll.u32 %v15185_v21, 16 }
  0x33   : > { %13901 = vmatmul.mubr.msk.bf16.gmra.mxu0 %vm1217_vm2, %v704_v5  ;;  %13972 = vmatprep.mubr.msk.bf16.mxu1 %vm1217_vm2, %v984_v22  ;;  %v995_v31 = vor.u32 %v993_v20, %v991_v24  ;;  %v999_v34 = vrot.slane %v997_v29, 1  ;;  %v720_v38 = vsel %vm668_vm1, %v715_v23, %v719_v18  ;;  %v1001_v39 = vshrl.u32 %v15184_v17, 16  ;;  %v15195_v17 = vld [vmem:[%s15677_s24 + $0x68] sm:$0xff]   ;;  %v15196_v20 = vld [vmem:[%s15677_s24 + $0x178] sm:$0xff]  }
  0x34   : > { %13904 = vmatprep.mubr.msk.bf16.mxu0 %vm1217_vm2, %v712_v13  ;;  %v1005_v40 = vshll.u32 %v15186_v32, 16  ;;  %v992_v41 = vsel %vm668_vm1, %v987_v27, %v991_v24  ;;  %v728_v42 = vsel %vm668_vm1, %v723_v28, %v727_v30  ;;  %v737_v43 = vshrl.u32 %v15185_v21, 16  ;;  %v15194_v13 = vld [vmem:[%s15677_s24 + $0x170] sm:$0xff]  }
  0x35   : > { %v741_v44 = vshll.u32 %v15187_v33, 16  ;;  %v1000_v45 = vsel %vm668_vm1, %v995_v31, %v999_v34  ;;  %v1009_v46 = vshrl.u32 %v15186_v32, 16  ;;  %v1013_v47 = vshll.u32 %v15188_v37, 16 }
  0x36   : > { %v735_v48 = vrot.slane %v733_v36, 1  ;;  %v731_v50 = vor.u32 %v729_v35, %v727_v30  ;;  %v1007_v51 = vrot.slane %v1005_v40, 1  ;;  %v1003_v53 = vor.u32 %v1001_v39, %v999_v34  ;;  %v15197_v35 = vld [vmem:[%s15677_s24 + $0x70] sm:$0xff]  }
  0x37   : > { %v743_v55 = vrot.slane %v741_v44, 1  ;;  %v1015_v58 = vrot.slane %v1013_v47, 1  ;;  %v745_v60 = vshrl.u32 %v15187_v33, 16  ;;  %v749_v61 = vshll.u32 %v15189_v49, 16 }
  0x38   : > { %v739_v54 = vor.u32 %v737_v43, %v735_v48  ;;  %v1011_v57 = vor.u32 %v1009_v46, %v1007_v51  ;;  %v736_v62 = vsel %vm668_vm1, %v731_v50, %v735_v48  ;;  %v1017_v63 = vshrl.u32 %v15188_v37, 16 }
  0x39   : > { %v1021_v0 = vshll.u32 %v15190_v52, 16  ;;  %v1008_v1 = vsel %vm668_vm1, %v1003_v53, %v1007_v51  ;;  %v753_v3 = vshrl.u32 %v15189_v49, 16  ;;  %v757_v5 = vshll.u32 %v15191_v56, 16 }
  0x3a   : > { %13973 = vmatmul.mubr.msk.bf16.gmra.mxu1 %vm1217_vm2, %v992_v41  ;;  %v744_v2 = vsel %vm668_vm1, %v739_v54, %v743_v55  ;;  %v1016_v6 = vsel %vm668_vm1, %v1011_v57, %v1015_v58  ;;  %v1025_v7 = vshrl.u32 %v15190_v52, 16  ;;  %v1029_v8 = vshll.u32 %v15192_v59, 16 }
  0x3b   : > { %13905 = vmatmul.mubr.msk.bf16.gmra.mxu0 %vm1217_vm2, %v720_v38  ;;  %13976 = vmatprep.mubr.msk.bf16.mxu1 %vm1217_vm2, %v1000_v45  ;;  %v751_v9 = vrot.slane %v749_v61, 1  ;;  %v747_v11 = vor.u32 %v745_v60, %v743_v55  ;;  %v1023_v12 = vrot.slane %v1021_v0, 1  ;;  %v1019_v14 = vor.u32 %v1017_v63, %v1015_v58  ;;  %v15198_v38 = vld [vmem:[%s15677_s24 + $0x180] sm:$0xff]   ;;  %v15200_v45 = vld [vmem:[%s15677_s24 + $0x188] sm:$0xff]  }
  0x3c   : > { %13908 = vmatprep.mubr.msk.bf16.mxu0 %vm1217_vm2, %v728_v42  ;;  %v759_v16 = vrot.slane %v757_v5, 1  ;;  %v1031_v19 = vrot.slane %v1029_v8, 1  ;;  %v761_v21 = vshrl.u32 %v15191_v56, 16  ;;  %v765_v22 = vshll.u32 %v15193_v10, 16  ;;  %v15199_v42 = vld [vmem:[%s15677_s24 + $0x78] sm:$0xff]  }
  0x3d   : > { %v755_v15 = vor.u32 %v753_v3, %v751_v9  ;;  %v1027_v18 = vor.u32 %v1025_v7, %v1023_v12  ;;  %v752_v23 = vsel %vm668_vm1, %v747_v11, %v751_v9  ;;  %v1033_v24 = vshrl.u32 %v15192_v59, 16  ;;  %v15201_v59 = vld [vmem:[%s15677_s24 + $0x80] sm:$0xff]  }
  0x3e   : > { %v1037_v26 = vshll.u32 %v15194_v13, 16  ;;  %v1024_v27 = vsel %vm668_vm1, %v1019_v14, %v1023_v12  ;;  %v769_v29 = vshrl.u32 %v15193_v10, 16  ;;  %v773_v30 = vshll.u32 %v15195_v17, 16 }
  0x3f   : > { %v760_v28 = vsel %vm668_vm1, %v755_v15, %v759_v16  ;;  %v1032_v31 = vsel %vm668_vm1, %v1027_v18, %v1031_v19  ;;  %v1041_v32 = vshrl.u32 %v15194_v13, 16  ;;  %v1045_v33 = vshll.u32 %v15196_v20, 16 }
  0x40   : > { %v767_v34 = vrot.slane %v765_v22, 1  ;;  %v763_v36 = vor.u32 %v761_v21, %v759_v16  ;;  %v1039_v37 = vrot.slane %v1037_v26, 1  ;;  %v1035_v39 = vor.u32 %v1033_v24, %v1031_v19 }
  0x41   : > { %v775_v41 = vrot.slane %v773_v30, 1  ;;  %v1047_v44 = vrot.slane %v1045_v33, 1  ;;  %v777_v46 = vshrl.u32 %v15195_v17, 16  ;;  %v781_v47 = vshll.u32 %v15197_v35, 16 }
  0x42   : > { %13977 = vmatmul.mubr.msk.bf16.gmra.mxu1 %vm1217_vm2, %v1008_v1  ;;  %v771_v40 = vor.u32 %v769_v29, %v767_v34  ;;  %v1043_v43 = vor.u32 %v1041_v32, %v1039_v37  ;;  %v768_v48 = vsel %vm668_vm1, %v763_v36, %v767_v34  ;;  %v1049_v49 = vshrl.u32 %v15196_v20, 16  ;;  %v15205_v20 = vld [vmem:[%s15677_s24 + $0x90] sm:$0xff]  }
  0x43   : > { %13909 = vmatmul.mubr.msk.bf16.gmra.mxu0 %vm1217_vm2, %v736_v62  ;;  %13980 = vmatprep.mubr.msk.bf16.mxu1 %vm1217_vm2, %v1016_v6  ;;  %v1053_v50 = vshll.u32 %v15198_v38, 16  ;;  %v1040_v51 = vsel %vm668_vm1, %v1035_v39, %v1039_v37  ;;  %v785_v53 = vshrl.u32 %v15197_v35, 16  ;;  %v789_v54 = vshll.u32 %v15199_v42, 16  ;;  %v15202_v62 = vld [vmem:[%s15677_s24 + $0x190] sm:$0xff]   ;;  %v15204_v6 = vld [vmem:[%s15677_s24 + $0x198] sm:$0xff]  }
  0x44   : > { %13912 = vmatprep.mubr.msk.bf16.mxu0 %vm1217_vm2, %v744_v2  ;;  %v776_v52 = vsel %vm668_vm1, %v771_v40, %v775_v41  ;;  %v1048_v55 = vsel %vm668_vm1, %v1043_v43, %v1047_v44  ;;  %v1057_v56 = vshrl.u32 %v15198_v38, 16  ;;  %v1061_v57 = vshll.u32 %v15200_v45, 16  ;;  %v15203_v2 = vld [vmem:[%s15677_s24 + $0x88] sm:$0xff]  }
  0x45   : > { %v783_v58 = vrot.slane %v781_v47, 1  ;;  %v779_v60 = vor.u32 %v777_v46, %v775_v41  ;;  %v1055_v61 = vrot.slane %v1053_v50, 1  ;;  %v1051_v63 = vor.u32 %v1049_v49, %v1047_v44  ;;  %v15210_v46 = vld [vmem:[%s15677_s24 + $0x1b0] sm:$0xff]   ;;  %v15211_v49 = vld [vmem:[%s15677_s24 + $0xa8] sm:$0xff]  }
  0x46   : > { %v791_v1 = vrot.slane %v789_v54, 1  ;;  %v1063_v5 = vrot.slane %v1061_v57, 1  ;;  %v793_v7 = vshrl.u32 %v15199_v42, 16  ;;  %v797_v8 = vshll.u32 %v15201_v59, 16 }
  0x47   : > { %v787_v0 = vor.u32 %v785_v53, %v783_v58  ;;  %v1059_v3 = vor.u32 %v1057_v56, %v1055_v61  ;;  %v784_v9 = vsel %vm668_vm1, %v779_v60, %v783_v58  ;;  %v1065_v10 = vshrl.u32 %v15200_v45, 16  ;;  %v15209_v45 = vld [vmem:[%s15677_s24 + $0xa0] sm:$0xff]  }
  0x48   : > { %v1069_v11 = vshll.u32 %v15202_v62, 16  ;;  %v1056_v12 = vsel %vm668_vm1, %v1051_v63, %v1055_v61  ;;  %v801_v14 = vshrl.u32 %v15201_v59, 16  ;;  %v805_v15 = vshll.u32 %v15203_v2, 16 }
  0x49   : > { %v792_v13 = vsel %vm668_vm1, %v787_v0, %v791_v1  ;;  %v1064_v16 = vsel %vm668_vm1, %v1059_v3, %v1063_v5  ;;  %v1073_v17 = vshrl.u32 %v15202_v62, 16  ;;  %v1077_v18 = vshll.u32 %v15204_v6, 16 }
  0x4a   : > { %13981 = vmatmul.mubr.msk.bf16.gmra.mxu1 %vm1217_vm2, %v1024_v27  ;;  %v799_v19 = vrot.slane %v797_v8, 1  ;;  %v795_v21 = vor.u32 %v793_v7, %v791_v1  ;;  %v1071_v22 = vrot.slane %v1069_v11, 1  ;;  %v1067_v24 = vor.u32 %v1065_v10, %v1063_v5  ;;  %v15213_v1 = vld [vmem:[%s15677_s24 + $0xb0] sm:$0xff]  }
  0x4b   : > { %13913 = vmatmul.mubr.msk.bf16.gmra.mxu0 %vm1217_vm2, %v752_v23  ;;  %13984 = vmatprep.mubr.msk.bf16.mxu1 %vm1217_vm2, %v1032_v31  ;;  %v15206_v23 = vld [vmem:[%s15677_s24 + $0x1a0] sm:$0xff]   ;;  %v807_v27 = vrot.slane %v805_v15, 1  ;;  %v1079_v30 = vrot.slane %v1077_v18, 1  ;;  %v15208_v31 = vld [vmem:[%s15677_s24 + $0x1a8] sm:$0xff]   ;;  %v809_v32 = vshrl.u32 %v15203_v2, 16  ;;  %v813_v33 = vshll.u32 %v15205_v20, 16 }
  0x4c   : > { %13916 = vmatprep.mubr.msk.bf16.mxu0 %vm1217_vm2, %v760_v28  ;;  %v803_v26 = vor.u32 %v801_v14, %v799_v19  ;;  %v15207_v28 = vld [vmem:[%s15677_s24 + $0x98] sm:$0xff]   ;;  %v1075_v29 = vor.u32 %v1073_v17, %v1071_v22  ;;  %v800_v34 = vsel %vm668_vm1, %v795_v21, %v799_v19  ;;  %v1081_v35 = vshrl.u32 %v15204_v6, 16  ;;  %v15214_v6 = vld [vmem:[%s15677_s24 + $0x1c0] sm:$0xff]  }
  0x4d   : > { %v1085_v36 = vshll.u32 %v15206_v23, 16  ;;  %v1072_v37 = vsel %vm668_vm1, %v1067_v24, %v1071_v22  ;;  %v817_v39 = vshrl.u32 %v15205_v20, 16  ;;  %v821_v40 = vshll.u32 %v15207_v28, 16  ;;  %v15832_v21 = vld [vmem:[%s15677_s24 + $0xc0] sm:$0xff]  }
  0x4e   : > { %v808_v38 = vsel %vm668_vm1, %v803_v26, %v807_v27  ;;  %v1080_v41 = vsel %vm668_vm1, %v1075_v29, %v1079_v30  ;;  %v1089_v42 = vshrl.u32 %v15206_v23, 16  ;;  %v1093_v43 = vshll.u32 %v15208_v31, 16  ;;  %v15836_v26 = vld [vmem:[%s15677_s24 + $0x1d0] sm:$0xff]   ;;  %v15841_v29 = vld [vmem:[%s15677_s24 + $0xc8] sm:$0xff]  }
  0x4f   : > { %v815_v44 = vrot.slane %v813_v33, 1  ;;  %v811_v47 = vor.u32 %v809_v32, %v807_v27  ;;  %v1083_v50 = vor.u32 %v1081_v35, %v1079_v30  ;;  %v825_v56 = vshrl.u32 %v15207_v28, 16  ;;  %v15846_v33 = vld [vmem:[%s15677_s24 + $0x1d8] sm:$0xff]  }
  0x50   : > { %v1095_v54 = vrot.slane %v1093_v43, 1  ;;  %v829_v57 = vshll.u32 %v15209_v45, 16  ;;  %v1101_v58 = vshll.u32 %v15210_v46, 16  ;;  %v1097_v60 = vshrl.u32 %v15208_v31, 16  ;;  %v15857_v43 = vld [vmem:[%s15677_s24 + $0x1e0] sm:$0xff]  }
  0x51   : > { %v816_v59 = vsel %vm668_vm1, %v811_v47, %v815_v44  ;;  %v837_v61 = vshll.u32 %v15211_v49, 16  ;;  %v833_v0 = vshrl.u32 %v15209_v45, 16  ;;  %v1105_v3 = vshrl.u32 %v15210_v46, 16 }
  0x52   : > { %13985 = vmatmul.mubr.msk.bf16.gmra.mxu1 %vm1217_vm2, %v1040_v51  ;;  %v819_v51 = vor.u32 %v817_v39, %v815_v44  ;;  %v831_v7 = vrot.slane %v829_v57, 1  ;;  %v1103_v8 = vrot.slane %v1101_v58, 1  ;;  %v841_v15 = vshrl.u32 %v15211_v49, 16  ;;  %v15860_v44 = vld [vmem:[%s15677_s24 + $0xd8] sm:$0xff]  }
  0x53   : > { %13917 = vmatmul.mubr.msk.bf16.gmra.mxu0 %vm1217_vm2, %v768_v48  ;;  %13988 = vmatprep.mubr.msk.bf16.mxu1 %vm1217_vm2, %v1048_v55  ;;  %v1087_v48 = vrot.slane %v1085_v36, 1  ;;  %v15212_v55 = vld [vmem:[%s15677_s24 + $0x1b8] sm:$0xff]   ;;  %v839_v11 = vrot.slane %v837_v61, 1  ;;  %v1117_v20 = vshll.u32 %v15214_v6, 16  ;;  %v849_v22 = vshrl.u32 %v15213_v1, 16 }
  0x54   : > { %13920 = vmatprep.mubr.msk.bf16.mxu0 %vm1217_vm2, %v776_v52  ;;  %v823_v52 = vrot.slane %v821_v40, 1  ;;  %v1109_v5 = vshll.u32 %v15212_v55, 16  ;;  %v835_v14 = vor.u32 %v833_v0, %v831_v7  ;;  %v1107_v17 = vor.u32 %v1105_v3, %v1103_v8 }
  0x55   : > { %v1091_v53 = vor.u32 %v1089_v42, %v1087_v48  ;;  %v1088_v62 = vsel %vm668_vm1, %v1083_v50, %v1087_v48  ;;  %v1113_v19 = vshrl.u32 %v15212_v55, 16  ;;  %v1121_v24 = vshrl.u32 %v15214_v6, 16 }
  0x56   : > { %v824_v63 = vsel %vm668_vm1, %v819_v51, %v823_v52  ;;  %v827_v10 = vor.u32 %v825_v56, %v823_v52  ;;  %v1111_v18 = vrot.slane %v1109_v5, 1  ;;  %v840_v31 = vsel %vm668_vm1, %v835_v14, %v839_v11 }
  0x57   : > { %v1096_v2 = vsel %vm668_vm1, %v1091_v53, %v1095_v54  ;;  %v1119_v35 = vrot.slane %v1117_v20, 1  ;;  %v843_v39 = vor.u32 %v841_v15, %v839_v11  ;;  %v1133_v48 = vshll.u32 %v15836_v26, 16  ;;  %v15902_v15 = vld [vmem:[%s20178_s1 + $0x6] sm:$0x3] }
  0x58   : > { %v832_v27 = vsel %vm668_vm1, %v827_v10, %v831_v7  ;;  %v1115_v40 = vor.u32 %v1113_v19, %v1111_v18  ;;  %v869_v49 = vshll.u32 %v15841_v29, 16  ;;  %v1141_v50 = vshll.u32 %v15846_v33, 16  ;;  %v15892_v10 = vld [vmem:[%s15677_s24 + $0xe8] sm:$0xff]   ;;  %15142 = vmatprep.subr.msk.bf16.mxu1 %vm1422_vm0, %v15902_v15 }
  0x59   : > { %v1123_v46 = vor.u32 %v1121_v24, %v1119_v35  ;;  %v865_v52 = vshrl.u32 %v15832_v21, 16  ;;  %v1149_v57 = vshll.u32 %v15857_v43, 16  ;;  %v885_v58 = vshll.u32 %v15860_v44, 16  ;;  %v15913_v19 = vld [vmem:[%s20178_s1 + $0x8] sm:$0x3] }
  0x5a   : > { %13989 = vmatmul.mubr.msk.bf16.gmra.mxu1 %vm1217_vm2, %v1056_v12  ;;  %v15828_v12 = vld [vmem:[%s15677_s24 + $0x1c8] sm:$0xff]   ;;  %v1120_v56 = vsel %vm668_vm1, %v1115_v40, %v1119_v35  ;;  %v1137_v0 = vshrl.u32 %v15836_v26, 16  ;;  %v873_v3 = vshrl.u32 %v15841_v29, 16  ;;  %v1145_v5 = vshrl.u32 %v15846_v33, 16  ;;  %15143 = vmatprep.subr.msk.bf16.mxu0 %vm1422_vm0, %v15913_v19  ;;  %v15942_v40 = vld [vmem:[%s15677_s24 + $0x100] sm:$0xff]  }
  0x5b   : > { %13921 = vmatmul.mubr.msk.bf16.gmra.mxu0 %vm1217_vm2, %v784_v9  ;;  %13992 = vmatprep.mubr.msk.bf16.mxu1 %vm1217_vm2, %v1064_v16  ;;  %v15823_v9 = vld [vmem:[%s15677_s24 + $0xb8] sm:$0xff]   ;;  %v845_v16 = vshll.u32 %v15213_v1, 16  ;;  %v1125_v28 = vshll.u32 %v15828_v12, 16  ;;  %v1129_v42 = vshrl.u32 %v15828_v12, 16  ;;  %v871_v1 = vrot.slane %v869_v49, 1 }
  0x5c   : > { %13924 = vmatprep.mubr.msk.bf16.mxu0 %vm1217_vm2, %v792_v13  ;;  %v1099_v13 = vor.u32 %v1097_v60, %v1095_v54  ;;  %v853_v23 = vshll.u32 %v15823_v9, 16  ;;  %v857_v36 = vshrl.u32 %v15823_v9, 16  ;;  %v15871_v54 = vld [vmem:[%s15677_s24 + $0x1e8] sm:$0xff]   ;;  %v15881_v60 = vld [vmem:[%s15677_s24 + $0x1f0] sm:$0xff]   ;;  %v1151_v11 = vrot.slane %v1149_v57, 1 }
  0x5d   : > { %v847_v32 = vrot.slane %v845_v16, 1  ;;  %v1127_v47 = vrot.slane %v1125_v28, 1  ;;  %v1157_v9 = vshll.u32 %v15871_v54, 16  ;;  %v15895_v12 = vrot.slane %v885_v58, 1  ;;  %v15960_v58 = vld [vmem:[%s15677_s24 + $0x108] sm:$0xff]  }
  0x5e   : > { %v1104_v30 = vsel %vm668_vm1, %v1099_v13, %v1103_v8  ;;  %v1153_v8 = vshrl.u32 %v15857_v43, 16  ;;  %v1165_v14 = vshll.u32 %v15881_v60, 16  ;;  %v905_v43 = vshrl.u32 %v15892_v10, 16 }
  0x5f   : > { %v851_v45 = vor.u32 %v849_v22, %v847_v32  ;;  %v848_v55 = vsel %vm668_vm1, %v843_v39, %v847_v32  ;;  %v1131_v20 = vor.u32 %v1129_v42, %v1127_v47  ;;  %v1161_v22 = vshrl.u32 %v15871_v54, 16  ;;  %v15939_v39 = vld [vmem:[%s15677_s24 + $0x208] sm:$0xff]  }
  0x60   : > { %v1159_v26 = vrot.slane %v1157_v9, 1  ;;  %v1167_v29 = vrot.slane %v1165_v14, 1  ;;  %v925_v54 = vshll.u32 %v15942_v40, 16  ;;  %v933_v9 = vshll.u32 %v15960_v58, 16 }
  0x62   : > { %13993 = vmatmul.mubr.msk.bf16.gmra.mxu1 %vm1217_vm2, %v1072_v37  ;;  %v861_v37 = vshll.u32 %v15832_v21, 16 }
  0x63   : > { %13925 = vmatmul.mubr.msk.bf16.gmra.mxu0 %vm1217_vm2, %v800_v34  ;;  %13996 = vmatprep.mubr.msk.bf16.mxu1 %vm1217_vm2, %v1080_v41  ;;  %v1112_v34 = vsel %vm668_vm1, %v1107_v17, %v1111_v18  ;;  %v855_v41 = vrot.slane %v853_v23, 1  ;;  %v889_v17 = vshrl.u32 %v15860_v44, 16  ;;  %v15908_v18 = vld [vmem:[%s15677_s24 + $0x1f8] sm:$0xff]   ;;  %v15918_v23 = vld [vmem:[%s15677_s24 + $0xf0] sm:$0xff]  }
  0x64   : > { %13928 = vmatprep.mubr.msk.bf16.mxu0 %vm1217_vm2, %v808_v38  ;;  %v15852_v38 = vld [vmem:[%s15677_s24 + $0xd0] sm:$0xff]   ;;  %v863_v51 = vrot.slane %v861_v37, 1  ;;  %v1173_v33 = vshll.u32 %v15908_v18, 16  ;;  %v1169_v37 = vshrl.u32 %v15881_v60, 16  ;;  %v913_v57 = vshrl.u32 %v15918_v23, 16 }
  0x65   : > { %v877_v53 = vshll.u32 %v15852_v38, 16  ;;  %v856_v61 = vsel %vm668_vm1, %v851_v45, %v855_v41  ;;  %v881_v7 = vshrl.u32 %v15852_v38, 16  ;;  %v859_v16 = vor.u32 %v857_v36, %v855_v41 }
  0x66   : > { %v867_v21 = vor.u32 %v865_v52, %v863_v51  ;;  %v909_v38 = vshll.u32 %v15918_v23, 16  ;;  %v875_v45 = vor.u32 %v873_v3, %v871_v1  ;;  %v927_v3 = vrot.slane %v925_v54, 1 }
  0x67   : > { %v879_v6 = vrot.slane %v877_v53, 1  ;;  %v864_v32 = vsel %vm668_vm1, %v859_v16, %v863_v51  ;;  %v1189_v53 = vshll.u32 %v15939_v39, 16  ;;  %v1171_v16 = vor.u32 %v1169_v37, %v1167_v29 }
  0x68   : > { %v872_v36 = vsel %vm668_vm1, %v867_v21, %v871_v1  ;;  %v911_v52 = vrot.slane %v909_v38, 1 }
  0x69   : > { %v883_v49 = vor.u32 %v881_v7, %v879_v6  ;;  %v929_v7 = vshrl.u32 %v15942_v40, 16 }
  0x6a   : > { %13997 = vmatmul.mubr.msk.bf16.gmra.mxu1 %vm1217_vm2, %v1088_v62  ;;  %v1128_v62 = vsel %vm668_vm1, %v1123_v46, %v1127_v47  ;;  %v1177_v46 = vshrl.u32 %v15908_v18, 16 }
  0x6b   : > { %13929 = vmatmul.mubr.msk.bf16.gmra.mxu0 %vm1217_vm2, %v816_v59  ;;  %14000 = vmatprep.mubr.msk.bf16.mxu1 %vm1217_vm2, %v1096_v2  ;;  %v15878_v59 = vld [vmem:[%s15677_s24 + $0xe0] sm:$0xff]   ;;  %v1143_v2 = vrot.slane %v1141_v50, 1  ;;  %v1175_v50 = vrot.slane %v1173_v33, 1 }
  0x6c   : > { %13932 = vmatprep.mubr.msk.bf16.mxu0 %vm1217_vm2, %v824_v63  ;;  %v1135_v63 = vrot.slane %v1133_v48, 1  ;;  %v893_v13 = vshll.u32 %v15878_v59, 16 }
  0x6d   : > { %v1147_v48 = vor.u32 %v1145_v5, %v1143_v2  ;;  %v1193_v5 = vshrl.u32 %v15939_v39, 16  ;;  %v1176_v44 = vsel %vm668_vm1, %v1171_v16, %v1175_v50  ;;  %v15390_v16 = vld [vmem:[%s15677_s24 + $0x48] sm:$0xff]  }
  0x6e   : > { %v1139_v24 = vor.u32 %v1137_v0, %v1135_v63  ;;  %v895_v28 = vrot.slane %v893_v13, 1  ;;  %v1136_v35 = vsel %vm668_vm1, %v1131_v20, %v1135_v63  ;;  %v888_v63 = vsel %vm668_vm1, %v883_v49, %v15895_v12 }
  0x6f   : > { %v1163_v13 = vor.u32 %v1161_v22, %v1159_v26 }
  0x70   : > { %v1144_v41 = vsel %vm668_vm1, %v1139_v24, %v1143_v2  ;;  %v1191_v2 = vrot.slane %v1189_v53, 1 }
  0x71   : > { %v1168_v20 = vsel %vm668_vm1, %v1163_v13, %v1167_v29  ;;  %v15389_v13 = vld [vmem:[%s15677_s24 + $0x40] sm:$0xff]  }
  0x72   : > { %14001 = vmatmul.mubr.msk.bf16.gmra.mxu1 %vm1217_vm2, %v1104_v30  ;;  %v897_v30 = vshrl.u32 %v15878_v59, 16  ;;  %v880_v59 = vsel %vm668_vm1, %v875_v45, %v879_v6  ;;  %v1195_v40 = vor.u32 %v1193_v5, %v1191_v2 }
  0x73   : > { %13933 = vmatmul.mubr.msk.bf16.gmra.mxu0 %vm1217_vm2, %v832_v27  ;;  %14004 = vmatprep.mubr.msk.bf16.mxu1 %vm1217_vm2, %v1112_v34  ;;  %v901_v27 = vshll.u32 %v15892_v10, 16  ;;  %v15932_v34 = vld [vmem:[%s15677_s24 + $0xf8] sm:$0xff]   ;;  %v891_v10 = vor.u32 %v889_v17, %v15895_v12  ;;  %v935_v12 = vrot.slane %v933_v9, 1 }
  0x74   : > { %13936 = vmatprep.mubr.msk.bf16.mxu0 %vm1217_vm2, %v840_v31  ;;  %v15927_v31 = vld [vmem:[%s15677_s24 + $0x200] sm:$0xff]   ;;  %v917_v51 = vshll.u32 %v15932_v34, 16  ;;  %v921_v1 = vshrl.u32 %v15932_v34, 16  ;;  %v899_v14 = vor.u32 %v897_v30, %v895_v28  ;;  %v937_v34 = vshrl.u32 %v15960_v58, 16 }
  0x75   : > { %v903_v42 = vrot.slane %v901_v27, 1  ;;  %v1181_v47 = vshll.u32 %v15927_v31, 16  ;;  %v896_v18 = vsel %vm668_vm1, %v891_v10, %v895_v28  ;;  %v1179_v27 = vor.u32 %v1177_v46, %v1175_v50 }
  0x76   : > { %v919_v0 = vrot.slane %v917_v51, 1  ;;  %v915_v28 = vor.u32 %v913_v57, %v911_v52  ;;  %v939_v54 = vor.u32 %v937_v34, %v935_v12  ;;  %v15396_v34 = vld [vmem:[%s15677_s24 + $0x78] sm:$0xff]  }
  0x77   : > { %v1183_v60 = vrot.slane %v1181_v47, 1  ;;  %v904_v21 = vsel %vm668_vm1, %v899_v14, %v903_v42  ;;  %v907_v22 = vor.u32 %v905_v43, %v903_v42  ;;  %v15381_v42 = vld [vmem:[%s15677_s24 + $0x4] sm:$0xf]  ;;  %v2741_v14 = vrot.slane %v15389_v13, 1 }
  0x78   : > { %v920_v33 = vsel %vm668_vm1, %v915_v28, %v919_v0  ;;  %v923_v39 = vor.u32 %v921_v1, %v919_v0  ;;  %v6154_v0 = vsel %vm1422_vm0, %v15913_v19, 0  ;;  %v15385_v1 = vld [vmem:[%s15677_s24 + $0x20] sm:$0xff]   ;;  %v15387_v19 = vld [vmem:[%s15677_s24 + $0x30] sm:$0xff]   ;;  %v15394_v28 = vld [vmem:[%s15677_s24 + $0x68] sm:$0xff]  }
  0x79   : > { %v912_v30 = vsel %vm668_vm1, %v907_v22, %v911_v52  ;;  %v15382_v52 = vld [vmem:[%s15677_s24 + $0x8] sm:$0xff]  }
  0x7a   : > { %14005 = vmatmul.mubr.msk.bf16.gmra.mxu1 %vm1217_vm2, %v1120_v56  ;;  %v1155_v56 = vor.u32 %v1153_v8, %v1151_v11  ;;  %v928_v46 = vsel %vm668_vm1, %v923_v39, %v927_v3  ;;  %v2727_v53 = vrot.slane %v15382_v52, 1 }
  0x7b   : > { %13937 = vmatmul.mubr.msk.bf16.gmra.mxu0 %vm1217_vm2, %v848_v55  ;;  %14008 = vmatprep.mubr.msk.bf16.mxu1 %vm1217_vm2, %v1128_v62  ;;  %v15956_v55 = vld [vmem:[%s15677_s24 + $0x210] sm:$0xff]   ;;  %v1152_v62 = vsel %vm668_vm1, %v1147_v48, %v1151_v11  ;;  %v15236_v11 = vld [vmem:[%s15677_s24 + $0x218] sm:$0xff]  }
  0x7c   : > { %13940 = vmatprep.mubr.msk.bf16.mxu0 %vm1217_vm2, %v856_v61  ;;  %v1185_v61 = vshrl.u32 %v15927_v31, 16  ;;  %v1160_v6 = vsel %vm668_vm1, %v1155_v56, %v1159_v26  ;;  %v1197_v8 = vshll.u32 %v15956_v55, 16  ;;  %v1201_v24 = vshrl.u32 %v15956_v55, 16  ;;  %v15237_v26 = vld [vmem:[%s15677_s24 + $0x220] ss:$0 sps:$4 sm:$0x11]  }
  0x7d   : > { %v1205_v17 = vshll.u32 %v15236_v11, 16  ;;  %v2719_v31 = vld [vmem:[%s15677_s24] sm:$0xe]  ;;  %v1213_v38 = vshll.u32 %v15237_v26, 16  ;;  %v944_v56 = vsel %vm668_vm1, %v939_v54, %v15702_v25 }
  0x7e   : > { %v1199_v23 = vrot.slane %v1197_v8, 1  ;;  %v1187_v29 = vor.u32 %v1185_v61, %v1183_v60  ;;  %v12645_v43 = vcombine.low %v2719_v31, %v15381_v42  ;;  %v15384_v61 = vld [vmem:[%s15677_s24 + $0x18] sm:$0xff]   ;;  %v15393_v26 = vld [vmem:[%s15677_s24 + $0x60] sm:$0xff]  }
  0x7f   : > { %v1207_v37 = vrot.slane %v1205_v17, 1  ;;  %v1215_v51 = vrot.slane %v1213_v38, 1  ;;  %v15388_v8 = vld [vmem:[%s15677_s24 + $0x38] sm:$0xff]   ;;  %v15397_v38 = vld [vmem:[%s15677_s24 + $0x80] sm:$0xff]  }
  0x80   : > { %v1203_v45 = vor.u32 %v1201_v24, %v1199_v23  ;;  %v1200_v47 = vsel %vm668_vm1, %v1195_v40, %v1199_v23  ;;  %v2726_v49 = vrot.slane %v12645_v43, 1  ;;  %v2739_v9 = vrot.slane %v15388_v8, 1  ;;  %v15391_v23 = vld [vmem:[%s15677_s24 + $0x50] sm:$0xff]   ;;  %v15398_v40 = vld [vmem:[%s15677_s24 + $0x88] sm:$0xff]  }
  0x81   : > { %v2745_v24 = vrot.slane %v15391_v23, 1  ;;  %v2757_v39 = vrot.slane %v15397_v38, 1 }
  0x82   : > { %14009 = vmatmul.mubr.msk.bf16.gmra.mxu1 %vm1217_vm2, %v1136_v35  ;;  %v1209_v35 = vshrl.u32 %v15236_v11, 16  ;;  %v1208_v50 = vsel %vm668_vm1, %v1203_v45, %v1207_v37  ;;  %v2728_v58 = vsel %vm2725_vm3, %v2726_v49, %v2727_v53 }
  0x83   : > { %13941 = vmatmul.mubr.msk.bf16.gmra.mxu0 %vm1217_vm2, %v864_v32  ;;  %14012 = vmatprep.mubr.msk.bf16.mxu1 %vm1217_vm2, %v1144_v41  ;;  %v1184_v32 = vsel %vm668_vm1, %v1179_v27, %v1183_v60  ;;  %v931_v41 = vor.u32 %v929_v7, %v927_v3  ;;  %v15386_v3 = vld [vmem:[%s15677_s24 + $0x28] sm:$0xff]   ;;  %v2749_v27 = vrot.slane %v15393_v26, 1 }
  0x84   : > { %13944 = vmatprep.mubr.msk.bf16.mxu0 %vm1217_vm2, %v872_v36  ;;  %v1192_v36 = vsel %vm668_vm1, %v1187_v29, %v1191_v2  ;;  %v1211_v55 = vor.u32 %v1209_v35, %v1207_v37  ;;  %v2733_v2 = vrot.slane %v15385_v1, 1  ;;  %v2735_v5 = vrot.slane %v15386_v3, 1 }
  0x85   : > { %v936_v48 = vsel %vm668_vm1, %v931_v41, %v935_v12  ;;  %v2751_v29 = vrot.slane %v15394_v28, 1  ;;  %v2755_v35 = vrot.slane %v15396_v34, 1  ;;  %v2759_v41 = vrot.slane %v15398_v40, 1 }
  0x86   : > { %v1216_v57 = vsel %vm668_vm1, %v1211_v55, %v1215_v51 }
  0x87   : > { %v2752_v31 = vsel %vm2725_vm3, %v2749_v27, %v2751_v29  ;;  %v2758_v42 = vsel %vm2725_vm3, %v2755_v35, %v2757_v39  ;;  %v2760_v43 = vsel %vm2725_vm3, %v2757_v39, %v2759_v41 }
  0x8a   : > { %14013 = vmatmul.mubr.msk.bf16.gmra.mxu1 %vm1217_vm2, %v1152_v62  ;;  %v2731_v62 = vrot.slane %v15384_v61, 1 }
  0x8b   : > { %13945 = vmatmul.mubr.msk.bf16.gmra.mxu0 %vm1217_vm2, %v880_v59  ;;  %14016 = vmatprep.mubr.msk.bf16.mxu1 %vm1217_vm2, %v1160_v6  ;;  %v15383_v59 = vld [vmem:[%s15677_s24 + $0x10] sm:$0xff]   ;;  %v2737_v6 = vrot.slane %v15387_v19, 1 }
  0x8c   : > { %13948 = vmatprep.mubr.msk.bf16.mxu0 %vm1217_vm2, %v888_v63  ;;  %v2729_v60 = vrot.slane %v15383_v59, 1  ;;  %v4607_v63 = vsel %vm1422_vm0, %v15902_v15, 0  ;;  %v2736_v15 = vsel %vm2725_vm3, %v2733_v2, %v2735_v5 }
  0x8d   : > { %v2738_v10 = vsel %vm2725_vm3, %v2735_v5, %v2737_v6  ;;  %v2740_v11 = vsel %vm2725_vm3, %v2737_v6, %v2739_v9 }
  0x8e   : > { %v2730_v25 = vsel %vm2725_vm3, %v2727_v53, %v2729_v60  ;;  %v2732_v7 = vsel %vm2725_vm3, %v2729_v60, %v2731_v62 }
  0x92   : > { %14017 = vmatmul.mubr.msk.bf16.gmra.mxu1 %vm1217_vm2, %v1168_v20  ;;  %v2742_v20 = vsel %vm2725_vm3, %v2739_v9, %v2741_v14 }
  0x93   : > { %13949 = vmatmul.mubr.msk.bf16.gmra.mxu0 %vm1217_vm2, %v896_v18  ;;  %14020 = vmatprep.mubr.msk.bf16.mxu1 %vm1217_vm2, %v1176_v44  ;;  %v2743_v18 = vrot.slane %v15390_v16, 1  ;;  %v15392_v44 = vld [vmem:[%s15677_s24 + $0x58] sm:$0xff]  }
  0x94   : > { %13952 = vmatprep.mubr.msk.bf16.mxu0 %vm1217_vm2, %v904_v21  ;;  %v2747_v12 = vrot.slane %v15392_v44, 1 }
  0x95   : > { %v2744_v21 = vsel %vm2725_vm3, %v2741_v14, %v2743_v18  ;;  %v2746_v17 = vsel %vm2725_vm3, %v2743_v18, %v2745_v24 }
  0x96   : > { %v2748_v22 = vsel %vm2725_vm3, %v2745_v24, %v2747_v12 }
  0x9a   : > { %14021 = vmatmul.mubr.msk.bf16.gmra.mxu1 %vm1217_vm2, %v1184_v32  ;;  %v15395_v32 = vld [vmem:[%s15677_s24 + $0x70] sm:$0xff]  }
  0x9b   : > { %13953 = vmatmul.mubr.msk.bf16.gmra.mxu0 %vm1217_vm2, %v912_v30  ;;  %14024 = vmatprep.mubr.msk.bf16.mxu1 %vm1217_vm2, %v1192_v36  ;;  %v2750_v30 = vsel %vm2725_vm3, %v2747_v12, %v2749_v27  ;;  %v15406_v27 = vld [vmem:[%s15677_s24 + $0xc8] sm:$0xff]  }
  0x9c   : > { %13956 = vmatprep.mubr.msk.bf16.mxu0 %vm1217_vm2, %v920_v33  ;;  %v2753_v33 = vrot.slane %v15395_v32, 1 }
  0x9e   : > { %v2754_v36 = vsel %vm2725_vm3, %v2751_v29, %v2753_v33  ;;  %v2756_v37 = vsel %vm2725_vm3, %v2753_v33, %v2755_v35 }
  0xa2   : > { %14025 = vmatmul.mubr.msk.bf16.gmra.mxu1 %vm1217_vm2, %v1200_v47  ;;  %v15399_v47 = vld [vmem:[%s15677_s24 + $0x90] sm:$0xff]  }
  0xa3   : > { %13957 = vmatmul.mubr.msk.bf16.gmra.mxu0 %vm1217_vm2, %v928_v46  ;;  %14028 = vmatprep.mubr.msk.bf16.mxu1 %vm1217_vm2, %v1208_v50  ;;  %v15400_v50 = vld [vmem:[%s15677_s24 + $0x98] sm:$0xff]  }
  0xa4   : > { %13960 = vmatprep.mubr.msk.bf16.mxu0 %vm1217_vm2, %v936_v48  ;;  %v2761_v48 = vrot.slane %v15399_v47, 1  ;;  %v2763_v51 = vrot.slane %v15400_v50, 1 }
  0xa6   : > { %v2762_v55 = vsel %vm2725_vm3, %v2759_v41, %v2761_v48  ;;  %v15408_v41 = vld [vmem:[%s15677_s24 + $0xd8] sm:$0xff]  }
  0xaa   : > { %14029 = vmatmul.mubr.msk.bf16.gmra.mxu1 %vm1217_vm2, %v1216_v57  ;;  %v2764_v57 = vsel %vm2725_vm3, %v2761_v48, %v2763_v51 }
  0xab   : > { %13961 = vmatmul.mubr.msk.bf16.gmra.mxu0 %vm1217_vm2, %v944_v56  ;;  %14034 = vmatprep.mubr.msk.bf16.mxu1 %vm1217_vm2, %v15687_v4  ;;  %v2734_v4 = vsel %vm2725_vm3, %v2731_v62, %v2733_v2 }
  0xac   : > { %14172 = vmatprep.mubr.msk.bf16.mxu0 %vm1217_vm2, %v2728_v58 }
  0xb2   : > { %14035 = vmatmul.mubr.msk.bf16.vlgmr.msra.gmra.mxu1 %vm1217_vm2, %v15382_v52 }
  0xb3   : > { %14173 = vmatmul.mubr.msk.bf16.vlgmr.msra.gmra.mxu0 %vm1217_vm2, %v2730_v25  ;;  %14309 = vmatpush3.bf16.msra.mxu1 %v4607_v63  ;;  %v15402_v63 = vld [vmem:[%s15677_s24 + $0xa8] sm:$0xff]  }
  0xb4   : > { %14447 = vmatpush3.bf16.msra.mxu0 %v6154_v0  ;;  %14038 = vmatprep.mubr.msk.bf16.mxu1 %vm1217_vm2, %v15383_v59  ;;  %v2767_v0 = vrot.slane %v15402_v63, 1 }
  0xb5   : > { %14176 = vmatprep.mubr.msk.bf16.mxu0 %vm1217_vm2, %v2732_v7 }
  0xba   : > { %14039 = vmatmul.mubr.msk.bf16.gmra.mxu1 %vm1217_vm2, %v15384_v61  ;;  %v15401_v61 = vld [vmem:[%s15677_s24 + $0xa0] sm:$0xff]  }
  0xbb   : > { %14177 = vmatmul.mubr.msk.bf16.gmra.mxu0 %vm1217_vm2, %v2734_v4  ;;  %14042 = vmatprep.mubr.msk.bf16.mxu1 %vm1217_vm2, %v15385_v1  ;;  %v2765_v62 = vrot.slane %v15401_v61, 1 }
  0xbc   : > { %14180 = vmatprep.mubr.msk.bf16.mxu0 %vm1217_vm2, %v2736_v15 }
  0xbd   : > { %v2766_v5 = vsel %vm2725_vm3, %v2763_v51, %v2765_v62  ;;  %v2768_v4 = vsel %vm2725_vm3, %v2765_v62, %v2767_v0 }
  0xc2   : > { %14043 = vmatmul.mubr.msk.bf16.gmra.mxu1 %vm1217_vm2, %v15386_v3 }
  0xc3   : > { %14181 = vmatmul.mubr.msk.bf16.gmra.mxu0 %vm1217_vm2, %v2738_v10  ;;  %14046 = vmatprep.mubr.msk.bf16.mxu1 %vm1217_vm2, %v15387_v19 }
  0xc4   : > { %14184 = vmatprep.mubr.msk.bf16.mxu0 %vm1217_vm2, %v2740_v11  ;;  %v15404_v11 = vld [vmem:[%s15677_s24 + $0xb8] sm:$0xff]  }
  0xca   : > { %14047 = vmatmul.mubr.msk.bf16.gmra.mxu1 %vm1217_vm2, %v15388_v8  ;;  %v15403_v8 = vld [vmem:[%s15677_s24 + $0xb0] sm:$0xff]  }
  0xcb   : > { %14185 = vmatmul.mubr.msk.bf16.gmra.mxu0 %vm1217_vm2, %v2742_v20  ;;  %14050 = vmatprep.mubr.msk.bf16.mxu1 %vm1217_vm2, %v15389_v13  ;;  %v2769_v9 = vrot.slane %v15403_v8, 1  ;;  %v2771_v13 = vrot.slane %v15404_v11, 1 }
  0xcc   : > { %14188 = vmatprep.mubr.msk.bf16.mxu0 %vm1217_vm2, %v2744_v21 }
  0xcd   : > { %v2770_v20 = vsel %vm2725_vm3, %v2767_v0, %v2769_v9 }
  0xd2   : > { %14051 = vmatmul.mubr.msk.bf16.gmra.mxu1 %vm1217_vm2, %v15390_v16 }
  0xd3   : > { %14189 = vmatmul.mubr.msk.bf16.gmra.mxu0 %vm1217_vm2, %v2746_v17  ;;  %14054 = vmatprep.mubr.msk.bf16.mxu1 %vm1217_vm2, %v15391_v23  ;;  %v2772_v23 = vsel %vm2725_vm3, %v2769_v9, %v2771_v13  ;;  %v15405_v17 = vld [vmem:[%s15677_s24 + $0xc0] sm:$0xff]  }
  0xd4   : > { %14192 = vmatprep.mubr.msk.bf16.mxu0 %vm1217_vm2, %v2748_v22  ;;  %v2773_v22 = vrot.slane %v15405_v17, 1 }
  0xda   : > { %14055 = vmatmul.mubr.msk.bf16.gmra.mxu1 %vm1217_vm2, %v15392_v44 }
  0xdb   : > { %14193 = vmatmul.mubr.msk.bf16.gmra.mxu0 %vm1217_vm2, %v2750_v30  ;;  %14058 = vmatprep.mubr.msk.bf16.mxu1 %vm1217_vm2, %v15393_v26 }
  0xdc   : > { %14196 = vmatprep.mubr.msk.bf16.mxu0 %vm1217_vm2, %v2752_v31 }
  0xe2   : > { %14059 = vmatmul.mubr.msk.bf16.gmra.mxu1 %vm1217_vm2, %v15394_v28  ;;  %v2775_v28 = vrot.slane %v15406_v27, 1 }
  0xe3   : > { %14197 = vmatmul.mubr.msk.bf16.gmra.mxu0 %vm1217_vm2, %v2754_v36  ;;  %14062 = vmatprep.mubr.msk.bf16.mxu1 %vm1217_vm2, %v15395_v32  ;;  %v2774_v32 = vsel %vm2725_vm3, %v2771_v13, %v2773_v22 }
  0xe4   : > { %14200 = vmatprep.mubr.msk.bf16.mxu0 %vm1217_vm2, %v2756_v37 }
  0xea   : > { %v16087_v46 = vpop.f32.mrf.mxu1  ;;  %14063 = vmatmul.mubr.msk.bf16.gmra.mxu1 %vm1217_vm2, %v15396_v34  ;;  %v2776_v34 = vsel %vm2725_vm3, %v2773_v22, %v2775_v28 }
  0xeb   : > { %v16084_v45 = vpop.f32.mrf.mxu0  ;;  %14201 = vmatmul.mubr.msk.bf16.gmra.mxu0 %vm1217_vm2, %v2758_v42  ;;  %20182 = vst [vmem:[#allocation5_spill] sm:$0xff] %v16087_v46  ;;  %14066 = vmatprep.mubr.msk.bf16.mxu1 %vm1217_vm2, %v15397_v38  ;;  %v15407_v38 = vld [vmem:[%s15677_s24 + $0xd0] sm:$0xff]   ;;  %v2779_v42 = vrot.slane %v15408_v41, 1 }
  0xec   : > { %14204 = vmatprep.mubr.msk.bf16.mxu0 %vm1217_vm2, %v2760_v43  ;;  %v16096_v52 = vpop.f32.mrf.mxu1  ;;  %v2777_v39 = vrot.slane %v15407_v38, 1 }
  0xed   : > { %v16092_v49 = vpop.f32.mrf.mxu0  ;;  %20183 = vst [vmem:[#allocation6_spill] sm:$0xff] %v16096_v52 }
  0xee   : > { %v16100_v54 = vpop.f32.mrf.mxu1 }
  0xef   : > { %v16098_v53 = vpop.f32.mrf.mxu0  ;;  %20184 = vst [vmem:[#allocation7_spill] sm:$0xff] %v16100_v54 }
  0xf0   : > { %v16106_v58 = vpop.f32.mrf.mxu1 }
  0xf1   : > { %v16103_v56 = vpop.f32.mrf.mxu0  ;;  %20185 = vst [vmem:[#allocation8_spill] sm:$0xff] %v16106_v58 }
  0xf2   : > { %v16111_v60 = vpop.f32.mrf.mxu1  ;;  %14067 = vmatmul.mubr.msk.bf16.gmra.mxu1 %vm1217_vm2, %v15398_v40 }
  0xf3   : > { %v16108_v59 = vpop.f32.mrf.mxu0  ;;  %14205 = vmatmul.mubr.msk.bf16.gmra.mxu0 %vm1217_vm2, %v2762_v55  ;;  %20186 = vst [vmem:[#allocation9_spill] sm:$0xff] %v16111_v60  ;;  %14070 = vmatprep.mubr.msk.bf16.mxu1 %vm1217_vm2, %v15399_v47  ;;  %v2780_v55 = vsel %vm2725_vm3, %v2777_v39, %v2779_v42 }
  0xf4   : > { %14208 = vmatprep.mubr.msk.bf16.mxu0 %vm1217_vm2, %v2764_v57  ;;  %v16120_v1 = vpop.f32.mrf.mxu1 }
  0xf5   : > { %v16116_v25 = vpop.f32.mrf.mxu0  ;;  %20187 = vst [vmem:[#allocation10_spill] sm:$0xff] %v16120_v1 }
  0xf6   : > { %v16124_v3 = vpop.f32.mrf.mxu1 }
  0xf7   : > { %v16122_v2 = vpop.f32.mrf.mxu0  ;;  %20188 = vst [vmem:[#allocation11_spill] sm:$0xff] %v16124_v3 }
  0xf8   : > { %v16130_v15 = vpop.f32.mrf.mxu1 }
  0xf9   : > { %v16127_v7 = vpop.f32.mrf.mxu0  ;;  %20189 = vst [vmem:[#allocation12_spill] sm:$0xff] %v16130_v15 }
  0xfa   : > { %v16135_v6 = vpop.f32.mrf.mxu1  ;;  %14071 = vmatmul.mubr.msk.bf16.gmra.mxu1 %vm1217_vm2, %v15400_v50  ;;  %v2778_v50 = vsel %vm2725_vm3, %v2775_v28, %v2777_v39  ;;  %v15412_v39 = vld [vmem:[%s15677_s24 + $0xf8] sm:$0xff]  }
  0xfb   : > { %v16132_v19 = vpop.f32.mrf.mxu0  ;;  %14209 = vmatmul.mubr.msk.bf16.gmra.mxu0 %vm1217_vm2, %v2766_v5  ;;  %20190 = vst [vmem:[#allocation13_spill] sm:$0xff] %v16135_v6  ;;  %14074 = vmatprep.mubr.msk.bf16.mxu1 %vm1217_vm2, %v15401_v61 }
  0xfc   : > { %14212 = vmatprep.mubr.msk.bf16.mxu0 %vm1217_vm2, %v2768_v4  ;;  %v16144_v14 = vpop.f32.mrf.mxu1  ;;  %v15410_v4 = vld [vmem:[%s15677_s24 + $0xe8] sm:$0xff]  }
  0xfd   : > { %v16140_v10 = vpop.f32.mrf.mxu0  ;;  %20191 = vst [vmem:[#allocation14_spill] sm:$0xff] %v16144_v14 }
  0xfe   : > { %v16148_v18 = vpop.f32.mrf.mxu1 }
  0xff   : > { %v16146_v16 = vpop.f32.mrf.mxu0  ;;  %20192 = vst [vmem:[#allocation15_spill] sm:$0xff] %v16148_v18 }
 0x100   : > { %v16154_v24 = vpop.f32.mrf.mxu1 }
 0x101   : > { %v16151_v21 = vpop.f32.mrf.mxu0  ;;  %20193 = vst [vmem:[#allocation16_spill] sm:$0xff] %v16154_v24 }
 0x102   : > { %v16159_v12 = vpop.f32.mrf.mxu1  ;;  %14075 = vmatmul.mubr.msk.bf16.gmra.mxu1 %vm1217_vm2, %v15402_v63  ;;  %v15409_v63 = vld [vmem:[%s15677_s24 + $0xe0] sm:$0xff]  }
 0x103   : > { %v16156_v44 = vpop.f32.mrf.mxu0  ;;  %14213 = vmatmul.mubr.msk.bf16.gmra.mxu0 %vm1217_vm2, %v2770_v20  ;;  %20194 = vst [vmem:[#allocation17_spill] sm:$0xff] %v16159_v12  ;;  %14078 = vmatprep.mubr.msk.bf16.mxu1 %vm1217_vm2, %v15403_v8  ;;  %v2781_v0 = vrot.slane %v15409_v63, 1  ;;  %v2783_v8 = vrot.slane %v15410_v4, 1 }
 0x104   : > { %14216 = vmatprep.mubr.msk.bf16.mxu0 %vm1217_vm2, %v2772_v23  ;;  %v16168_v29 = vpop.f32.mrf.mxu1 }
 0x105   : > { %v16164_v26 = vpop.f32.mrf.mxu0  ;;  %20195 = vst [vmem:[#allocation18_spill] sm:$0xff] %v16168_v29  ;;  %v2782_v20 = vsel %vm2725_vm3, %v2779_v42, %v2781_v0  ;;  %v2787_v42 = vrot.slane %v15412_v39, 1 }
 0x106   : > { %v16172_v31 = vpop.f32.mrf.mxu1 }
 0x107   : > { %v16170_v30 = vpop.f32.mrf.mxu0  ;;  %20196 = vst [vmem:[#allocation19_spill] sm:$0xff] %v16172_v31 }
 0x108   : > { %v16178_v35 = vpop.f32.mrf.mxu1 }
 0x109   : > { %v16175_v33 = vpop.f32.mrf.mxu0  ;;  %20197 = vst [vmem:[#allocation20_spill] sm:$0xff] %v16178_v35 }
 0x10a   : > { %v16183_v37 = vpop.f32.mrf.mxu1  ;;  %14079 = vmatmul.mubr.msk.bf16.gmra.mxu1 %vm1217_vm2, %v15404_v11 }
 0x10b   : > { %v16180_v36 = vpop.f32.mrf.mxu0  ;;  %14217 = vmatmul.mubr.msk.bf16.gmra.mxu0 %vm1217_vm2, %v2774_v32  ;;  %20198 = vst [vmem:[#allocation21_spill] sm:$0xff] %v16183_v37  ;;  %14082 = vmatprep.mubr.msk.bf16.mxu1 %vm1217_vm2, %v15405_v17  ;;  %v2784_v17 = vsel %vm2725_vm3, %v2781_v0, %v2783_v8  ;;  %v15411_v32 = vld [vmem:[%s15677_s24 + $0xf0] sm:$0xff]  }
 0x10c   : > { %14220 = vmatprep.mubr.msk.bf16.mxu0 %vm1217_vm2, %v2776_v34  ;;  %v16192_v43 = vpop.f32.mrf.mxu1  ;;  %v2785_v34 = vrot.slane %v15411_v32, 1 }
 0x10d   : > { %v16188_v40 = vpop.f32.mrf.mxu0  ;;  %20199 = vst [vmem:[#allocation22_spill] sm:$0xff] %v16192_v43 }
 0x10e   : > { %v16196_v48 = vpop.f32.mrf.mxu1 }
 0x10f   : > { %v16194_v47 = vpop.f32.mrf.mxu0  ;;  %20200 = vst [vmem:[#allocation23_spill] sm:$0xff] %v16196_v48 }
 0x110   : > { %v16202_v57 = vpop.f32.mrf.mxu1 }
 0x111   : > { %v16199_v51 = vpop.f32.mrf.mxu0  ;;  %20201 = vst [vmem:[#allocation24_spill] sm:$0xff] %v16202_v57 }
 0x112   : > { %v16207_v62 = vpop.f32.mrf.mxu1  ;;  %14083 = vmatmul.mubr.msk.bf16.gmra.mxu1 %vm1217_vm2, %v15406_v27 }
 0x113   : > { %v16204_v61 = vpop.f32.mrf.mxu0  ;;  %14221 = vmatmul.mubr.msk.bf16.gmra.mxu0 %vm1217_vm2, %v2778_v50  ;;  %20202 = vst [vmem:[#allocation25_spill] sm:$0xff] %v16207_v62  ;;  %14086 = vmatprep.mubr.msk.bf16.mxu1 %vm1217_vm2, %v15407_v38 }
 0x114   : > { %14224 = vmatprep.mubr.msk.bf16.mxu0 %vm1217_vm2, %v2780_v55  ;;  %v16216_v9 = vpop.f32.mrf.mxu1 }
 0x115   : > { %v16212_v5 = vpop.f32.mrf.mxu0  ;;  %20203 = vst [vmem:[#allocation26_spill] sm:$0xff] %v16216_v9 }
 0x116   : > { %v16220_v13 = vpop.f32.mrf.mxu1 }
 0x117   : > { %v16218_v11 = vpop.f32.mrf.mxu0  ;;  %20204 = vst [vmem:[#allocation27_spill] sm:$0xff] %v16220_v13 }
 0x118   : > { %v16226_v22 = vpop.f32.mrf.mxu1 }
 0x119   : > { %v16223_v23 = vpop.f32.mrf.mxu0  ;;  %20205 = vst [vmem:[#allocation28_spill] sm:$0xff] %v16226_v22 }
 0x11a   : > { %v16231_v28 = vpop.f32.mrf.mxu1  ;;  %14087 = vmatmul.mubr.msk.bf16.gmra.mxu1 %vm1217_vm2, %v15408_v41  ;;  %v2786_v41 = vsel %vm2725_vm3, %v2783_v8, %v2785_v34  ;;  %v15414_v8 = vld [vmem:[%s15677_s24 + $0x108] sm:$0xff]  }
 0x11b   : > { %v16228_v27 = vpop.f32.mrf.mxu0  ;;  %14225 = vmatmul.mubr.msk.bf16.gmra.mxu0 %vm1217_vm2, %v2782_v20  ;;  %20206 = vst [vmem:[#allocation29_spill] sm:$0xff] %v16231_v28  ;;  %14090 = vmatprep.mubr.msk.bf16.mxu1 %vm1217_vm2, %v15409_v63 }
 0x11c   : > { %14228 = vmatprep.mubr.msk.bf16.mxu0 %vm1217_vm2, %v2784_v17  ;;  %v16240_v50 = vpop.f32.mrf.mxu1  ;;  %v2788_v17 = vsel %vm2725_vm3, %v2785_v34, %v2787_v42  ;;  %v2791_v34 = vrot.slane %v15414_v8, 1 }
 0x11d   : > { %v16236_v38 = vpop.f32.mrf.mxu0  ;;  %20207 = vst [vmem:[#allocation30_spill] sm:$0xff] %v16240_v50  ;;  %v15413_v50 = vld [vmem:[%s15677_s24 + $0x100] sm:$0xff]  }
 0x11e   : > { %v16244_v0 = vpop.f32.mrf.mxu1 }
 0x11f   : > { %v16242_v55 = vpop.f32.mrf.mxu0  ;;  %20208 = vst [vmem:[#allocation31_spill] sm:$0xff] %v16244_v0  ;;  %v2789_v0 = vrot.slane %v15413_v50, 1 }
 0x120   : > { %v16250_v28 = vpop.f32.mrf.mxu1 }
 0x121   : > { %v16247_v20 = vpop.f32.mrf.mxu0  ;;  %20209 = vst [vmem:[#allocation32_spill] sm:$0xff] %v16250_v28 }
 0x122   : > { %v16255_v63 = vpop.f32.mrf.mxu1  ;;  %14091 = vmatmul.mubr.msk.bf16.gmra.mxu1 %vm1217_vm2, %v15410_v4  ;;  %v2790_v4 = vsel %vm2725_vm3, %v2787_v42, %v2789_v0  ;;  %v15416_v42 = vld [vmem:[%s15677_s24 + $0x118] sm:$0xff]  }
 0x123   : > { %v16252_v22 = vpop.f32.mrf.mxu0  ;;  %14229 = vmatmul.mubr.msk.bf16.gmra.mxu0 %vm1217_vm2, %v2786_v41  ;;  %20210 = vst [vmem:[#allocation33_spill] sm:$0xff] %v16255_v63  ;;  %14094 = vmatprep.mubr.msk.bf16.mxu1 %vm1217_vm2, %v15411_v32 }
 0x124   : > { %14232 = vmatprep.mubr.msk.bf16.mxu0 %vm1217_vm2, %v2788_v17  ;;  %v16264_v28 = vpop.f32.mrf.mxu1  ;;  %v2792_v17 = vsel %vm2725_vm3, %v2789_v0, %v2791_v34  ;;  %v2795_v0 = vrot.slane %v15416_v42, 1 }
 0x125   : > { %v16260_v13 = vpop.f32.mrf.mxu0  ;;  %20211 = vst [vmem:[#allocation34_spill] sm:$0xff] %v16264_v28  ;;  %v15415_v28 = vld [vmem:[%s15677_s24 + $0x110] sm:$0xff]  }
 0x126   : > { %v16268_v41 = vpop.f32.mrf.mxu1 }
 0x127   : > { %v16266_v9 = vpop.f32.mrf.mxu0  ;;  %20212 = vst [vmem:[#allocation35_spill] sm:$0xff] %v16268_v41  ;;  %v2793_v41 = vrot.slane %v15415_v28, 1 }
 0x128   : > { %v16274_v62 = vpop.f32.mrf.mxu1 }
 0x129   : > { %v16271_v63 = vpop.f32.mrf.mxu0  ;;  %20213 = vst [vmem:[#allocation36_spill] sm:$0xff] %v16274_v62 }
 0x12a   : > { %v16279_v32 = vpop.f32.mrf.mxu1  ;;  %14095 = vmatmul.mubr.msk.bf16.gmra.mxu1 %vm1217_vm2, %v15412_v39  ;;  %v2794_v39 = vsel %vm2725_vm3, %v2791_v34, %v2793_v41  ;;  %v15418_v34 = vld [vmem:[%s15677_s24 + $0x128] sm:$0xff]  }
 0x12b   : > { %v16276_v57 = vpop.f32.mrf.mxu0  ;;  %14233 = vmatmul.mubr.msk.bf16.gmra.mxu0 %vm1217_vm2, %v2790_v4  ;;  %20214 = vst [vmem:[#allocation37_spill] sm:$0xff] %v16279_v32  ;;  %14098 = vmatprep.mubr.msk.bf16.mxu1 %vm1217_vm2, %v15413_v50 }
 0x12c   : > { %14236 = vmatprep.mubr.msk.bf16.mxu0 %vm1217_vm2, %v2792_v17  ;;  %v16288_v62 = vpop.f32.mrf.mxu1  ;;  %v2796_v17 = vsel %vm2725_vm3, %v2793_v41, %v2795_v0  ;;  %v2799_v41 = vrot.slane %v15418_v34, 1 }
 0x12d   : > { %v16284_v48 = vpop.f32.mrf.mxu0  ;;  %20215 = vst [vmem:[#allocation38_spill] sm:$0xff] %v16288_v62  ;;  %v15417_v62 = vld [vmem:[%s15677_s24 + $0x120] sm:$0xff]  }
 0x12e   : > { %v16292_v4 = vpop.f32.mrf.mxu1 }
 0x12f   : > { %v16290_v43 = vpop.f32.mrf.mxu0  ;;  %20216 = vst [vmem:[#allocation39_spill] sm:$0xff] %v16292_v4  ;;  %v2797_v4 = vrot.slane %v15417_v62, 1 }
 0x130   : > { %v16298_v37 = vpop.f32.mrf.mxu1 }
 0x131   : > { %v16295_v32 = vpop.f32.mrf.mxu0  ;;  %20217 = vst [vmem:[#allocation40_spill] sm:$0xff] %v16298_v37 }
 0x132   : > { %v16303_v50 = vpop.f32.mrf.mxu1  ;;  %14099 = vmatmul.mubr.msk.bf16.gmra.mxu1 %vm1217_vm2, %v15414_v8  ;;  %v2798_v8 = vsel %vm2725_vm3, %v2795_v0, %v2797_v4  ;;  %v15420_v0 = vld [vmem:[%s15677_s24 + $0x138] sm:$0xff]  }
 0x133   : > { %v16300_v35 = vpop.f32.mrf.mxu0  ;;  %14237 = vmatmul.mubr.msk.bf16.gmra.mxu0 %vm1217_vm2, %v2794_v39  ;;  %20218 = vst [vmem:[#allocation41_spill] sm:$0xff] %v16303_v50  ;;  %14102 = vmatprep.mubr.msk.bf16.mxu1 %vm1217_vm2, %v15415_v28 }
 0x134   : > { %14240 = vmatprep.mubr.msk.bf16.mxu0 %vm1217_vm2, %v2796_v17  ;;  %v16312_v37 = vpop.f32.mrf.mxu1  ;;  %v2800_v17 = vsel %vm2725_vm3, %v2797_v4, %v2799_v41  ;;  %v2803_v4 = vrot.slane %v15420_v0, 1 }
 0x135   : > { %v16308_v31 = vpop.f32.mrf.mxu0  ;;  %20219 = vst [vmem:[#allocation42_spill] sm:$0xff] %v16312_v37  ;;  %v15419_v37 = vld [vmem:[%s15677_s24 + $0x130] sm:$0xff]  }
 0x136   : > { %v16316_v39 = vpop.f32.mrf.mxu1 }
 0x137   : > { %v16314_v29 = vpop.f32.mrf.mxu0  ;;  %20220 = vst [vmem:[#allocation43_spill] sm:$0xff] %v16316_v39  ;;  %v2801_v39 = vrot.slane %v15419_v37, 1 }
 0x138   : > { %v16322_v12 = vpop.f32.mrf.mxu1 }
 0x139   : > { %v16319_v50 = vpop.f32.mrf.mxu0  ;;  %20221 = vst [vmem:[#allocation44_spill] sm:$0xff] %v16322_v12 }
 0x13a   : > { %v16327_v28 = vpop.f32.mrf.mxu1  ;;  %14103 = vmatmul.mubr.msk.bf16.gmra.mxu1 %vm1217_vm2, %v15416_v42  ;;  %v2802_v42 = vsel %vm2725_vm3, %v2799_v41, %v2801_v39  ;;  %v15422_v41 = vld [vmem:[%s15677_s24 + $0x148] sm:$0xff]  }
 0x13b   : > { %v16324_v24 = vpop.f32.mrf.mxu0  ;;  %14241 = vmatmul.mubr.msk.bf16.gmra.mxu0 %vm1217_vm2, %v2798_v8  ;;  %20222 = vst [vmem:[#allocation45_spill] sm:$0xff] %v16327_v28  ;;  %14106 = vmatprep.mubr.msk.bf16.mxu1 %vm1217_vm2, %v15417_v62 }
 0x13c   : > { %14244 = vmatprep.mubr.msk.bf16.mxu0 %vm1217_vm2, %v2800_v17  ;;  %v16336_v12 = vpop.f32.mrf.mxu1  ;;  %v2804_v17 = vsel %vm2725_vm3, %v2801_v39, %v2803_v4  ;;  %v2807_v39 = vrot.slane %v15422_v41, 1 }
 0x13d   : > { %v16332_v18 = vpop.f32.mrf.mxu0  ;;  %20223 = vst [vmem:[#allocation46_spill] sm:$0xff] %v16336_v12  ;;  %v15421_v12 = vld [vmem:[%s15677_s24 + $0x140] sm:$0xff]  }
 0x13e   : > { %v16340_v8 = vpop.f32.mrf.mxu1 }
 0x13f   : > { %v16338_v14 = vpop.f32.mrf.mxu0  ;;  %20225 = vst [vmem:[#allocation48_spill] sm:$0xff] %v16340_v8  ;;  %v2805_v8 = vrot.slane %v15421_v12, 1 }
 0x140   : > { %20224 = vst [vmem:[#allocation47_spill] sm:$0xff] %v16338_v14  ;;  %v16346_v6 = vpop.f32.mrf.mxu1 }
 0x141   : > { %v16343_v28 = vpop.f32.mrf.mxu0  ;;  %20227 = vst [vmem:[#allocation50_spill] sm:$0xff] %v16346_v6  ;;  %v16363_v6 = vld [vmem:[%s20178_s1 + $0xa] sm:$0x3] }
 0x142   : > { %20226 = vst [vmem:[#allocation49_spill] sm:$0xff] %v16343_v28  ;;  %v16351_v62 = vpop.f32.mrf.mxu1  ;;  %14107 = vmatmul.mubr.msk.bf16.gmra.mxu1 %vm1217_vm2, %v15418_v34  ;;  %15144 = vmatprep.subr.msk.bf16.mxu1 %vm1422_vm0, %v16363_v6 }
 0x143   : > { %v16348_v15 = vpop.f32.mrf.mxu0  ;;  %14245 = vmatmul.mubr.msk.bf16.gmra.mxu0 %vm1217_vm2, %v2802_v42  ;;  %20229 = vst [vmem:[#allocation52_spill] sm:$0xff] %v16351_v62  ;;  %14110 = vmatprep.mubr.msk.bf16.mxu1 %vm1217_vm2, %v15419_v37  ;;  %v2806_v62 = vsel %vm2725_vm3, %v2803_v4, %v2805_v8  ;;  %v15423_v4 = vld [vmem:[%s15677_s24 + $0x150] sm:$0xff]  }
 0x144   : > { %20228 = vst [vmem:[#allocation51_spill] sm:$0xff] %v16348_v15  ;;  %14248 = vmatprep.mubr.msk.bf16.mxu0 %vm1217_vm2, %v2804_v17  ;;  %v16365_v42 = vpop.f32.mrf.mxu1  ;;  %v16374_v17 = vld [vmem:[%s20178_s1 + $0xc] sm:$0x3] }
 0x145   : > { %v16356_v3 = vpop.f32.mrf.mxu0  ;;  %20231 = vst [vmem:[#allocation54_spill] sm:$0xff] %v16365_v42  ;;  %15145 = vmatprep.subr.msk.bf16.mxu0 %vm1422_vm0, %v16374_v17  ;;  %v2808_v42 = vsel %vm2725_vm3, %v2805_v8, %v2807_v39  ;;  %v15424_v8 = vld [vmem:[%s15677_s24 + $0x158] sm:$0xff]  }
 0x146   : > { %20230 = vst [vmem:[#allocation53_spill] sm:$0xff] %v16356_v3  ;;  %v16376_v37 = vpop.f32.mrf.mxu1  ;;  %v2811_v46 = vrot.slane %v15424_v8, 1 }
 0x147   : > { %v16369_v34 = vpop.f32.mrf.mxu0  ;;  %20233 = vst [vmem:[#allocation56_spill] sm:$0xff] %v16376_v37  ;;  %v2809_v37 = vrot.slane %v15423_v4, 1 }
 0x148   : > { %20232 = vst [vmem:[#allocation55_spill] sm:$0xff] %v16369_v34  ;;  %v16384_v60 = vpop.f32.mrf.mxu1 }
 0x149   : > { %v16381_v1 = vpop.f32.mrf.mxu0  ;;  %20235 = vst [vmem:[#allocation58_spill] sm:$0xff] %v16384_v60 }
 0x14a   : > { %20234 = vst [vmem:[#allocation57_spill] sm:$0xff] %v16381_v1  ;;  %v16389_v54 = vpop.f32.mrf.mxu1  ;;  %14111 = vmatmul.mubr.msk.bf16.gmra.mxu1 %vm1217_vm2, %v15420_v0  ;;  %v2810_v0 = vsel %vm2725_vm3, %v2807_v39, %v2809_v37  ;;  %v15426_v39 = vld [vmem:[%s15677_s24 + $0x168] sm:$0xff]  }
 0x14b   : > { %v16386_v58 = vpop.f32.mrf.mxu0  ;;  %14249 = vmatmul.mubr.msk.bf16.gmra.mxu0 %vm1217_vm2, %v2806_v62  ;;  %20237 = vst [vmem:[#allocation60_spill] sm:$0xff] %v16389_v54  ;;  %14114 = vmatprep.mubr.msk.bf16.mxu1 %vm1217_vm2, %v15421_v12 }
 0x14c   : > { %20236 = vst [vmem:[#allocation59_spill] sm:$0xff] %v16386_v58  ;;  %14252 = vmatprep.mubr.msk.bf16.mxu0 %vm1217_vm2, %v2808_v42  ;;  %v16398_v60 = vpop.f32.mrf.mxu1  ;;  %v2812_v42 = vsel %vm2725_vm3, %v2809_v37, %v2811_v46  ;;  %v2815_v37 = vrot.slane %v15426_v39, 1 }
 0x14d   : > { %v16394_v52 = vpop.f32.mrf.mxu0  ;;  %20239 = vst [vmem:[#allocation62_spill] sm:$0xff] %v16398_v60  ;;  %v15425_v60 = vld [vmem:[%s15677_s24 + $0x160] sm:$0xff]  }
 0x14e   : > { %20238 = vst [vmem:[#allocation61_spill] sm:$0xff] %v16394_v52  ;;  %v16402_v62 = vpop.f32.mrf.mxu1 }
 0x14f   : > { %v16400_v58 = vpop.f32.mrf.mxu0  ;;  %20241 = vst [vmem:[#allocation64_spill] sm:$0xff] %v16402_v62  ;;  %v2813_v62 = vrot.slane %v15425_v60, 1 }
 0x150   : > { %20240 = vst [vmem:[#allocation63_spill] sm:$0xff] %v16400_v58  ;;  %v16408_v1 = vpop.f32.mrf.mxu1 }
 0x151   : > { %v16405_v54 = vpop.f32.mrf.mxu0  ;;  %20243 = vst [vmem:[#allocation66_spill] sm:$0xff] %v16408_v1 }
 0x152   : > { %20242 = vst [vmem:[#allocation65_spill] sm:$0xff] %v16405_v54  ;;  %v16413_v12 = vpop.f32.mrf.mxu1  ;;  %14115 = vmatmul.mubr.msk.bf16.gmra.mxu1 %vm1217_vm2, %v15422_v41  ;;  %v2814_v41 = vsel %vm2725_vm3, %v2811_v46, %v2813_v62  ;;  %v15428_v46 = vld [vmem:[%s15677_s24 + $0x178] sm:$0xff]  }
 0x153   : > { %v16410_v52 = vpop.f32.mrf.mxu0  ;;  %14253 = vmatmul.mubr.msk.bf16.gmra.mxu0 %vm1217_vm2, %v2810_v0  ;;  %20245 = vst [vmem:[#allocation68_spill] sm:$0xff] %v16413_v12  ;;  %14118 = vmatprep.mubr.msk.bf16.mxu1 %vm1217_vm2, %v15423_v4 }
 0x154   : > { %20244 = vst [vmem:[#allocation67_spill] sm:$0xff] %v16410_v52  ;;  %14256 = vmatprep.mubr.msk.bf16.mxu0 %vm1217_vm2, %v2812_v42  ;;  %v16422_v1 = vpop.f32.mrf.mxu1  ;;  %v2816_v42 = vsel %vm2725_vm3, %v2813_v62, %v2815_v37  ;;  %v2819_v62 = vrot.slane %v15428_v46, 1 }
 0x155   : > { %v16418_v58 = vpop.f32.mrf.mxu0  ;;  %20247 = vst [vmem:[#allocation70_spill] sm:$0xff] %v16422_v1  ;;  %v15427_v1 = vld [vmem:[%s15677_s24 + $0x170] sm:$0xff]  }
 0x156   : > { %20246 = vst [vmem:[#allocation69_spill] sm:$0xff] %v16418_v58  ;;  %v16426_v0 = vpop.f32.mrf.mxu1 }
 0x157   : > { %v16424_v52 = vpop.f32.mrf.mxu0  ;;  %20249 = vst [vmem:[#allocation72_spill] sm:$0xff] %v16426_v0  ;;  %v2817_v0 = vrot.slane %v15427_v1, 1 }
 0x158   : > { %20248 = vst [vmem:[#allocation71_spill] sm:$0xff] %v16424_v52  ;;  %v16432_v54 = vpop.f32.mrf.mxu1 }
 0x159   : > { %v16429_v12 = vpop.f32.mrf.mxu0  ;;  %20251 = vst [vmem:[#allocation74_spill] sm:$0xff] %v16432_v54 }
 0x15a   : > { %20250 = vst [vmem:[#allocation73_spill] sm:$0xff] %v16429_v12  ;;  %v16437_v4 = vpop.f32.mrf.mxu1  ;;  %14119 = vmatmul.mubr.msk.bf16.gmra.mxu1 %vm1217_vm2, %v15424_v8  ;;  %v2818_v8 = vsel %vm2725_vm3, %v2815_v37, %v2817_v0  ;;  %v15430_v37 = vld [vmem:[%s15677_s24 + $0x188] sm:$0xff]  }
 0x15b   : > { %v16434_v58 = vpop.f32.mrf.mxu0  ;;  %14257 = vmatmul.mubr.msk.bf16.gmra.mxu0 %vm1217_vm2, %v2814_v41  ;;  %20253 = vst [vmem:[#allocation76_spill] sm:$0xff] %v16437_v4  ;;  %14122 = vmatprep.mubr.msk.bf16.mxu1 %vm1217_vm2, %v15425_v60 }
 0x15c   : > { %20252 = vst [vmem:[#allocation75_spill] sm:$0xff] %v16434_v58  ;;  %14260 = vmatprep.mubr.msk.bf16.mxu0 %vm1217_vm2, %v2816_v42  ;;  %v16446_v54 = vpop.f32.mrf.mxu1  ;;  %v2820_v42 = vsel %vm2725_vm3, %v2817_v0, %v2819_v62  ;;  %v2823_v0 = vrot.slane %v15430_v37, 1 }
 0x15d   : > { %v16442_v52 = vpop.f32.mrf.mxu0  ;;  %20255 = vst [vmem:[#allocation78_spill] sm:$0xff] %v16446_v54  ;;  %v15429_v54 = vld [vmem:[%s15677_s24 + $0x180] sm:$0xff]  }
 0x15e   : > { %20254 = vst [vmem:[#allocation77_spill] sm:$0xff] %v16442_v52  ;;  %v16450_v41 = vpop.f32.mrf.mxu1 }
 0x15f   : > { %v16448_v58 = vpop.f32.mrf.mxu0  ;;  %20257 = vst [vmem:[#allocation80_spill] sm:$0xff] %v16450_v41  ;;  %v2821_v41 = vrot.slane %v15429_v54, 1 }
 0x160   : > { %20256 = vst [vmem:[#allocation79_spill] sm:$0xff] %v16448_v58  ;;  %v16456_v12 = vpop.f32.mrf.mxu1 }
 0x161   : > { %v16453_v4 = vpop.f32.mrf.mxu0  ;;  %20259 = vst [vmem:[#allocation82_spill] sm:$0xff] %v16456_v12 }
 0x162   : > { %20258 = vst [vmem:[#allocation81_spill] sm:$0xff] %v16453_v4  ;;  %v16461_v60 = vpop.f32.mrf.mxu1  ;;  %14123 = vmatmul.mubr.msk.bf16.gmra.mxu1 %vm1217_vm2, %v15426_v39  ;;  %v2822_v39 = vsel %vm2725_vm3, %v2819_v62, %v2821_v41  ;;  %v15432_v62 = vld [vmem:[%s15677_s24 + $0x198] sm:$0xff]  }
 0x163   : > { %v16458_v52 = vpop.f32.mrf.mxu0  ;;  %14261 = vmatmul.mubr.msk.bf16.gmra.mxu0 %vm1217_vm2, %v2818_v8  ;;  %20261 = vst [vmem:[#allocation84_spill] sm:$0xff] %v16461_v60  ;;  %14126 = vmatprep.mubr.msk.bf16.mxu1 %vm1217_vm2, %v15427_v1 }
 0x164   : > { %20260 = vst [vmem:[#allocation83_spill] sm:$0xff] %v16458_v52  ;;  %14264 = vmatprep.mubr.msk.bf16.mxu0 %vm1217_vm2, %v2820_v42  ;;  %v16470_v12 = vpop.f32.mrf.mxu1  ;;  %v2824_v42 = vsel %vm2725_vm3, %v2821_v41, %v2823_v0  ;;  %v2827_v41 = vrot.slane %v15432_v62, 1 }
 0x165   : > { %v16466_v58 = vpop.f32.mrf.mxu0  ;;  %20263 = vst [vmem:[#allocation86_spill] sm:$0xff] %v16470_v12  ;;  %v15431_v12 = vld [vmem:[%s15677_s24 + $0x190] sm:$0xff]  }
 0x166   : > { %20262 = vst [vmem:[#allocation85_spill] sm:$0xff] %v16466_v58  ;;  %v16474_v8 = vpop.f32.mrf.mxu1 }
 0x167   : > { %v16472_v52 = vpop.f32.mrf.mxu0  ;;  %20265 = vst [vmem:[#allocation88_spill] sm:$0xff] %v16474_v8  ;;  %v2825_v8 = vrot.slane %v15431_v12, 1 }
 0x168   : > { %20264 = vst [vmem:[#allocation87_spill] sm:$0xff] %v16472_v52  ;;  %v16480_v4 = vpop.f32.mrf.mxu1 }
 0x169   : > { %v16477_v60 = vpop.f32.mrf.mxu0  ;;  %20267 = vst [vmem:[#allocation90_spill] sm:$0xff] %v16480_v4 }
 0x16a   : > { %20266 = vst [vmem:[#allocation89_spill] sm:$0xff] %v16477_v60  ;;  %v16485_v1 = vpop.f32.mrf.mxu1  ;;  %14127 = vmatmul.mubr.msk.bf16.gmra.mxu1 %vm1217_vm2, %v15428_v46  ;;  %v2826_v46 = vsel %vm2725_vm3, %v2823_v0, %v2825_v8  ;;  %v15434_v0 = vld [vmem:[%s15677_s24 + $0x1a8] sm:$0xff]  }
 0x16b   : > { %v16482_v58 = vpop.f32.mrf.mxu0  ;;  %14265 = vmatmul.mubr.msk.bf16.gmra.mxu0 %vm1217_vm2, %v2822_v39  ;;  %20269 = vst [vmem:[#allocation92_spill] sm:$0xff] %v16485_v1  ;;  %14130 = vmatprep.mubr.msk.bf16.mxu1 %vm1217_vm2, %v15429_v54 }
 0x16c   : > { %20268 = vst [vmem:[#allocation91_spill] sm:$0xff] %v16482_v58  ;;  %14268 = vmatprep.mubr.msk.bf16.mxu0 %vm1217_vm2, %v2824_v42  ;;  %v16494_v4 = vpop.f32.mrf.mxu1  ;;  %v2828_v42 = vsel %vm2725_vm3, %v2825_v8, %v2827_v41 }
 0x16d   : > { %v16490_v52 = vpop.f32.mrf.mxu0  ;;  %20271 = vst [vmem:[#allocation94_spill] sm:$0xff] %v16494_v4  ;;  %v15433_v4 = vld [vmem:[%s15677_s24 + $0x1a0] sm:$0xff]  }
 0x16e   : > { %20270 = vst [vmem:[#allocation93_spill] sm:$0xff] %v16490_v52  ;;  %v16498_v39 = vpop.f32.mrf.mxu1 }
 0x16f   : > { %v16496_v58 = vpop.f32.mrf.mxu0  ;;  %20273 = vst [vmem:[#allocation96_spill] sm:$0xff] %v16498_v39 }
 0x170   : > { %20272 = vst [vmem:[#allocation95_spill] sm:$0xff] %v16496_v58  ;;  %v16504_v60 = vpop.f32.mrf.mxu1  ;;  %v2829_v58 = vrot.slane %v15433_v4, 1 }
 0x171   : > { %v16501_v1 = vpop.f32.mrf.mxu0  ;;  %20275 = vst [vmem:[#allocation98_spill] sm:$0xff] %v16504_v60 }
 0x172   : > { %20274 = vst [vmem:[#allocation97_spill] sm:$0xff] %v16501_v1  ;;  %v14036_v54 = vpop.f32.mrf.mxu1  ;;  %14131 = vmatmul.mubr.msk.bf16.gmra.mxu1 %vm1217_vm2, %v15430_v37  ;;  %v2831_v1 = vrot.slane %v15434_v0, 1  ;;  %v2830_v37 = vsel %vm2725_vm3, %v2827_v41, %v2829_v58 }
 0x173   : > { %v14174_v52 = vpop.f32.mrf.mxu0  ;;  %14269 = vmatmul.mubr.msk.bf16.gmra.mxu0 %vm1217_vm2, %v2826_v46  ;;  %v2185_v39 = vadd.f32 %v14036_v54, %v16084_v45  ;;  %14134 = vmatprep.mubr.msk.bf16.mxu1 %vm1217_vm2, %v15431_v12 }
 0x174   : > { %14272 = vmatprep.mubr.msk.bf16.mxu0 %vm1217_vm2, %v2828_v42  ;;  %v2176_v8 = vpop.f32.mrf.mxu1  ;;  %v2832_v12 = vsel %vm2725_vm3, %v2829_v58, %v2831_v1 }
 0x175   : > { %v3104_v34 = vpop.f32.mrf.mxu0  ;;  %v16513_v3 = vadd.f32 %v14174_v52, %v2185_v39  ;;  %v2177_v60 = vadd.f32 %v2176_v8, %v16092_v49 }
 0x176   : > { %v14037_v15 = vpop.f32.mrf.mxu1 }
 0x177   : > { %v14175_v46 = vpop.f32.mrf.mxu0  ;;  %v16517_v42 = vadd.f32 %v3104_v34, %v2177_v60  ;;  %v2188_v28 = vadd.f32 %v14037_v15, %v16098_v53  ;;  %v15435_v34 = vld [vmem:[%s15677_s24 + $0x1b0] sm:$0xff]  }
 0x178   : > { %v2179_v54 = vpop.f32.mrf.mxu1  ;;  %v2833_v60 = vrot.slane %v15435_v34, 1 }
 0x179   : > { %v3107_v45 = vpop.f32.mrf.mxu0  ;;  %v16521_v14 = vadd.f32 %v14175_v46, %v2188_v28  ;;  %v2180_v52 = vadd.f32 %v2179_v54, %v16103_v56  ;;  %v15436_v28 = vld [vmem:[%s15677_s24 + $0x1b8] sm:$0xff]  }
 0x17a   : > { %v14040_v49 = vpop.f32.mrf.mxu1  ;;  %14135 = vmatmul.mubr.msk.bf16.gmra.mxu1 %vm1217_vm2, %v15432_v62  ;;  %v2835_v41 = vrot.slane %v15436_v28, 1 }
 0x17b   : > { %v14178_v39 = vpop.f32.mrf.mxu0  ;;  %14273 = vmatmul.mubr.msk.bf16.gmra.mxu0 %vm1217_vm2, %v2830_v37  ;;  %v16528_v53 = vadd.f32 %v3107_v45, %v2180_v52  ;;  %v2201_v15 = vadd.f32 %v14040_v49, %v16108_v59  ;;  %14138 = vmatprep.mubr.msk.bf16.mxu1 %vm1217_vm2, %v15433_v4 }
 0x17c   : > { %14276 = vmatprep.mubr.msk.bf16.mxu0 %vm1217_vm2, %v2832_v12  ;;  %v2192_v56 = vpop.f32.mrf.mxu1  ;;  %v2834_v12 = vsel %vm2725_vm3, %v2831_v1, %v2833_v60  ;;  %v2836_v4 = vsel %vm2725_vm3, %v2833_v60, %v2835_v41  ;;  %v15437_v1 = vld [vmem:[%s15677_s24 + $0x1c0] sm:$0xff]  }
 0x17d   : > { %v3120_v58 = vpop.f32.mrf.mxu0  ;;  %v16533_v8 = vadd.f32 %v14178_v39, %v2201_v15  ;;  %v2193_v46 = vadd.f32 %v2192_v56, %v16116_v25 }
 0x17e   : > { %v14041_v37 = vpop.f32.mrf.mxu1 }
 0x17f   : > { %v14179_v62 = vpop.f32.mrf.mxu0  ;;  %v16537_v54 = vadd.f32 %v3120_v58, %v2193_v46  ;;  %v2204_v45 = vadd.f32 %v14041_v37, %v16122_v2  ;;  %v2837_v58 = vrot.slane %v15437_v1, 1  ;;  %v15438_v46 = vld [vmem:[%s15677_s24 + $0x1c8] sm:$0xff]  }
 0x180   : > { %v2195_v52 = vpop.f32.mrf.mxu1 }
 0x181   : > { %v3123_v59 = vpop.f32.mrf.mxu0  ;;  %v16541_v49 = vadd.f32 %v14179_v62, %v2204_v45  ;;  %v2196_v39 = vadd.f32 %v2195_v52, %v16127_v7  ;;  %v2839_v62 = vrot.slane %v15438_v46, 1 }
 0x182   : > { %v14044_v25 = vpop.f32.mrf.mxu1  ;;  %14139 = vmatmul.mubr.msk.bf16.gmra.mxu1 %vm1217_vm2, %v15434_v0 }
 0x183   : > { %v14182_v15 = vpop.f32.mrf.mxu0  ;;  %14277 = vmatmul.mubr.msk.bf16.gmra.mxu0 %vm1217_vm2, %v2834_v12  ;;  %v16548_v2 = vadd.f32 %v3123_v59, %v2196_v39  ;;  %v2217_v56 = vadd.f32 %v14044_v25, %v16132_v19  ;;  %14142 = vmatprep.mubr.msk.bf16.mxu1 %vm1217_vm2, %v15435_v34  ;;  %v2840_v34 = vsel %vm2725_vm3, %v2837_v58, %v2839_v62 }
 0x184   : > { %14280 = vmatprep.mubr.msk.bf16.mxu0 %vm1217_vm2, %v2836_v4  ;;  %v2208_v7 = vpop.f32.mrf.mxu1  ;;  %v2838_v4 = vsel %vm2725_vm3, %v2835_v41, %v2837_v58  ;;  %v15439_v41 = vld [vmem:[%s15677_s24 + $0x1d0] sm:$0xff]  }
 0x185   : > { %v3136_v60 = vpop.f32.mrf.mxu0  ;;  %v16553_v37 = vadd.f32 %v14182_v15, %v2217_v56  ;;  %v2209_v12 = vadd.f32 %v2208_v7, %v16140_v10 }
 0x186   : > { %v14045_v45 = vpop.f32.mrf.mxu1 }
 0x187   : > { %v14183_v0 = vpop.f32.mrf.mxu0  ;;  %v16557_v52 = vadd.f32 %v3136_v60, %v2209_v12  ;;  %v2220_v59 = vadd.f32 %v14045_v45, %v16146_v16  ;;  %v2841_v60 = vrot.slane %v15439_v41, 1  ;;  %v15440_v12 = vld [vmem:[%s15677_s24 + $0x1d8] sm:$0xff]  }
 0x188   : > { %v2211_v39 = vpop.f32.mrf.mxu1 }
 0x189   : > { %v3139_v19 = vpop.f32.mrf.mxu0  ;;  %v16561_v25 = vadd.f32 %v14183_v0, %v2220_v59  ;;  %v2212_v15 = vadd.f32 %v2211_v39, %v16151_v21  ;;  %v2843_v0 = vrot.slane %v15440_v12, 1 }
 0x18a   : > { %v14048_v10 = vpop.f32.mrf.mxu1  ;;  %14143 = vmatmul.mubr.msk.bf16.gmra.mxu1 %vm1217_vm2, %v15436_v28 }
 0x18b   : > { %v14186_v56 = vpop.f32.mrf.mxu0  ;;  %14281 = vmatmul.mubr.msk.bf16.gmra.mxu0 %vm1217_vm2, %v2838_v4  ;;  %v16568_v16 = vadd.f32 %v3139_v19, %v2212_v15  ;;  %v2233_v7 = vadd.f32 %v14048_v10, %v16156_v44  ;;  %14146 = vmatprep.mubr.msk.bf16.mxu1 %vm1217_vm2, %v15437_v1  ;;  %v2844_v1 = vsel %vm2725_vm3, %v2841_v60, %v2843_v0 }
 0x18c   : > { %14284 = vmatprep.mubr.msk.bf16.mxu0 %vm1217_vm2, %v2840_v34  ;;  %v2224_v21 = vpop.f32.mrf.mxu1  ;;  %v2842_v34 = vsel %vm2725_vm3, %v2839_v62, %v2841_v60  ;;  %v15441_v62 = vld [vmem:[%s15677_s24 + $0x1e0] sm:$0xff]  }
 0x18d   : > { %v3152_v58 = vpop.f32.mrf.mxu0  ;;  %v16573_v45 = vadd.f32 %v14186_v56, %v2233_v7  ;;  %v2225_v4 = vadd.f32 %v2224_v21, %v16164_v26 }
 0x18e   : > { %v14049_v59 = vpop.f32.mrf.mxu1 }
 0x18f   : > { %v14187_v28 = vpop.f32.mrf.mxu0  ;;  %v16577_v39 = vadd.f32 %v3152_v58, %v2225_v4  ;;  %v2236_v19 = vadd.f32 %v14049_v59, %v16170_v30  ;;  %v2845_v58 = vrot.slane %v15441_v62, 1  ;;  %v15442_v4 = vld [vmem:[%s15677_s24 + $0x1e8] sm:$0xff]  }
 0x190   : > { %v2227_v15 = vpop.f32.mrf.mxu1 }
 0x191   : > { %v3155_v44 = vpop.f32.mrf.mxu0  ;;  %v16581_v10 = vadd.f32 %v14187_v28, %v2236_v19  ;;  %v2228_v56 = vadd.f32 %v2227_v15, %v16175_v33  ;;  %v2847_v28 = vrot.slane %v15442_v4, 1 }
 0x192   : > { %v14052_v26 = vpop.f32.mrf.mxu1  ;;  %14147 = vmatmul.mubr.msk.bf16.gmra.mxu1 %vm1217_vm2, %v15438_v46 }
 0x193   : > { %v14190_v7 = vpop.f32.mrf.mxu0  ;;  %14285 = vmatmul.mubr.msk.bf16.gmra.mxu0 %vm1217_vm2, %v2842_v34  ;;  %v16588_v30 = vadd.f32 %v3155_v44, %v2228_v56  ;;  %v2249_v21 = vadd.f32 %v14052_v26, %v16180_v36  ;;  %14150 = vmatprep.mubr.msk.bf16.mxu1 %vm1217_vm2, %v15439_v41  ;;  %v2848_v41 = vsel %vm2725_vm3, %v2845_v58, %v2847_v28 }
 0x194   : > { %14288 = vmatprep.mubr.msk.bf16.mxu0 %vm1217_vm2, %v2844_v1  ;;  %v2240_v33 = vpop.f32.mrf.mxu1  ;;  %v2846_v1 = vsel %vm2725_vm3, %v2843_v0, %v2845_v58  ;;  %v15443_v0 = vld [vmem:[%s15677_s24 + $0x1f0] sm:$0xff]  }
 0x195   : > { %v3168_v60 = vpop.f32.mrf.mxu0  ;;  %v16593_v59 = vadd.f32 %v14190_v7, %v2249_v21  ;;  %v2241_v34 = vadd.f32 %v2240_v33, %v16188_v40 }
 0x196   : > { %v14053_v19 = vpop.f32.mrf.mxu1 }
 0x197   : > { %v14191_v46 = vpop.f32.mrf.mxu0  ;;  %v16597_v15 = vadd.f32 %v3168_v60, %v2241_v34  ;;  %v2252_v44 = vadd.f32 %v14053_v19, %v16194_v47  ;;  %v2849_v60 = vrot.slane %v15443_v0, 1  ;;  %v15444_v34 = vld [vmem:[%s15677_s24 + $0x1f8] sm:$0xff]  }
 0x198   : > { %v2243_v56 = vpop.f32.mrf.mxu1 }
 0x199   : > { %v3171_v36 = vpop.f32.mrf.mxu0  ;;  %v16601_v26 = vadd.f32 %v14191_v46, %v2252_v44  ;;  %v2244_v7 = vadd.f32 %v2243_v56, %v16199_v51  ;;  %v2851_v46 = vrot.slane %v15444_v34, 1 }
 0x19a   : > { %v14056_v40 = vpop.f32.mrf.mxu1  ;;  %14151 = vmatmul.mubr.msk.bf16.gmra.mxu1 %vm1217_vm2, %v15440_v12 }
 0x19b   : > { %v14194_v21 = vpop.f32.mrf.mxu0  ;;  %14289 = vmatmul.mubr.msk.bf16.gmra.mxu0 %vm1217_vm2, %v2846_v1  ;;  %v16608_v47 = vadd.f32 %v3171_v36, %v2244_v7  ;;  %v2265_v33 = vadd.f32 %v14056_v40, %v16204_v61  ;;  %14154 = vmatprep.mubr.msk.bf16.mxu1 %vm1217_vm2, %v15441_v62  ;;  %v2852_v62 = vsel %vm2725_vm3, %v2849_v60, %v2851_v46 }
 0x19c   : > { %14292 = vmatprep.mubr.msk.bf16.mxu0 %vm1217_vm2, %v2848_v41  ;;  %v2256_v51 = vpop.f32.mrf.mxu1  ;;  %v2850_v41 = vsel %vm2725_vm3, %v2847_v28, %v2849_v60 }
 0x19d   : > { %v3184_v58 = vpop.f32.mrf.mxu0  ;;  %v16613_v19 = vadd.f32 %v14194_v21, %v2265_v33  ;;  %v2257_v1 = vadd.f32 %v2256_v51, %v16212_v5 }
 0x19e   : > { %v14057_v44 = vpop.f32.mrf.mxu1 }
 0x19f   : > { %20276 = vst [vmem:[#allocation99_spill] sm:$0xff] %v16613_v19  ;;  %v14195_v12 = vpop.f32.mrf.mxu0  ;;  %v16617_v56 = vadd.f32 %v3184_v58, %v2257_v1  ;;  %v2268_v36 = vadd.f32 %v14057_v44, %v16218_v11  ;;  %v15445_v11 = vld [vmem:[%s15677_s24 + $0x200] sm:$0xff]   ;;  %v15446_v1 = vld [vmem:[%s15677_s24 + $0x208] sm:$0xff]   ;;  %v3784_v44 = vld [vmem:[%s15677_s24 + $0x14] sm:$0xf] }
 0x1a0   : > { %v2259_v7 = vpop.f32.mrf.mxu1  ;;  %v2853_v28 = vrot.slane %v15445_v11, 1 }
 0x1a1   : > { %20277 = vst [vmem:[#allocation100_spill] sm:$0xff] %v16617_v56  ;;  %v3187_v61 = vpop.f32.mrf.mxu0  ;;  %v16621_v40 = vadd.f32 %v14195_v12, %v2268_v36  ;;  %v2260_v5 = vadd.f32 %v2259_v7, %v16223_v23  ;;  %v2855_v23 = vrot.slane %v15446_v1, 1  ;;  %v3783_v12 = vld [vmem:[%s15677_s24 + $0x10] sm:$0xe] }
 0x1a2   : > { %v14060_v33 = vpop.f32.mrf.mxu1  ;;  %14155 = vmatmul.mubr.msk.bf16.gmra.mxu1 %vm1217_vm2, %v15442_v4 }
 0x1a3   : > { %20278 = vst [vmem:[#allocation101_spill] sm:$0xff] %v16621_v40  ;;  %v14198_v21 = vpop.f32.mrf.mxu0  ;;  %14293 = vmatmul.mubr.msk.bf16.gmra.mxu0 %vm1217_vm2, %v2850_v41  ;;  %v16628_v58 = vadd.f32 %v3187_v61, %v2260_v5  ;;  %v2281_v60 = vadd.f32 %v14060_v33, %v16228_v27  ;;  %14158 = vmatprep.mubr.msk.bf16.mxu1 %vm1217_vm2, %v15443_v0  ;;  %v16646_v40 = vld [vmem:[%s15677_s24 + $0x18] sm:$0xff]  }
 0x1a4   : > { %14296 = vmatprep.mubr.msk.bf16.mxu0 %vm1217_vm2, %v2852_v62  ;;  %v2272_v41 = vpop.f32.mrf.mxu1  ;;  %v2854_v61 = vsel %vm2725_vm3, %v2851_v46, %v2853_v28  ;;  %v16639_v5 = vcombine.low %v3783_v12, %v3784_v44  ;;  %v16656_v12 = vld [vmem:[%s15677_s24 + $0x218] sm:$0xff]  }
 0x1a5   : > { %20279 = vst [vmem:[#allocation102_spill] sm:$0xff] %v16628_v58  ;;  %v3200_v51 = vpop.f32.mrf.mxu0  ;;  %v16635_v36 = vadd.f32 %v14198_v21, %v2281_v60  ;;  %v2273_v4 = vadd.f32 %v2272_v41, %v16236_v38  ;;  %v2856_v58 = vsel %vm2725_vm3, %v2853_v28, %v2855_v23  ;;  %v2859_v28 = vrot.slane %v16656_v12, 1 }
 0x1a6   : > { %v14061_v7 = vpop.f32.mrf.mxu1  ;;  %v5330_v44 = vshrl.u32 %v16639_v5, 16 }
 0x1a7   : > { %20280 = vst [vmem:[#allocation103_spill] sm:$0xff] %v16635_v36  ;;  %v14199_v62 = vpop.f32.mrf.mxu0  ;;  %v16641_v27 = vadd.f32 %v3200_v51, %v2273_v4  ;;  %v2284_v0 = vadd.f32 %v14061_v7, %v16242_v55  ;;  %v15447_v51 = vld [vmem:[%s15677_s24 + $0x210] sm:$0xff]   ;;  %v5333_v4 = vshll.u32 %v16639_v5, 16 }
 0x1a8   : > { %v2275_v21 = vpop.f32.mrf.mxu1  ;;  %v2857_v55 = vrot.slane %v15447_v51, 1 }
 0x1a9   : > { %20281 = vst [vmem:[#allocation104_spill] sm:$0xff] %v16641_v27  ;;  %v3203_v33 = vpop.f32.mrf.mxu0  ;;  %v16648_v60 = vadd.f32 %v14199_v62, %v2284_v0  ;;  %v2276_v38 = vadd.f32 %v2275_v21, %v16247_v20  ;;  %v16671_v27 = vld [vmem:[%s15677_s24 + $0x20] sm:$0xff]  }
 0x1aa   : > { %v14064_v46 = vpop.f32.mrf.mxu1  ;;  %14159 = vmatmul.mubr.msk.bf16.gmra.mxu1 %vm1217_vm2, %v15444_v34  ;;  %v5338_v34 = vshrl.u32 %v16646_v40, 16 }
 0x1ab   : > { %20282 = vst [vmem:[#allocation105_spill] sm:$0xff] %v16648_v60  ;;  %v14202_v41 = vpop.f32.mrf.mxu0  ;;  %14297 = vmatmul.mubr.msk.bf16.gmra.mxu0 %vm1217_vm2, %v2854_v61  ;;  %v16661_v20 = vadd.f32 %v3203_v33, %v2276_v38  ;;  %v2297_v62 = vadd.f32 %v14064_v46, %v16252_v22  ;;  %14162 = vmatprep.mubr.msk.bf16.mxu1 %vm1217_vm2, %v15445_v11  ;;  %v5332_v46 = vrot.slane %v5330_v44, 1  ;;  %v5335_v11 = vrot.slane %v5333_v4, 2 }
 0x1ac   : > { %14300 = vmatprep.mubr.msk.bf16.mxu0 %vm1217_vm2, %v2856_v58  ;;  %v5341_v58 = vshll.u32 %v16646_v40, 16  ;;  %v2288_v61 = vpop.f32.mrf.mxu1  ;;  %v2858_v38 = vsel %vm2725_vm3, %v2855_v23, %v2857_v55  ;;  %v2860_v22 = vsel %vm2725_vm3, %v2857_v55, %v2859_v28  ;;  %v5347_v55 = vshrl.u32 %v16671_v27, 16 }
 0x1ad   : > { %20283 = vst [vmem:[#allocation106_spill] sm:$0xff] %v16661_v20  ;;  %v3216_v7 = vpop.f32.mrf.mxu0  ;;  %v16667_v0 = vadd.f32 %v14202_v41, %v2297_v62  ;;  %v2289_v21 = vadd.f32 %v2288_v61, %v16260_v13  ;;  %v5340_v41 = vrot.slane %v5338_v34, 1  ;;  %v16679_v13 = vld [vmem:[%s15677_s24 + $0x28] sm:$0xff]   ;;  %v5350_v44 = vshll.u32 %v16671_v27, 16 }
 0x1ae   : > { %v14065_v33 = vpop.f32.mrf.mxu1  ;;  %v5343_v62 = vrot.slane %v5341_v58, 2  ;;  %v4265_v34 = vrot.slane %v16639_v5, 1  ;;  %v5336_v58 = vor.u32 %v5335_v11, %v5332_v46  ;;  %v16703_v46 = vld [vmem:[%s15677_s24 + $0x30] sm:$0xff]   ;;  %v16706_v11 = vld [vmem:[%s15677_s24 + $0x38] sm:$0xff]  }
 0x1af   : > { %20284 = vst [vmem:[#allocation107_spill] sm:$0xff] %v16667_v0  ;;  %v14203_v60 = vpop.f32.mrf.mxu0  ;;  %v16675_v20 = vadd.f32 %v3216_v7, %v2289_v21  ;;  %v2300_v36 = vadd.f32 %v14065_v33, %v16266_v9  ;;  %v15449_v9 = vld [vmem:[%s15677_s24 + $0x220] ss:$0 sps:$4 sm:$0x11]   ;;  %v5356_v33 = vshrl.u32 %v16679_v13, 16 }
 0x1b0   : > { %v2291_v0 = vpop.f32.mrf.mxu1  ;;  %v2861_v7 = vrot.slane %v15449_v9, 1 }
 0x1b1   : > { %v3219_v56 = vpop.f32.mrf.mxu0  ;;  %v16681_v61 = vadd.f32 %v14203_v60, %v2300_v36  ;;  %v2292_v19 = vadd.f32 %v2291_v0, %v16271_v63  ;;  %v5344_v0 = vor.u32 %v5343_v62, %v5340_v41 }
 0x1b2   : > { %v14068_v4 = vpop.f32.mrf.mxu1  ;;  %14163 = vmatmul.mubr.msk.bf16.gmra.mxu1 %vm1217_vm2, %v15446_v1  ;;  %v4266_v1 = vrot.slane %v16646_v40, 1 }
 0x1b3   : > { %v14206_v23 = vpop.f32.mrf.mxu0  ;;  %14301 = vmatmul.mubr.msk.bf16.gmra.mxu0 %vm1217_vm2, %v2858_v38  ;;  %v16691_v36 = vadd.f32 %v3219_v56, %v2292_v19  ;;  %v2313_v63 = vadd.f32 %v14068_v4, %v16276_v57  ;;  %14166 = vmatprep.mubr.msk.bf16.mxu1 %vm1217_vm2, %v15447_v51  ;;  %v5359_v38 = vshll.u32 %v16679_v13, 16  ;;  %v5349_v56 = vrot.slane %v5347_v55, 1 }
 0x1b4   : > { %14304 = vmatprep.mubr.msk.bf16.mxu0 %vm1217_vm2, %v2860_v22  ;;  %v2304_v21 = vpop.f32.mrf.mxu1  ;;  %v5352_v22 = vrot.slane %v5350_v44, 2  ;;  %v2862_v51 = vsel %vm2725_vm3, %v2859_v28, %v2861_v7 }
 0x1b5   : > { %v3232_v60 = vpop.f32.mrf.mxu0  ;;  %v16698_v5 = vadd.f32 %v14206_v23, %v2313_v63  ;;  %v2305_v19 = vadd.f32 %v2304_v21, %v16284_v48  ;;  %v5345_v23 = vsel %vm5328_vm4, %v5336_v58, %v5344_v0  ;;  %v4267_v48 = vsel %vm2725_vm3, %v4265_v34, %v4266_v1 }
 0x1b6   : > { %v14069_v4 = vpop.f32.mrf.mxu1  ;;  %v5358_v63 = vrot.slane %v5356_v33, 1  ;;  %v5361_v55 = vrot.slane %v5359_v38, 2  ;;  %v5353_v21 = vor.u32 %v5352_v22, %v5349_v56  ;;  %v5368_v34 = vshll.u32 %v16703_v46, 16 }
 0x1b7   : > { %v14207_v57 = vpop.f32.mrf.mxu0  ;;  %v16708_v40 = vadd.f32 %v3232_v60, %v2305_v19  ;;  %v2316_v41 = vadd.f32 %v14069_v4, %v16290_v43  ;;  %v5365_v43 = vshrl.u32 %v16703_v46, 16  ;;  %v5374_v58 = vshrl.u32 %v16706_v11, 16 }
 0x1b8   : > { %v2307_v9 = vpop.f32.mrf.mxu1  ;;  %v5377_v33 = vshll.u32 %v16706_v11, 16  ;;  %v4270_v56 = vrot.slane %v16679_v13, 1  ;;  %v5362_v22 = vor.u32 %v5361_v55, %v5358_v63 }
 0x1b9   : > { %v3235_v62 = vpop.f32.mrf.mxu0  ;;  %v16713_v44 = vadd.f32 %v14207_v57, %v2316_v41  ;;  %v2308_v28 = vadd.f32 %v2307_v9, %v16295_v32  ;;  %v5367_v9 = vrot.slane %v5365_v43, 1 }
 0x1ba   : > { %v14072_v60 = vpop.f32.mrf.mxu1  ;;  %14167 = vmatmul.mubr.msk.bf16.gmra.mxu1 %vm1217_vm2, %v16656_v12  ;;  %v4268_v12 = vrot.slane %v16671_v27, 1 }
 0x1bb   : > { %v14210_v7 = vpop.f32.mrf.mxu0  ;;  %14305 = vmatmul.mubr.msk.bf16.gmra.mxu0 %vm1217_vm2, %v2862_v51  ;;  %v16724_v32 = vadd.f32 %v3235_v62, %v2308_v28  ;;  %v2329_v38 = vadd.f32 %v14072_v60, %v16300_v35  ;;  %14310 = vmatprep.mubr.msk.bf16.mxu1 %vm1217_vm2, %v4267_v48  ;;  %v5354_v62 = vsel %vm5328_vm4, %v5344_v0, %v5353_v21  ;;  %v5370_v28 = vrot.slane %v5368_v34, 2 }
 0x1bc   : > { %14448 = vmatprep.mubr.msk.bf16.mxu0 %vm1217_vm2, %v5345_v23  ;;  %v2320_v57 = vpop.f32.mrf.mxu1  ;;  %v16735_v23 = vld [vmem:[%s15677_s24 + $0x40] sm:$0xff]   ;;  %v5376_v48 = vrot.slane %v5374_v58, 1  ;;  %v5379_v60 = vrot.slane %v5377_v33, 2  ;;  %v4269_v55 = vsel %vm2725_vm3, %v4266_v1, %v4268_v12  ;;  %v4271_v43 = vsel %vm2725_vm3, %v4268_v12, %v4270_v56 }
 0x1bd   : > { %v3248_v19 = vpop.f32.mrf.mxu0  ;;  %v16730_v4 = vadd.f32 %v14210_v7, %v2329_v38  ;;  %v2321_v51 = vadd.f32 %v2320_v57, %v16308_v31  ;;  %v8757_v31 = vsel %vm1422_vm0, %v16374_v17, 0  ;;  %v16744_v7 = vld [vmem:[%s15677_s24 + $0x48] sm:$0xff]   ;;  %v7218_v38 = vsel %vm1422_vm0, %v16363_v6, 0 }
 0x1be   : > { %v14073_v35 = vpop.f32.mrf.mxu1  ;;  %v5363_v34 = vsel %vm5328_vm4, %v5353_v21, %v5362_v22  ;;  %v5383_v1 = vshrl.u32 %v16735_v23, 16  ;;  %v5386_v17 = vshll.u32 %v16735_v23, 16  ;;  %v4272_v6 = vrot.slane %v16703_v46, 1 }
 0x1bf   : > { %v14211_v41 = vpop.f32.mrf.mxu0  ;;  %v16737_v27 = vadd.f32 %v3248_v19, %v2321_v51  ;;  %v2332_v13 = vadd.f32 %v14073_v35, %v16314_v29  ;;  %v5371_v12 = vor.u32 %v5370_v28, %v5367_v9  ;;  %v5380_v57 = vor.u32 %v5379_v60, %v5376_v48 }
 0x1c0   : > { %v2323_v0 = vpop.f32.mrf.mxu1  ;;  %v4274_v46 = vrot.slane %v16706_v11, 1  ;;  %v5385_v48 = vrot.slane %v5383_v1, 1  ;;  %v5388_v60 = vrot.slane %v5386_v17, 2  ;;  %v20287_v11 = vld [vmem:[#allocation47_spill] sm:$0xff] }
 0x1c1   : > { %v3251_v63 = vpop.f32.mrf.mxu0  ;;  %v16750_v58 = vadd.f32 %v14211_v41, %v2332_v13  ;;  %v2324_v29 = vadd.f32 %v2323_v0, %v16319_v50  ;;  %v5392_v41 = vshrl.u32 %v16744_v7, 16  ;;  %v16773_v0 = vld [vmem:[%s15677_s24 + $0x50] sm:$0xff]  }
 0x1c2   : > { %v14076_v19 = vpop.f32.mrf.mxu1  ;;  %14311 = vmatmul.mubr.msk.bf16.vlgmr.msra.gmra.mxu1 %vm1217_vm2, %v4269_v55  ;;  %v5372_v55 = vsel %vm5328_vm4, %v5362_v22, %v5371_v12  ;;  %v4275_v17 = vsel %vm2725_vm3, %v4272_v6, %v4274_v46 }
 0x1c3   : > { %v14214_v33 = vpop.f32.mrf.mxu0  ;;  %14449 = vmatmul.mubr.msk.bf16.vlgmr.msra.gmra.mxu0 %vm1217_vm2, %v5354_v62  ;;  %v16758_v21 = vadd.f32 %v3251_v63, %v2324_v29  ;;  %v2345_v51 = vadd.f32 %v14076_v19, %v16324_v24  ;;  %14585 = vmatpush3.bf16.msra.mxu1 %v7218_v38  ;;  %v5395_v62 = vshll.u32 %v16744_v7, 16  ;;  %v4273_v63 = vsel %vm2725_vm3, %v4270_v56, %v4272_v6  ;;  %v16776_v38 = vld [vmem:[%s15677_s24 + $0x58] sm:$0xff]   ;;  %v20289_v56 = vld [vmem:[#allocation49_spill] sm:$0xff] }
 0x1c4   : > { %14723 = vmatpush3.bf16.msra.mxu0 %v8757_v31  ;;  %14314 = vmatprep.mubr.msk.bf16.mxu1 %vm1217_vm2, %v4271_v43  ;;  %v2336_v35 = vpop.f32.mrf.mxu1  ;;  %v5381_v31 = vsel %vm5328_vm4, %v5371_v12, %v5380_v57  ;;  %v5389_v12 = vor.u32 %v5388_v60, %v5385_v48  ;;  %v5410_v6 = vshrl.u32 %v16776_v38, 16  ;;  %v4276_v48 = vrot.slane %v16735_v23, 1 }
 0x1c5   : > { %v3264_v50 = vpop.f32.mrf.mxu0  ;;  %14452 = vmatprep.mubr.msk.bf16.mxu0 %vm1217_vm2, %v5363_v34  ;;  %v16766_v9 = vadd.f32 %v14214_v33, %v2345_v51  ;;  %v2337_v28 = vadd.f32 %v2336_v35, %v16332_v18  ;;  %v5394_v18 = vrot.slane %v5392_v41, 1  ;;  %v5397_v33 = vrot.slane %v5395_v62, 2 }
 0x1c6   : > { %v14077_v13 = vpop.f32.mrf.mxu1  ;;  %v5404_v41 = vshll.u32 %v16773_v0, 16  ;;  %v5413_v62 = vshll.u32 %v16776_v38, 16 }
 0x1c7   : > { %20285 = vst [vmem:[#allocation108_spill] sm:$0xff] %v16766_v9  ;;  %v14215_v24 = vpop.f32.mrf.mxu0  ;;  %v16778_v43 = vadd.f32 %v3264_v50, %v2337_v28  ;;  %v2348_v34 = vadd.f32 %v14077_v13, %v20287_v11  ;;  %v5401_v50 = vshrl.u32 %v16773_v0, 16  ;;  %v5398_v60 = vor.u32 %v5397_v33, %v5394_v18  ;;  %v20295_v18 = vld [vmem:[#allocation55_spill] sm:$0xff] }
 0x1c8   : > { %v2339_v1 = vpop.f32.mrf.mxu1 }
 0x1c9   : > { %20286 = vst [vmem:[#allocation109_spill] sm:$0xff] %v16778_v43  ;;  %v3267_v29 = vpop.f32.mrf.mxu0  ;;  %v16782_v19 = vadd.f32 %v14215_v24, %v2348_v34  ;;  %v2340_v22 = vadd.f32 %v2339_v1, %v20289_v56  ;;  %v20291_v24 = vld [vmem:[#allocation51_spill] sm:$0xff]  ;;  %v20293_v34 = vld [vmem:[#allocation53_spill] sm:$0xff] }
 0x1ca   : > { %v14080_v35 = vpop.f32.mrf.mxu1  ;;  %14315 = vmatmul.mubr.msk.bf16.gmra.mxu1 %vm1217_vm2, %v4273_v63 }
 0x1cb   : > { %20288 = vst [vmem:[#allocation47_spill] sm:$0xff] %v16782_v19  ;;  %v14218_v51 = vpop.f32.mrf.mxu0  ;;  %14453 = vmatmul.mubr.msk.bf16.gmra.mxu0 %vm1217_vm2, %v5372_v55  ;;  %v16792_v28 = vadd.f32 %v3267_v29, %v2340_v22  ;;  %v2361_v13 = vadd.f32 %v14080_v35, %v20291_v24  ;;  %14318 = vmatprep.mubr.msk.bf16.mxu1 %vm1217_vm2, %v4275_v17  ;;  %v16803_v22 = vld [vmem:[%s15677_s24 + $0x60] sm:$0xff]   ;;  %v5403_v24 = vrot.slane %v5401_v50, 1  ;;  %v5412_v17 = vrot.slane %v5410_v6, 1 }
 0x1cc   : > { %14456 = vmatprep.mubr.msk.bf16.mxu0 %vm1217_vm2, %v5381_v31  ;;  %v2352_v63 = vpop.f32.mrf.mxu1  ;;  %v4278_v31 = vrot.slane %v16744_v7, 1  ;;  %v5390_v29 = vsel %vm5328_vm4, %v5380_v57, %v5389_v12  ;;  %v5415_v19 = vrot.slane %v5413_v62, 2  ;;  %v20297_v50 = vld [vmem:[#allocation57_spill] sm:$0xff]  ;;  %v5419_v62 = vshrl.u32 %v16803_v22, 16 }
 0x1cd   : > { %20290 = vst [vmem:[#allocation49_spill] sm:$0xff] %v16792_v28  ;;  %v3280_v55 = vpop.f32.mrf.mxu0  ;;  %v16798_v11 = vadd.f32 %v14218_v51, %v2361_v13  ;;  %v2353_v1 = vadd.f32 %v2352_v63, %v20293_v34  ;;  %v5406_v28 = vrot.slane %v5404_v41, 2  ;;  %v4277_v51 = vsel %vm2725_vm3, %v4274_v46, %v4276_v48  ;;  %v16811_v63 = vld [vmem:[%s15677_s24 + $0x68] sm:$0xff]  }
 0x1ce   : > { %v14081_v35 = vpop.f32.mrf.mxu1  ;;  %v5399_v13 = vsel %vm5328_vm4, %v5389_v12, %v5398_v60  ;;  %v4279_v57 = vsel %vm2725_vm3, %v4276_v48, %v4278_v31  ;;  %v4280_v46 = vrot.slane %v16773_v0, 1  ;;  %v5416_v48 = vor.u32 %v5415_v19, %v5412_v17  ;;  %v20301_v0 = vld [vmem:[#allocation61_spill] sm:$0xff] }
 0x1cf   : > { %20292 = vst [vmem:[#allocation51_spill] sm:$0xff] %v16798_v11  ;;  %v14219_v56 = vpop.f32.mrf.mxu0  ;;  %v16805_v23 = vadd.f32 %v3280_v55, %v2353_v1  ;;  %v2364_v33 = vadd.f32 %v14081_v35, %v20295_v18  ;;  %v5422_v55 = vshll.u32 %v16803_v22, 16  ;;  %v5407_v12 = vor.u32 %v5406_v28, %v5403_v24  ;;  %v20299_v35 = vld [vmem:[#allocation59_spill] sm:$0xff] }
 0x1d0   : > { %v2355_v34 = vpop.f32.mrf.mxu1  ;;  %v5421_v24 = vrot.slane %v5419_v62, 1 }
 0x1d1   : > { %20294 = vst [vmem:[#allocation53_spill] sm:$0xff] %v16805_v23  ;;  %v3283_v7 = vpop.f32.mrf.mxu0  ;;  %v16814_v11 = vadd.f32 %v14219_v56, %v2364_v33  ;;  %v2356_v41 = vadd.f32 %v2355_v34, %v20297_v50  ;;  %v5431_v34 = vshll.u32 %v16811_v63, 16  ;;  %v5424_v17 = vrot.slane %v5422_v55, 2 }
 0x1d2   : > { %v14084_v1 = vpop.f32.mrf.mxu1  ;;  %14319 = vmatmul.mubr.msk.bf16.gmra.mxu1 %vm1217_vm2, %v4277_v51 }
 0x1d3   : > { %20296 = vst [vmem:[#allocation55_spill] sm:$0xff] %v16814_v11  ;;  %v14222_v6 = vpop.f32.mrf.mxu0  ;;  %14457 = vmatmul.mubr.msk.bf16.gmra.mxu0 %vm1217_vm2, %v5390_v29  ;;  %v16823_v56 = vadd.f32 %v3283_v7, %v2356_v41  ;;  %v2377_v18 = vadd.f32 %v14084_v1, %v20299_v35  ;;  %14322 = vmatprep.mubr.msk.bf16.mxu1 %vm1217_vm2, %v4279_v57  ;;  %v5428_v29 = vshrl.u32 %v16811_v63, 16  ;;  %v16837_v35 = vld [vmem:[%s15677_s24 + $0x70] sm:$0xff]  }
 0x1d4   : > { %14460 = vmatprep.mubr.msk.bf16.mxu0 %vm1217_vm2, %v5399_v13  ;;  %v2368_v51 = vpop.f32.mrf.mxu1  ;;  %v4282_v13 = vrot.slane %v16776_v38, 1  ;;  %v4281_v41 = vsel %vm2725_vm3, %v4278_v31, %v4280_v46  ;;  %v5408_v1 = vsel %vm5328_vm4, %v5398_v60, %v5407_v12  ;;  %v5417_v57 = vsel %vm5328_vm4, %v5407_v12, %v5416_v48  ;;  %v20303_v38 = vld [vmem:[#allocation63_spill] sm:$0xff]  ;;  %v20305_v31 = vld [vmem:[#allocation65_spill] sm:$0xff] }
 0x1d5   : > { %20298 = vst [vmem:[#allocation57_spill] sm:$0xff] %v16823_v56  ;;  %v3296_v33 = vpop.f32.mrf.mxu0  ;;  %v16830_v50 = vadd.f32 %v14222_v6, %v2377_v18  ;;  %v2369_v19 = vadd.f32 %v2368_v51, %v20301_v0  ;;  %v16840_v56 = vld [vmem:[%s15677_s24 + $0x78] sm:$0xff]   ;;  %v5430_v51 = vrot.slane %v5428_v29, 1  ;;  %v5433_v0 = vrot.slane %v5431_v34, 2 }
 0x1d6   : > { %v14085_v7 = vpop.f32.mrf.mxu1  ;;  %v4283_v55 = vsel %vm2725_vm3, %v4280_v46, %v4282_v13  ;;  %v5425_v12 = vor.u32 %v5424_v17, %v5421_v24  ;;  %v5440_v29 = vshll.u32 %v16837_v35, 16  ;;  %v5446_v46 = vshrl.u32 %v16840_v56, 16 }
 0x1d7   : > { %20300 = vst [vmem:[#allocation59_spill] sm:$0xff] %v16830_v50  ;;  %v14223_v28 = vpop.f32.mrf.mxu0  ;;  %v16842_v11 = vadd.f32 %v3296_v33, %v2369_v19  ;;  %v2380_v6 = vadd.f32 %v14085_v7, %v20303_v38  ;;  %v5437_v33 = vshrl.u32 %v16837_v35, 16  ;;  %v5449_v34 = vshll.u32 %v16840_v56, 16 }
 0x1d8   : > { %v2371_v62 = vpop.f32.mrf.mxu1  ;;  %v4284_v24 = vrot.slane %v16803_v22, 1  ;;  %v5434_v17 = vor.u32 %v5433_v0, %v5430_v51  ;;  %v20311_v51 = vld [vmem:[#allocation71_spill] sm:$0xff] }
 0x1d9   : > { %20302 = vst [vmem:[#allocation61_spill] sm:$0xff] %v16842_v11  ;;  %v3299_v18 = vpop.f32.mrf.mxu0  ;;  %v16846_v50 = vadd.f32 %v14223_v28, %v2380_v6  ;;  %v2372_v60 = vadd.f32 %v2371_v62, %v20305_v31  ;;  %v20307_v28 = vld [vmem:[#allocation67_spill] sm:$0xff]  ;;  %v20309_v6 = vld [vmem:[#allocation69_spill] sm:$0xff] }
 0x1da   : > { %v14088_v43 = vpop.f32.mrf.mxu1  ;;  %14323 = vmatmul.mubr.msk.bf16.gmra.mxu1 %vm1217_vm2, %v4281_v41 }
 0x1db   : > { %20304 = vst [vmem:[#allocation63_spill] sm:$0xff] %v16846_v50  ;;  %v14226_v23 = vpop.f32.mrf.mxu0  ;;  %14461 = vmatmul.mubr.msk.bf16.gmra.mxu0 %vm1217_vm2, %v5408_v1  ;;  %v16856_v19 = vadd.f32 %v3299_v18, %v2372_v60  ;;  %v2393_v7 = vadd.f32 %v14088_v43, %v20307_v28  ;;  %14326 = vmatprep.mubr.msk.bf16.mxu1 %vm1217_vm2, %v4283_v55  ;;  %v16867_v60 = vld [vmem:[%s15677_s24 + $0x80] sm:$0xff]   ;;  %v5439_v28 = vrot.slane %v5437_v33, 1  ;;  %v5448_v55 = vrot.slane %v5446_v46, 1 }
 0x1dc   : > { %14464 = vmatprep.mubr.msk.bf16.mxu0 %vm1217_vm2, %v5417_v57  ;;  %v2384_v41 = vpop.f32.mrf.mxu1  ;;  %v4286_v57 = vrot.slane %v16811_v63, 1  ;;  %v5426_v18 = vsel %vm5328_vm4, %v5416_v48, %v5425_v12  ;;  %v5451_v50 = vrot.slane %v5449_v34, 2  ;;  %v20313_v33 = vld [vmem:[#allocation73_spill] sm:$0xff]  ;;  %v5455_v34 = vshrl.u32 %v16867_v60, 16 }
 0x1dd   : > { %20306 = vst [vmem:[#allocation65_spill] sm:$0xff] %v16856_v19  ;;  %v3312_v1 = vpop.f32.mrf.mxu0  ;;  %v16862_v38 = vadd.f32 %v14226_v23, %v2393_v7  ;;  %v2385_v62 = vadd.f32 %v2384_v41, %v20309_v6  ;;  %v5442_v19 = vrot.slane %v5440_v29, 2  ;;  %v4285_v23 = vsel %vm2725_vm3, %v4282_v13, %v4284_v24  ;;  %v16875_v41 = vld [vmem:[%s15677_s24 + $0x88] sm:$0xff]  }
 0x1de   : > { %v14089_v43 = vpop.f32.mrf.mxu1  ;;  %v5435_v7 = vsel %vm5328_vm4, %v5425_v12, %v5434_v17  ;;  %v4287_v48 = vsel %vm2725_vm3, %v4284_v24, %v4286_v57  ;;  %v4288_v13 = vrot.slane %v16837_v35, 1  ;;  %v5452_v24 = vor.u32 %v5451_v50, %v5448_v55  ;;  %v20317_v35 = vld [vmem:[#allocation77_spill] sm:$0xff] }
 0x1df   : > { %20308 = vst [vmem:[#allocation67_spill] sm:$0xff] %v16862_v38  ;;  %v14227_v31 = vpop.f32.mrf.mxu0  ;;  %v16869_v22 = vadd.f32 %v3312_v1, %v2385_v62  ;;  %v2396_v0 = vadd.f32 %v14089_v43, %v20311_v51  ;;  %v5458_v1 = vshll.u32 %v16867_v60, 16  ;;  %v5443_v12 = vor.u32 %v5442_v19, %v5439_v28  ;;  %v20315_v43 = vld [vmem:[#allocation75_spill] sm:$0xff] }
 0x1e0   : > { %v2387_v6 = vpop.f32.mrf.mxu1  ;;  %v5457_v28 = vrot.slane %v5455_v34, 1 }
 0x1e1   : > { %20310 = vst [vmem:[#allocation69_spill] sm:$0xff] %v16869_v22  ;;  %v3315_v63 = vpop.f32.mrf.mxu0  ;;  %v16878_v38 = vadd.f32 %v14227_v31, %v2396_v0  ;;  %v2388_v29 = vadd.f32 %v2387_v6, %v20313_v33  ;;  %v5467_v6 = vshll.u32 %v16875_v41, 16  ;;  %v5460_v55 = vrot.slane %v5458_v1, 2 }
 0x1e2   : > { %v14092_v62 = vpop.f32.mrf.mxu1  ;;  %14327 = vmatmul.mubr.msk.bf16.gmra.mxu1 %vm1217_vm2, %v4285_v23 }
 0x1e3   : > { %20312 = vst [vmem:[#allocation71_spill] sm:$0xff] %v16878_v38  ;;  %v14230_v46 = vpop.f32.mrf.mxu0  ;;  %14465 = vmatmul.mubr.msk.bf16.gmra.mxu0 %vm1217_vm2, %v5426_v18  ;;  %v16887_v31 = vadd.f32 %v3315_v63, %v2388_v29  ;;  %v2409_v51 = vadd.f32 %v14092_v62, %v20315_v43  ;;  %14330 = vmatprep.mubr.msk.bf16.mxu1 %vm1217_vm2, %v4287_v48  ;;  %v5464_v18 = vshrl.u32 %v16875_v41, 16  ;;  %v16901_v43 = vld [vmem:[%s15677_s24 + $0x90] sm:$0xff]  }
 0x1e4   : > { %14468 = vmatprep.mubr.msk.bf16.mxu0 %vm1217_vm2, %v5435_v7  ;;  %v2400_v23 = vpop.f32.mrf.mxu1  ;;  %v4290_v7 = vrot.slane %v16840_v56, 1  ;;  %v4289_v29 = vsel %vm2725_vm3, %v4286_v57, %v4288_v13  ;;  %v5444_v62 = vsel %vm5328_vm4, %v5434_v17, %v5443_v12  ;;  %v5453_v48 = vsel %vm5328_vm4, %v5443_v12, %v5452_v24  ;;  %v20319_v56 = vld [vmem:[#allocation79_spill] sm:$0xff]  ;;  %v20321_v57 = vld [vmem:[#allocation81_spill] sm:$0xff] }
 0x1e5   : > { %20314 = vst [vmem:[#allocation73_spill] sm:$0xff] %v16887_v31  ;;  %v3328_v0 = vpop.f32.mrf.mxu0  ;;  %v16894_v33 = vadd.f32 %v14230_v46, %v2409_v51  ;;  %v2401_v50 = vadd.f32 %v2400_v23, %v20317_v35  ;;  %v16904_v31 = vld [vmem:[%s15677_s24 + $0x98] sm:$0xff]   ;;  %v5466_v23 = vrot.slane %v5464_v18, 1  ;;  %v5469_v35 = vrot.slane %v5467_v6, 2 }
 0x1e6   : > { %v14093_v63 = vpop.f32.mrf.mxu1  ;;  %v4291_v1 = vsel %vm2725_vm3, %v4288_v13, %v4290_v7  ;;  %v5461_v12 = vor.u32 %v5460_v55, %v5457_v28  ;;  %v5476_v18 = vshll.u32 %v16901_v43, 16  ;;  %v5482_v13 = vshrl.u32 %v16904_v31, 16 }
 0x1e7   : > { %20316 = vst [vmem:[#allocation75_spill] sm:$0xff] %v16894_v33  ;;  %v14231_v19 = vpop.f32.mrf.mxu0  ;;  %v16906_v38 = vadd.f32 %v3328_v0, %v2401_v50  ;;  %v2412_v46 = vadd.f32 %v14093_v63, %v20319_v56  ;;  %v5473_v0 = vshrl.u32 %v16901_v43, 16  ;;  %v5485_v6 = vshll.u32 %v16904_v31, 16 }
 0x1e8   : > { %v2403_v34 = vpop.f32.mrf.mxu1  ;;  %v4292_v28 = vrot.slane %v16867_v60, 1  ;;  %v5470_v55 = vor.u32 %v5469_v35, %v5466_v23  ;;  %v20327_v23 = vld [vmem:[#allocation87_spill] sm:$0xff] }
 0x1e9   : > { %20318 = vst [vmem:[#allocation77_spill] sm:$0xff] %v16906_v38  ;;  %v3331_v51 = vpop.f32.mrf.mxu0  ;;  %v16910_v33 = vadd.f32 %v14231_v19, %v2412_v46  ;;  %v2404_v17 = vadd.f32 %v2403_v34, %v20321_v57  ;;  %v20323_v19 = vld [vmem:[#allocation83_spill] sm:$0xff]  ;;  %v20325_v46 = vld [vmem:[#allocation85_spill] sm:$0xff] }
 0x1ea   : > { %v14096_v11 = vpop.f32.mrf.mxu1  ;;  %14331 = vmatmul.mubr.msk.bf16.gmra.mxu1 %vm1217_vm2, %v4289_v29 }
 0x1eb   : > { %20320 = vst [vmem:[#allocation79_spill] sm:$0xff] %v16910_v33  ;;  %v14234_v22 = vpop.f32.mrf.mxu0  ;;  %14469 = vmatmul.mubr.msk.bf16.gmra.mxu0 %vm1217_vm2, %v5444_v62  ;;  %v16920_v50 = vadd.f32 %v3331_v51, %v2404_v17  ;;  %v2425_v63 = vadd.f32 %v14096_v11, %v20323_v19  ;;  %14334 = vmatprep.mubr.msk.bf16.mxu1 %vm1217_vm2, %v4291_v1  ;;  %v16931_v17 = vld [vmem:[%s15677_s24 + $0xa0] sm:$0xff]   ;;  %v5475_v19 = vrot.slane %v5473_v0, 1  ;;  %v5484_v1 = vrot.slane %v5482_v13, 1 }
 0x1ec   : > { %14472 = vmatprep.mubr.msk.bf16.mxu0 %vm1217_vm2, %v5453_v48  ;;  %v2416_v29 = vpop.f32.mrf.mxu1  ;;  %v4294_v48 = vrot.slane %v16875_v41, 1  ;;  %v5462_v51 = vsel %vm5328_vm4, %v5452_v24, %v5461_v12  ;;  %v5487_v33 = vrot.slane %v5485_v6, 2  ;;  %v20329_v0 = vld [vmem:[#allocation89_spill] sm:$0xff]  ;;  %v5491_v6 = vshrl.u32 %v16931_v17, 16 }
 0x1ed   : > { %20322 = vst [vmem:[#allocation81_spill] sm:$0xff] %v16920_v50  ;;  %v3344_v62 = vpop.f32.mrf.mxu0  ;;  %v16926_v56 = vadd.f32 %v14234_v22, %v2425_v63  ;;  %v2417_v34 = vadd.f32 %v2416_v29, %v20325_v46  ;;  %v5478_v50 = vrot.slane %v5476_v18, 2  ;;  %v4293_v22 = vsel %vm2725_vm3, %v4290_v7, %v4292_v28  ;;  %v16939_v29 = vld [vmem:[%s15677_s24 + $0xa8] sm:$0xff]  }
 0x1ee   : > { %v14097_v11 = vpop.f32.mrf.mxu1  ;;  %v5471_v63 = vsel %vm5328_vm4, %v5461_v12, %v5470_v55  ;;  %v4295_v24 = vsel %vm2725_vm3, %v4292_v28, %v4294_v48  ;;  %v4296_v7 = vrot.slane %v16901_v43, 1  ;;  %v5488_v28 = vor.u32 %v5487_v33, %v5484_v1  ;;  %v20333_v43 = vld [vmem:[#allocation93_spill] sm:$0xff] }
 0x1ef   : > { %20324 = vst [vmem:[#allocation83_spill] sm:$0xff] %v16926_v56  ;;  %v14235_v57 = vpop.f32.mrf.mxu0  ;;  %v16933_v60 = vadd.f32 %v3344_v62, %v2417_v34  ;;  %v2428_v35 = vadd.f32 %v14097_v11, %v20327_v23  ;;  %v5494_v62 = vshll.u32 %v16931_v17, 16  ;;  %v5479_v12 = vor.u32 %v5478_v50, %v5475_v19  ;;  %v20331_v11 = vld [vmem:[#allocation91_spill] sm:$0xff] }
 0x1f0   : > { %v2419_v46 = vpop.f32.mrf.mxu1  ;;  %v5493_v19 = vrot.slane %v5491_v6, 1 }
 0x1f1   : > { %20326 = vst [vmem:[#allocation85_spill] sm:$0xff] %v16933_v60  ;;  %v3347_v41 = vpop.f32.mrf.mxu0  ;;  %v16942_v56 = vadd.f32 %v14235_v57, %v2428_v35  ;;  %v2420_v18 = vadd.f32 %v2419_v46, %v20329_v0  ;;  %v5503_v46 = vshll.u32 %v16939_v29, 16  ;;  %v5496_v1 = vrot.slane %v5494_v62, 2 }
 0x1f2   : > { %v14100_v34 = vpop.f32.mrf.mxu1  ;;  %14335 = vmatmul.mubr.msk.bf16.gmra.mxu1 %vm1217_vm2, %v4293_v22 }
 0x1f3   : > { %20328 = vst [vmem:[#allocation87_spill] sm:$0xff] %v16942_v56  ;;  %v14238_v13 = vpop.f32.mrf.mxu0  ;;  %14473 = vmatmul.mubr.msk.bf16.gmra.mxu0 %vm1217_vm2, %v5462_v51  ;;  %v16951_v57 = vadd.f32 %v3347_v41, %v2420_v18  ;;  %v2441_v23 = vadd.f32 %v14100_v34, %v20331_v11  ;;  %14338 = vmatprep.mubr.msk.bf16.mxu1 %vm1217_vm2, %v4295_v24  ;;  %v5500_v51 = vshrl.u32 %v16939_v29, 16  ;;  %v16965_v11 = vld [vmem:[%s15677_s24 + $0xb0] sm:$0xff]  }
 0x1f4   : > { %14476 = vmatprep.mubr.msk.bf16.mxu0 %vm1217_vm2, %v5471_v63  ;;  %v2432_v22 = vpop.f32.mrf.mxu1  ;;  %v4298_v63 = vrot.slane %v16904_v31, 1  ;;  %v4297_v18 = vsel %vm2725_vm3, %v4294_v48, %v4296_v7  ;;  %v5480_v34 = vsel %vm5328_vm4, %v5470_v55, %v5479_v12  ;;  %v5489_v24 = vsel %vm5328_vm4, %v5479_v12, %v5488_v28  ;;  %v20335_v31 = vld [vmem:[#allocation95_spill] sm:$0xff]  ;;  %v20337_v48 = vld [vmem:[#allocation97_spill] sm:$0xff] }
 0x1f5   : > { %20330 = vst [vmem:[#allocation89_spill] sm:$0xff] %v16951_v57  ;;  %v3360_v35 = vpop.f32.mrf.mxu0  ;;  %v16958_v0 = vadd.f32 %v14238_v13, %v2441_v23  ;;  %v2433_v33 = vadd.f32 %v2432_v22, %v20333_v43  ;;  %v16968_v57 = vld [vmem:[%s15677_s24 + $0xb8] sm:$0xff]   ;;  %v5502_v22 = vrot.slane %v5500_v51, 1  ;;  %v5505_v43 = vrot.slane %v5503_v46, 2 }
 0x1f6   : > { %v14101_v41 = vpop.f32.mrf.mxu1  ;;  %v4299_v62 = vsel %vm2725_vm3, %v4296_v7, %v4298_v63  ;;  %v5497_v12 = vor.u32 %v5496_v1, %v5493_v19  ;;  %v5512_v51 = vshll.u32 %v16965_v11, 16  ;;  %v5518_v7 = vshrl.u32 %v16968_v57, 16 }
 0x1f7   : > { %20332 = vst [vmem:[#allocation91_spill] sm:$0xff] %v16958_v0  ;;  %v14239_v50 = vpop.f32.mrf.mxu0  ;;  %v16970_v56 = vadd.f32 %v3360_v35, %v2433_v33  ;;  %v2444_v13 = vadd.f32 %v14101_v41, %v20335_v31  ;;  %v5509_v35 = vshrl.u32 %v16965_v11, 16  ;;  %v5521_v46 = vshll.u32 %v16968_v57, 16 }
 0x1f8   : > { %v2435_v6 = vpop.f32.mrf.mxu1  ;;  %v4300_v19 = vrot.slane %v16931_v17, 1  ;;  %v5506_v1 = vor.u32 %v5505_v43, %v5502_v22  ;;  %v20343_v22 = vld [vmem:[#allocation7_spill] sm:$0xff] }
 0x1f9   : > { %20334 = vst [vmem:[#allocation93_spill] sm:$0xff] %v16970_v56  ;;  %v3363_v23 = vpop.f32.mrf.mxu0  ;;  %v16974_v0 = vadd.f32 %v14239_v50, %v2444_v13  ;;  %v2436_v55 = vadd.f32 %v2435_v6, %v20337_v48  ;;  %v20339_v50 = vld [vmem:[#allocation5_spill] sm:$0xff]  ;;  %v20341_v13 = vld [vmem:[#allocation6_spill] sm:$0xff] }
 0x1fa   : > { %v14104_v38 = vpop.f32.mrf.mxu1  ;;  %14339 = vmatmul.mubr.msk.bf16.gmra.mxu1 %vm1217_vm2, %v4297_v18 }
 0x1fb   : > { %20336 = vst [vmem:[#allocation95_spill] sm:$0xff] %v16974_v0  ;;  %v14242_v60 = vpop.f32.mrf.mxu0  ;;  %14477 = vmatmul.mubr.msk.bf16.gmra.mxu0 %vm1217_vm2, %v5480_v34  ;;  %v16984_v33 = vadd.f32 %v3363_v23, %v2436_v55  ;;  %v2457_v41 = vadd.f32 %v14104_v38, %v20339_v50  ;;  %14342 = vmatprep.mubr.msk.bf16.mxu1 %vm1217_vm2, %v4299_v62  ;;  %v16995_v55 = vld [vmem:[%s15677_s24 + $0xc0] sm:$0xff]   ;;  %v5511_v50 = vrot.slane %v5509_v35, 1  ;;  %v5520_v62 = vrot.slane %v5518_v7, 1 }
 0x1fc   : > { %14480 = vmatprep.mubr.msk.bf16.mxu0 %vm1217_vm2, %v5489_v24  ;;  %v2448_v18 = vpop.f32.mrf.mxu1  ;;  %v4302_v24 = vrot.slane %v16939_v29, 1  ;;  %v5498_v23 = vsel %vm5328_vm4, %v5488_v28, %v5497_v12  ;;  %v5523_v0 = vrot.slane %v5521_v46, 2  ;;  %v20345_v35 = vld [vmem:[#allocation8_spill] sm:$0xff]  ;;  %v5527_v46 = vshrl.u32 %v16995_v55, 16 }
 0x1fd   : > { %20338 = vst [vmem:[#allocation97_spill] sm:$0xff] %v16984_v33  ;;  %v3376_v34 = vpop.f32.mrf.mxu0  ;;  %v16990_v31 = vadd.f32 %v14242_v60, %v2457_v41  ;;  %v2449_v6 = vadd.f32 %v2448_v18, %v20341_v13  ;;  %v5514_v33 = vrot.slane %v5512_v51, 2  ;;  %v4301_v60 = vsel %vm2725_vm3, %v4298_v63, %v4300_v19  ;;  %v17003_v18 = vld [vmem:[%s15677_s24 + $0xc8] sm:$0xff]  }
 0x1fe   : > { %v14105_v38 = vpop.f32.mrf.mxu1  ;;  %v5507_v41 = vsel %vm5328_vm4, %v5497_v12, %v5506_v1  ;;  %v4303_v28 = vsel %vm2725_vm3, %v4300_v19, %v4302_v24  ;;  %v4304_v63 = vrot.slane %v16965_v11, 1  ;;  %v5524_v19 = vor.u32 %v5523_v0, %v5520_v62  ;;  %v20349_v11 = vld [vmem:[#allocation10_spill] sm:$0xff] }
 0x1ff   : > { %20340 = vst [vmem:[#allocation5_spill] sm:$0xff] %v16990_v31  ;;  %v14243_v48 = vpop.f32.mrf.mxu0  ;;  %v16997_v17 = vadd.f32 %v3376_v34, %v2449_v6  ;;  %v2460_v43 = vadd.f32 %v14105_v38, %v20343_v22  ;;  %v5530_v34 = vshll.u32 %v16995_v55, 16  ;;  %v5515_v12 = vor.u32 %v5514_v33, %v5511_v50  ;;  %v20347_v38 = vld [vmem:[#allocation9_spill] sm:$0xff] }
 0x200   : > { %v2451_v13 = vpop.f32.mrf.mxu1  ;;  %v5529_v50 = vrot.slane %v5527_v46, 1 }
 0x201   : > { %20342 = vst [vmem:[#allocation6_spill] sm:$0xff] %v16997_v17  ;;  %v3379_v29 = vpop.f32.mrf.mxu0  ;;  %v17006_v31 = vadd.f32 %v14243_v48, %v2460_v43  ;;  %v2452_v51 = vadd.f32 %v2451_v13, %v20345_v35  ;;  %v5539_v13 = vshll.u32 %v17003_v18, 16  ;;  %v5532_v62 = vrot.slane %v5530_v34, 2 }
 0x202   : > { %v14108_v6 = vpop.f32.mrf.mxu1  ;;  %14343 = vmatmul.mubr.msk.bf16.gmra.mxu1 %vm1217_vm2, %v4301_v60 }
 0x203   : > { %20344 = vst [vmem:[#allocation7_spill] sm:$0xff] %v17006_v31  ;;  %v14246_v7 = vpop.f32.mrf.mxu0  ;;  %14481 = vmatmul.mubr.msk.bf16.gmra.mxu0 %vm1217_vm2, %v5498_v23  ;;  %v17015_v48 = vadd.f32 %v3379_v29, %v2452_v51  ;;  %v2473_v22 = vadd.f32 %v14108_v6, %v20347_v38  ;;  %14346 = vmatprep.mubr.msk.bf16.mxu1 %vm1217_vm2, %v4303_v28  ;;  %v5536_v23 = vshrl.u32 %v17003_v18, 16  ;;  %v17029_v38 = vld [vmem:[%s15677_s24 + $0xd0] sm:$0xff]  }
 0x204   : > { %14484 = vmatprep.mubr.msk.bf16.mxu0 %vm1217_vm2, %v5507_v41  ;;  %v2464_v60 = vpop.f32.mrf.mxu1  ;;  %v4306_v41 = vrot.slane %v16968_v57, 1  ;;  %v4305_v51 = vsel %vm2725_vm3, %v4302_v24, %v4304_v63  ;;  %v5516_v6 = vsel %vm5328_vm4, %v5506_v1, %v5515_v12  ;;  %v5525_v28 = vsel %vm5328_vm4, %v5515_v12, %v5524_v19  ;;  %v20351_v57 = vld [vmem:[#allocation11_spill] sm:$0xff]  ;;  %v20353_v24 = vld [vmem:[#allocation12_spill] sm:$0xff] }
 0x205   : > { %20346 = vst [vmem:[#allocation8_spill] sm:$0xff] %v17015_v48  ;;  %v3392_v43 = vpop.f32.mrf.mxu0  ;;  %v17022_v35 = vadd.f32 %v14246_v7, %v2473_v22  ;;  %v2465_v0 = vadd.f32 %v2464_v60, %v20349_v11  ;;  %v17032_v48 = vld [vmem:[%s15677_s24 + $0xd8] sm:$0xff]   ;;  %v5538_v60 = vrot.slane %v5536_v23, 1  ;;  %v5541_v11 = vrot.slane %v5539_v13, 2 }
 0x206   : > { %v14109_v29 = vpop.f32.mrf.mxu1  ;;  %v4307_v34 = vsel %vm2725_vm3, %v4304_v63, %v4306_v41  ;;  %v5533_v12 = vor.u32 %v5532_v62, %v5529_v50  ;;  %v5548_v23 = vshll.u32 %v17029_v38, 16  ;;  %v5554_v63 = vshrl.u32 %v17032_v48, 16 }
 0x207   : > { %20348 = vst [vmem:[#allocation9_spill] sm:$0xff] %v17022_v35  ;;  %v14247_v33 = vpop.f32.mrf.mxu0  ;;  %v17034_v31 = vadd.f32 %v3392_v43, %v2465_v0  ;;  %v2476_v7 = vadd.f32 %v14109_v29, %v20351_v57  ;;  %v5545_v43 = vshrl.u32 %v17029_v38, 16  ;;  %v5557_v13 = vshll.u32 %v17032_v48, 16 }
 0x208   : > { %v2467_v46 = vpop.f32.mrf.mxu1  ;;  %v4308_v50 = vrot.slane %v16995_v55, 1  ;;  %v5542_v62 = vor.u32 %v5541_v11, %v5538_v60  ;;  %v20359_v60 = vld [vmem:[#allocation15_spill] sm:$0xff] }
 0x209   : > { %20350 = vst [vmem:[#allocation10_spill] sm:$0xff] %v17034_v31  ;;  %v3395_v22 = vpop.f32.mrf.mxu0  ;;  %v17038_v35 = vadd.f32 %v14247_v33, %v2476_v7  ;;  %v2468_v1 = vadd.f32 %v2467_v46, %v20353_v24  ;;  %v20355_v33 = vld [vmem:[#allocation13_spill] sm:$0xff]  ;;  %v20357_v7 = vld [vmem:[#allocation14_spill] sm:$0xff] }
 0x20a   : > { %v14112_v56 = vpop.f32.mrf.mxu1  ;;  %14347 = vmatmul.mubr.msk.bf16.gmra.mxu1 %vm1217_vm2, %v4305_v51 }
 0x20b   : > { %20352 = vst [vmem:[#allocation11_spill] sm:$0xff] %v17038_v35  ;;  %v14250_v17 = vpop.f32.mrf.mxu0  ;;  %14485 = vmatmul.mubr.msk.bf16.gmra.mxu0 %vm1217_vm2, %v5516_v6  ;;  %v17048_v0 = vadd.f32 %v3395_v22, %v2468_v1  ;;  %v2489_v29 = vadd.f32 %v14112_v56, %v20355_v33  ;;  %14350 = vmatprep.mubr.msk.bf16.mxu1 %vm1217_vm2, %v4307_v34  ;;  %v17059_v1 = vld [vmem:[%s15677_s24 + $0xe0] sm:$0xff]   ;;  %v5547_v33 = vrot.slane %v5545_v43, 1  ;;  %v5556_v34 = vrot.slane %v5554_v63, 1 }
 0x20c   : > { %14488 = vmatprep.mubr.msk.bf16.mxu0 %vm1217_vm2, %v5525_v28  ;;  %v2480_v51 = vpop.f32.mrf.mxu1  ;;  %v4310_v28 = vrot.slane %v17003_v18, 1  ;;  %v5534_v22 = vsel %vm5328_vm4, %v5524_v19, %v5533_v12  ;;  %v5559_v35 = vrot.slane %v5557_v13, 2  ;;  %v20361_v43 = vld [vmem:[#allocation16_spill] sm:$0xff]  ;;  %v5563_v13 = vshrl.u32 %v17059_v1, 16 }
 0x20d   : > { %20354 = vst [vmem:[#allocation12_spill] sm:$0xff] %v17048_v0  ;;  %v3408_v6 = vpop.f32.mrf.mxu0  ;;  %v17054_v57 = vadd.f32 %v14250_v17, %v2489_v29  ;;  %v2481_v46 = vadd.f32 %v2480_v51, %v20357_v7  ;;  %v5550_v0 = vrot.slane %v5548_v23, 2  ;;  %v4309_v17 = vsel %vm2725_vm3, %v4306_v41, %v4308_v50  ;;  %v17067_v51 = vld [vmem:[%s15677_s24 + $0xe8] sm:$0xff]  }
 0x20e   : > { %v14113_v56 = vpop.f32.mrf.mxu1  ;;  %v5543_v29 = vsel %vm5328_vm4, %v5533_v12, %v5542_v62  ;;  %v4311_v19 = vsel %vm2725_vm3, %v4308_v50, %v4310_v28  ;;  %v4312_v41 = vrot.slane %v17029_v38, 1  ;;  %v5560_v50 = vor.u32 %v5559_v35, %v5556_v34  ;;  %v20365_v38 = vld [vmem:[#allocation18_spill] sm:$0xff] }
 0x20f   : > { %20356 = vst [vmem:[#allocation13_spill] sm:$0xff] %v17054_v57  ;;  %v14251_v24 = vpop.f32.mrf.mxu0  ;;  %v17061_v55 = vadd.f32 %v3408_v6, %v2481_v46  ;;  %v2492_v11 = vadd.f32 %v14113_v56, %v20359_v60  ;;  %v5566_v6 = vshll.u32 %v17059_v1, 16  ;;  %v5551_v12 = vor.u32 %v5550_v0, %v5547_v33  ;;  %v20363_v56 = vld [vmem:[#allocation17_spill] sm:$0xff] }
 0x210   : > { %v2483_v7 = vpop.f32.mrf.mxu1  ;;  %v5565_v33 = vrot.slane %v5563_v13, 1 }
 0x211   : > { %20358 = vst [vmem:[#allocation14_spill] sm:$0xff] %v17061_v55  ;;  %v3411_v18 = vpop.f32.mrf.mxu0  ;;  %v17070_v57 = vadd.f32 %v14251_v24, %v2492_v11  ;;  %v2484_v23 = vadd.f32 %v2483_v7, %v20361_v43  ;;  %v5575_v7 = vshll.u32 %v17067_v51, 16  ;;  %v5568_v34 = vrot.slane %v5566_v6, 2 }
 0x212   : > { %v14116_v46 = vpop.f32.mrf.mxu1  ;;  %14351 = vmatmul.mubr.msk.bf16.gmra.mxu1 %vm1217_vm2, %v4309_v17 }
 0x213   : > { %20360 = vst [vmem:[#allocation15_spill] sm:$0xff] %v17070_v57  ;;  %v14254_v63 = vpop.f32.mrf.mxu0  ;;  %14489 = vmatmul.mubr.msk.bf16.gmra.mxu0 %vm1217_vm2, %v5534_v22  ;;  %v17079_v24 = vadd.f32 %v3411_v18, %v2484_v23  ;;  %v2505_v60 = vadd.f32 %v14116_v46, %v20363_v56  ;;  %14354 = vmatprep.mubr.msk.bf16.mxu1 %vm1217_vm2, %v4311_v19  ;;  %v5572_v22 = vshrl.u32 %v17067_v51, 16  ;;  %v17093_v56 = vld [vmem:[%s15677_s24 + $0xf0] sm:$0xff]  }
 0x214   : > { %14492 = vmatprep.mubr.msk.bf16.mxu0 %vm1217_vm2, %v5543_v29  ;;  %v2496_v17 = vpop.f32.mrf.mxu1  ;;  %v4314_v29 = vrot.slane %v17032_v48, 1  ;;  %v4313_v23 = vsel %vm2725_vm3, %v4310_v28, %v4312_v41  ;;  %v5552_v46 = vsel %vm5328_vm4, %v5542_v62, %v5551_v12  ;;  %v5561_v19 = vsel %vm5328_vm4, %v5551_v12, %v5560_v50  ;;  %v20367_v48 = vld [vmem:[#allocation19_spill] sm:$0xff]  ;;  %v20369_v28 = vld [vmem:[#allocation20_spill] sm:$0xff] }
 0x215   : > { %20362 = vst [vmem:[#allocation16_spill] sm:$0xff] %v17079_v24  ;;  %v3424_v11 = vpop.f32.mrf.mxu0  ;;  %v17086_v43 = vadd.f32 %v14254_v63, %v2505_v60  ;;  %v2497_v35 = vadd.f32 %v2496_v17, %v20365_v38  ;;  %v17096_v24 = vld [vmem:[%s15677_s24 + $0xf8] sm:$0xff]   ;;  %v5574_v17 = vrot.slane %v5572_v22, 1  ;;  %v5577_v38 = vrot.slane %v5575_v7, 2 }
 0x216   : > { %v14117_v18 = vpop.f32.mrf.mxu1  ;;  %v4315_v6 = vsel %vm2725_vm3, %v4312_v41, %v4314_v29  ;;  %v5569_v12 = vor.u32 %v5568_v34, %v5565_v33  ;;  %v5584_v22 = vshll.u32 %v17093_v56, 16  ;;  %v5590_v41 = vshrl.u32 %v17096_v24, 16 }
 0x217   : > { %20364 = vst [vmem:[#allocation17_spill] sm:$0xff] %v17086_v43  ;;  %v14255_v0 = vpop.f32.mrf.mxu0  ;;  %v17098_v57 = vadd.f32 %v3424_v11, %v2497_v35  ;;  %v2508_v63 = vadd.f32 %v14117_v18, %v20367_v48  ;;  %v5581_v11 = vshrl.u32 %v17093_v56, 16  ;;  %v5593_v7 = vshll.u32 %v17096_v24, 16 }
 0x218   : > { %v2499_v13 = vpop.f32.mrf.mxu1  ;;  %v4316_v33 = vrot.slane %v17059_v1, 1  ;;  %v5578_v34 = vor.u32 %v5577_v38, %v5574_v17  ;;  %v20375_v17 = vld [vmem:[#allocation23_spill] sm:$0xff] }
 0x219   : > { %20366 = vst [vmem:[#allocation18_spill] sm:$0xff] %v17098_v57  ;;  %v3427_v60 = vpop.f32.mrf.mxu0  ;;  %v17102_v43 = vadd.f32 %v14255_v0, %v2508_v63  ;;  %v2500_v62 = vadd.f32 %v2499_v13, %v20369_v28  ;;  %v20371_v0 = vld [vmem:[#allocation21_spill] sm:$0xff]  ;;  %v20373_v63 = vld [vmem:[#allocation22_spill] sm:$0xff] }
 0x21a   : > { %v14120_v31 = vpop.f32.mrf.mxu1  ;;  %14355 = vmatmul.mubr.msk.bf16.gmra.mxu1 %vm1217_vm2, %v4313_v23 }
 0x21b   : > { %20368 = vst [vmem:[#allocation19_spill] sm:$0xff] %v17102_v43  ;;  %v14258_v55 = vpop.f32.mrf.mxu0  ;;  %14493 = vmatmul.mubr.msk.bf16.gmra.mxu0 %vm1217_vm2, %v5552_v46  ;;  %v17112_v35 = vadd.f32 %v3427_v60, %v2500_v62  ;;  %v2521_v18 = vadd.f32 %v14120_v31, %v20371_v0  ;;  %14358 = vmatprep.mubr.msk.bf16.mxu1 %vm1217_vm2, %v4315_v6  ;;  %v17123_v62 = vld [vmem:[%s15677_s24 + $0x100] sm:$0xff]   ;;  %v5583_v0 = vrot.slane %v5581_v11, 1  ;;  %v5592_v6 = vrot.slane %v5590_v41, 1 }
 0x21c   : > { %14496 = vmatprep.mubr.msk.bf16.mxu0 %vm1217_vm2, %v5561_v19  ;;  %v2512_v23 = vpop.f32.mrf.mxu1  ;;  %v4318_v19 = vrot.slane %v17067_v51, 1  ;;  %v5570_v60 = vsel %vm5328_vm4, %v5560_v50, %v5569_v12  ;;  %v5595_v43 = vrot.slane %v5593_v7, 2  ;;  %v20377_v11 = vld [vmem:[#allocation24_spill] sm:$0xff]  ;;  %v5599_v7 = vshrl.u32 %v17123_v62, 16 }
 0x21d   : > { %20370 = vst [vmem:[#allocation20_spill] sm:$0xff] %v17112_v35  ;;  %v3440_v46 = vpop.f32.mrf.mxu0  ;;  %v17118_v48 = vadd.f32 %v14258_v55, %v2521_v18  ;;  %v2513_v13 = vadd.f32 %v2512_v23, %v20373_v63  ;;  %v5586_v35 = vrot.slane %v5584_v22, 2  ;;  %v4317_v55 = vsel %vm2725_vm3, %v4314_v29, %v4316_v33  ;;  %v17131_v23 = vld [vmem:[%s15677_s24 + $0x108] sm:$0xff]  }
 0x21e   : > { %v14121_v31 = vpop.f32.mrf.mxu1  ;;  %v5579_v18 = vsel %vm5328_vm4, %v5569_v12, %v5578_v34  ;;  %v4319_v50 = vsel %vm2725_vm3, %v4316_v33, %v4318_v19  ;;  %v4320_v29 = vrot.slane %v17093_v56, 1  ;;  %v5596_v33 = vor.u32 %v5595_v43, %v5592_v6  ;;  %v20381_v56 = vld [vmem:[#allocation26_spill] sm:$0xff] }
 0x21f   : > { %20372 = vst [vmem:[#allocation21_spill] sm:$0xff] %v17118_v48  ;;  %v14259_v28 = vpop.f32.mrf.mxu0  ;;  %v17125_v1 = vadd.f32 %v3440_v46, %v2513_v13  ;;  %v2524_v38 = vadd.f32 %v14121_v31, %v20375_v17  ;;  %v5602_v46 = vshll.u32 %v17123_v62, 16  ;;  %v5587_v12 = vor.u32 %v5586_v35, %v5583_v0  ;;  %v20379_v31 = vld [vmem:[#allocation25_spill] sm:$0xff] }
 0x220   : > { %v2515_v63 = vpop.f32.mrf.mxu1  ;;  %v5601_v0 = vrot.slane %v5599_v7, 1 }
 0x221   : > { %20374 = vst [vmem:[#allocation22_spill] sm:$0xff] %v17125_v1  ;;  %v3443_v51 = vpop.f32.mrf.mxu0  ;;  %v17134_v48 = vadd.f32 %v14259_v28, %v2524_v38  ;;  %v2516_v22 = vadd.f32 %v2515_v63, %v20377_v11  ;;  %v5611_v63 = vshll.u32 %v17131_v23, 16  ;;  %v5604_v6 = vrot.slane %v5602_v46, 2 }
 0x222   : > { %v14124_v13 = vpop.f32.mrf.mxu1  ;;  %14359 = vmatmul.mubr.msk.bf16.gmra.mxu1 %vm1217_vm2, %v4317_v55 }
 0x223   : > { %20376 = vst [vmem:[#allocation23_spill] sm:$0xff] %v17134_v48  ;;  %v14262_v41 = vpop.f32.mrf.mxu0  ;;  %14497 = vmatmul.mubr.msk.bf16.gmra.mxu0 %vm1217_vm2, %v5570_v60  ;;  %v17143_v28 = vadd.f32 %v3443_v51, %v2516_v22  ;;  %v2537_v17 = vadd.f32 %v14124_v13, %v20379_v31  ;;  %14362 = vmatprep.mubr.msk.bf16.mxu1 %vm1217_vm2, %v4319_v50  ;;  %v5608_v60 = vshrl.u32 %v17131_v23, 16  ;;  %v17157_v31 = vld [vmem:[%s15677_s24 + $0x110] sm:$0xff]  }
 0x224   : > { %14500 = vmatprep.mubr.msk.bf16.mxu0 %vm1217_vm2, %v5579_v18  ;;  %v2528_v55 = vpop.f32.mrf.mxu1  ;;  %v4322_v18 = vrot.slane %v17096_v24, 1  ;;  %v4321_v22 = vsel %vm2725_vm3, %v4318_v19, %v4320_v29  ;;  %v5588_v13 = vsel %vm5328_vm4, %v5578_v34, %v5587_v12  ;;  %v5597_v50 = vsel %vm5328_vm4, %v5587_v12, %v5596_v33  ;;  %v20383_v24 = vld [vmem:[#allocation27_spill] sm:$0xff]  ;;  %v20385_v19 = vld [vmem:[#allocation28_spill] sm:$0xff] }
 0x225   : > { %20378 = vst [vmem:[#allocation24_spill] sm:$0xff] %v17143_v28  ;;  %v3456_v38 = vpop.f32.mrf.mxu0  ;;  %v17150_v11 = vadd.f32 %v14262_v41, %v2537_v17  ;;  %v2529_v43 = vadd.f32 %v2528_v55, %v20381_v56  ;;  %v17160_v28 = vld [vmem:[%s15677_s24 + $0x118] sm:$0xff]   ;;  %v5610_v55 = vrot.slane %v5608_v60, 1  ;;  %v5613_v56 = vrot.slane %v5611_v63, 2 }
 0x226   : > { %v14125_v51 = vpop.f32.mrf.mxu1  ;;  %v4323_v46 = vsel %vm2725_vm3, %v4320_v29, %v4322_v18  ;;  %v5605_v12 = vor.u32 %v5604_v6, %v5601_v0  ;;  %v5620_v60 = vshll.u32 %v17157_v31, 16  ;;  %v5626_v29 = vshrl.u32 %v17160_v28, 16 }
 0x227   : > { %20380 = vst [vmem:[#allocation25_spill] sm:$0xff] %v17150_v11  ;;  %v14263_v35 = vpop.f32.mrf.mxu0  ;;  %v17162_v48 = vadd.f32 %v3456_v38, %v2529_v43  ;;  %v2540_v41 = vadd.f32 %v14125_v51, %v20383_v24  ;;  %v5617_v38 = vshrl.u32 %v17157_v31, 16  ;;  %v5629_v63 = vshll.u32 %v17160_v28, 16 }
 0x228   : > { %v2531_v7 = vpop.f32.mrf.mxu1  ;;  %v4324_v0 = vrot.slane %v17123_v62, 1  ;;  %v5614_v6 = vor.u32 %v5613_v56, %v5610_v55  ;;  %v20391_v55 = vld [vmem:[#allocation31_spill] sm:$0xff] }
 0x229   : > { %20382 = vst [vmem:[#allocation26_spill] sm:$0xff] %v17162_v48  ;;  %v3459_v17 = vpop.f32.mrf.mxu0  ;;  %v17166_v11 = vadd.f32 %v14263_v35, %v2540_v41  ;;  %v2532_v34 = vadd.f32 %v2531_v7, %v20385_v19  ;;  %v20387_v35 = vld [vmem:[#allocation29_spill] sm:$0xff]  ;;  %v20389_v41 = vld [vmem:[#allocation30_spill] sm:$0xff] }
 0x22a   : > { %v14128_v57 = vpop.f32.mrf.mxu1  ;;  %14363 = vmatmul.mubr.msk.bf16.gmra.mxu1 %vm1217_vm2, %v4321_v22 }
 0x22b   : > { %20384 = vst [vmem:[#allocation27_spill] sm:$0xff] %v17166_v11  ;;  %v14266_v1 = vpop.f32.mrf.mxu0  ;;  %14501 = vmatmul.mubr.msk.bf16.gmra.mxu0 %vm1217_vm2, %v5588_v13  ;;  %v17176_v43 = vadd.f32 %v3459_v17, %v2532_v34  ;;  %v2553_v51 = vadd.f32 %v14128_v57, %v20387_v35  ;;  %14366 = vmatprep.mubr.msk.bf16.mxu1 %vm1217_vm2, %v4323_v46  ;;  %v17187_v34 = vld [vmem:[%s15677_s24 + $0x120] sm:$0xff]   ;;  %v5619_v35 = vrot.slane %v5617_v38, 1  ;;  %v5628_v46 = vrot.slane %v5626_v29, 1 }
 0x22c   : > { %14504 = vmatprep.mubr.msk.bf16.mxu0 %vm1217_vm2, %v5597_v50  ;;  %v2544_v22 = vpop.f32.mrf.mxu1  ;;  %v4326_v50 = vrot.slane %v17131_v23, 1  ;;  %v5606_v17 = vsel %vm5328_vm4, %v5596_v33, %v5605_v12  ;;  %v5631_v11 = vrot.slane %v5629_v63, 2  ;;  %v20393_v38 = vld [vmem:[#allocation32_spill] sm:$0xff]  ;;  %v5635_v63 = vshrl.u32 %v17187_v34, 16 }
 0x22d   : > { %20386 = vst [vmem:[#allocation28_spill] sm:$0xff] %v17176_v43  ;;  %v3472_v13 = vpop.f32.mrf.mxu0  ;;  %v17182_v24 = vadd.f32 %v14266_v1, %v2553_v51  ;;  %v2545_v7 = vadd.f32 %v2544_v22, %v20389_v41  ;;  %v5622_v43 = vrot.slane %v5620_v60, 2  ;;  %v4325_v1 = vsel %vm2725_vm3, %v4322_v18, %v4324_v0  ;;  %v17195_v22 = vld [vmem:[%s15677_s24 + $0x128] sm:$0xff]  }
 0x22e   : > { %v14129_v57 = vpop.f32.mrf.mxu1  ;;  %v5615_v51 = vsel %vm5328_vm4, %v5605_v12, %v5614_v6  ;;  %v4327_v33 = vsel %vm2725_vm3, %v4324_v0, %v4326_v50  ;;  %v4328_v18 = vrot.slane %v17157_v31, 1  ;;  %v5632_v0 = vor.u32 %v5631_v11, %v5628_v46  ;;  %v20397_v31 = vld [vmem:[#allocation34_spill] sm:$0xff] }
 0x22f   : > { %20388 = vst [vmem:[#allocation29_spill] sm:$0xff] %v17182_v24  ;;  %v14267_v19 = vpop.f32.mrf.mxu0  ;;  %v17189_v62 = vadd.f32 %v3472_v13, %v2545_v7  ;;  %v2556_v56 = vadd.f32 %v14129_v57, %v20391_v55  ;;  %v5638_v13 = vshll.u32 %v17187_v34, 16  ;;  %v5623_v12 = vor.u32 %v5622_v43, %v5619_v35  ;;  %v20395_v57 = vld [vmem:[#allocation33_spill] sm:$0xff] }
 0x230   : > { %v2547_v41 = vpop.f32.mrf.mxu1  ;;  %v5637_v35 = vrot.slane %v5635_v63, 1 }
 0x231   : > { %20390 = vst [vmem:[#allocation30_spill] sm:$0xff] %v17189_v62  ;;  %v3475_v23 = vpop.f32.mrf.mxu0  ;;  %v17198_v24 = vadd.f32 %v14267_v19, %v2556_v56  ;;  %v2548_v60 = vadd.f32 %v2547_v41, %v20393_v38  ;;  %v5647_v41 = vshll.u32 %v17195_v22, 16  ;;  %v5640_v46 = vrot.slane %v5638_v13, 2 }
 0x232   : > { %v14132_v7 = vpop.f32.mrf.mxu1  ;;  %14367 = vmatmul.mubr.msk.bf16.gmra.mxu1 %vm1217_vm2, %v4325_v1 }
 0x233   : > { %20392 = vst [vmem:[#allocation31_spill] sm:$0xff] %v17198_v24  ;;  %v14270_v29 = vpop.f32.mrf.mxu0  ;;  %14505 = vmatmul.mubr.msk.bf16.gmra.mxu0 %vm1217_vm2, %v5606_v17  ;;  %v17207_v19 = vadd.f32 %v3475_v23, %v2548_v60  ;;  %v2569_v55 = vadd.f32 %v14132_v7, %v20395_v57  ;;  %14370 = vmatprep.mubr.msk.bf16.mxu1 %vm1217_vm2, %v4327_v33  ;;  %v5644_v17 = vshrl.u32 %v17195_v22, 16  ;;  %v17221_v57 = vld [vmem:[%s15677_s24 + $0x130] sm:$0xff]  }
 0x234   : > { %14508 = vmatprep.mubr.msk.bf16.mxu0 %vm1217_vm2, %v5615_v51  ;;  %v2560_v1 = vpop.f32.mrf.mxu1  ;;  %v4330_v51 = vrot.slane %v17160_v28, 1  ;;  %v4329_v60 = vsel %vm2725_vm3, %v4326_v50, %v4328_v18  ;;  %v5624_v7 = vsel %vm5328_vm4, %v5614_v6, %v5623_v12  ;;  %v5633_v33 = vsel %vm5328_vm4, %v5623_v12, %v5632_v0  ;;  %v20399_v28 = vld [vmem:[#allocation35_spill] sm:$0xff]  ;;  %v20401_v50 = vld [vmem:[#allocation36_spill] sm:$0xff] }
 0x235   : > { %20394 = vst [vmem:[#allocation32_spill] sm:$0xff] %v17207_v19  ;;  %v3488_v56 = vpop.f32.mrf.mxu0  ;;  %v17214_v38 = vadd.f32 %v14270_v29, %v2569_v55  ;;  %v2561_v11 = vadd.f32 %v2560_v1, %v20397_v31  ;;  %v17224_v19 = vld [vmem:[%s15677_s24 + $0x138] sm:$0xff]   ;;  %v5646_v1 = vrot.slane %v5644_v17, 1  ;;  %v5649_v31 = vrot.slane %v5647_v41, 2 }
 0x236   : > { %v14133_v23 = vpop.f32.mrf.mxu1  ;;  %v4331_v13 = vsel %vm2725_vm3, %v4328_v18, %v4330_v51  ;;  %v5641_v12 = vor.u32 %v5640_v46, %v5637_v35  ;;  %v5656_v17 = vshll.u32 %v17221_v57, 16  ;;  %v5662_v18 = vshrl.u32 %v17224_v19, 16 }
 0x237   : > { %20396 = vst [vmem:[#allocation33_spill] sm:$0xff] %v17214_v38  ;;  %v14271_v43 = vpop.f32.mrf.mxu0  ;;  %v17226_v24 = vadd.f32 %v3488_v56, %v2561_v11  ;;  %v2572_v29 = vadd.f32 %v14133_v23, %v20399_v28  ;;  %v5653_v56 = vshrl.u32 %v17221_v57, 16  ;;  %v5665_v41 = vshll.u32 %v17224_v19, 16 }
 0x238   : > { %v2563_v63 = vpop.f32.mrf.mxu1  ;;  %v4332_v35 = vrot.slane %v17187_v34, 1  ;;  %v5650_v46 = vor.u32 %v5649_v31, %v5646_v1  ;;  %v20407_v1 = vld [vmem:[#allocation39_spill] sm:$0xff] }
 0x239   : > { %20398 = vst [vmem:[#allocation34_spill] sm:$0xff] %v17226_v24  ;;  %v3491_v55 = vpop.f32.mrf.mxu0  ;;  %v17230_v38 = vadd.f32 %v14271_v43, %v2572_v29  ;;  %v2564_v6 = vadd.f32 %v2563_v63, %v20401_v50  ;;  %v20403_v43 = vld [vmem:[#allocation37_spill] sm:$0xff]  ;;  %v20405_v29 = vld [vmem:[#allocation38_spill] sm:$0xff] }
 0x23a   : > { %v14136_v48 = vpop.f32.mrf.mxu1  ;;  %14371 = vmatmul.mubr.msk.bf16.gmra.mxu1 %vm1217_vm2, %v4329_v60 }
 0x23b   : > { %20400 = vst [vmem:[#allocation35_spill] sm:$0xff] %v17230_v38  ;;  %v14274_v62 = vpop.f32.mrf.mxu0  ;;  %14509 = vmatmul.mubr.msk.bf16.gmra.mxu0 %vm1217_vm2, %v5624_v7  ;;  %v17240_v11 = vadd.f32 %v3491_v55, %v2564_v6  ;;  %v2585_v23 = vadd.f32 %v14136_v48, %v20403_v43  ;;  %14374 = vmatprep.mubr.msk.bf16.mxu1 %vm1217_vm2, %v4331_v13  ;;  %v17251_v6 = vld [vmem:[%s15677_s24 + $0x140] sm:$0xff]   ;;  %v5655_v43 = vrot.slane %v5653_v56, 1  ;;  %v5664_v13 = vrot.slane %v5662_v18, 1 }
 0x23c   : > { %14512 = vmatprep.mubr.msk.bf16.mxu0 %vm1217_vm2, %v5633_v33  ;;  %v2576_v60 = vpop.f32.mrf.mxu1  ;;  %v4334_v33 = vrot.slane %v17195_v22, 1  ;;  %v5642_v55 = vsel %vm5328_vm4, %v5632_v0, %v5641_v12  ;;  %v5667_v38 = vrot.slane %v5665_v41, 2  ;;  %v20409_v56 = vld [vmem:[#allocation40_spill] sm:$0xff]  ;;  %v5671_v41 = vshrl.u32 %v17251_v6, 16 }
 0x23d   : > { %20402 = vst [vmem:[#allocation36_spill] sm:$0xff] %v17240_v11  ;;  %v3504_v7 = vpop.f32.mrf.mxu0  ;;  %v17246_v28 = vadd.f32 %v14274_v62, %v2585_v23  ;;  %v2577_v63 = vadd.f32 %v2576_v60, %v20405_v29  ;;  %v5658_v11 = vrot.slane %v5656_v17, 2  ;;  %v4333_v62 = vsel %vm2725_vm3, %v4330_v51, %v4332_v35  ;;  %v17259_v60 = vld [vmem:[%s15677_s24 + $0x148] sm:$0xff]  }
 0x23e   : > { %v14137_v48 = vpop.f32.mrf.mxu1  ;;  %v5651_v23 = vsel %vm5328_vm4, %v5641_v12, %v5650_v46  ;;  %v4335_v0 = vsel %vm2725_vm3, %v4332_v35, %v4334_v33  ;;  %v4336_v51 = vrot.slane %v17221_v57, 1  ;;  %v5668_v35 = vor.u32 %v5667_v38, %v5664_v13  ;;  %v20413_v57 = vld [vmem:[#allocation42_spill] sm:$0xff] }
 0x23f   : > { %20404 = vst [vmem:[#allocation37_spill] sm:$0xff] %v17246_v28  ;;  %v14275_v50 = vpop.f32.mrf.mxu0  ;;  %v17253_v34 = vadd.f32 %v3504_v7, %v2577_v63  ;;  %v2588_v31 = vadd.f32 %v14137_v48, %v20407_v1  ;;  %v5674_v7 = vshll.u32 %v17251_v6, 16  ;;  %v5659_v12 = vor.u32 %v5658_v11, %v5655_v43  ;;  %v20411_v48 = vld [vmem:[#allocation41_spill] sm:$0xff] }
 0x240   : > { %v2579_v29 = vpop.f32.mrf.mxu1  ;;  %v5673_v43 = vrot.slane %v5671_v41, 1 }
 0x241   : > { %20406 = vst [vmem:[#allocation38_spill] sm:$0xff] %v17253_v34  ;;  %v3507_v22 = vpop.f32.mrf.mxu0  ;;  %v17262_v28 = vadd.f32 %v14275_v50, %v2588_v31  ;;  %v2580_v17 = vadd.f32 %v2579_v29, %v20409_v56  ;;  %v5683_v29 = vshll.u32 %v17259_v60, 16  ;;  %v5676_v13 = vrot.slane %v5674_v7, 2 }
 0x242   : > { %v14140_v63 = vpop.f32.mrf.mxu1  ;;  %14375 = vmatmul.mubr.msk.bf16.gmra.mxu1 %vm1217_vm2, %v4333_v62 }
 0x243   : > { %20408 = vst [vmem:[#allocation39_spill] sm:$0xff] %v17262_v28  ;;  %v14278_v18 = vpop.f32.mrf.mxu0  ;;  %14513 = vmatmul.mubr.msk.bf16.gmra.mxu0 %vm1217_vm2, %v5642_v55  ;;  %v17271_v50 = vadd.f32 %v3507_v22, %v2580_v17  ;;  %v2601_v1 = vadd.f32 %v14140_v63, %v20411_v48  ;;  %14378 = vmatprep.mubr.msk.bf16.mxu1 %vm1217_vm2, %v4335_v0  ;;  %v5680_v55 = vshrl.u32 %v17259_v60, 16  ;;  %v17285_v48 = vld [vmem:[%s15677_s24 + $0x150] sm:$0xff]  }
 0x244   : > { %14516 = vmatprep.mubr.msk.bf16.mxu0 %vm1217_vm2, %v5651_v23  ;;  %v2592_v62 = vpop.f32.mrf.mxu1  ;;  %v4338_v23 = vrot.slane %v17224_v19, 1  ;;  %v4337_v17 = vsel %vm2725_vm3, %v4334_v33, %v4336_v51  ;;  %v5660_v63 = vsel %vm5328_vm4, %v5650_v46, %v5659_v12  ;;  %v5669_v0 = vsel %vm5328_vm4, %v5659_v12, %v5668_v35  ;;  %v20415_v19 = vld [vmem:[#allocation43_spill] sm:$0xff]  ;;  %v20417_v33 = vld [vmem:[#allocation44_spill] sm:$0xff] }
 0x245   : > { %20410 = vst [vmem:[#allocation40_spill] sm:$0xff] %v17271_v50  ;;  %v3520_v31 = vpop.f32.mrf.mxu0  ;;  %v17278_v56 = vadd.f32 %v14278_v18, %v2601_v1  ;;  %v2593_v38 = vadd.f32 %v2592_v62, %v20413_v57  ;;  %v17288_v50 = vld [vmem:[%s15677_s24 + $0x158] sm:$0xff]   ;;  %v5682_v62 = vrot.slane %v5680_v55, 1  ;;  %v5685_v57 = vrot.slane %v5683_v29, 2 }
 0x246   : > { %v14141_v22 = vpop.f32.mrf.mxu1  ;;  %v4339_v7 = vsel %vm2725_vm3, %v4336_v51, %v4338_v23  ;;  %v5677_v12 = vor.u32 %v5676_v13, %v5673_v43  ;;  %v5692_v55 = vshll.u32 %v17285_v48, 16  ;;  %v5698_v51 = vshrl.u32 %v17288_v50, 16 }
 0x247   : > { %20412 = vst [vmem:[#allocation41_spill] sm:$0xff] %v17278_v56  ;;  %v14279_v11 = vpop.f32.mrf.mxu0  ;;  %v17290_v28 = vadd.f32 %v3520_v31, %v2593_v38  ;;  %v2604_v18 = vadd.f32 %v14141_v22, %v20415_v19  ;;  %v5689_v31 = vshrl.u32 %v17285_v48, 16  ;;  %v5701_v29 = vshll.u32 %v17288_v50, 16 }
 0x248   : > { %v2595_v41 = vpop.f32.mrf.mxu1  ;;  %v4340_v43 = vrot.slane %v17251_v6, 1  ;;  %v5686_v13 = vor.u32 %v5685_v57, %v5682_v62  ;;  %v20423_v62 = vld [vmem:[#allocation48_spill] sm:$0xff] }
 0x249   : > { %20414 = vst [vmem:[#allocation42_spill] sm:$0xff] %v17290_v28  ;;  %v3523_v1 = vpop.f32.mrf.mxu0  ;;  %v17294_v56 = vadd.f32 %v14279_v11, %v2604_v18  ;;  %v2596_v46 = vadd.f32 %v2595_v41, %v20417_v33  ;;  %v20419_v11 = vld [vmem:[#allocation45_spill] sm:$0xff]  ;;  %v20421_v18 = vld [vmem:[#allocation46_spill] sm:$0xff] }
 0x24a   : > { %v14144_v24 = vpop.f32.mrf.mxu1  ;;  %14379 = vmatmul.mubr.msk.bf16.gmra.mxu1 %vm1217_vm2, %v4337_v17 }
 0x24b   : > { %20416 = vst [vmem:[#allocation43_spill] sm:$0xff] %v17294_v56  ;;  %v14282_v34 = vpop.f32.mrf.mxu0  ;;  %14517 = vmatmul.mubr.msk.bf16.gmra.mxu0 %vm1217_vm2, %v5660_v63  ;;  %v17304_v38 = vadd.f32 %v3523_v1, %v2596_v46  ;;  %v2617_v22 = vadd.f32 %v14144_v24, %v20419_v11  ;;  %14382 = vmatprep.mubr.msk.bf16.mxu1 %vm1217_vm2, %v4339_v7  ;;  %v17315_v46 = vld [vmem:[%s15677_s24 + $0x160] sm:$0xff]   ;;  %v5691_v11 = vrot.slane %v5689_v31, 1  ;;  %v5700_v7 = vrot.slane %v5698_v51, 1  ;;  %v20425_v31 = vld [vmem:[#allocation50_spill] sm:$0xff] }
 0x24c   : > { %14520 = vmatprep.mubr.msk.bf16.mxu0 %vm1217_vm2, %v5669_v0  ;;  %v2608_v17 = vpop.f32.mrf.mxu1  ;;  %v4342_v0 = vrot.slane %v17259_v60, 1  ;;  %v5678_v1 = vsel %vm5328_vm4, %v5668_v35, %v5677_v12  ;;  %v5703_v56 = vrot.slane %v5701_v29, 2  ;;  %v5707_v29 = vshrl.u32 %v17315_v46, 16 }
 0x24d   : > { %20418 = vst [vmem:[#allocation44_spill] sm:$0xff] %v17304_v38  ;;  %v3536_v63 = vpop.f32.mrf.mxu0  ;;  %v17310_v19 = vadd.f32 %v14282_v34, %v2617_v22  ;;  %v2609_v41 = vadd.f32 %v2608_v17, %v20421_v18  ;;  %v5694_v38 = vrot.slane %v5692_v55, 2  ;;  %v4341_v34 = vsel %vm2725_vm3, %v4338_v23, %v4340_v43  ;;  %v17323_v17 = vld [vmem:[%s15677_s24 + $0x168] sm:$0xff]  }
 0x24e   : > { %v14145_v24 = vpop.f32.mrf.mxu1  ;;  %v5687_v22 = vsel %vm5328_vm4, %v5677_v12, %v5686_v13  ;;  %v4343_v35 = vsel %vm2725_vm3, %v4340_v43, %v4342_v0  ;;  %v4344_v23 = vrot.slane %v17285_v48, 1  ;;  %v5704_v43 = vor.u32 %v5703_v56, %v5700_v7 }
 0x24f   : > { %20420 = vst [vmem:[#allocation45_spill] sm:$0xff] %v17310_v19  ;;  %v14283_v33 = vpop.f32.mrf.mxu0  ;;  %v17317_v6 = vadd.f32 %v3536_v63, %v2609_v41  ;;  %v2620_v57 = vadd.f32 %v14145_v24, %v20423_v62  ;;  %v5710_v63 = vshll.u32 %v17315_v46, 16  ;;  %v5695_v12 = vor.u32 %v5694_v38, %v5691_v11  ;;  %v20427_v24 = vld [vmem:[#allocation52_spill] sm:$0xff]  ;;  %v20429_v11 = vld [vmem:[#allocation54_spill] sm:$0xff] }
 0x250   : > { %v2611_v18 = vpop.f32.mrf.mxu1  ;;  %v4346_v56 = vrot.slane %v17288_v50, 1 }
 0x251   : > { %20422 = vst [vmem:[#allocation46_spill] sm:$0xff] %v17317_v6  ;;  %v3539_v60 = vpop.f32.mrf.mxu0  ;;  %v17326_v19 = vadd.f32 %v14283_v33, %v2620_v57  ;;  %v2612_v55 = vadd.f32 %v2611_v18, %v20425_v31  ;;  %v5719_v18 = vshll.u32 %v17323_v17, 16  ;;  %v13200_v31 = vld [vmem:[%s20178_s1 + $0x10] sm:$0x3]  ;;  %v5705_v50 = vsel %vm5328_vm4, %v5695_v12, %v5704_v43 }
 0x252   : > { %v14148_v41 = vpop.f32.mrf.mxu1  ;;  %14383 = vmatmul.mubr.msk.bf16.gmra.mxu1 %vm1217_vm2, %v4341_v34  ;;  %v13130_v34 = vld [vmem:[%s20178_s1 + $0xe] sm:$0x3]  ;;  %15147 = vmatprep.subr.msk.bf16.mxu0 %vm1422_vm0, %v13200_v31 }
 0x253   : > { %20424 = vst [vmem:[#allocation48_spill] sm:$0xff] %v17326_v19  ;;  %v14286_v51 = vpop.f32.mrf.mxu0  ;;  %14521 = vmatmul.mubr.msk.bf16.gmra.mxu0 %vm1217_vm2, %v5678_v1  ;;  %v17335_v33 = vadd.f32 %v3539_v60, %v2612_v55  ;;  %v2633_v62 = vadd.f32 %v14148_v41, %v20427_v24  ;;  %14386 = vmatprep.mubr.msk.bf16.mxu1 %vm1217_vm2, %v4343_v35  ;;  %v5716_v1 = vshrl.u32 %v17323_v17, 16  ;;  %v5712_v35 = vrot.slane %v5710_v63, 2 }
 0x254   : > { %14524 = vmatprep.mubr.msk.bf16.mxu0 %vm1217_vm2, %v5687_v22  ;;  %v2624_v48 = vpop.f32.mrf.mxu1  ;;  %15146 = vmatprep.subr.msk.bf16.mxu1 %vm1422_vm0, %v13130_v34  ;;  %v5709_v22 = vrot.slane %v5707_v29, 1  ;;  %v4345_v41 = vsel %vm2725_vm3, %v4342_v0, %v4344_v23  ;;  %v5696_v24 = vsel %vm5328_vm4, %v5686_v13, %v5695_v12  ;;  %v20430_v29 = vld [vmem:[#allocation56_spill] sm:$0xff]  ;;  %v4347_v0 = vsel %vm2725_vm3, %v4344_v23, %v4346_v56  ;;  %v20432_v13 = vld [vmem:[#allocation58_spill] sm:$0xff] }
 0x255   : > { %20426 = vst [vmem:[#allocation50_spill] sm:$0xff] %v17335_v33  ;;  %v3552_v57 = vpop.f32.mrf.mxu0  ;;  %v17346_v38 = vadd.f32 %v14286_v51, %v2633_v62  ;;  %v2625_v7 = vadd.f32 %v2624_v48, %v20429_v11  ;;  %v17356_v33 = vld [vmem:[%s15677_s24 + $0x170] sm:$0xff]   ;;  %v17359_v51 = vld [vmem:[%s15677_s24 + $0x178] sm:$0xff]   ;;  %v5718_v48 = vrot.slane %v5716_v1, 1  ;;  %v5721_v11 = vrot.slane %v5719_v18, 2 }
 0x256   : > { %v14149_v55 = vpop.f32.mrf.mxu1  ;;  %v5713_v28 = vor.u32 %v5712_v35, %v5709_v22  ;;  %v5728_v1 = vshll.u32 %v17356_v33, 16  ;;  %v5734_v23 = vshrl.u32 %v17359_v51, 16  ;;  %v5737_v18 = vshll.u32 %v17359_v51, 16 }
 0x257   : > { %20428 = vst [vmem:[#allocation52_spill] sm:$0xff] %v17346_v38  ;;  %v14287_v60 = vpop.f32.mrf.mxu0  ;;  %v17362_v62 = vadd.f32 %v3552_v57, %v2625_v7  ;;  %v2636_v63 = vadd.f32 %v14149_v55, %v20430_v29  ;;  %v5725_v57 = vshrl.u32 %v17356_v33, 16  ;;  %v4348_v22 = vrot.slane %v17315_v46, 1 }
 0x258   : > { %v2627_v38 = vpop.f32.mrf.mxu1  ;;  %v5722_v35 = vor.u32 %v5721_v11, %v5718_v48  ;;  %v20438_v48 = vld [vmem:[#allocation64_spill] sm:$0xff] }
 0x259   : > { %v3555_v34 = vpop.f32.mrf.mxu0  ;;  %v17366_v19 = vadd.f32 %v14287_v60, %v2636_v63  ;;  %v2628_v12 = vadd.f32 %v2627_v38, %v20432_v13  ;;  %v20434_v38 = vld [vmem:[#allocation60_spill] sm:$0xff] }
 0x25a   : > { %v14152_v9 = vpop.f32.mrf.mxu1  ;;  %14387 = vmatmul.mubr.msk.bf16.gmra.mxu1 %vm1217_vm2, %v4345_v41  ;;  %v4350_v41 = vrot.slane %v17323_v17, 1  ;;  %v17387_v13 = vld [vmem:[%s15677_s24 + $0x180] sm:$0xff]  }
 0x25b   : > { %20431 = vst [vmem:[#allocation54_spill] sm:$0xff] %v17366_v19  ;;  %v14290_v6 = vpop.f32.mrf.mxu0  ;;  %14525 = vmatmul.mubr.msk.bf16.gmra.mxu0 %vm1217_vm2, %v5696_v24  ;;  %v17376_v7 = vadd.f32 %v3555_v34, %v2628_v12  ;;  %v2649_v60 = vadd.f32 %v14152_v9, %v20434_v38  ;;  %14390 = vmatprep.mubr.msk.bf16.mxu1 %vm1217_vm2, %v4347_v0  ;;  %v5727_v12 = vrot.slane %v5725_v57, 1  ;;  %v5730_v38 = vrot.slane %v5728_v1, 2  ;;  %v20440_v57 = vld [vmem:[#allocation66_spill] sm:$0xff] }
 0x25c   : > { %14528 = vmatprep.mubr.msk.bf16.mxu0 %vm1217_vm2, %v5705_v50  ;;  %v2640_v55 = vpop.f32.mrf.mxu1  ;;  %v20436_v50 = vld [vmem:[#allocation62_spill] sm:$0xff]  ;;  %v5714_v34 = vsel %vm5328_vm4, %v5704_v43, %v5713_v28  ;;  %v5736_v0 = vrot.slane %v5734_v23, 1  ;;  %v4351_v43 = vsel %vm2725_vm3, %v4348_v22, %v4350_v41 }
 0x25d   : > { %20433 = vst [vmem:[#allocation56_spill] sm:$0xff] %v17376_v7  ;;  %v3568_v31 = vpop.f32.mrf.mxu0  ;;  %v17382_v24 = vadd.f32 %v14290_v6, %v2649_v60  ;;  %v2641_v29 = vadd.f32 %v2640_v55, %v20436_v50  ;;  %v5739_v7 = vrot.slane %v5737_v18, 2  ;;  %v4349_v6 = vsel %vm2725_vm3, %v4346_v56, %v4348_v22  ;;  %v17395_v55 = vld [vmem:[%s15677_s24 + $0x188] sm:$0xff]  }
 0x25e   : > { %v14153_v9 = vpop.f32.mrf.mxu1  ;;  %v5723_v60 = vsel %vm5328_vm4, %v5713_v28, %v5722_v35  ;;  %v5743_v18 = vshrl.u32 %v17387_v13, 16  ;;  %v4352_v28 = vrot.slane %v17356_v33, 1  ;;  %v5731_v56 = vor.u32 %v5730_v38, %v5727_v12  ;;  %v20444_v33 = vld [vmem:[#allocation70_spill] sm:$0xff] }
 0x25f   : > { %20435 = vst [vmem:[#allocation58_spill] sm:$0xff] %v17382_v24  ;;  %v14291_v63 = vpop.f32.mrf.mxu0  ;;  %v17389_v46 = vadd.f32 %v3568_v31, %v2641_v29  ;;  %v2652_v11 = vadd.f32 %v14153_v9, %v20438_v48  ;;  %v5746_v31 = vshll.u32 %v17387_v13, 16  ;;  %v5740_v22 = vor.u32 %v5739_v7, %v5736_v0  ;;  %v20442_v9 = vld [vmem:[#allocation68_spill] sm:$0xff] }
 0x260   : > { %v2643_v50 = vpop.f32.mrf.mxu1  ;;  %v5745_v38 = vrot.slane %v5743_v18, 1 }
 0x261   : > { %20437 = vst [vmem:[#allocation60_spill] sm:$0xff] %v17389_v46  ;;  %v3571_v17 = vpop.f32.mrf.mxu0  ;;  %v17398_v24 = vadd.f32 %v14291_v63, %v2652_v11  ;;  %v2644_v1 = vadd.f32 %v2643_v50, %v20440_v57  ;;  %v5755_v50 = vshll.u32 %v17395_v55, 16  ;;  %v5748_v0 = vrot.slane %v5746_v31, 2 }
 0x262   : > { %v14156_v29 = vpop.f32.mrf.mxu1  ;;  %14391 = vmatmul.mubr.msk.bf16.gmra.mxu1 %vm1217_vm2, %v4349_v6 }
 0x263   : > { %20439 = vst [vmem:[#allocation62_spill] sm:$0xff] %v17398_v24  ;;  %v14294_v23 = vpop.f32.mrf.mxu0  ;;  %14529 = vmatmul.mubr.msk.bf16.gmra.mxu0 %vm1217_vm2, %v5714_v34  ;;  %v17407_v63 = vadd.f32 %v3571_v17, %v2644_v1  ;;  %v2665_v48 = vadd.f32 %v14156_v29, %v20442_v9  ;;  %14394 = vmatprep.mubr.msk.bf16.mxu1 %vm1217_vm2, %v4351_v43  ;;  %v5752_v34 = vshrl.u32 %v17395_v55, 16  ;;  %v17421_v9 = vld [vmem:[%s15677_s24 + $0x190] sm:$0xff]  }
 0x264   : > { %14532 = vmatprep.mubr.msk.bf16.mxu0 %vm1217_vm2, %v5723_v60  ;;  %v2656_v6 = vpop.f32.mrf.mxu1  ;;  %v4354_v60 = vrot.slane %v17359_v51, 1  ;;  %v4353_v1 = vsel %vm2725_vm3, %v4350_v41, %v4352_v28  ;;  %v5732_v29 = vsel %vm5328_vm4, %v5722_v35, %v5731_v56  ;;  %v5741_v43 = vsel %vm5328_vm4, %v5731_v56, %v5740_v22  ;;  %v20446_v51 = vld [vmem:[#allocation72_spill] sm:$0xff]  ;;  %v20448_v41 = vld [vmem:[#allocation74_spill] sm:$0xff] }
 0x265   : > { %20441 = vst [vmem:[#allocation64_spill] sm:$0xff] %v17407_v63  ;;  %v3584_v11 = vpop.f32.mrf.mxu0  ;;  %v17414_v57 = vadd.f32 %v14294_v23, %v2665_v48  ;;  %v2657_v7 = vadd.f32 %v2656_v6, %v20444_v33  ;;  %v17424_v63 = vld [vmem:[%s15677_s24 + $0x198] sm:$0xff]   ;;  %v5754_v6 = vrot.slane %v5752_v34, 1  ;;  %v5757_v33 = vrot.slane %v5755_v50, 2 }
 0x266   : > { %v14157_v17 = vpop.f32.mrf.mxu1  ;;  %v4355_v31 = vsel %vm2725_vm3, %v4352_v28, %v4354_v60  ;;  %v5749_v56 = vor.u32 %v5748_v0, %v5745_v38  ;;  %v5764_v34 = vshll.u32 %v17421_v9, 16  ;;  %v5770_v28 = vshrl.u32 %v17424_v63, 16 }
 0x267   : > { %20443 = vst [vmem:[#allocation66_spill] sm:$0xff] %v17414_v57  ;;  %v14295_v12 = vpop.f32.mrf.mxu0  ;;  %v17426_v24 = vadd.f32 %v3584_v11, %v2657_v7  ;;  %v2668_v23 = vadd.f32 %v14157_v17, %v20446_v51  ;;  %v5761_v11 = vshrl.u32 %v17421_v9, 16  ;;  %v5773_v50 = vshll.u32 %v17424_v63, 16 }
 0x268   : > { %v2659_v18 = vpop.f32.mrf.mxu1  ;;  %v4356_v38 = vrot.slane %v17387_v13, 1  ;;  %v5758_v0 = vor.u32 %v5757_v33, %v5754_v6  ;;  %v20454_v6 = vld [vmem:[#allocation80_spill] sm:$0xff] }
 0x269   : > { %20445 = vst [vmem:[#allocation68_spill] sm:$0xff] %v17426_v24  ;;  %v3587_v48 = vpop.f32.mrf.mxu0  ;;  %v17430_v57 = vadd.f32 %v14295_v12, %v2668_v23  ;;  %v2660_v35 = vadd.f32 %v2659_v18, %v20448_v41  ;;  %v20450_v12 = vld [vmem:[#allocation76_spill] sm:$0xff]  ;;  %v20452_v23 = vld [vmem:[#allocation78_spill] sm:$0xff] }
 0x26a   : > { %v14160_v19 = vpop.f32.mrf.mxu1  ;;  %14395 = vmatmul.mubr.msk.bf16.gmra.mxu1 %vm1217_vm2, %v4353_v1 }
 0x26b   : > { %20447 = vst [vmem:[#allocation70_spill] sm:$0xff] %v17430_v57  ;;  %v14298_v46 = vpop.f32.mrf.mxu0  ;;  %14533 = vmatmul.mubr.msk.bf16.gmra.mxu0 %vm1217_vm2, %v5732_v29  ;;  %v17440_v7 = vadd.f32 %v3587_v48, %v2660_v35  ;;  %v2681_v17 = vadd.f32 %v14160_v19, %v20450_v12  ;;  %14398 = vmatprep.mubr.msk.bf16.mxu1 %vm1217_vm2, %v4355_v31  ;;  %v17451_v35 = vld [vmem:[%s15677_s24 + $0x1a0] sm:$0xff]   ;;  %v5763_v12 = vrot.slane %v5761_v11, 1  ;;  %v5772_v31 = vrot.slane %v5770_v28, 1  ;;  %v20456_v11 = vld [vmem:[#allocation82_spill] sm:$0xff] }
 0x26c   : > { %14536 = vmatprep.mubr.msk.bf16.mxu0 %vm1217_vm2, %v5741_v43  ;;  %v2672_v1 = vpop.f32.mrf.mxu1  ;;  %v4358_v43 = vrot.slane %v17395_v55, 1  ;;  %v5750_v48 = vsel %vm5328_vm4, %v5740_v22, %v5749_v56  ;;  %v5775_v57 = vrot.slane %v5773_v50, 2  ;;  %v5779_v50 = vshrl.u32 %v17451_v35, 16 }
 0x26d   : > { %20449 = vst [vmem:[#allocation72_spill] sm:$0xff] %v17440_v7  ;;  %v3600_v29 = vpop.f32.mrf.mxu0  ;;  %v17446_v51 = vadd.f32 %v14298_v46, %v2681_v17  ;;  %v2673_v18 = vadd.f32 %v2672_v1, %v20452_v23  ;;  %v5766_v7 = vrot.slane %v5764_v34, 2  ;;  %v4357_v46 = vsel %vm2725_vm3, %v4354_v60, %v4356_v38  ;;  %v17459_v1 = vld [vmem:[%s15677_s24 + $0x1a8] sm:$0xff]  }
 0x26e   : > { %v14161_v19 = vpop.f32.mrf.mxu1  ;;  %v5759_v17 = vsel %vm5328_vm4, %v5749_v56, %v5758_v0  ;;  %v4359_v22 = vsel %vm2725_vm3, %v4356_v38, %v4358_v43  ;;  %v4360_v60 = vrot.slane %v17421_v9, 1  ;;  %v5776_v38 = vor.u32 %v5775_v57, %v5772_v31  ;;  %v20460_v9 = vld [vmem:[#allocation86_spill] sm:$0xff] }
 0x26f   : > { %20451 = vst [vmem:[#allocation74_spill] sm:$0xff] %v17446_v51  ;;  %v14299_v41 = vpop.f32.mrf.mxu0  ;;  %v17453_v13 = vadd.f32 %v3600_v29, %v2673_v18  ;;  %v2684_v33 = vadd.f32 %v14161_v19, %v20454_v6  ;;  %v5782_v29 = vshll.u32 %v17451_v35, 16  ;;  %v5767_v56 = vor.u32 %v5766_v7, %v5763_v12  ;;  %v20458_v19 = vld [vmem:[#allocation84_spill] sm:$0xff] }
 0x270   : > { %v2675_v23 = vpop.f32.mrf.mxu1  ;;  %v5781_v12 = vrot.slane %v5779_v50, 1 }
 0x271   : > { %20453 = vst [vmem:[#allocation76_spill] sm:$0xff] %v17453_v13  ;;  %v3603_v55 = vpop.f32.mrf.mxu0  ;;  %v17462_v51 = vadd.f32 %v14299_v41, %v2684_v33  ;;  %v2676_v34 = vadd.f32 %v2675_v23, %v20456_v11  ;;  %v5791_v23 = vshll.u32 %v17459_v1, 16  ;;  %v5784_v31 = vrot.slane %v5782_v29, 2 }
 0x272   : > { %v14164_v18 = vpop.f32.mrf.mxu1  ;;  %14399 = vmatmul.mubr.msk.bf16.gmra.mxu1 %vm1217_vm2, %v4357_v46 }
 0x273   : > { %20455 = vst [vmem:[#allocation78_spill] sm:$0xff] %v17462_v51  ;;  %v14302_v28 = vpop.f32.mrf.mxu0  ;;  %14537 = vmatmul.mubr.msk.bf16.gmra.mxu0 %vm1217_vm2, %v5750_v48  ;;  %v17471_v41 = vadd.f32 %v3603_v55, %v2676_v34  ;;  %v2697_v6 = vadd.f32 %v14164_v18, %v20458_v19  ;;  %14402 = vmatprep.mubr.msk.bf16.mxu1 %vm1217_vm2, %v4359_v22  ;;  %v5788_v48 = vshrl.u32 %v17459_v1, 16  ;;  %v17485_v19 = vld [vmem:[%s15677_s24 + $0x1b0] sm:$0xff]  }
 0x274   : > { %14540 = vmatprep.mubr.msk.bf16.mxu0 %vm1217_vm2, %v5759_v17  ;;  %v2688_v46 = vpop.f32.mrf.mxu1  ;;  %v4362_v17 = vrot.slane %v17424_v63, 1  ;;  %v4361_v34 = vsel %vm2725_vm3, %v4358_v43, %v4360_v60  ;;  %v5768_v18 = vsel %vm5328_vm4, %v5758_v0, %v5767_v56  ;;  %v5777_v22 = vsel %vm5328_vm4, %v5767_v56, %v5776_v38  ;;  %v20461_v63 = vld [vmem:[#allocation88_spill] sm:$0xff]  ;;  %v20463_v43 = vld [vmem:[#allocation90_spill] sm:$0xff] }
 0x275   : > { %20457 = vst [vmem:[#allocation80_spill] sm:$0xff] %v17471_v41  ;;  %v3616_v33 = vpop.f32.mrf.mxu0  ;;  %v17478_v11 = vadd.f32 %v14302_v28, %v2697_v6  ;;  %v2689_v57 = vadd.f32 %v2688_v46, %v20460_v9  ;;  %v17488_v41 = vld [vmem:[%s15677_s24 + $0x1b8] sm:$0xff]   ;;  %v5790_v46 = vrot.slane %v5788_v48, 1  ;;  %v5793_v9 = vrot.slane %v5791_v23, 2 }
 0x276   : > { %v14165_v55 = vpop.f32.mrf.mxu1  ;;  %v4363_v29 = vsel %vm2725_vm3, %v4360_v60, %v4362_v17  ;;  %v5785_v56 = vor.u32 %v5784_v31, %v5781_v12  ;;  %v5800_v48 = vshll.u32 %v17485_v19, 16  ;;  %v5806_v60 = vshrl.u32 %v17488_v41, 16 }
 0x277   : > { %20459 = vst [vmem:[#allocation82_spill] sm:$0xff] %v17478_v11  ;;  %v14303_v7 = vpop.f32.mrf.mxu0  ;;  %v17490_v51 = vadd.f32 %v3616_v33, %v2689_v57  ;;  %v2700_v28 = vadd.f32 %v14165_v55, %v20461_v63  ;;  %v5797_v33 = vshrl.u32 %v17485_v19, 16  ;;  %v5809_v23 = vshll.u32 %v17488_v41, 16 }
 0x278   : > { %v2691_v50 = vpop.f32.mrf.mxu1  ;;  %v4364_v12 = vrot.slane %v17451_v35, 1  ;;  %v5794_v31 = vor.u32 %v5793_v9, %v5790_v46  ;;  %v20468_v46 = vld [vmem:[#allocation96_spill] sm:$0xff] }
 0x279   : > { %v3619_v6 = vpop.f32.mrf.mxu0  ;;  %v17494_v11 = vadd.f32 %v14303_v7, %v2700_v28  ;;  %v2692_v0 = vadd.f32 %v2691_v50, %v20463_v43  ;;  %v20465_v7 = vld [vmem:[#allocation92_spill] sm:$0xff]  ;;  %v20467_v28 = vld [vmem:[#allocation94_spill] sm:$0xff] }
 0x27a   : > { %v14168_v24 = vpop.f32.mrf.mxu1  ;;  %14403 = vmatmul.mubr.msk.bf16.gmra.mxu1 %vm1217_vm2, %v4361_v34 }
 0x27b   : > { %20462 = vst [vmem:[#allocation84_spill] sm:$0xff] %v17494_v11  ;;  %v14306_v13 = vpop.f32.mrf.mxu0  ;;  %14541 = vmatmul.mubr.msk.bf16.gmra.mxu0 %vm1217_vm2, %v5768_v18  ;;  %v17504_v57 = vadd.f32 %v3619_v6, %v2692_v0  ;;  %v2713_v55 = vadd.f32 %v14168_v24, %v20465_v7  ;;  %14406 = vmatprep.mubr.msk.bf16.mxu1 %vm1217_vm2, %v4363_v29  ;;  %v17515_v0 = vld [vmem:[%s15677_s24 + $0x1c0] sm:$0xff]   ;;  %v5799_v7 = vrot.slane %v5797_v33, 1  ;;  %v5808_v29 = vrot.slane %v5806_v60, 1  ;;  %v20469_v33 = vld [vmem:[#allocation98_spill] sm:$0xff] }
 0x27c   : > { %14544 = vmatprep.mubr.msk.bf16.mxu0 %vm1217_vm2, %v5777_v22  ;;  %v2704_v34 = vpop.f32.mrf.mxu1  ;;  %v4366_v22 = vrot.slane %v17459_v1, 1  ;;  %v5786_v6 = vsel %vm5328_vm4, %v5776_v38, %v5785_v56  ;;  %v5811_v11 = vrot.slane %v5809_v23, 2  ;;  %v5815_v23 = vshrl.u32 %v17515_v0, 16 }
 0x27d   : > { %20464 = vst [vmem:[#allocation86_spill] sm:$0xff] %v17504_v57  ;;  %v3632_v18 = vpop.f32.mrf.mxu0  ;;  %v17510_v63 = vadd.f32 %v14306_v13, %v2713_v55  ;;  %v2705_v50 = vadd.f32 %v2704_v34, %v20467_v28  ;;  %v5802_v57 = vrot.slane %v5800_v48, 2  ;;  %v4365_v13 = vsel %vm2725_vm3, %v4362_v17, %v4364_v12  ;;  %v17523_v34 = vld [vmem:[%s15677_s24 + $0x1c8] sm:$0xff]  }
 0x27e   : > { %v14169_v24 = vpop.f32.mrf.mxu1  ;;  %v5795_v55 = vsel %vm5328_vm4, %v5785_v56, %v5794_v31  ;;  %v4367_v38 = vsel %vm2725_vm3, %v4364_v12, %v4366_v22  ;;  %v4368_v17 = vrot.slane %v17485_v19, 1  ;;  %v5812_v12 = vor.u32 %v5811_v11, %v5808_v29 }
 0x27f   : > { %20466 = vst [vmem:[#allocation88_spill] sm:$0xff] %v17510_v63  ;;  %v14307_v43 = vpop.f32.mrf.mxu0  ;;  %v17517_v35 = vadd.f32 %v3632_v18, %v2705_v50  ;;  %v2716_v9 = vadd.f32 %v14169_v24, %v20468_v46  ;;  %v5818_v18 = vshll.u32 %v17515_v0, 16  ;;  %v5803_v56 = vor.u32 %v5802_v57, %v5799_v7 }
 0x280   : > { %v2707_v28 = vpop.f32.mrf.mxu1  ;;  %v5817_v57 = vrot.slane %v5815_v23, 1  ;;  %v4369_v29 = vsel %vm2725_vm3, %v4366_v22, %v4368_v17 }
 0x281   : > { %v3635_v1 = vpop.f32.mrf.mxu0  ;;  %v17526_v63 = vadd.f32 %v14307_v43, %v2716_v9  ;;  %v2708_v48 = vadd.f32 %v2707_v28, %v20469_v33  ;;  %v5827_v9 = vshll.u32 %v17523_v34, 16  ;;  %v5820_v7 = vrot.slane %v5818_v18, 2  ;;  %v17549_v33 = vld [vmem:[%s15677_s24 + $0x1d0] sm:$0xff]  }
 0x282   : > { %v14312_v50 = vpop.f32.mrf.mxu1  ;;  %14407 = vmatmul.mubr.msk.bf16.gmra.mxu1 %vm1217_vm2, %v4365_v13 }
 0x283   : > { %v14450_v60 = vpop.f32.mrf.mxu0  ;;  %14545 = vmatmul.mubr.msk.bf16.gmra.mxu0 %vm1217_vm2, %v5786_v6  ;;  %v17535_v43 = vadd.f32 %v3635_v1, %v2708_v48  ;;  %v5188_v24 = vadd.f32 %v14312_v50, %v16513_v3  ;;  %14410 = vmatprep.mubr.msk.bf16.mxu1 %vm1217_vm2, %v4367_v38  ;;  %v5824_v6 = vshrl.u32 %v17523_v34, 16  ;;  %v5804_v1 = vsel %vm5328_vm4, %v5794_v31, %v5803_v56  ;;  %v17552_v48 = vld [vmem:[%s15677_s24 + $0x1d8] sm:$0xff]  }
 0x284   : > { %14548 = vmatprep.mubr.msk.bf16.mxu0 %vm1217_vm2, %v5795_v55  ;;  %v4643_v13 = vpop.f32.mrf.mxu1  ;;  %v4370_v55 = vrot.slane %v17488_v41, 1  ;;  %v5813_v38 = vsel %vm5328_vm4, %v5803_v56, %v5812_v12  ;;  %v5821_v56 = vor.u32 %v5820_v7, %v5817_v57 }
 0x285   : > { %v6190_v46 = vpop.f32.mrf.mxu0  ;;  %v17542_v28 = vadd.f32 %v14450_v60, %v5188_v24  ;;  %v5186_v11 = vadd.f32 %v4643_v13, %v16517_v42  ;;  %v5826_v42 = vrot.slane %v5824_v6, 1  ;;  %v5829_v24 = vrot.slane %v5827_v9, 2 }
 0x286   : > { %v14313_v3 = vpop.f32.mrf.mxu1  ;;  %v4371_v18 = vsel %vm2725_vm3, %v4368_v17, %v4370_v55  ;;  %v5842_v17 = vshrl.u32 %v17552_v48, 16  ;;  %v5845_v6 = vshll.u32 %v17552_v48, 16 }
 0x287   : > { %20470 = vst [vmem:[#allocation90_spill] sm:$0xff] %v17542_v28  ;;  %v14451_v19 = vpop.f32.mrf.mxu0  ;;  %v17554_v50 = vadd.f32 %v6190_v46, %v5186_v11  ;;  %v5189_v41 = vadd.f32 %v14313_v3, %v16521_v14  ;;  %v5833_v14 = vshrl.u32 %v17549_v33, 16  ;;  %v5836_v46 = vshll.u32 %v17549_v33, 16 }
 0x288   : > { %v4646_v23 = vpop.f32.mrf.mxu1  ;;  %v5830_v57 = vor.u32 %v5829_v24, %v5826_v42  ;;  %v4374_v3 = vrot.slane %v17523_v34, 1 }
 0x289   : > { %v6193_v60 = vpop.f32.mrf.mxu0  ;;  %v17558_v13 = vadd.f32 %v14451_v19, %v5189_v41  ;;  %v5187_v31 = vadd.f32 %v4646_v23, %v16528_v53  ;;  %v4372_v19 = vrot.slane %v17515_v0, 1  ;;  %v5822_v41 = vsel %vm5328_vm4, %v5812_v12, %v5821_v56 }
 0x28a   : > { %v14316_v28 = vpop.f32.mrf.mxu1  ;;  %14411 = vmatmul.mubr.msk.bf16.gmra.mxu1 %vm1217_vm2, %v4369_v29  ;;  %v5838_v23 = vrot.slane %v5836_v46, 2 }
 0x28b   : > { %v14454_v22 = vpop.f32.mrf.mxu0  ;;  %14549 = vmatmul.mubr.msk.bf16.gmra.mxu0 %vm1217_vm2, %v5804_v1  ;;  %v17568_v9 = vadd.f32 %v6193_v60, %v5187_v31  ;;  %v5192_v53 = vadd.f32 %v14316_v28, %v16533_v8  ;;  %14414 = vmatprep.mubr.msk.bf16.mxu1 %vm1217_vm2, %v4371_v18  ;;  %v17579_v60 = vld [vmem:[%s15677_s24 + $0x1e0] sm:$0xff]   ;;  %v5835_v28 = vrot.slane %v5833_v14, 1  ;;  %v5844_v18 = vrot.slane %v5842_v17, 1 }
 0x28c   : > { %14552 = vmatprep.mubr.msk.bf16.mxu0 %vm1217_vm2, %v5813_v38  ;;  %v4659_v7 = vpop.f32.mrf.mxu1  ;;  %v5847_v31 = vrot.slane %v5845_v6, 2  ;;  %v4373_v24 = vsel %vm2725_vm3, %v4370_v55, %v4372_v19  ;;  %v4375_v12 = vsel %vm2725_vm3, %v4372_v19, %v4374_v3  ;;  %v5851_v17 = vshrl.u32 %v17579_v60, 16 }
 0x28d   : > { %v6206_v11 = vpop.f32.mrf.mxu0  ;;  %v17574_v29 = vadd.f32 %v14454_v22, %v5192_v53  ;;  %v5190_v1 = vadd.f32 %v4659_v7, %v16537_v54  ;;  %v5831_v22 = vsel %vm5328_vm4, %v5821_v56, %v5830_v57  ;;  %v17587_v54 = vld [vmem:[%s15677_s24 + $0x1e8] sm:$0xff]   ;;  %v4376_v55 = vrot.slane %v17549_v33, 1 }
 0x28e   : > { %v14317_v8 = vpop.f32.mrf.mxu1  ;;  %v5839_v56 = vor.u32 %v5838_v23, %v5835_v28  ;;  %v5853_v23 = vrot.slane %v5851_v17, 1 }
 0x28f   : > { %v14455_v38 = vpop.f32.mrf.mxu0  ;;  %v17581_v0 = vadd.f32 %v6206_v11, %v5190_v1  ;;  %v5193_v42 = vadd.f32 %v14317_v8, %v16541_v49  ;;  %v5854_v49 = vshll.u32 %v17579_v60, 16  ;;  %v5848_v11 = vor.u32 %v5847_v31, %v5844_v18 }
 0x290   : > { %v4662_v53 = vpop.f32.mrf.mxu1  ;;  %v4377_v31 = vsel %vm2725_vm3, %v4374_v3, %v4376_v55 }
 0x291   : > { %v6209_v34 = vpop.f32.mrf.mxu0  ;;  %v17590_v7 = vadd.f32 %v14455_v38, %v5193_v42  ;;  %v5191_v14 = vadd.f32 %v4662_v53, %v16548_v2  ;;  %v5860_v38 = vshrl.u32 %v17587_v54, 16  ;;  %v4378_v42 = vrot.slane %v17552_v48, 1  ;;  %v17613_v53 = vld [vmem:[%s15677_s24 + $0x1f0] sm:$0xff]  }
 0x292   : > { %v14320_v6 = vpop.f32.mrf.mxu1  ;;  %14415 = vmatmul.mubr.msk.bf16.gmra.mxu1 %vm1217_vm2, %v4373_v24  ;;  %v5856_v18 = vrot.slane %v5854_v49, 2 }
 0x293   : > { %v14458_v46 = vpop.f32.mrf.mxu0  ;;  %14553 = vmatmul.mubr.msk.bf16.gmra.mxu0 %vm1217_vm2, %v5822_v41  ;;  %v17599_v19 = vadd.f32 %v6209_v34, %v5191_v14  ;;  %v5196_v2 = vadd.f32 %v14320_v6, %v16553_v37  ;;  %14418 = vmatprep.mubr.msk.bf16.mxu1 %vm1217_vm2, %v4375_v12  ;;  %v5863_v41 = vshll.u32 %v17587_v54, 16  ;;  %v5840_v34 = vsel %vm5328_vm4, %v5830_v57, %v5839_v56  ;;  %v17616_v12 = vld [vmem:[%s15677_s24 + $0x1f8] sm:$0xff]  }
 0x294   : > { %14556 = vmatprep.mubr.msk.bf16.mxu0 %vm1217_vm2, %v5831_v22  ;;  %v4675_v8 = vpop.f32.mrf.mxu1  ;;  %v5849_v22 = vsel %vm5328_vm4, %v5839_v56, %v5848_v11  ;;  %v4379_v49 = vsel %vm2725_vm3, %v4376_v55, %v4378_v42  ;;  %v5857_v56 = vor.u32 %v5856_v18, %v5853_v23  ;;  %v5878_v55 = vshrl.u32 %v17616_v12, 16 }
 0x295   : > { %v6222_v1 = vpop.f32.mrf.mxu0  ;;  %v17606_v24 = vadd.f32 %v14458_v46, %v5196_v2  ;;  %v5194_v33 = vadd.f32 %v4675_v8, %v16557_v52  ;;  %v5862_v52 = vrot.slane %v5860_v38, 1  ;;  %v5865_v6 = vrot.slane %v5863_v41, 2 }
 0x296   : > { %v14321_v37 = vpop.f32.mrf.mxu1  ;;  %v5881_v38 = vshll.u32 %v17616_v12, 16 }
 0x297   : > { %v14459_v28 = vpop.f32.mrf.mxu0  ;;  %v17618_v14 = vadd.f32 %v6222_v1, %v5194_v33  ;;  %v5197_v48 = vadd.f32 %v14321_v37, %v16561_v25  ;;  %v5869_v25 = vshrl.u32 %v17613_v53, 16  ;;  %v5872_v1 = vshll.u32 %v17613_v53, 16 }
 0x298   : > { %v4678_v17 = vpop.f32.mrf.mxu1  ;;  %v5866_v23 = vor.u32 %v5865_v6, %v5862_v52  ;;  %v4382_v37 = vrot.slane %v17587_v54, 1 }
 0x299   : > { %v6225_v46 = vpop.f32.mrf.mxu0  ;;  %v17622_v2 = vadd.f32 %v14459_v28, %v5197_v48  ;;  %v5195_v57 = vadd.f32 %v4678_v17, %v16568_v16  ;;  %v4380_v28 = vrot.slane %v17579_v60, 1  ;;  %v5858_v48 = vsel %vm5328_vm4, %v5848_v11, %v5857_v56 }
 0x29a   : > { %v14324_v8 = vpop.f32.mrf.mxu1  ;;  %14419 = vmatmul.mubr.msk.bf16.gmra.mxu1 %vm1217_vm2, %v4377_v31  ;;  %v5871_v17 = vrot.slane %v5869_v25, 1 }
 0x29b   : > { %v14462_v3 = vpop.f32.mrf.mxu0  ;;  %14557 = vmatmul.mubr.msk.bf16.gmra.mxu0 %vm1217_vm2, %v5840_v34  ;;  %v17632_v41 = vadd.f32 %v6225_v46, %v5195_v57  ;;  %v5200_v16 = vadd.f32 %v14324_v8, %v16573_v45  ;;  %14422 = vmatprep.mubr.msk.bf16.mxu1 %vm1217_vm2, %v4379_v49  ;;  %v17643_v46 = vld [vmem:[%s15677_s24 + $0x200] sm:$0xff]   ;;  %v5874_v57 = vrot.slane %v5872_v1, 2  ;;  %v5880_v49 = vrot.slane %v5878_v55, 1 }
 0x29c   : > { %14560 = vmatprep.mubr.msk.bf16.mxu0 %vm1217_vm2, %v5849_v22  ;;  %v4691_v18 = vpop.f32.mrf.mxu1  ;;  %v5883_v8 = vrot.slane %v5881_v38, 2  ;;  %v4381_v6 = vsel %vm2725_vm3, %v4378_v42, %v4380_v28  ;;  %v4383_v11 = vsel %vm2725_vm3, %v4380_v28, %v4382_v37  ;;  %v5887_v55 = vshrl.u32 %v17643_v46, 16 }
 0x29d   : > { %v6238_v33 = vpop.f32.mrf.mxu0  ;;  %v17638_v31 = vadd.f32 %v14462_v3, %v5200_v16  ;;  %v5198_v34 = vadd.f32 %v4691_v18, %v16577_v39  ;;  %v5867_v3 = vsel %vm5328_vm4, %v5857_v56, %v5866_v23  ;;  %v17651_v39 = vld [vmem:[%s15677_s24 + $0x208] sm:$0xff]   ;;  %v4384_v42 = vrot.slane %v17613_v53, 1 }
 0x29e   : > { %v14325_v45 = vpop.f32.mrf.mxu1  ;;  %v5875_v56 = vor.u32 %v5874_v57, %v5871_v17  ;;  %v5889_v57 = vrot.slane %v5887_v55, 1 }
 0x29f   : > { %v14463_v22 = vpop.f32.mrf.mxu0  ;;  %v17645_v60 = vadd.f32 %v6238_v33, %v5198_v34  ;;  %v5201_v52 = vadd.f32 %v14325_v45, %v16581_v10  ;;  %v5890_v10 = vshll.u32 %v17643_v46, 16  ;;  %v5884_v33 = vor.u32 %v5883_v8, %v5880_v49 }
 0x2a0   : > { %v4694_v16 = vpop.f32.mrf.mxu1  ;;  %v4385_v8 = vsel %vm2725_vm3, %v4382_v37, %v4384_v42 }
 0x2a1   : > { %v6241_v54 = vpop.f32.mrf.mxu0  ;;  %v17654_v18 = vadd.f32 %v14463_v22, %v5201_v52  ;;  %v5199_v25 = vadd.f32 %v4694_v16, %v16588_v30  ;;  %v5896_v22 = vshrl.u32 %v17651_v39, 16  ;;  %v4386_v52 = vrot.slane %v17616_v12, 1  ;;  %v17677_v16 = vld [vmem:[%s15677_s24 + $0x210] sm:$0xff]  }
 0x2a2   : > { %v14328_v38 = vpop.f32.mrf.mxu1  ;;  %14423 = vmatmul.mubr.msk.bf16.gmra.mxu1 %vm1217_vm2, %v4381_v6  ;;  %v5892_v49 = vrot.slane %v5890_v10, 2 }
 0x2a3   : > { %v14466_v1 = vpop.f32.mrf.mxu0  ;;  %14561 = vmatmul.mubr.msk.bf16.gmra.mxu0 %vm1217_vm2, %v5858_v48  ;;  %v17663_v28 = vadd.f32 %v6241_v54, %v5199_v25  ;;  %v5204_v30 = vadd.f32 %v14328_v38, %v16593_v59  ;;  %14426 = vmatprep.mubr.msk.bf16.mxu1 %vm1217_vm2, %v4383_v11  ;;  %v5899_v48 = vshll.u32 %v17651_v39, 16  ;;  %v5876_v54 = vsel %vm5328_vm4, %v5866_v23, %v5875_v56  ;;  %v17680_v11 = vld [vmem:[%s15677_s24 + $0x218] sm:$0xff]  }
 0x2a4   : > { %14564 = vmatprep.mubr.msk.bf16.mxu0 %vm1217_vm2, %v5867_v3  ;;  %v4707_v45 = vpop.f32.mrf.mxu1  ;;  %v5885_v3 = vsel %vm5328_vm4, %v5875_v56, %v5884_v33  ;;  %v4387_v10 = vsel %vm2725_vm3, %v4384_v42, %v4386_v52  ;;  %v5893_v56 = vor.u32 %v5892_v49, %v5889_v57  ;;  %v5917_v42 = vshll.u32 %v17680_v11, 16 }
 0x2a5   : > { %v6254_v34 = vpop.f32.mrf.mxu0  ;;  %v17670_v6 = vadd.f32 %v14466_v1, %v5204_v30  ;;  %v5202_v53 = vadd.f32 %v4707_v45, %v16597_v15  ;;  %v5898_v15 = vrot.slane %v5896_v22, 1  ;;  %v5901_v38 = vrot.slane %v5899_v48, 2 }
 0x2a6   : > { %v14329_v59 = vpop.f32.mrf.mxu1  ;;  %v5914_v22 = vshrl.u32 %v17680_v11, 16  ;;  %v4388_v57 = vrot.slane %v17643_v46, 1 }
 0x2a7   : > { %v14467_v17 = vpop.f32.mrf.mxu0  ;;  %v17682_v25 = vadd.f32 %v6254_v34, %v5202_v53  ;;  %v5205_v12 = vadd.f32 %v14329_v59, %v16601_v26  ;;  %v5905_v26 = vshrl.u32 %v17677_v16, 16  ;;  %v5908_v34 = vshll.u32 %v17677_v16, 16 }
 0x2a8   : > { %v4710_v55 = vpop.f32.mrf.mxu1  ;;  %v5902_v49 = vor.u32 %v5901_v38, %v5898_v15  ;;  %v20478_v15 = vld [vmem:[#allocation101_spill] sm:$0xff] }
 0x2a9   : > { %20471 = vst [vmem:[#allocation92_spill] sm:$0xff] %v17682_v25  ;;  %v6257_v1 = vpop.f32.mrf.mxu0  ;;  %v17686_v30 = vadd.f32 %v14467_v17, %v5205_v12  ;;  %v5203_v23 = vadd.f32 %v4710_v55, %v16608_v47  ;;  %v20474_v47 = vld [vmem:[#allocation99_spill] sm:$0xff] }
 0x2aa   : > { %v14332_v45 = vpop.f32.mrf.mxu1  ;;  %14427 = vmatmul.mubr.msk.bf16.gmra.mxu1 %vm1217_vm2, %v4385_v8  ;;  %v4390_v8 = vrot.slane %v17651_v39, 1 }
 0x2ab   : > { %20472 = vst [vmem:[#allocation94_spill] sm:$0xff] %v17686_v30  ;;  %v14470_v37 = vpop.f32.mrf.mxu0  ;;  %14565 = vmatmul.mubr.msk.bf16.gmra.mxu0 %vm1217_vm2, %v5876_v54  ;;  %v17696_v48 = vadd.f32 %v6257_v1, %v5203_v23  ;;  %v5208_v53 = vadd.f32 %v14332_v45, %v20474_v47  ;;  %14430 = vmatprep.mubr.msk.bf16.mxu1 %vm1217_vm2, %v4387_v10  ;;  %v5907_v45 = vrot.slane %v5905_v26, 1  ;;  %v5910_v47 = vrot.slane %v5908_v34, 2  ;;  %v17707_v10 = vld [vmem:[%s15677_s24 + $0x220] sm:$0xff]   ;;  %v20480_v34 = vld [vmem:[#allocation102_spill] sm:$0xff] }
 0x2ac   : > { %14568 = vmatprep.mubr.msk.bf16.mxu0 %vm1217_vm2, %v5885_v3  ;;  %v4723_v59 = vpop.f32.mrf.mxu1  ;;  %v20476_v3 = vld [vmem:[#allocation100_spill] sm:$0xff]  ;;  %v5894_v1 = vsel %vm5328_vm4, %v5884_v33, %v5893_v56  ;;  %v5919_v30 = vrot.slane %v5917_v42, 2  ;;  %v4391_v33 = vsel %vm2725_vm3, %v4388_v57, %v4390_v8 }
 0x2ad   : > { %20473 = vst [vmem:[#allocation96_spill] sm:$0xff] %v17696_v48  ;;  %v6270_v17 = vpop.f32.mrf.mxu0  ;;  %v17702_v54 = vadd.f32 %v14470_v37, %v5208_v53  ;;  %v5206_v12 = vadd.f32 %v4723_v59, %v20476_v3  ;;  %v5916_v48 = vrot.slane %v5914_v22, 1  ;;  %v4389_v37 = vsel %vm2725_vm3, %v4386_v52, %v4388_v57  ;;  %v17715_v59 = vld [vmem:[%s15677_s24 + $0x228] sm:$0xff]  }
 0x2ae   : > { %v14333_v23 = vpop.f32.mrf.mxu1  ;;  %v5903_v53 = vsel %vm5328_vm4, %v5893_v56, %v5902_v49  ;;  %v5911_v52 = vor.u32 %v5910_v47, %v5907_v45  ;;  %v5926_v57 = vshll.u32 %v17707_v10, 16  ;;  %v4394_v45 = vrot.slane %v17680_v11, 1 }
 0x2af   : > { %20475 = vst [vmem:[#allocation98_spill] sm:$0xff] %v17702_v54  ;;  %v14471_v55 = vpop.f32.mrf.mxu0  ;;  %v17709_v46 = vadd.f32 %v6270_v17, %v5206_v12  ;;  %v5209_v38 = vadd.f32 %v14333_v23, %v20478_v15  ;;  %v4392_v17 = vrot.slane %v17677_v16, 1  ;;  %v5920_v56 = vor.u32 %v5919_v30, %v5916_v48  ;;  %v20482_v15 = vld [vmem:[#allocation103_spill] sm:$0xff]  ;;  %v20484_v48 = vld [vmem:[#allocation104_spill] sm:$0xff] }
 0x2b0   : > { %v4726_v3 = vpop.f32.mrf.mxu1  ;;  %v5923_v23 = vshrl.u32 %v17707_v10, 16  ;;  %v5932_v16 = vshrl.u32 %v17715_v59, 16 }
 0x2b1   : > { %20477 = vst [vmem:[#allocation99_spill] sm:$0xff] %v17709_v46  ;;  %v6273_v39 = vpop.f32.mrf.mxu0  ;;  %v17718_v26 = vadd.f32 %v14471_v55, %v5209_v38  ;;  %v5207_v22 = vadd.f32 %v4726_v3, %v20480_v34  ;;  %v20485_v46 = vld [vmem:[#allocation105_spill] sm:$0xff] }
 0x2b2   : > { %v14336_v12 = vpop.f32.mrf.mxu1  ;;  %14431 = vmatmul.mubr.msk.bf16.gmra.mxu1 %vm1217_vm2, %v4389_v37 }
 0x2b3   : > { %20479 = vst [vmem:[#allocation100_spill] sm:$0xff] %v17718_v26  ;;  %v14474_v42 = vpop.f32.mrf.mxu0  ;;  %14569 = vmatmul.mubr.msk.bf16.gmra.mxu0 %vm1217_vm2, %v5894_v1  ;;  %v17727_v55 = vadd.f32 %v6273_v39, %v5207_v22  ;;  %v5212_v38 = vadd.f32 %v14336_v12, %v20482_v15  ;;  %14434 = vmatprep.mubr.msk.bf16.mxu1 %vm1217_vm2, %v4391_v33  ;;  %v5935_v1 = vshll.u32 %v17715_v59, 16  ;;  %v5925_v33 = vrot.slane %v5923_v23, 1 }
 0x2b4   : > { %14572 = vmatprep.mubr.msk.bf16.mxu0 %vm1217_vm2, %v5903_v53  ;;  %v4739_v37 = vpop.f32.mrf.mxu1  ;;  %v4393_v39 = vsel %vm2725_vm3, %v4390_v8, %v4392_v17  ;;  %v5912_v22 = vsel %vm5328_vm4, %v5902_v49, %v5911_v52  ;;  %v5921_v12 = vsel %vm5328_vm4, %v5911_v52, %v5920_v56  ;;  %v5928_v15 = vrot.slane %v5926_v57, 2  ;;  %v20486_v8 = vld [vmem:[#allocation106_spill] sm:$0xff] }
 0x2b5   : > { %20481 = vst [vmem:[#allocation101_spill] sm:$0xff] %v17727_v55  ;;  %v6286_v3 = vpop.f32.mrf.mxu0  ;;  %v17734_v30 = vadd.f32 %v14474_v42, %v5212_v38  ;;  %v5210_v47 = vadd.f32 %v4739_v37, %v20484_v48  ;;  %v15308_v55 = vld [vmem:[%s15677_s24 + $0x230] ss:$0 sps:$4 sm:$0x33]   ;;  %v5934_v42 = vrot.slane %v5932_v16, 1  ;;  %v5937_v38 = vrot.slane %v5935_v1, 2 }
 0x2b6   : > { %v14337_v34 = vpop.f32.mrf.mxu1  ;;  %v4395_v37 = vsel %vm2725_vm3, %v4392_v17, %v4394_v45  ;;  %v5929_v23 = vor.u32 %v5928_v15, %v5925_v33  ;;  %v5941_v57 = vshrl.u32 %v15308_v55, 16  ;;  %v5944_v17 = vshll.u32 %v15308_v55, 16 }
 0x2b7   : > { %20483 = vst [vmem:[#allocation102_spill] sm:$0xff] %v17734_v30  ;;  %v14475_v53 = vpop.f32.mrf.mxu0  ;;  %v17741_v26 = vadd.f32 %v6286_v3, %v5210_v47  ;;  %v5213_v54 = vadd.f32 %v14337_v34, %v20485_v46  ;;  %v4396_v46 = vrot.slane %v17707_v10, 1  ;;  %v20487_v3 = vld [vmem:[#allocation107_spill] sm:$0xff]  ;;  %v7934_v34 = vld [vmem:[%s15677_s24 + $0x24] sm:$0xf] }
 0x2b8   : > { %v4742_v30 = vpop.f32.mrf.mxu1  ;;  %v5930_v15 = vsel %vm5328_vm4, %v5920_v56, %v5929_v23 }
 0x2b9   : > { %v6289_v11 = vpop.f32.mrf.mxu0  ;;  %v17745_v48 = vadd.f32 %v14475_v53, %v5213_v54  ;;  %v5211_v25 = vadd.f32 %v4742_v30, %v20486_v8  ;;  %v5938_v30 = vor.u32 %v5937_v38, %v5934_v42  ;;  %v4398_v53 = vrot.slane %v17715_v59, 1 }
 0x2ba   : > { %v14340_v52 = vpop.f32.mrf.mxu1  ;;  %14435 = vmatmul.mubr.msk.bf16.gmra.mxu1 %vm1217_vm2, %v4393_v39  ;;  %v7933_v39 = vld [vmem:[%s15677_s24 + $0x20] sm:$0xc]  ;;  %v4397_v33 = vsel %vm2725_vm3, %v4394_v45, %v4396_v46  ;;  %v5943_v42 = vrot.slane %v5941_v57, 1  ;;  %v5946_v38 = vrot.slane %v5944_v17, 2  ;;  %v15450_v45 = vld [vmem:[%s15677_s24 + $0x14] sm:$0xf] }
 0x2bb   : > { %v14478_v49 = vpop.f32.mrf.mxu0  ;;  %14573 = vmatmul.mubr.msk.bf16.gmra.mxu0 %vm1217_vm2, %v5912_v22  ;;  %v17752_v54 = vadd.f32 %v6289_v11, %v5211_v25  ;;  %v5216_v16 = vadd.f32 %v14340_v52, %v20487_v3  ;;  %14438 = vmatprep.mubr.msk.bf16.mxu1 %vm1217_vm2, %v4395_v37  ;;  %v6869_v25 = vld [vmem:[%s15677_s24 + $0x10] sm:$0xc]  ;;  %v15307_v11 = vld [vmem:[%s15677_s24 + $0x230] ss:$0 sps:$4 sm:$0x11]   ;;  %v17770_v52 = vcombine.low %v7933_v39, %v7934_v34 }
 0x2bc   : > { %14576 = vmatprep.mubr.msk.bf16.mxu0 %vm1217_vm2, %v5921_v12  ;;  %v4755_v47 = vpop.f32.mrf.mxu1 }
 0x2bd   : > { %v6302_v1 = vpop.f32.mrf.mxu0  ;;  %v17759_v10 = vadd.f32 %v14478_v49, %v5216_v16  ;;  %v5214_v22 = vadd.f32 %v4755_v47, %v16675_v20  ;;  %v5939_v49 = vsel %vm5328_vm4, %v5929_v23, %v5938_v30  ;;  %v17773_v20 = vld [vmem:[%s15677_s24 + $0x28] sm:$0xff]   ;;  %v4399_v16 = vsel %vm2725_vm3, %v4396_v46, %v4398_v53 }
 0x2be   : > { %v14341_v12 = vpop.f32.mrf.mxu1  ;;  %v12923_v47 = vcombine.low %v6869_v25, %v15450_v45  ;;  %v4400_v23 = vrot.slane %v15307_v11, 1 }
 0x2bf   : > { %v14479_v55 = vpop.f32.mrf.mxu0  ;;  %v17766_v37 = vadd.f32 %v6302_v1, %v5214_v22  ;;  %v5217_v59 = vadd.f32 %v14341_v12, %v16681_v61  ;;  %v5947_v1 = vor.u32 %v5946_v38, %v5943_v42  ;;  %v8416_v22 = vrot.slane %v17773_v20, 2  ;;  %v15451_v12 = vld [vmem:[%s15677_s24 + $0x18] sm:$0xff]  }
 0x2c0   : > { %v4758_v3 = vpop.f32.mrf.mxu1  ;;  %v6876_v25 = vrot.slane %v12923_v47, 2 }
 0x2c1   : > { %v6305_v8 = vpop.f32.mrf.mxu0  ;;  %v17777_v56 = vadd.f32 %v14479_v55, %v5217_v59  ;;  %v5215_v57 = vadd.f32 %v4758_v3, %v16691_v36  ;;  %v8415_v36 = vrot.slane %v17770_v52, 2  ;;  %v15312_v59 = vld [vmem:[%s15677_s24 + $0x30] sm:$0xff]   ;;  %v4401_v3 = vsel %vm2725_vm3, %v4398_v53, %v4400_v23 }
 0x2c2   : > { %v14344_v61 = vpop.f32.mrf.mxu1  ;;  %14439 = vmatmul.mubr.msk.bf16.gmra.mxu1 %vm1217_vm2, %v4397_v33  ;;  %v6877_v33 = vrot.slane %v15451_v12, 2 }
 0x2c3   : > { %v14482_v17 = vpop.f32.mrf.mxu0  ;;  %14577 = vmatmul.mubr.msk.bf16.gmra.mxu0 %vm1217_vm2, %v5930_v15  ;;  %v17783_v39 = vadd.f32 %v6305_v8, %v5215_v57  ;;  %v5220_v46 = vadd.f32 %v14344_v61, %v16698_v5  ;;  %14442 = vmatprep.mubr.msk.bf16.mxu1 %vm1217_vm2, %v4399_v16  ;;  %v5948_v5 = vsel %vm5328_vm4, %v5938_v30, %v5947_v1 }
 0x2c4   : > { %14580 = vmatprep.mubr.msk.bf16.mxu0 %vm1217_vm2, %v5939_v49  ;;  %v4771_v55 = vpop.f32.mrf.mxu1  ;;  %v8417_v16 = vsel %vm6875_vm5, %v8415_v36, %v8416_v22  ;;  %v6878_v47 = vsel %vm6875_vm5, %v6876_v25, %v6877_v33  ;;  %v15453_v36 = vld [vmem:[%s15677_s24 + $0x28] sm:$0xff]  }
 0x2c5   : > { %v6318_v34 = vpop.f32.mrf.mxu0  ;;  %v17790_v15 = vadd.f32 %v14482_v17, %v5220_v46  ;;  %v5218_v11 = vadd.f32 %v4771_v55, %v16708_v40  ;;  %v15313_v17 = vld [vmem:[%s15677_s24 + $0x38] sm:$0xff]   ;;  %v15452_v46 = vld [vmem:[%s15677_s24 + $0x20] sm:$0xff]   ;;  %v6881_v55 = vrot.slane %v15453_v36, 2 }
 0x2c6   : > { %v14345_v38 = vpop.f32.mrf.mxu1 }
 0x2c7   : > { %v14483_v42 = vpop.f32.mrf.mxu0  ;;  %v17795_v8 = vadd.f32 %v6318_v34, %v5218_v11  ;;  %v5221_v49 = vadd.f32 %v14345_v38, %v16713_v44  ;;  %v8418_v44 = vrot.slane %v15312_v59, 2  ;;  %v15314_v59 = vld [vmem:[%s15677_s24 + $0x40] sm:$0xff]  }
 0x2c8   : > { %v4774_v45 = vpop.f32.mrf.mxu1 }
 0x2c9   : > { %v6321_v20 = vpop.f32.mrf.mxu0  ;;  %v17801_v40 = vadd.f32 %v14483_v42, %v5221_v49  ;;  %v5219_v57 = vadd.f32 %v4774_v45, %v16724_v32  ;;  %v6879_v32 = vrot.slane %v15452_v46, 2  ;;  %v8420_v42 = vrot.slane %v15313_v17, 2 }
 0x2ca   : > { %v14348_v61 = vpop.f32.mrf.mxu1  ;;  %14443 = vmatmul.mubr.msk.bf16.gmra.mxu1 %vm1217_vm2, %v4401_v3 }
 0x2cb   : > { %v14486_v30 = vpop.f32.mrf.mxu0  ;;  %14581 = vmatmul.mubr.msk.bf16.gmra.mxu0 %vm1217_vm2, %v5948_v5  ;;  %v17808_v53 = vadd.f32 %v6321_v20, %v5219_v57  ;;  %v5224_v23 = vadd.f32 %v14348_v61, %v16730_v4  ;;  %14586 = vmatprep.mubr.msk.bf16.mxu1 %vm1217_vm2, %v6878_v47  ;;  %v8419_v5 = vsel %vm6875_vm5, %v8416_v22, %v8418_v44  ;;  %v15455_v22 = vld [vmem:[%s20178_s1 + $0xe] sm:$0x3] }
 0x2cc   : > { %14724 = vmatprep.mubr.msk.bf16.mxu0 %vm1217_vm2, %v8417_v16  ;;  %v4787_v34 = vpop.f32.mrf.mxu1  ;;  %v6880_v3 = vsel %vm6875_vm5, %v6877_v33, %v6879_v32  ;;  %v15454_v16 = vld [vmem:[%s20178_s1 + $0x10] sm:$0x3]  ;;  %v10304_v57 = vsel %vm1422_vm0, %v15455_v22, 0  ;;  %v8421_v61 = vsel %vm6875_vm5, %v8418_v44, %v8420_v42 }
 0x2cd   : > { %v6334_v1 = vpop.f32.mrf.mxu0  ;;  %v17814_v25 = vadd.f32 %v14486_v30, %v5224_v23  ;;  %v5222_v12 = vadd.f32 %v4787_v34, %v16737_v27  ;;  %v11368_v45 = vsel %vm1422_vm0, %v15454_v16, 0  ;;  %v17828_v27 = vld [vmem:[%s15677_s24 + $0x48] sm:$0xff]   ;;  %v20488_v34 = vld [vmem:[#allocation108_spill] sm:$0xff] }
 0x2ce   : > { %v14349_v38 = vpop.f32.mrf.mxu1 }
 0x2cf   : > { %v14487_v11 = vpop.f32.mrf.mxu0  ;;  %v17819_v4 = vadd.f32 %v6334_v1, %v5222_v12  ;;  %v5225_v49 = vadd.f32 %v14349_v38, %v16750_v58  ;;  %v6882_v58 = vsel %vm6875_vm5, %v6879_v32, %v6881_v55  ;;  %v8422_v1 = vrot.slane %v15314_v59, 2  ;;  %v15457_v38 = vld [vmem:[%s15677_s24 + $0x38] sm:$0xff]  }
 0x2d0   : > { %v4790_v47 = vpop.f32.mrf.mxu1 }
 0x2d1   : > { %v6337_v20 = vpop.f32.mrf.mxu0  ;;  %v17835_v30 = vadd.f32 %v14487_v11, %v5225_v49  ;;  %v5223_v33 = vadd.f32 %v4790_v47, %v16758_v21  ;;  %v15456_v21 = vld [vmem:[%s15677_s24 + $0x30] sm:$0xff]   ;;  %v8424_v11 = vrot.slane %v17828_v27, 2  ;;  %v20489_v49 = vld [vmem:[#allocation109_spill] sm:$0xff] }
 0x2d2   : > { %v14352_v23 = vpop.f32.mrf.mxu1  ;;  %14587 = vmatmul.mubr.msk.bf16.vlgmr.msra.gmra.mxu1 %vm1217_vm2, %v6880_v3  ;;  %v6883_v12 = vrot.slane %v15456_v21, 2  ;;  %v15316_v47 = vld [vmem:[%s15677_s24 + $0x50] sm:$0xff]   ;;  %v20491_v21 = vld [vmem:[#allocation49_spill] sm:$0xff] }
 0x2d3   : > { %v14490_v17 = vpop.f32.mrf.mxu0  ;;  %14725 = vmatmul.mubr.msk.bf16.vlgmr.msra.gmra.mxu0 %vm1217_vm2, %v8419_v5  ;;  %v17841_v46 = vadd.f32 %v6337_v20, %v5223_v33  ;;  %v5228_v36 = vadd.f32 %v14352_v23, %v20488_v34  ;;  %14861 = vmatpush3.bf16.msra.mxu1 %v10304_v57  ;;  %v6885_v5 = vrot.slane %v15457_v38, 2  ;;  %v20490_v57 = vld [vmem:[#allocation47_spill] sm:$0xff] }
 0x2d4   : > { %14999 = vmatpush3.bf16.msra.mxu0 %v11368_v45  ;;  %14590 = vmatprep.mubr.msk.bf16.mxu1 %vm1217_vm2, %v6882_v58  ;;  %v4803_v44 = vpop.f32.mrf.mxu1  ;;  %v8423_v45 = vsel %vm6875_vm5, %v8420_v42, %v8422_v1  ;;  %v6884_v33 = vsel %vm6875_vm5, %v6881_v55, %v6883_v12  ;;  %v15317_v23 = vld [vmem:[%s15677_s24 + $0x58] sm:$0xff]   ;;  %v8426_v55 = vrot.slane %v15316_v47, 2 }
 0x2d5   : > { %v6350_v32 = vpop.f32.mrf.mxu0  ;;  %14728 = vmatprep.mubr.msk.bf16.mxu0 %vm1217_vm2, %v8421_v61  ;;  %v17849_v59 = vadd.f32 %v14490_v17, %v5228_v36  ;;  %v5226_v20 = vadd.f32 %v4803_v44, %v20489_v49  ;;  %v8425_v61 = vsel %vm6875_vm5, %v8422_v1, %v8424_v11  ;;  %v6886_v34 = vsel %vm6875_vm5, %v6883_v12, %v6885_v5  ;;  %v20493_v38 = vld [vmem:[#allocation51_spill] sm:$0xff] }
 0x2d6   : > { %v14353_v16 = vpop.f32.mrf.mxu1 }
 0x2d7   : > { %v14491_v3 = vpop.f32.mrf.mxu0  ;;  %v17854_v22 = vadd.f32 %v6350_v32, %v5226_v20  ;;  %v5229_v58 = vadd.f32 %v14353_v16, %v20490_v57  ;;  %v15458_v20 = vld [vmem:[%s15677_s24 + $0x40] sm:$0xff]   ;;  %v8428_v16 = vrot.slane %v15317_v23, 2 }
 0x2d8   : > { %v4806_v17 = vpop.f32.mrf.mxu1 }
 0x2d9   : > { %v6353_v27 = vpop.f32.mrf.mxu0  ;;  %v17861_v36 = vadd.f32 %v14491_v3, %v5229_v58  ;;  %v5227_v42 = vadd.f32 %v4806_v17, %v20491_v21  ;;  %v6887_v3 = vrot.slane %v15458_v20, 2  ;;  %v8429_v23 = vsel %vm6875_vm5, %v8426_v55, %v8428_v16 }
 0x2da   : > { %v14356_v32 = vpop.f32.mrf.mxu1  ;;  %14591 = vmatmul.mubr.msk.bf16.gmra.mxu1 %vm1217_vm2, %v6884_v33  ;;  %v20495_v33 = vld [vmem:[#allocation53_spill] sm:$0xff] }
 0x2db   : > { %v14494_v44 = vpop.f32.mrf.mxu0  ;;  %14729 = vmatmul.mubr.msk.bf16.gmra.mxu0 %vm1217_vm2, %v8423_v45  ;;  %v17867_v1 = vadd.f32 %v6353_v27, %v5227_v42  ;;  %v5232_v49 = vadd.f32 %v14356_v32, %v20493_v38  ;;  %14594 = vmatprep.mubr.msk.bf16.mxu1 %vm1217_vm2, %v6886_v34  ;;  %v15459_v45 = vld [vmem:[%s15677_s24 + $0x48] sm:$0xff]   ;;  %v8427_v27 = vsel %vm6875_vm5, %v8424_v11, %v8426_v55  ;;  %v15318_v42 = vld [vmem:[%s15677_s24 + $0x60] sm:$0xff]   ;;  %v20497_v38 = vld [vmem:[#allocation55_spill] sm:$0xff] }
 0x2dc   : > { %14732 = vmatprep.mubr.msk.bf16.mxu0 %vm1217_vm2, %v8425_v61  ;;  %v4819_v57 = vpop.f32.mrf.mxu1  ;;  %v6889_v58 = vrot.slane %v15459_v45, 2  ;;  %v6888_v20 = vsel %vm6875_vm5, %v6885_v5, %v6887_v3  ;;  %v15319_v45 = vld [vmem:[%s15677_s24 + $0x68] sm:$0xff]   ;;  %v8430_v5 = vrot.slane %v15318_v42, 2 }
 0x2dd   : > { %20492 = vst [vmem:[#allocation103_spill] sm:$0xff] %v17867_v1  ;;  %v6366_v12 = vpop.f32.mrf.mxu0  ;;  %v17873_v17 = vadd.f32 %v14494_v44, %v5232_v49  ;;  %v5230_v61 = vadd.f32 %v4819_v57, %v20495_v33  ;;  %v20499_v33 = vld [vmem:[#allocation57_spill] sm:$0xff] }
 0x2de   : > { %v14357_v21 = vpop.f32.mrf.mxu1  ;;  %v6890_v49 = vsel %vm6875_vm5, %v6887_v3, %v6889_v58 }
 0x2df   : > { %20494 = vst [vmem:[#allocation104_spill] sm:$0xff] %v17873_v17  ;;  %v14495_v47 = vpop.f32.mrf.mxu0  ;;  %v17878_v32 = vadd.f32 %v6366_v12, %v5230_v61  ;;  %v5233_v34 = vadd.f32 %v14357_v21, %v20497_v38  ;;  %v20501_v61 = vld [vmem:[#allocation59_spill] sm:$0xff] }
 0x2e0   : > { %v4822_v44 = vpop.f32.mrf.mxu1 }
 0x2e1   : > { %20496 = vst [vmem:[#allocation105_spill] sm:$0xff] %v17878_v32  ;;  %v6369_v1 = vpop.f32.mrf.mxu0  ;;  %v17885_v57 = vadd.f32 %v14495_v47, %v5233_v34  ;;  %v5231_v11 = vadd.f32 %v4822_v44, %v20499_v33  ;;  %v15460_v47 = vld [vmem:[%s15677_s24 + $0x50] sm:$0xff]   ;;  %v8432_v34 = vrot.slane %v15319_v45, 2 }
 0x2e2   : > { %v14360_v12 = vpop.f32.mrf.mxu1  ;;  %14595 = vmatmul.mubr.msk.bf16.gmra.mxu1 %vm1217_vm2, %v6888_v20  ;;  %v6891_v38 = vrot.slane %v15460_v47, 2  ;;  %v20503_v20 = vld [vmem:[#allocation61_spill] sm:$0xff] }
 0x2e3   : > { %20498 = vst [vmem:[#allocation106_spill] sm:$0xff] %v17885_v57  ;;  %v14498_v17 = vpop.f32.mrf.mxu0  ;;  %14733 = vmatmul.mubr.msk.bf16.gmra.mxu0 %vm1217_vm2, %v8427_v27  ;;  %v17891_v55 = vadd.f32 %v6369_v1, %v5231_v11  ;;  %v5236_v21 = vadd.f32 %v14360_v12, %v20501_v61  ;;  %14598 = vmatprep.mubr.msk.bf16.mxu1 %vm1217_vm2, %v6890_v49  ;;  %v15461_v27 = vld [vmem:[%s15677_s24 + $0x58] sm:$0xff]   ;;  %v15320_v11 = vld [vmem:[%s15677_s24 + $0x70] sm:$0xff]  }
 0x2e4   : > { %14736 = vmatprep.mubr.msk.bf16.mxu0 %vm1217_vm2, %v8429_v23  ;;  %v4835_v44 = vpop.f32.mrf.mxu1  ;;  %v6893_v33 = vrot.slane %v15461_v27, 2  ;;  %v8431_v1 = vsel %vm6875_vm5, %v8428_v16, %v8430_v5  ;;  %v20505_v61 = vld [vmem:[#allocation63_spill] sm:$0xff]  ;;  %v6892_v47 = vsel %vm6875_vm5, %v6889_v58, %v6891_v38  ;;  %v8433_v45 = vsel %vm6875_vm5, %v8430_v5, %v8432_v34 }
 0x2e5   : > { %20500 = vst [vmem:[#allocation107_spill] sm:$0xff] %v17891_v55  ;;  %v6382_v3 = vpop.f32.mrf.mxu0  ;;  %v17897_v57 = vadd.f32 %v14498_v17, %v5236_v21  ;;  %v5234_v23 = vadd.f32 %v4835_v44, %v20503_v20  ;;  %v15321_v27 = vld [vmem:[%s15677_s24 + $0x78] sm:$0xff]   ;;  %v20507_v20 = vld [vmem:[#allocation65_spill] sm:$0xff]  ;;  %v8434_v58 = vrot.slane %v15320_v11, 2 }
 0x2e6   : > { %v14361_v32 = vpop.f32.mrf.mxu1  ;;  %v6894_v21 = vsel %vm6875_vm5, %v6891_v38, %v6893_v33  ;;  %v20509_v5 = vld [vmem:[#allocation67_spill] sm:$0xff] }
 0x2e7   : > { %20502 = vst [vmem:[#allocation108_spill] sm:$0xff] %v17897_v57  ;;  %v14499_v42 = vpop.f32.mrf.mxu0  ;;  %v17902_v12 = vadd.f32 %v6382_v3, %v5234_v23  ;;  %v5237_v49 = vadd.f32 %v14361_v32, %v20505_v61 }
 0x2e8   : > { %v4838_v17 = vpop.f32.mrf.mxu1 }
 0x2e9   : > { %20504 = vst [vmem:[#allocation109_spill] sm:$0xff] %v17902_v12  ;;  %v6385_v55 = vpop.f32.mrf.mxu0  ;;  %v17909_v44 = vadd.f32 %v14499_v42, %v5237_v49  ;;  %v5235_v16 = vadd.f32 %v4838_v17, %v20507_v20  ;;  %v15462_v42 = vld [vmem:[%s15677_s24 + $0x60] sm:$0xff]   ;;  %v8436_v49 = vrot.slane %v15321_v27, 2 }
 0x2ea   : > { %v14364_v3 = vpop.f32.mrf.mxu1  ;;  %14599 = vmatmul.mubr.msk.bf16.gmra.mxu1 %vm1217_vm2, %v6892_v47  ;;  %v6895_v61 = vrot.slane %v15462_v42, 2  ;;  %v20511_v47 = vld [vmem:[#allocation69_spill] sm:$0xff] }
 0x2eb   : > { %20506 = vst [vmem:[#allocation47_spill] sm:$0xff] %v17909_v44  ;;  %v14502_v57 = vpop.f32.mrf.mxu0  ;;  %14737 = vmatmul.mubr.msk.bf16.gmra.mxu0 %vm1217_vm2, %v8431_v1  ;;  %v17915_v32 = vadd.f32 %v6385_v55, %v5235_v16  ;;  %v5240_v23 = vadd.f32 %v14364_v3, %v20509_v5  ;;  %14602 = vmatprep.mubr.msk.bf16.mxu1 %vm1217_vm2, %v6894_v21  ;;  %v15463_v1 = vld [vmem:[%s15677_s24 + $0x68] sm:$0xff]   ;;  %v15322_v16 = vld [vmem:[%s15677_s24 + $0x80] sm:$0xff]   ;;  %v20513_v5 = vld [vmem:[#allocation71_spill] sm:$0xff] }
 0x2ec   : > { %14740 = vmatprep.mubr.msk.bf16.mxu0 %vm1217_vm2, %v8433_v45  ;;  %v4851_v17 = vpop.f32.mrf.mxu1  ;;  %v6897_v20 = vrot.slane %v15463_v1, 2  ;;  %v8435_v55 = vsel %vm6875_vm5, %v8432_v34, %v8434_v58  ;;  %v6896_v42 = vsel %vm6875_vm5, %v6893_v33, %v6895_v61  ;;  %v8437_v27 = vsel %vm6875_vm5, %v8434_v58, %v8436_v49  ;;  %v15323_v1 = vld [vmem:[%s15677_s24 + $0x88] sm:$0xff]   ;;  %v20517_v58 = vld [vmem:[#allocation75_spill] sm:$0xff] }
 0x2ed   : > { %20508 = vst [vmem:[#allocation49_spill] sm:$0xff] %v17915_v32  ;;  %v6398_v38 = vpop.f32.mrf.mxu0  ;;  %v17921_v44 = vadd.f32 %v14502_v57, %v5240_v23  ;;  %v5238_v45 = vadd.f32 %v4851_v17, %v20511_v47  ;;  %v20515_v47 = vld [vmem:[#allocation73_spill] sm:$0xff]  ;;  %v8438_v33 = vrot.slane %v15322_v16, 2 }
 0x2ee   : > { %v14365_v12 = vpop.f32.mrf.mxu1  ;;  %v6898_v23 = vsel %vm6875_vm5, %v6895_v61, %v6897_v20 }
 0x2ef   : > { %20510 = vst [vmem:[#allocation51_spill] sm:$0xff] %v17921_v44  ;;  %v14503_v11 = vpop.f32.mrf.mxu0  ;;  %v17926_v3 = vadd.f32 %v6398_v38, %v5238_v45  ;;  %v5241_v21 = vadd.f32 %v14365_v12, %v20513_v5 }
 0x2f0   : > { %v4854_v57 = vpop.f32.mrf.mxu1 }
 0x2f1   : > { %20512 = vst [vmem:[#allocation53_spill] sm:$0xff] %v17926_v3  ;;  %v6401_v32 = vpop.f32.mrf.mxu0  ;;  %v17933_v17 = vadd.f32 %v14503_v11, %v5241_v21  ;;  %v5239_v34 = vadd.f32 %v4854_v57, %v20515_v47  ;;  %v15464_v11 = vld [vmem:[%s15677_s24 + $0x70] sm:$0xff]   ;;  %v8440_v21 = vrot.slane %v15323_v1, 2 }
 0x2f2   : > { %v14368_v38 = vpop.f32.mrf.mxu1  ;;  %14603 = vmatmul.mubr.msk.bf16.gmra.mxu1 %vm1217_vm2, %v6896_v42  ;;  %v6899_v5 = vrot.slane %v15464_v11, 2  ;;  %v20519_v42 = vld [vmem:[#allocation77_spill] sm:$0xff] }
 0x2f3   : > { %20514 = vst [vmem:[#allocation55_spill] sm:$0xff] %v17933_v17  ;;  %v14506_v44 = vpop.f32.mrf.mxu0  ;;  %14741 = vmatmul.mubr.msk.bf16.gmra.mxu0 %vm1217_vm2, %v8435_v55  ;;  %v17939_v12 = vadd.f32 %v6401_v32, %v5239_v34  ;;  %v5244_v45 = vadd.f32 %v14368_v38, %v20517_v58  ;;  %14606 = vmatprep.mubr.msk.bf16.mxu1 %vm1217_vm2, %v6898_v23  ;;  %v15465_v55 = vld [vmem:[%s15677_s24 + $0x78] sm:$0xff]   ;;  %v15324_v34 = vld [vmem:[%s15677_s24 + $0x90] sm:$0xff]  }
 0x2f4   : > { %14744 = vmatprep.mubr.msk.bf16.mxu0 %vm1217_vm2, %v8437_v27  ;;  %v4867_v57 = vpop.f32.mrf.mxu1  ;;  %v6901_v47 = vrot.slane %v15465_v55, 2  ;;  %v8439_v32 = vsel %vm6875_vm5, %v8436_v49, %v8438_v33  ;;  %v20521_v58 = vld [vmem:[#allocation79_spill] sm:$0xff]  ;;  %v6900_v11 = vsel %vm6875_vm5, %v6897_v20, %v6899_v5  ;;  %v8441_v1 = vsel %vm6875_vm5, %v8438_v33, %v8440_v21 }
 0x2f5   : > { %20516 = vst [vmem:[#allocation57_spill] sm:$0xff] %v17939_v12  ;;  %v6414_v61 = vpop.f32.mrf.mxu0  ;;  %v17945_v17 = vadd.f32 %v14506_v44, %v5244_v45  ;;  %v5242_v27 = vadd.f32 %v4867_v57, %v20519_v42  ;;  %v15325_v55 = vld [vmem:[%s15677_s24 + $0x98] sm:$0xff]   ;;  %v20523_v42 = vld [vmem:[#allocation81_spill] sm:$0xff]  ;;  %v8442_v20 = vrot.slane %v15324_v34, 2 }
 0x2f6   : > { %v14369_v3 = vpop.f32.mrf.mxu1  ;;  %v6902_v45 = vsel %vm6875_vm5, %v6899_v5, %v6901_v47  ;;  %v20525_v33 = vld [vmem:[#allocation83_spill] sm:$0xff] }
 0x2f7   : > { %20518 = vst [vmem:[#allocation59_spill] sm:$0xff] %v17945_v17  ;;  %v14507_v16 = vpop.f32.mrf.mxu0  ;;  %v17950_v38 = vadd.f32 %v6414_v61, %v5242_v27  ;;  %v5245_v23 = vadd.f32 %v14369_v3, %v20521_v58 }
 0x2f8   : > { %v4870_v44 = vpop.f32.mrf.mxu1 }
 0x2f9   : > { %20520 = vst [vmem:[#allocation61_spill] sm:$0xff] %v17950_v38  ;;  %v6417_v12 = vpop.f32.mrf.mxu0  ;;  %v17957_v57 = vadd.f32 %v14507_v16, %v5245_v23  ;;  %v5243_v49 = vadd.f32 %v4870_v44, %v20523_v42  ;;  %v15466_v16 = vld [vmem:[%s15677_s24 + $0x80] sm:$0xff]   ;;  %v8444_v23 = vrot.slane %v15325_v55, 2 }
 0x2fa   : > { %v14372_v61 = vpop.f32.mrf.mxu1  ;;  %14607 = vmatmul.mubr.msk.bf16.gmra.mxu1 %vm1217_vm2, %v6900_v11  ;;  %v6903_v58 = vrot.slane %v15466_v16, 2  ;;  %v20527_v11 = vld [vmem:[#allocation85_spill] sm:$0xff] }
 0x2fb   : > { %20522 = vst [vmem:[#allocation63_spill] sm:$0xff] %v17957_v57  ;;  %v14510_v17 = vpop.f32.mrf.mxu0  ;;  %14745 = vmatmul.mubr.msk.bf16.gmra.mxu0 %vm1217_vm2, %v8439_v32  ;;  %v17963_v3 = vadd.f32 %v6417_v12, %v5243_v49  ;;  %v5248_v27 = vadd.f32 %v14372_v61, %v20525_v33  ;;  %14610 = vmatprep.mubr.msk.bf16.mxu1 %vm1217_vm2, %v6902_v45  ;;  %v15467_v32 = vld [vmem:[%s15677_s24 + $0x88] sm:$0xff]   ;;  %v15326_v49 = vld [vmem:[%s15677_s24 + $0xa0] sm:$0xff]   ;;  %v20529_v33 = vld [vmem:[#allocation87_spill] sm:$0xff] }
 0x2fc   : > { %14748 = vmatprep.mubr.msk.bf16.mxu0 %vm1217_vm2, %v8441_v1  ;;  %v4883_v44 = vpop.f32.mrf.mxu1  ;;  %v6905_v42 = vrot.slane %v15467_v32, 2  ;;  %v8443_v12 = vsel %vm6875_vm5, %v8440_v21, %v8442_v20  ;;  %v6904_v16 = vsel %vm6875_vm5, %v6901_v47, %v6903_v58  ;;  %v8445_v55 = vsel %vm6875_vm5, %v8442_v20, %v8444_v23  ;;  %v15327_v32 = vld [vmem:[%s15677_s24 + $0xa8] sm:$0xff]   ;;  %v20533_v20 = vld [vmem:[#allocation91_spill] sm:$0xff] }
 0x2fd   : > { %20524 = vst [vmem:[#allocation65_spill] sm:$0xff] %v17963_v3  ;;  %v6430_v5 = vpop.f32.mrf.mxu0  ;;  %v17969_v57 = vadd.f32 %v14510_v17, %v5248_v27  ;;  %v5246_v1 = vadd.f32 %v4883_v44, %v20527_v11  ;;  %v20531_v11 = vld [vmem:[#allocation89_spill] sm:$0xff]  ;;  %v8446_v47 = vrot.slane %v15326_v49, 2 }
 0x2fe   : > { %v14373_v38 = vpop.f32.mrf.mxu1  ;;  %v6906_v27 = vsel %vm6875_vm5, %v6903_v58, %v6905_v42 }
 0x2ff   : > { %20526 = vst [vmem:[#allocation67_spill] sm:$0xff] %v17969_v57  ;;  %v14511_v34 = vpop.f32.mrf.mxu0  ;;  %v17974_v61 = vadd.f32 %v6430_v5, %v5246_v1  ;;  %v5249_v45 = vadd.f32 %v14373_v38, %v20529_v33 }
 0x300   : > { %v4886_v17 = vpop.f32.mrf.mxu1 }
 0x301   : > { %20528 = vst [vmem:[#allocation69_spill] sm:$0xff] %v17974_v61  ;;  %v6433_v3 = vpop.f32.mrf.mxu0  ;;  %v17981_v44 = vadd.f32 %v14511_v34, %v5249_v45  ;;  %v5247_v21 = vadd.f32 %v4886_v17, %v20531_v11  ;;  %v15468_v34 = vld [vmem:[%s15677_s24 + $0x90] sm:$0xff]   ;;  %v8448_v45 = vrot.slane %v15327_v32, 2 }
 0x302   : > { %v14376_v5 = vpop.f32.mrf.mxu1  ;;  %14611 = vmatmul.mubr.msk.bf16.gmra.mxu1 %vm1217_vm2, %v6904_v16  ;;  %v6907_v33 = vrot.slane %v15468_v34, 2  ;;  %v20535_v16 = vld [vmem:[#allocation93_spill] sm:$0xff] }
 0x303   : > { %20530 = vst [vmem:[#allocation71_spill] sm:$0xff] %v17981_v44  ;;  %v14514_v57 = vpop.f32.mrf.mxu0  ;;  %14749 = vmatmul.mubr.msk.bf16.gmra.mxu0 %vm1217_vm2, %v8443_v12  ;;  %v17987_v38 = vadd.f32 %v6433_v3, %v5247_v21  ;;  %v5252_v1 = vadd.f32 %v14376_v5, %v20533_v20  ;;  %14614 = vmatprep.mubr.msk.bf16.mxu1 %vm1217_vm2, %v6906_v27  ;;  %v15469_v12 = vld [vmem:[%s15677_s24 + $0x98] sm:$0xff]   ;;  %v15328_v21 = vld [vmem:[%s15677_s24 + $0xb0] sm:$0xff]  }
 0x304   : > { %14752 = vmatprep.mubr.msk.bf16.mxu0 %vm1217_vm2, %v8445_v55  ;;  %v4899_v17 = vpop.f32.mrf.mxu1  ;;  %v6909_v11 = vrot.slane %v15469_v12, 2  ;;  %v8447_v3 = vsel %vm6875_vm5, %v8444_v23, %v8446_v47  ;;  %v20537_v20 = vld [vmem:[#allocation95_spill] sm:$0xff]  ;;  %v6908_v34 = vsel %vm6875_vm5, %v6905_v42, %v6907_v33  ;;  %v8449_v32 = vsel %vm6875_vm5, %v8446_v47, %v8448_v45  ;;  %v20541_v47 = vld [vmem:[#allocation5_spill] sm:$0xff] }
 0x305   : > { %20532 = vst [vmem:[#allocation73_spill] sm:$0xff] %v17987_v38  ;;  %v6446_v58 = vpop.f32.mrf.mxu0  ;;  %v17993_v44 = vadd.f32 %v14514_v57, %v5252_v1  ;;  %v5250_v55 = vadd.f32 %v4899_v17, %v20535_v16  ;;  %v15329_v12 = vld [vmem:[%s15677_s24 + $0xb8] sm:$0xff]   ;;  %v20539_v16 = vld [vmem:[#allocation97_spill] sm:$0xff]  ;;  %v8450_v42 = vrot.slane %v15328_v21, 2 }
 0x306   : > { %v14377_v61 = vpop.f32.mrf.mxu1  ;;  %v6910_v1 = vsel %vm6875_vm5, %v6907_v33, %v6909_v11 }
 0x307   : > { %20534 = vst [vmem:[#allocation75_spill] sm:$0xff] %v17993_v44  ;;  %v14515_v49 = vpop.f32.mrf.mxu0  ;;  %v17998_v5 = vadd.f32 %v6446_v58, %v5250_v55  ;;  %v5253_v27 = vadd.f32 %v14377_v61, %v20537_v20 }
 0x308   : > { %v4902_v57 = vpop.f32.mrf.mxu1 }
 0x309   : > { %20536 = vst [vmem:[#allocation77_spill] sm:$0xff] %v17998_v5  ;;  %v6449_v38 = vpop.f32.mrf.mxu0  ;;  %v18005_v17 = vadd.f32 %v14515_v49, %v5253_v27  ;;  %v5251_v23 = vadd.f32 %v4902_v57, %v20539_v16  ;;  %v15470_v49 = vld [vmem:[%s15677_s24 + $0xa0] sm:$0xff]   ;;  %v8452_v27 = vrot.slane %v15329_v12, 2 }
 0x30a   : > { %v14380_v58 = vpop.f32.mrf.mxu1  ;;  %14615 = vmatmul.mubr.msk.bf16.gmra.mxu1 %vm1217_vm2, %v6908_v34  ;;  %v6911_v20 = vrot.slane %v15470_v49, 2  ;;  %v20543_v34 = vld [vmem:[#allocation6_spill] sm:$0xff] }
 0x30b   : > { %20538 = vst [vmem:[#allocation79_spill] sm:$0xff] %v18005_v17  ;;  %v14518_v44 = vpop.f32.mrf.mxu0  ;;  %14753 = vmatmul.mubr.msk.bf16.gmra.mxu0 %vm1217_vm2, %v8447_v3  ;;  %v18011_v61 = vadd.f32 %v6449_v38, %v5251_v23  ;;  %v5256_v55 = vadd.f32 %v14380_v58, %v20541_v47  ;;  %14618 = vmatprep.mubr.msk.bf16.mxu1 %vm1217_vm2, %v6910_v1  ;;  %v15471_v3 = vld [vmem:[%s15677_s24 + $0xa8] sm:$0xff]   ;;  %v15330_v23 = vld [vmem:[%s15677_s24 + $0xc0] sm:$0xff]   ;;  %v20545_v47 = vld [vmem:[#allocation7_spill] sm:$0xff] }
 0x30c   : > { %14756 = vmatprep.mubr.msk.bf16.mxu0 %vm1217_vm2, %v8449_v32  ;;  %v4915_v57 = vpop.f32.mrf.mxu1  ;;  %v6913_v16 = vrot.slane %v15471_v3, 2  ;;  %v8451_v38 = vsel %vm6875_vm5, %v8448_v45, %v8450_v42  ;;  %v6912_v49 = vsel %vm6875_vm5, %v6909_v11, %v6911_v20  ;;  %v8453_v12 = vsel %vm6875_vm5, %v8450_v42, %v8452_v27  ;;  %v15331_v3 = vld [vmem:[%s15677_s24 + $0xc8] sm:$0xff]  }
 0x30d   : > { %20540 = vst [vmem:[#allocation81_spill] sm:$0xff] %v18011_v61  ;;  %v6462_v33 = vpop.f32.mrf.mxu0  ;;  %v18017_v17 = vadd.f32 %v14518_v44, %v5256_v55  ;;  %v5254_v32 = vadd.f32 %v4915_v57, %v20543_v34  ;;  %v20547_v34 = vld [vmem:[#allocation8_spill] sm:$0xff]  ;;  %v8454_v11 = vrot.slane %v15330_v23, 2  ;;  %v20549_v42 = vld [vmem:[#allocation9_spill] sm:$0xff] }
 0x30e   : > { %v14381_v5 = vpop.f32.mrf.mxu1  ;;  %v6914_v55 = vsel %vm6875_vm5, %v6911_v20, %v6913_v16 }
 0x30f   : > { %20542 = vst [vmem:[#allocation83_spill] sm:$0xff] %v18017_v17  ;;  %v14519_v21 = vpop.f32.mrf.mxu0  ;;  %v18022_v58 = vadd.f32 %v6462_v33, %v5254_v32  ;;  %v5257_v1 = vadd.f32 %v14381_v5, %v20545_v47 }
 0x310   : > { %v4918_v44 = vpop.f32.mrf.mxu1 }
 0x311   : > { %20544 = vst [vmem:[#allocation85_spill] sm:$0xff] %v18022_v58  ;;  %v6465_v61 = vpop.f32.mrf.mxu0  ;;  %v18029_v57 = vadd.f32 %v14519_v21, %v5257_v1  ;;  %v5255_v45 = vadd.f32 %v4918_v44, %v20547_v34  ;;  %v15472_v21 = vld [vmem:[%s15677_s24 + $0xb0] sm:$0xff]   ;;  %v8456_v1 = vrot.slane %v15331_v3, 2 }
 0x312   : > { %v14384_v33 = vpop.f32.mrf.mxu1  ;;  %14619 = vmatmul.mubr.msk.bf16.gmra.mxu1 %vm1217_vm2, %v6912_v49  ;;  %v6915_v47 = vrot.slane %v15472_v21, 2  ;;  %v20551_v49 = vld [vmem:[#allocation10_spill] sm:$0xff] }
 0x313   : > { %20546 = vst [vmem:[#allocation87_spill] sm:$0xff] %v18029_v57  ;;  %v14522_v17 = vpop.f32.mrf.mxu0  ;;  %14757 = vmatmul.mubr.msk.bf16.gmra.mxu0 %vm1217_vm2, %v8451_v38  ;;  %v18035_v5 = vadd.f32 %v6465_v61, %v5255_v45  ;;  %v5260_v32 = vadd.f32 %v14384_v33, %v20549_v42  ;;  %14622 = vmatprep.mubr.msk.bf16.mxu1 %vm1217_vm2, %v6914_v55  ;;  %v15473_v38 = vld [vmem:[%s15677_s24 + $0xb8] sm:$0xff]   ;;  %v15332_v45 = vld [vmem:[%s15677_s24 + $0xd0] sm:$0xff]  }
 0x314   : > { %14760 = vmatprep.mubr.msk.bf16.mxu0 %vm1217_vm2, %v8453_v12  ;;  %v4931_v44 = vpop.f32.mrf.mxu1  ;;  %v6917_v34 = vrot.slane %v15473_v38, 2  ;;  %v8455_v61 = vsel %vm6875_vm5, %v8452_v27, %v8454_v11  ;;  %v20553_v42 = vld [vmem:[#allocation11_spill] sm:$0xff]  ;;  %v6916_v21 = vsel %vm6875_vm5, %v6913_v16, %v6915_v47  ;;  %v8457_v3 = vsel %vm6875_vm5, %v8454_v11, %v8456_v1  ;;  %v20557_v11 = vld [vmem:[#allocation13_spill] sm:$0xff] }
 0x315   : > { %20548 = vst [vmem:[#allocation89_spill] sm:$0xff] %v18035_v5  ;;  %v6478_v20 = vpop.f32.mrf.mxu0  ;;  %v18041_v57 = vadd.f32 %v14522_v17, %v5260_v32  ;;  %v5258_v12 = vadd.f32 %v4931_v44, %v20551_v49  ;;  %v15333_v38 = vld [vmem:[%s15677_s24 + $0xd8] sm:$0xff]   ;;  %v8458_v16 = vrot.slane %v15332_v45, 2 }
 0x316   : > { %v14385_v58 = vpop.f32.mrf.mxu1  ;;  %v6918_v32 = vsel %vm6875_vm5, %v6915_v47, %v6917_v34  ;;  %v20555_v49 = vld [vmem:[#allocation12_spill] sm:$0xff] }
 0x317   : > { %20550 = vst [vmem:[#allocation91_spill] sm:$0xff] %v18041_v57  ;;  %v14523_v23 = vpop.f32.mrf.mxu0  ;;  %v18046_v33 = vadd.f32 %v6478_v20, %v5258_v12  ;;  %v5261_v55 = vadd.f32 %v14385_v58, %v20553_v42 }
 0x318   : > { %v4934_v17 = vpop.f32.mrf.mxu1 }
 0x319   : > { %20552 = vst [vmem:[#allocation93_spill] sm:$0xff] %v18046_v33  ;;  %v6481_v5 = vpop.f32.mrf.mxu0  ;;  %v18053_v44 = vadd.f32 %v14523_v23, %v5261_v55  ;;  %v5259_v27 = vadd.f32 %v4934_v17, %v20555_v49  ;;  %v15474_v23 = vld [vmem:[%s15677_s24 + $0xc0] sm:$0xff]   ;;  %v8460_v55 = vrot.slane %v15333_v38, 2 }
 0x31a   : > { %v14388_v20 = vpop.f32.mrf.mxu1  ;;  %14623 = vmatmul.mubr.msk.bf16.gmra.mxu1 %vm1217_vm2, %v6916_v21  ;;  %v6919_v42 = vrot.slane %v15474_v23, 2  ;;  %v20559_v21 = vld [vmem:[#allocation14_spill] sm:$0xff] }
 0x31b   : > { %20554 = vst [vmem:[#allocation95_spill] sm:$0xff] %v18053_v44  ;;  %v14526_v57 = vpop.f32.mrf.mxu0  ;;  %14761 = vmatmul.mubr.msk.bf16.gmra.mxu0 %vm1217_vm2, %v8455_v61  ;;  %v18059_v58 = vadd.f32 %v6481_v5, %v5259_v27  ;;  %v5264_v12 = vadd.f32 %v14388_v20, %v20557_v11  ;;  %14626 = vmatprep.mubr.msk.bf16.mxu1 %vm1217_vm2, %v6918_v32  ;;  %v15475_v61 = vld [vmem:[%s15677_s24 + $0xc8] sm:$0xff]   ;;  %v15334_v27 = vld [vmem:[%s15677_s24 + $0xe0] sm:$0xff]   ;;  %v20561_v11 = vld [vmem:[#allocation15_spill] sm:$0xff] }
 0x31c   : > { %14764 = vmatprep.mubr.msk.bf16.mxu0 %vm1217_vm2, %v8457_v3  ;;  %v4947_v17 = vpop.f32.mrf.mxu1  ;;  %v6921_v49 = vrot.slane %v15475_v61, 2  ;;  %v8459_v5 = vsel %vm6875_vm5, %v8456_v1, %v8458_v16  ;;  %v6920_v23 = vsel %vm6875_vm5, %v6917_v34, %v6919_v42  ;;  %v8461_v38 = vsel %vm6875_vm5, %v8458_v16, %v8460_v55  ;;  %v15335_v61 = vld [vmem:[%s15677_s24 + $0xe8] sm:$0xff]  }
 0x31d   : > { %20556 = vst [vmem:[#allocation97_spill] sm:$0xff] %v18059_v58  ;;  %v6494_v47 = vpop.f32.mrf.mxu0  ;;  %v18065_v44 = vadd.f32 %v14526_v57, %v5264_v12  ;;  %v5262_v3 = vadd.f32 %v4947_v17, %v20559_v21  ;;  %v20563_v21 = vld [vmem:[#allocation16_spill] sm:$0xff]  ;;  %v8462_v34 = vrot.slane %v15334_v27, 2  ;;  %v20565_v16 = vld [vmem:[#allocation17_spill] sm:$0xff] }
 0x31e   : > { %v14389_v33 = vpop.f32.mrf.mxu1  ;;  %v6922_v12 = vsel %vm6875_vm5, %v6919_v42, %v6921_v49 }
 0x31f   : > { %20558 = vst [vmem:[#allocation5_spill] sm:$0xff] %v18065_v44  ;;  %v14527_v45 = vpop.f32.mrf.mxu0  ;;  %v18070_v20 = vadd.f32 %v6494_v47, %v5262_v3  ;;  %v5265_v32 = vadd.f32 %v14389_v33, %v20561_v11 }
 0x320   : > { %v4950_v57 = vpop.f32.mrf.mxu1 }
 0x321   : > { %20560 = vst [vmem:[#allocation6_spill] sm:$0xff] %v18070_v20  ;;  %v6497_v58 = vpop.f32.mrf.mxu0  ;;  %v18077_v17 = vadd.f32 %v14527_v45, %v5265_v32  ;;  %v5263_v1 = vadd.f32 %v4950_v57, %v20563_v21  ;;  %v15476_v45 = vld [vmem:[%s15677_s24 + $0xd0] sm:$0xff]   ;;  %v8464_v32 = vrot.slane %v15335_v61, 2 }
 0x322   : > { %v14392_v47 = vpop.f32.mrf.mxu1  ;;  %14627 = vmatmul.mubr.msk.bf16.gmra.mxu1 %vm1217_vm2, %v6920_v23  ;;  %v6923_v11 = vrot.slane %v15476_v45, 2  ;;  %v20567_v23 = vld [vmem:[#allocation18_spill] sm:$0xff] }
 0x323   : > { %20562 = vst [vmem:[#allocation7_spill] sm:$0xff] %v18077_v17  ;;  %v14530_v44 = vpop.f32.mrf.mxu0  ;;  %14765 = vmatmul.mubr.msk.bf16.gmra.mxu0 %vm1217_vm2, %v8459_v5  ;;  %v18083_v33 = vadd.f32 %v6497_v58, %v5263_v1  ;;  %v5268_v3 = vadd.f32 %v14392_v47, %v20565_v16  ;;  %14630 = vmatprep.mubr.msk.bf16.mxu1 %vm1217_vm2, %v6922_v12  ;;  %v15477_v5 = vld [vmem:[%s15677_s24 + $0xd8] sm:$0xff]   ;;  %v15336_v1 = vld [vmem:[%s15677_s24 + $0xf0] sm:$0xff]  }
 0x324   : > { %14768 = vmatprep.mubr.msk.bf16.mxu0 %vm1217_vm2, %v8461_v38  ;;  %v4963_v57 = vpop.f32.mrf.mxu1  ;;  %v6925_v21 = vrot.slane %v15477_v5, 2  ;;  %v8463_v58 = vsel %vm6875_vm5, %v8460_v55, %v8462_v34  ;;  %v20569_v16 = vld [vmem:[#allocation19_spill] sm:$0xff]  ;;  %v6924_v45 = vsel %vm6875_vm5, %v6921_v49, %v6923_v11  ;;  %v8465_v61 = vsel %vm6875_vm5, %v8462_v34, %v8464_v32  ;;  %v20573_v34 = vld [vmem:[#allocation21_spill] sm:$0xff] }
 0x325   : > { %20564 = vst [vmem:[#allocation8_spill] sm:$0xff] %v18083_v33  ;;  %v6510_v42 = vpop.f32.mrf.mxu0  ;;  %v18089_v17 = vadd.f32 %v14530_v44, %v5268_v3  ;;  %v5266_v38 = vadd.f32 %v4963_v57, %v20567_v23  ;;  %v15337_v5 = vld [vmem:[%s15677_s24 + $0xf8] sm:$0xff]   ;;  %v8466_v49 = vrot.slane %v15336_v1, 2 }
 0x326   : > { %v14393_v20 = vpop.f32.mrf.mxu1  ;;  %v6926_v3 = vsel %vm6875_vm5, %v6923_v11, %v6925_v21  ;;  %v20571_v23 = vld [vmem:[#allocation20_spill] sm:$0xff] }
 0x327   : > { %20566 = vst [vmem:[#allocation9_spill] sm:$0xff] %v18089_v17  ;;  %v14531_v27 = vpop.f32.mrf.mxu0  ;;  %v18094_v47 = vadd.f32 %v6510_v42, %v5266_v38  ;;  %v5269_v12 = vadd.f32 %v14393_v20, %v20569_v16 }
 0x328   : > { %v4966_v44 = vpop.f32.mrf.mxu1 }
 0x329   : > { %20568 = vst [vmem:[#allocation10_spill] sm:$0xff] %v18094_v47  ;;  %v6513_v33 = vpop.f32.mrf.mxu0  ;;  %v18101_v57 = vadd.f32 %v14531_v27, %v5269_v12  ;;  %v5267_v55 = vadd.f32 %v4966_v44, %v20571_v23  ;;  %v15478_v27 = vld [vmem:[%s15677_s24 + $0xe0] sm:$0xff]   ;;  %v8468_v12 = vrot.slane %v15337_v5, 2 }
 0x32a   : > { %v14396_v42 = vpop.f32.mrf.mxu1  ;;  %14631 = vmatmul.mubr.msk.bf16.gmra.mxu1 %vm1217_vm2, %v6924_v45  ;;  %v6927_v16 = vrot.slane %v15478_v27, 2  ;;  %v20575_v45 = vld [vmem:[#allocation22_spill] sm:$0xff] }
 0x32b   : > { %20570 = vst [vmem:[#allocation11_spill] sm:$0xff] %v18101_v57  ;;  %v14534_v17 = vpop.f32.mrf.mxu0  ;;  %14769 = vmatmul.mubr.msk.bf16.gmra.mxu0 %vm1217_vm2, %v8463_v58  ;;  %v18107_v20 = vadd.f32 %v6513_v33, %v5267_v55  ;;  %v5272_v38 = vadd.f32 %v14396_v42, %v20573_v34  ;;  %14634 = vmatprep.mubr.msk.bf16.mxu1 %vm1217_vm2, %v6926_v3  ;;  %v15479_v58 = vld [vmem:[%s15677_s24 + $0xe8] sm:$0xff]   ;;  %v15338_v55 = vld [vmem:[%s15677_s24 + $0x100] sm:$0xff]   ;;  %v20577_v34 = vld [vmem:[#allocation23_spill] sm:$0xff] }
 0x32c   : > { %14772 = vmatprep.mubr.msk.bf16.mxu0 %vm1217_vm2, %v8465_v61  ;;  %v4979_v44 = vpop.f32.mrf.mxu1  ;;  %v6929_v23 = vrot.slane %v15479_v58, 2  ;;  %v8467_v33 = vsel %vm6875_vm5, %v8464_v32, %v8466_v49  ;;  %v6928_v27 = vsel %vm6875_vm5, %v6925_v21, %v6927_v16  ;;  %v8469_v5 = vsel %vm6875_vm5, %v8466_v49, %v8468_v12  ;;  %v15339_v58 = vld [vmem:[%s15677_s24 + $0x108] sm:$0xff]  }
 0x32d   : > { %20572 = vst [vmem:[#allocation12_spill] sm:$0xff] %v18107_v20  ;;  %v6526_v11 = vpop.f32.mrf.mxu0  ;;  %v18113_v57 = vadd.f32 %v14534_v17, %v5272_v38  ;;  %v5270_v61 = vadd.f32 %v4979_v44, %v20575_v45  ;;  %v20579_v45 = vld [vmem:[#allocation24_spill] sm:$0xff]  ;;  %v8470_v21 = vrot.slane %v15338_v55, 2  ;;  %v20581_v49 = vld [vmem:[#allocation25_spill] sm:$0xff] }
 0x32e   : > { %v14397_v47 = vpop.f32.mrf.mxu1  ;;  %v6930_v38 = vsel %vm6875_vm5, %v6927_v16, %v6929_v23 }
 0x32f   : > { %20574 = vst [vmem:[#allocation13_spill] sm:$0xff] %v18113_v57  ;;  %v14535_v1 = vpop.f32.mrf.mxu0  ;;  %v18118_v42 = vadd.f32 %v6526_v11, %v5270_v61  ;;  %v5273_v3 = vadd.f32 %v14397_v47, %v20577_v34 }
 0x330   : > { %v4982_v17 = vpop.f32.mrf.mxu1 }
 0x331   : > { %20576 = vst [vmem:[#allocation14_spill] sm:$0xff] %v18118_v42  ;;  %v6529_v20 = vpop.f32.mrf.mxu0  ;;  %v18125_v44 = vadd.f32 %v14535_v1, %v5273_v3  ;;  %v5271_v32 = vadd.f32 %v4982_v17, %v20579_v45  ;;  %v15480_v1 = vld [vmem:[%s15677_s24 + $0xf0] sm:$0xff]   ;;  %v8472_v3 = vrot.slane %v15339_v58, 2 }
 0x332   : > { %v14400_v11 = vpop.f32.mrf.mxu1  ;;  %14635 = vmatmul.mubr.msk.bf16.gmra.mxu1 %vm1217_vm2, %v6928_v27  ;;  %v6931_v34 = vrot.slane %v15480_v1, 2  ;;  %v20583_v27 = vld [vmem:[#allocation26_spill] sm:$0xff] }
 0x333   : > { %20578 = vst [vmem:[#allocation15_spill] sm:$0xff] %v18125_v44  ;;  %v14538_v57 = vpop.f32.mrf.mxu0  ;;  %14773 = vmatmul.mubr.msk.bf16.gmra.mxu0 %vm1217_vm2, %v8467_v33  ;;  %v18131_v47 = vadd.f32 %v6529_v20, %v5271_v32  ;;  %v5276_v61 = vadd.f32 %v14400_v11, %v20581_v49  ;;  %14638 = vmatprep.mubr.msk.bf16.mxu1 %vm1217_vm2, %v6930_v38  ;;  %v15481_v33 = vld [vmem:[%s15677_s24 + $0xf8] sm:$0xff]   ;;  %v15340_v32 = vld [vmem:[%s15677_s24 + $0x110] sm:$0xff]  }
 0x334   : > { %14776 = vmatprep.mubr.msk.bf16.mxu0 %vm1217_vm2, %v8469_v5  ;;  %v4995_v17 = vpop.f32.mrf.mxu1  ;;  %v6933_v45 = vrot.slane %v15481_v33, 2  ;;  %v8471_v20 = vsel %vm6875_vm5, %v8468_v12, %v8470_v21  ;;  %v20585_v49 = vld [vmem:[#allocation27_spill] sm:$0xff]  ;;  %v6932_v1 = vsel %vm6875_vm5, %v6929_v23, %v6931_v34  ;;  %v8473_v58 = vsel %vm6875_vm5, %v8470_v21, %v8472_v3  ;;  %v20589_v21 = vld [vmem:[#allocation29_spill] sm:$0xff] }
 0x335   : > { %20580 = vst [vmem:[#allocation16_spill] sm:$0xff] %v18131_v47  ;;  %v6542_v16 = vpop.f32.mrf.mxu0  ;;  %v18137_v44 = vadd.f32 %v14538_v57, %v5276_v61  ;;  %v5274_v5 = vadd.f32 %v4995_v17, %v20583_v27  ;;  %v15341_v33 = vld [vmem:[%s15677_s24 + $0x118] sm:$0xff]   ;;  %v8474_v23 = vrot.slane %v15340_v32, 2 }
 0x336   : > { %v14401_v42 = vpop.f32.mrf.mxu1  ;;  %v6934_v61 = vsel %vm6875_vm5, %v6931_v34, %v6933_v45  ;;  %v20587_v27 = vld [vmem:[#allocation28_spill] sm:$0xff] }
 0x337   : > { %20582 = vst [vmem:[#allocation17_spill] sm:$0xff] %v18137_v44  ;;  %v14539_v55 = vpop.f32.mrf.mxu0  ;;  %v18142_v11 = vadd.f32 %v6542_v16, %v5274_v5  ;;  %v5277_v38 = vadd.f32 %v14401_v42, %v20585_v49 }
 0x338   : > { %v4998_v57 = vpop.f32.mrf.mxu1 }
 0x339   : > { %20584 = vst [vmem:[#allocation18_spill] sm:$0xff] %v18142_v11  ;;  %v6545_v47 = vpop.f32.mrf.mxu0  ;;  %v18149_v17 = vadd.f32 %v14539_v55, %v5277_v38  ;;  %v5275_v12 = vadd.f32 %v4998_v57, %v20587_v27  ;;  %v15482_v55 = vld [vmem:[%s15677_s24 + $0x100] sm:$0xff]   ;;  %v8476_v38 = vrot.slane %v15341_v33, 2 }
 0x33a   : > { %v14404_v16 = vpop.f32.mrf.mxu1  ;;  %14639 = vmatmul.mubr.msk.bf16.gmra.mxu1 %vm1217_vm2, %v6932_v1  ;;  %v6935_v49 = vrot.slane %v15482_v55, 2  ;;  %v20591_v1 = vld [vmem:[#allocation30_spill] sm:$0xff] }
 0x33b   : > { %20586 = vst [vmem:[#allocation19_spill] sm:$0xff] %v18149_v17  ;;  %v14542_v44 = vpop.f32.mrf.mxu0  ;;  %14777 = vmatmul.mubr.msk.bf16.gmra.mxu0 %vm1217_vm2, %v8471_v20  ;;  %v18155_v42 = vadd.f32 %v6545_v47, %v5275_v12  ;;  %v5280_v5 = vadd.f32 %v14404_v16, %v20589_v21  ;;  %14642 = vmatprep.mubr.msk.bf16.mxu1 %vm1217_vm2, %v6934_v61  ;;  %v15483_v20 = vld [vmem:[%s15677_s24 + $0x108] sm:$0xff]   ;;  %v15342_v12 = vld [vmem:[%s15677_s24 + $0x120] sm:$0xff]   ;;  %v20593_v21 = vld [vmem:[#allocation31_spill] sm:$0xff] }
 0x33c   : > { %14780 = vmatprep.mubr.msk.bf16.mxu0 %vm1217_vm2, %v8473_v58  ;;  %v5011_v57 = vpop.f32.mrf.mxu1  ;;  %v6937_v27 = vrot.slane %v15483_v20, 2  ;;  %v8475_v47 = vsel %vm6875_vm5, %v8472_v3, %v8474_v23  ;;  %v6936_v55 = vsel %vm6875_vm5, %v6933_v45, %v6935_v49  ;;  %v8477_v33 = vsel %vm6875_vm5, %v8474_v23, %v8476_v38  ;;  %v15343_v20 = vld [vmem:[%s15677_s24 + $0x128] sm:$0xff]  }
 0x33d   : > { %20588 = vst [vmem:[#allocation20_spill] sm:$0xff] %v18155_v42  ;;  %v6558_v34 = vpop.f32.mrf.mxu0  ;;  %v18161_v17 = vadd.f32 %v14542_v44, %v5280_v5  ;;  %v5278_v58 = vadd.f32 %v5011_v57, %v20591_v1  ;;  %v20595_v1 = vld [vmem:[#allocation32_spill] sm:$0xff]  ;;  %v8478_v45 = vrot.slane %v15342_v12, 2  ;;  %v20597_v23 = vld [vmem:[#allocation33_spill] sm:$0xff] }
 0x33e   : > { %v14405_v11 = vpop.f32.mrf.mxu1  ;;  %v6938_v5 = vsel %vm6875_vm5, %v6935_v49, %v6937_v27 }
 0x33f   : > { %20590 = vst [vmem:[#allocation21_spill] sm:$0xff] %v18161_v17  ;;  %v14543_v32 = vpop.f32.mrf.mxu0  ;;  %v18166_v16 = vadd.f32 %v6558_v34, %v5278_v58  ;;  %v5281_v61 = vadd.f32 %v14405_v11, %v20593_v21 }
 0x340   : > { %v5014_v44 = vpop.f32.mrf.mxu1 }
 0x341   : > { %20592 = vst [vmem:[#allocation22_spill] sm:$0xff] %v18166_v16  ;;  %v6561_v42 = vpop.f32.mrf.mxu0  ;;  %v18173_v57 = vadd.f32 %v14543_v32, %v5281_v61  ;;  %v5279_v3 = vadd.f32 %v5014_v44, %v20595_v1  ;;  %v15484_v32 = vld [vmem:[%s15677_s24 + $0x110] sm:$0xff]   ;;  %v8480_v61 = vrot.slane %v15343_v20, 2 }
 0x342   : > { %v14408_v34 = vpop.f32.mrf.mxu1  ;;  %14643 = vmatmul.mubr.msk.bf16.gmra.mxu1 %vm1217_vm2, %v6936_v55  ;;  %v6939_v21 = vrot.slane %v15484_v32, 2  ;;  %v20599_v55 = vld [vmem:[#allocation34_spill] sm:$0xff] }
 0x343   : > { %20594 = vst [vmem:[#allocation23_spill] sm:$0xff] %v18173_v57  ;;  %v14546_v17 = vpop.f32.mrf.mxu0  ;;  %14781 = vmatmul.mubr.msk.bf16.gmra.mxu0 %vm1217_vm2, %v8475_v47  ;;  %v18179_v11 = vadd.f32 %v6561_v42, %v5279_v3  ;;  %v5284_v58 = vadd.f32 %v14408_v34, %v20597_v23  ;;  %14646 = vmatprep.mubr.msk.bf16.mxu1 %vm1217_vm2, %v6938_v5  ;;  %v15485_v47 = vld [vmem:[%s15677_s24 + $0x118] sm:$0xff]   ;;  %v15344_v3 = vld [vmem:[%s15677_s24 + $0x130] sm:$0xff]  }
 0x344   : > { %14784 = vmatprep.mubr.msk.bf16.mxu0 %vm1217_vm2, %v8477_v33  ;;  %v5027_v44 = vpop.f32.mrf.mxu1  ;;  %v6941_v1 = vrot.slane %v15485_v47, 2  ;;  %v8479_v42 = vsel %vm6875_vm5, %v8476_v38, %v8478_v45  ;;  %v20601_v23 = vld [vmem:[#allocation35_spill] sm:$0xff]  ;;  %v6940_v32 = vsel %vm6875_vm5, %v6937_v27, %v6939_v21  ;;  %v8481_v20 = vsel %vm6875_vm5, %v8478_v45, %v8480_v61  ;;  %v20605_v45 = vld [vmem:[#allocation37_spill] sm:$0xff] }
 0x345   : > { %20596 = vst [vmem:[#allocation24_spill] sm:$0xff] %v18179_v11  ;;  %v6574_v49 = vpop.f32.mrf.mxu0  ;;  %v18185_v57 = vadd.f32 %v14546_v17, %v5284_v58  ;;  %v5282_v33 = vadd.f32 %v5027_v44, %v20599_v55  ;;  %v15345_v47 = vld [vmem:[%s15677_s24 + $0x138] sm:$0xff]   ;;  %v8482_v27 = vrot.slane %v15344_v3, 2 }
 0x346   : > { %v14409_v16 = vpop.f32.mrf.mxu1  ;;  %v6942_v58 = vsel %vm6875_vm5, %v6939_v21, %v6941_v1  ;;  %v20603_v55 = vld [vmem:[#allocation36_spill] sm:$0xff] }
 0x347   : > { %20598 = vst [vmem:[#allocation25_spill] sm:$0xff] %v18185_v57  ;;  %v14547_v12 = vpop.f32.mrf.mxu0  ;;  %v18190_v34 = vadd.f32 %v6574_v49, %v5282_v33  ;;  %v5285_v5 = vadd.f32 %v14409_v16, %v20601_v23 }
 0x348   : > { %v5030_v17 = vpop.f32.mrf.mxu1 }
 0x349   : > { %20600 = vst [vmem:[#allocation26_spill] sm:$0xff] %v18190_v34  ;;  %v6577_v11 = vpop.f32.mrf.mxu0  ;;  %v18197_v44 = vadd.f32 %v14547_v12, %v5285_v5  ;;  %v5283_v38 = vadd.f32 %v5030_v17, %v20603_v55  ;;  %v15486_v12 = vld [vmem:[%s15677_s24 + $0x120] sm:$0xff]   ;;  %v8484_v5 = vrot.slane %v15345_v47, 2 }
 0x34a   : > { %v14412_v49 = vpop.f32.mrf.mxu1  ;;  %14647 = vmatmul.mubr.msk.bf16.gmra.mxu1 %vm1217_vm2, %v6940_v32  ;;  %v6943_v23 = vrot.slane %v15486_v12, 2  ;;  %v20607_v32 = vld [vmem:[#allocation38_spill] sm:$0xff] }
 0x34b   : > { %20602 = vst [vmem:[#allocation27_spill] sm:$0xff] %v18197_v44  ;;  %v14550_v57 = vpop.f32.mrf.mxu0  ;;  %14785 = vmatmul.mubr.msk.bf16.gmra.mxu0 %vm1217_vm2, %v8479_v42  ;;  %v18203_v16 = vadd.f32 %v6577_v11, %v5283_v38  ;;  %v5288_v33 = vadd.f32 %v14412_v49, %v20605_v45  ;;  %14650 = vmatprep.mubr.msk.bf16.mxu1 %vm1217_vm2, %v6942_v58  ;;  %v15487_v42 = vld [vmem:[%s15677_s24 + $0x128] sm:$0xff]   ;;  %v15346_v38 = vld [vmem:[%s15677_s24 + $0x140] sm:$0xff]   ;;  %v20609_v45 = vld [vmem:[#allocation39_spill] sm:$0xff] }
 0x34c   : > { %14788 = vmatprep.mubr.msk.bf16.mxu0 %vm1217_vm2, %v8481_v20  ;;  %v5043_v17 = vpop.f32.mrf.mxu1  ;;  %v6945_v55 = vrot.slane %v15487_v42, 2  ;;  %v8483_v11 = vsel %vm6875_vm5, %v8480_v61, %v8482_v27  ;;  %v6944_v12 = vsel %vm6875_vm5, %v6941_v1, %v6943_v23  ;;  %v8485_v47 = vsel %vm6875_vm5, %v8482_v27, %v8484_v5  ;;  %v15347_v42 = vld [vmem:[%s15677_s24 + $0x148] sm:$0xff]  }
 0x34d   : > { %20604 = vst [vmem:[#allocation28_spill] sm:$0xff] %v18203_v16  ;;  %v6590_v21 = vpop.f32.mrf.mxu0  ;;  %v18209_v44 = vadd.f32 %v14550_v57, %v5288_v33  ;;  %v5286_v20 = vadd.f32 %v5043_v17, %v20607_v32  ;;  %v20611_v32 = vld [vmem:[#allocation40_spill] sm:$0xff]  ;;  %v8486_v1 = vrot.slane %v15346_v38, 2  ;;  %v20613_v27 = vld [vmem:[#allocation41_spill] sm:$0xff] }
 0x34e   : > { %v14413_v34 = vpop.f32.mrf.mxu1  ;;  %v6946_v33 = vsel %vm6875_vm5, %v6943_v23, %v6945_v55 }
 0x34f   : > { %20606 = vst [vmem:[#allocation29_spill] sm:$0xff] %v18209_v44  ;;  %v14551_v3 = vpop.f32.mrf.mxu0  ;;  %v18214_v49 = vadd.f32 %v6590_v21, %v5286_v20  ;;  %v5289_v58 = vadd.f32 %v14413_v34, %v20609_v45 }
 0x350   : > { %v5046_v57 = vpop.f32.mrf.mxu1 }
 0x351   : > { %20608 = vst [vmem:[#allocation30_spill] sm:$0xff] %v18214_v49  ;;  %v6593_v16 = vpop.f32.mrf.mxu0  ;;  %v18221_v17 = vadd.f32 %v14551_v3, %v5289_v58  ;;  %v5287_v61 = vadd.f32 %v5046_v57, %v20611_v32  ;;  %v15488_v3 = vld [vmem:[%s15677_s24 + $0x130] sm:$0xff]   ;;  %v8488_v58 = vrot.slane %v15347_v42, 2 }
 0x352   : > { %v14416_v21 = vpop.f32.mrf.mxu1  ;;  %14651 = vmatmul.mubr.msk.bf16.gmra.mxu1 %vm1217_vm2, %v6944_v12  ;;  %v6947_v45 = vrot.slane %v15488_v3, 2  ;;  %v20615_v12 = vld [vmem:[#allocation42_spill] sm:$0xff] }
 0x353   : > { %20610 = vst [vmem:[#allocation31_spill] sm:$0xff] %v18221_v17  ;;  %v14554_v44 = vpop.f32.mrf.mxu0  ;;  %14789 = vmatmul.mubr.msk.bf16.gmra.mxu0 %vm1217_vm2, %v8483_v11  ;;  %v18227_v34 = vadd.f32 %v6593_v16, %v5287_v61  ;;  %v5292_v20 = vadd.f32 %v14416_v21, %v20613_v27  ;;  %14654 = vmatprep.mubr.msk.bf16.mxu1 %vm1217_vm2, %v6946_v33  ;;  %v15489_v11 = vld [vmem:[%s15677_s24 + $0x138] sm:$0xff]   ;;  %v15348_v61 = vld [vmem:[%s15677_s24 + $0x150] sm:$0xff]  }
 0x354   : > { %14792 = vmatprep.mubr.msk.bf16.mxu0 %vm1217_vm2, %v8485_v47  ;;  %v5059_v57 = vpop.f32.mrf.mxu1  ;;  %v6949_v32 = vrot.slane %v15489_v11, 2  ;;  %v8487_v16 = vsel %vm6875_vm5, %v8484_v5, %v8486_v1  ;;  %v20617_v27 = vld [vmem:[#allocation43_spill] sm:$0xff]  ;;  %v6948_v3 = vsel %vm6875_vm5, %v6945_v55, %v6947_v45  ;;  %v8489_v42 = vsel %vm6875_vm5, %v8486_v1, %v8488_v58  ;;  %v20621_v1 = vld [vmem:[#allocation45_spill] sm:$0xff] }
 0x355   : > { %20612 = vst [vmem:[#allocation32_spill] sm:$0xff] %v18227_v34  ;;  %v6606_v23 = vpop.f32.mrf.mxu0  ;;  %v18233_v17 = vadd.f32 %v14554_v44, %v5292_v20  ;;  %v5290_v47 = vadd.f32 %v5059_v57, %v20615_v12  ;;  %v15349_v11 = vld [vmem:[%s15677_s24 + $0x158] sm:$0xff]   ;;  %v8490_v55 = vrot.slane %v15348_v61, 2 }
 0x356   : > { %v14417_v49 = vpop.f32.mrf.mxu1  ;;  %v6950_v20 = vsel %vm6875_vm5, %v6947_v45, %v6949_v32  ;;  %v20619_v12 = vld [vmem:[#allocation44_spill] sm:$0xff] }
 0x357   : > { %20614 = vst [vmem:[#allocation33_spill] sm:$0xff] %v18233_v17  ;;  %v14555_v38 = vpop.f32.mrf.mxu0  ;;  %v18238_v21 = vadd.f32 %v6606_v23, %v5290_v47  ;;  %v5293_v33 = vadd.f32 %v14417_v49, %v20617_v27 }
 0x358   : > { %v5062_v44 = vpop.f32.mrf.mxu1 }
 0x359   : > { %20616 = vst [vmem:[#allocation34_spill] sm:$0xff] %v18238_v21  ;;  %v6609_v34 = vpop.f32.mrf.mxu0  ;;  %v18245_v57 = vadd.f32 %v14555_v38, %v5293_v33  ;;  %v5291_v5 = vadd.f32 %v5062_v44, %v20619_v12  ;;  %v15490_v38 = vld [vmem:[%s15677_s24 + $0x140] sm:$0xff]   ;;  %v8492_v33 = vrot.slane %v15349_v11, 2 }
 0x35a   : > { %v14420_v23 = vpop.f32.mrf.mxu1  ;;  %14655 = vmatmul.mubr.msk.bf16.gmra.mxu1 %vm1217_vm2, %v6948_v3  ;;  %v6951_v27 = vrot.slane %v15490_v38, 2  ;;  %v20623_v3 = vld [vmem:[#allocation46_spill] sm:$0xff] }
 0x35b   : > { %20618 = vst [vmem:[#allocation35_spill] sm:$0xff] %v18245_v57  ;;  %v14558_v17 = vpop.f32.mrf.mxu0  ;;  %14793 = vmatmul.mubr.msk.bf16.gmra.mxu0 %vm1217_vm2, %v8487_v16  ;;  %v18251_v49 = vadd.f32 %v6609_v34, %v5291_v5  ;;  %v5296_v47 = vadd.f32 %v14420_v23, %v20621_v1  ;;  %14658 = vmatprep.mubr.msk.bf16.mxu1 %vm1217_vm2, %v6950_v20  ;;  %v15491_v16 = vld [vmem:[%s15677_s24 + $0x148] sm:$0xff]   ;;  %v15350_v5 = vld [vmem:[%s15677_s24 + $0x160] sm:$0xff]  }
 0x35c   : > { %14796 = vmatprep.mubr.msk.bf16.mxu0 %vm1217_vm2, %v8489_v42  ;;  %v5075_v44 = vpop.f32.mrf.mxu1  ;;  %v6953_v12 = vrot.slane %v15491_v16, 2  ;;  %v8491_v34 = vsel %vm6875_vm5, %v8488_v58, %v8490_v55  ;;  %v20624_v1 = vld [vmem:[#allocation48_spill] sm:$0xff]  ;;  %v6952_v38 = vsel %vm6875_vm5, %v6949_v32, %v6951_v27  ;;  %v8493_v11 = vsel %vm6875_vm5, %v8490_v55, %v8492_v33  ;;  %v15351_v16 = vld [vmem:[%s15677_s24 + $0x168] sm:$0xff]  }
 0x35d   : > { %20620 = vst [vmem:[#allocation36_spill] sm:$0xff] %v18251_v49  ;;  %v6622_v45 = vpop.f32.mrf.mxu0  ;;  %v18257_v57 = vadd.f32 %v14558_v17, %v5296_v47  ;;  %v5294_v42 = vadd.f32 %v5075_v44, %v20623_v3  ;;  %v20626_v3 = vld [vmem:[#allocation50_spill] sm:$0xff]  ;;  %v8494_v32 = vrot.slane %v15350_v5, 2  ;;  %v20628_v55 = vld [vmem:[#allocation52_spill] sm:$0xff] }
 0x35e   : > { %v14421_v21 = vpop.f32.mrf.mxu1  ;;  %v6954_v47 = vsel %vm6875_vm5, %v6951_v27, %v6953_v12 }
 0x35f   : > { %20622 = vst [vmem:[#allocation37_spill] sm:$0xff] %v18257_v57  ;;  %v14559_v61 = vpop.f32.mrf.mxu0  ;;  %v18262_v23 = vadd.f32 %v6622_v45, %v5294_v42  ;;  %v5297_v20 = vadd.f32 %v14421_v21, %v20624_v1 }
 0x360   : > { %v5078_v17 = vpop.f32.mrf.mxu1 }
 0x361   : > { %v6625_v49 = vpop.f32.mrf.mxu0  ;;  %v18269_v44 = vadd.f32 %v14559_v61, %v5297_v20  ;;  %v5295_v58 = vadd.f32 %v5078_v17, %v20626_v3  ;;  %v15492_v61 = vld [vmem:[%s15677_s24 + $0x150] sm:$0xff]   ;;  %v8496_v20 = vrot.slane %v15351_v16, 2 }
 0x362   : > { %v14424_v45 = vpop.f32.mrf.mxu1  ;;  %14659 = vmatmul.mubr.msk.bf16.gmra.mxu1 %vm1217_vm2, %v6952_v38  ;;  %v6955_v1 = vrot.slane %v15492_v61, 2 }
 0x363   : > { %20625 = vst [vmem:[#allocation38_spill] sm:$0xff] %v18269_v44  ;;  %v14562_v57 = vpop.f32.mrf.mxu0  ;;  %14797 = vmatmul.mubr.msk.bf16.gmra.mxu0 %vm1217_vm2, %v8491_v34  ;;  %v18275_v21 = vadd.f32 %v6625_v49, %v5295_v58  ;;  %v5300_v42 = vadd.f32 %v14424_v45, %v20628_v55  ;;  %14662 = vmatprep.mubr.msk.bf16.mxu1 %vm1217_vm2, %v6954_v47  ;;  %v15493_v34 = vld [vmem:[%s15677_s24 + $0x158] sm:$0xff]   ;;  %v15352_v58 = vld [vmem:[%s15677_s24 + $0x170] sm:$0xff]  }
 0x364   : > { %14800 = vmatprep.mubr.msk.bf16.mxu0 %vm1217_vm2, %v8493_v11  ;;  %v5091_v17 = vpop.f32.mrf.mxu1  ;;  %v6957_v3 = vrot.slane %v15493_v34, 2  ;;  %v8495_v49 = vsel %vm6875_vm5, %v8492_v33, %v8494_v32  ;;  %v20631_v55 = vld [vmem:[#allocation54_spill] sm:$0xff]  ;;  %v6956_v61 = vsel %vm6875_vm5, %v6953_v12, %v6955_v1  ;;  %v8497_v16 = vsel %vm6875_vm5, %v8494_v32, %v8496_v20  ;;  %v15353_v34 = vld [vmem:[%s15677_s24 + $0x178] sm:$0xff]  }
 0x365   : > { %20627 = vst [vmem:[#allocation39_spill] sm:$0xff] %v18275_v21  ;;  %v6638_v27 = vpop.f32.mrf.mxu0  ;;  %v18281_v44 = vadd.f32 %v14562_v57, %v5300_v42  ;;  %v5298_v38 = vadd.f32 %v5091_v17, %v17362_v62  ;;  %v20633_v17 = vld [vmem:[#allocation56_spill] sm:$0xff]  ;;  %v8498_v12 = vrot.slane %v15352_v58, 2 }
 0x366   : > { %v14425_v11 = vpop.f32.mrf.mxu1  ;;  %v6958_v42 = vsel %vm6875_vm5, %v6955_v1, %v6957_v3 }
 0x367   : > { %20629 = vst [vmem:[#allocation40_spill] sm:$0xff] %v18281_v44  ;;  %v14563_v5 = vpop.f32.mrf.mxu0  ;;  %v18286_v45 = vadd.f32 %v6638_v27, %v5298_v38  ;;  %v5301_v47 = vadd.f32 %v14425_v11, %v20631_v55  ;;  %v20635_v38 = vld [vmem:[#allocation58_spill] sm:$0xff] }
 0x368   : > { %v5094_v57 = vpop.f32.mrf.mxu1 }
 0x369   : > { %20630 = vst [vmem:[#allocation41_spill] sm:$0xff] %v18286_v45  ;;  %v6641_v21 = vpop.f32.mrf.mxu0  ;;  %v18293_v62 = vadd.f32 %v14563_v5, %v5301_v47  ;;  %v5299_v33 = vadd.f32 %v5094_v57, %v20633_v17  ;;  %v15494_v5 = vld [vmem:[%s15677_s24 + $0x160] sm:$0xff]   ;;  %v8500_v47 = vrot.slane %v15353_v34, 2 }
 0x36a   : > { %v14428_v27 = vpop.f32.mrf.mxu1  ;;  %14663 = vmatmul.mubr.msk.bf16.gmra.mxu1 %vm1217_vm2, %v6956_v61  ;;  %v6959_v55 = vrot.slane %v15494_v5, 2  ;;  %v20637_v61 = vld [vmem:[#allocation60_spill] sm:$0xff] }
 0x36b   : > { %20632 = vst [vmem:[#allocation42_spill] sm:$0xff] %v18293_v62  ;;  %v14566_v44 = vpop.f32.mrf.mxu0  ;;  %14801 = vmatmul.mubr.msk.bf16.gmra.mxu0 %vm1217_vm2, %v8495_v49  ;;  %v18299_v32 = vadd.f32 %v6641_v21, %v5299_v33  ;;  %v5304_v11 = vadd.f32 %v14428_v27, %v20635_v38  ;;  %14666 = vmatprep.mubr.msk.bf16.mxu1 %vm1217_vm2, %v6958_v42  ;;  %v15495_v49 = vld [vmem:[%s15677_s24 + $0x168] sm:$0xff]   ;;  %v15354_v33 = vld [vmem:[%s15677_s24 + $0x180] sm:$0xff]  }
 0x36c   : > { %14804 = vmatprep.mubr.msk.bf16.mxu0 %vm1217_vm2, %v8497_v16  ;;  %v5107_v57 = vpop.f32.mrf.mxu1  ;;  %v6961_v17 = vrot.slane %v15495_v49, 2  ;;  %v8499_v21 = vsel %vm6875_vm5, %v8496_v20, %v8498_v12  ;;  %v20639_v38 = vld [vmem:[#allocation62_spill] sm:$0xff]  ;;  %v6960_v5 = vsel %vm6875_vm5, %v6957_v3, %v6959_v55  ;;  %v8501_v34 = vsel %vm6875_vm5, %v8498_v12, %v8500_v47 }
 0x36d   : > { %20634 = vst [vmem:[#allocation43_spill] sm:$0xff] %v18299_v32  ;;  %v6654_v1 = vpop.f32.mrf.mxu0  ;;  %v18305_v62 = vadd.f32 %v14566_v44, %v5304_v11  ;;  %v5302_v16 = vadd.f32 %v5107_v57, %v20637_v61  ;;  %v15355_v49 = vld [vmem:[%s15677_s24 + $0x188] sm:$0xff]   ;;  %v20641_v61 = vld [vmem:[#allocation64_spill] sm:$0xff]  ;;  %v8502_v3 = vrot.slane %v15354_v33, 2 }
 0x36e   : > { %v14429_v45 = vpop.f32.mrf.mxu1  ;;  %v6962_v11 = vsel %vm6875_vm5, %v6959_v55, %v6961_v17  ;;  %v20643_v12 = vld [vmem:[#allocation66_spill] sm:$0xff] }
 0x36f   : > { %20636 = vst [vmem:[#allocation44_spill] sm:$0xff] %v18305_v62  ;;  %v14567_v58 = vpop.f32.mrf.mxu0  ;;  %v18310_v27 = vadd.f32 %v6654_v1, %v5302_v16  ;;  %v5305_v42 = vadd.f32 %v14429_v45, %v20639_v38 }
 0x370   : > { %v5110_v44 = vpop.f32.mrf.mxu1 }
 0x371   : > { %20638 = vst [vmem:[#allocation45_spill] sm:$0xff] %v18310_v27  ;;  %v6657_v32 = vpop.f32.mrf.mxu0  ;;  %v18317_v57 = vadd.f32 %v14567_v58, %v5305_v42  ;;  %v5303_v20 = vadd.f32 %v5110_v44, %v20641_v61  ;;  %v15496_v58 = vld [vmem:[%s15677_s24 + $0x170] sm:$0xff]   ;;  %v8504_v42 = vrot.slane %v15355_v49, 2 }
 0x372   : > { %v14432_v1 = vpop.f32.mrf.mxu1  ;;  %14667 = vmatmul.mubr.msk.bf16.gmra.mxu1 %vm1217_vm2, %v6960_v5  ;;  %v6963_v38 = vrot.slane %v15496_v58, 2  ;;  %v20645_v5 = vld [vmem:[#allocation68_spill] sm:$0xff] }
 0x373   : > { %20640 = vst [vmem:[#allocation46_spill] sm:$0xff] %v18317_v57  ;;  %v14570_v62 = vpop.f32.mrf.mxu0  ;;  %14805 = vmatmul.mubr.msk.bf16.gmra.mxu0 %vm1217_vm2, %v8499_v21  ;;  %v18323_v45 = vadd.f32 %v6657_v32, %v5303_v20  ;;  %v5308_v16 = vadd.f32 %v14432_v1, %v20643_v12  ;;  %14670 = vmatprep.mubr.msk.bf16.mxu1 %vm1217_vm2, %v6962_v11  ;;  %v15497_v21 = vld [vmem:[%s15677_s24 + $0x178] sm:$0xff]   ;;  %v15356_v20 = vld [vmem:[%s15677_s24 + $0x190] sm:$0xff]  }
 0x374   : > { %14808 = vmatprep.mubr.msk.bf16.mxu0 %vm1217_vm2, %v8501_v34  ;;  %v5123_v44 = vpop.f32.mrf.mxu1  ;;  %v6965_v61 = vrot.slane %v15497_v21, 2  ;;  %v8503_v32 = vsel %vm6875_vm5, %v8500_v47, %v8502_v3  ;;  %v20647_v12 = vld [vmem:[#allocation70_spill] sm:$0xff]  ;;  %v6964_v58 = vsel %vm6875_vm5, %v6961_v17, %v6963_v38  ;;  %v8505_v49 = vsel %vm6875_vm5, %v8502_v3, %v8504_v42  ;;  %v15357_v21 = vld [vmem:[%s15677_s24 + $0x198] sm:$0xff]  }
 0x375   : > { %20642 = vst [vmem:[#allocation48_spill] sm:$0xff] %v18323_v45  ;;  %v6670_v55 = vpop.f32.mrf.mxu0  ;;  %v18329_v57 = vadd.f32 %v14570_v62, %v5308_v16  ;;  %v5306_v34 = vadd.f32 %v5123_v44, %v20645_v5  ;;  %v20649_v5 = vld [vmem:[#allocation72_spill] sm:$0xff]  ;;  %v8506_v17 = vrot.slane %v15356_v20, 2  ;;  %v20651_v3 = vld [vmem:[#allocation74_spill] sm:$0xff] }
 0x376   : > { %v14433_v27 = vpop.f32.mrf.mxu1  ;;  %v6966_v16 = vsel %vm6875_vm5, %v6963_v38, %v6965_v61 }
 0x377   : > { %20644 = vst [vmem:[#allocation50_spill] sm:$0xff] %v18329_v57  ;;  %v14571_v33 = vpop.f32.mrf.mxu0  ;;  %v18334_v1 = vadd.f32 %v6670_v55, %v5306_v34  ;;  %v5309_v11 = vadd.f32 %v14433_v27, %v20647_v12 }
 0x378   : > { %v5126_v62 = vpop.f32.mrf.mxu1 }
 0x379   : > { %20646 = vst [vmem:[#allocation52_spill] sm:$0xff] %v18334_v1  ;;  %v6673_v45 = vpop.f32.mrf.mxu0  ;;  %v18341_v44 = vadd.f32 %v14571_v33, %v5309_v11  ;;  %v5307_v47 = vadd.f32 %v5126_v62, %v20649_v5  ;;  %v15498_v33 = vld [vmem:[%s15677_s24 + $0x180] sm:$0xff]   ;;  %v8508_v11 = vrot.slane %v15357_v21, 2 }
 0x37a   : > { %v14436_v55 = vpop.f32.mrf.mxu1  ;;  %14671 = vmatmul.mubr.msk.bf16.gmra.mxu1 %vm1217_vm2, %v6964_v58  ;;  %v6967_v12 = vrot.slane %v15498_v33, 2  ;;  %v20653_v58 = vld [vmem:[#allocation76_spill] sm:$0xff] }
 0x37b   : > { %20648 = vst [vmem:[#allocation54_spill] sm:$0xff] %v18341_v44  ;;  %v14574_v57 = vpop.f32.mrf.mxu0  ;;  %14809 = vmatmul.mubr.msk.bf16.gmra.mxu0 %vm1217_vm2, %v8503_v32  ;;  %v18347_v27 = vadd.f32 %v6673_v45, %v5307_v47  ;;  %v5312_v34 = vadd.f32 %v14436_v55, %v20651_v3  ;;  %14674 = vmatprep.mubr.msk.bf16.mxu1 %vm1217_vm2, %v6966_v16  ;;  %v15499_v32 = vld [vmem:[%s15677_s24 + $0x188] sm:$0xff]   ;;  %v15358_v47 = vld [vmem:[%s15677_s24 + $0x1a0] sm:$0xff]  }
 0x37c   : > { %14812 = vmatprep.mubr.msk.bf16.mxu0 %vm1217_vm2, %v8505_v49  ;;  %v5139_v62 = vpop.f32.mrf.mxu1  ;;  %v6969_v5 = vrot.slane %v15499_v32, 2  ;;  %v8507_v45 = vsel %vm6875_vm5, %v8504_v42, %v8506_v17  ;;  %v20654_v3 = vld [vmem:[#allocation78_spill] sm:$0xff]  ;;  %v6968_v33 = vsel %vm6875_vm5, %v6965_v61, %v6967_v12  ;;  %v8509_v21 = vsel %vm6875_vm5, %v8506_v17, %v8508_v11 }
 0x37d   : > { %20650 = vst [vmem:[#allocation56_spill] sm:$0xff] %v18347_v27  ;;  %v6686_v38 = vpop.f32.mrf.mxu0  ;;  %v18353_v44 = vadd.f32 %v14574_v57, %v5312_v34  ;;  %v5310_v49 = vadd.f32 %v5139_v62, %v20653_v58  ;;  %v15359_v32 = vld [vmem:[%s15677_s24 + $0x1a8] sm:$0xff]   ;;  %v20656_v58 = vld [vmem:[#allocation80_spill] sm:$0xff]  ;;  %v8510_v61 = vrot.slane %v15358_v47, 2 }
 0x37e   : > { %v14437_v1 = vpop.f32.mrf.mxu1  ;;  %v6970_v34 = vsel %vm6875_vm5, %v6967_v12, %v6969_v5  ;;  %v20658_v17 = vld [vmem:[#allocation82_spill] sm:$0xff] }
 0x37f   : > { %20652 = vst [vmem:[#allocation58_spill] sm:$0xff] %v18353_v44  ;;  %v14575_v20 = vpop.f32.mrf.mxu0  ;;  %v18358_v55 = vadd.f32 %v6686_v38, %v5310_v49  ;;  %v5313_v16 = vadd.f32 %v14437_v1, %v20654_v3 }
 0x380   : > { %v5142_v57 = vpop.f32.mrf.mxu1 }
 0x381   : > { %v6689_v27 = vpop.f32.mrf.mxu0  ;;  %v18365_v62 = vadd.f32 %v14575_v20, %v5313_v16  ;;  %v5311_v42 = vadd.f32 %v5142_v57, %v20656_v58  ;;  %v15500_v20 = vld [vmem:[%s15677_s24 + $0x190] sm:$0xff]   ;;  %v8512_v16 = vrot.slane %v15359_v32, 2 }
 0x382   : > { %v14440_v38 = vpop.f32.mrf.mxu1  ;;  %14675 = vmatmul.mubr.msk.bf16.gmra.mxu1 %vm1217_vm2, %v6968_v33  ;;  %v6971_v3 = vrot.slane %v15500_v20, 2 }
 0x383   : > { %20655 = vst [vmem:[#allocation60_spill] sm:$0xff] %v18365_v62  ;;  %v14578_v44 = vpop.f32.mrf.mxu0  ;;  %14813 = vmatmul.mubr.msk.bf16.gmra.mxu0 %vm1217_vm2, %v8507_v45  ;;  %v18371_v1 = vadd.f32 %v6689_v27, %v5311_v42  ;;  %v5316_v49 = vadd.f32 %v14440_v38, %v20658_v17  ;;  %14678 = vmatprep.mubr.msk.bf16.mxu1 %vm1217_vm2, %v6970_v34  ;;  %v15501_v45 = vld [vmem:[%s15677_s24 + $0x198] sm:$0xff]   ;;  %v15360_v42 = vld [vmem:[%s15677_s24 + $0x1b0] sm:$0xff]  }
 0x384   : > { %14816 = vmatprep.mubr.msk.bf16.mxu0 %vm1217_vm2, %v8509_v21  ;;  %v5155_v57 = vpop.f32.mrf.mxu1  ;;  %v6973_v58 = vrot.slane %v15501_v45, 2  ;;  %v8511_v27 = vsel %vm6875_vm5, %v8508_v11, %v8510_v61  ;;  %v20660_v17 = vld [vmem:[#allocation84_spill] sm:$0xff]  ;;  %v6972_v20 = vsel %vm6875_vm5, %v6969_v5, %v6971_v3  ;;  %v8513_v32 = vsel %vm6875_vm5, %v8510_v61, %v8512_v16 }
 0x385   : > { %20657 = vst [vmem:[#allocation62_spill] sm:$0xff] %v18371_v1  ;;  %v6702_v12 = vpop.f32.mrf.mxu0  ;;  %v18377_v62 = vadd.f32 %v14578_v44, %v5316_v49  ;;  %v5314_v33 = vadd.f32 %v5155_v57, %v17490_v51  ;;  %v15361_v45 = vld [vmem:[%s15677_s24 + $0x1b8] sm:$0xff]   ;;  %v20662_v57 = vld [vmem:[#allocation86_spill] sm:$0xff]  ;;  %v8514_v5 = vrot.slane %v15360_v42, 2 }
 0x386   : > { %v14441_v21 = vpop.f32.mrf.mxu1  ;;  %v6974_v49 = vsel %vm6875_vm5, %v6971_v3, %v6973_v58 }
 0x387   : > { %20659 = vst [vmem:[#allocation64_spill] sm:$0xff] %v18377_v62  ;;  %v14579_v47 = vpop.f32.mrf.mxu0  ;;  %v18382_v38 = vadd.f32 %v6702_v12, %v5314_v33  ;;  %v5317_v34 = vadd.f32 %v14441_v21, %v20660_v17  ;;  %v20663_v33 = vld [vmem:[#allocation88_spill] sm:$0xff] }
 0x388   : > { %v5158_v44 = vpop.f32.mrf.mxu1 }
 0x389   : > { %v6705_v1 = vpop.f32.mrf.mxu0  ;;  %v18389_v51 = vadd.f32 %v14579_v47, %v5317_v34  ;;  %v5315_v11 = vadd.f32 %v5158_v44, %v20662_v57  ;;  %v15502_v47 = vld [vmem:[%s15677_s24 + $0x1a0] sm:$0xff]   ;;  %v8516_v34 = vrot.slane %v15361_v45, 2 }
 0x38a   : > { %v14444_v12 = vpop.f32.mrf.mxu1  ;;  %14679 = vmatmul.mubr.msk.bf16.gmra.mxu1 %vm1217_vm2, %v6972_v20  ;;  %v6975_v17 = vrot.slane %v15502_v47, 2 }
 0x38b   : > { %20661 = vst [vmem:[#allocation66_spill] sm:$0xff] %v18389_v51  ;;  %v14582_v62 = vpop.f32.mrf.mxu0  ;;  %14817 = vmatmul.mubr.msk.bf16.gmra.mxu0 %vm1217_vm2, %v8511_v27  ;;  %v18395_v61 = vadd.f32 %v6705_v1, %v5315_v11  ;;  %v5320_v21 = vadd.f32 %v14444_v12, %v20663_v33  ;;  %14682 = vmatprep.mubr.msk.bf16.mxu1 %vm1217_vm2, %v6974_v49  ;;  %v15503_v27 = vld [vmem:[%s15677_s24 + $0x1a8] sm:$0xff]   ;;  %v15362_v11 = vld [vmem:[%s15677_s24 + $0x1c0] sm:$0xff]  }
 0x38c   : > { %14820 = vmatprep.mubr.msk.bf16.mxu0 %vm1217_vm2, %v8513_v32  ;;  %v5171_v44 = vpop.f32.mrf.mxu1  ;;  %v6977_v57 = vrot.slane %v15503_v27, 2  ;;  %v8515_v1 = vsel %vm6875_vm5, %v8512_v16, %v8514_v5  ;;  %v6976_v47 = vsel %vm6875_vm5, %v6973_v58, %v6975_v17  ;;  %v8517_v45 = vsel %vm6875_vm5, %v8514_v5, %v8516_v34  ;;  %v15363_v27 = vld [vmem:[%s15677_s24 + $0x1c8] sm:$0xff]  }
 0x38d   : > { %v6718_v3 = vpop.f32.mrf.mxu0  ;;  %v18401_v51 = vadd.f32 %v14582_v62, %v5320_v21  ;;  %v5318_v20 = vadd.f32 %v5171_v44, %v17517_v35  ;;  %v20665_v5 = vld [vmem:[#allocation90_spill] sm:$0xff] }
 0x38e   : > { %v14445_v32 = vpop.f32.mrf.mxu1  ;;  %v6978_v21 = vsel %vm6875_vm5, %v6975_v17, %v6977_v57 }
 0x38f   : > { %v14583_v42 = vpop.f32.mrf.mxu0  ;;  %v18406_v12 = vadd.f32 %v6718_v3, %v5318_v20  ;;  %v5321_v49 = vadd.f32 %v14445_v32, %v17526_v63  ;;  %v8518_v63 = vrot.slane %v15362_v11, 2 }
 0x390   : > { %v5174_v62 = vpop.f32.mrf.mxu1 }
 0x391   : > { %v6721_v33 = vpop.f32.mrf.mxu0  ;;  %v18413_v35 = vadd.f32 %v14583_v42, %v5321_v49  ;;  %v5319_v16 = vadd.f32 %v5174_v62, %v17535_v43  ;;  %v15504_v42 = vld [vmem:[%s15677_s24 + $0x1b0] sm:$0xff]   ;;  %v8520_v43 = vrot.slane %v15363_v27, 2 }
 0x392   : > { %v14588_v3 = vpop.f32.mrf.mxu1  ;;  %14683 = vmatmul.mubr.msk.bf16.gmra.mxu1 %vm1217_vm2, %v6976_v47  ;;  %v6979_v32 = vrot.slane %v15504_v42, 2 }
 0x393   : > { %20664 = vst [vmem:[#allocation68_spill] sm:$0xff] %v18413_v35  ;;  %v14726_v44 = vpop.f32.mrf.mxu0  ;;  %14821 = vmatmul.mubr.msk.bf16.gmra.mxu0 %vm1217_vm2, %v8515_v1  ;;  %v18419_v58 = vadd.f32 %v6721_v33, %v5319_v16  ;;  %v7799_v20 = vadd.f32 %v14588_v3, %v20665_v5  ;;  %14686 = vmatprep.mubr.msk.bf16.mxu1 %vm1217_vm2, %v6978_v21  ;;  %v15505_v1 = vld [vmem:[%s15677_s24 + $0x1b8] sm:$0xff]   ;;  %v15364_v16 = vld [vmem:[%s15677_s24 + $0x1d0] sm:$0xff]  }
 0x394   : > { %14824 = vmatprep.mubr.msk.bf16.mxu0 %vm1217_vm2, %v8517_v45  ;;  %v7254_v49 = vpop.f32.mrf.mxu1  ;;  %v6981_v62 = vrot.slane %v15505_v1, 2  ;;  %v8519_v33 = vsel %vm6875_vm5, %v8516_v34, %v8518_v63  ;;  %v6980_v42 = vsel %vm6875_vm5, %v6977_v57, %v6979_v32  ;;  %v8521_v27 = vsel %vm6875_vm5, %v8518_v63, %v8520_v43  ;;  %v15365_v1 = vld [vmem:[%s15677_s24 + $0x1d8] sm:$0xff]  }
 0x395   : > { %v8793_v17 = vpop.f32.mrf.mxu0  ;;  %v18425_v35 = vadd.f32 %v14726_v44, %v7799_v20  ;;  %v7797_v47 = vadd.f32 %v7254_v49, %v17554_v50 }
 0x396   : > { %v14589_v45 = vpop.f32.mrf.mxu1  ;;  %v6982_v20 = vsel %vm6875_vm5, %v6979_v32, %v6981_v62 }
 0x397   : > { %v14727_v11 = vpop.f32.mrf.mxu0  ;;  %v18430_v3 = vadd.f32 %v8793_v17, %v7797_v47  ;;  %v7800_v21 = vadd.f32 %v14589_v45, %v17558_v13  ;;  %v8522_v13 = vrot.slane %v15364_v16, 2  ;;  %v15506_v47 = vld [vmem:[%s15677_s24 + $0x1c0] sm:$0xff]  }
 0x398   : > { %v7257_v44 = vpop.f32.mrf.mxu1 }
 0x399   : > { %v8796_v5 = vpop.f32.mrf.mxu0  ;;  %v18437_v50 = vadd.f32 %v14727_v11, %v7800_v21  ;;  %v7798_v34 = vadd.f32 %v7257_v44, %v17568_v9  ;;  %v6983_v11 = vrot.slane %v15506_v47, 2  ;;  %v8524_v9 = vrot.slane %v15365_v1, 2 }
 0x39a   : > { %v14592_v17 = vpop.f32.mrf.mxu1  ;;  %14687 = vmatmul.mubr.msk.bf16.gmra.mxu1 %vm1217_vm2, %v6980_v42 }
 0x39b   : > { %v14730_v49 = vpop.f32.mrf.mxu0  ;;  %14825 = vmatmul.mubr.msk.bf16.gmra.mxu0 %vm1217_vm2, %v8519_v33  ;;  %v18443_v57 = vadd.f32 %v8796_v5, %v7798_v34  ;;  %v7803_v63 = vadd.f32 %v14592_v17, %v17574_v29  ;;  %14690 = vmatprep.mubr.msk.bf16.mxu1 %vm1217_vm2, %v6982_v20  ;;  %v15507_v33 = vld [vmem:[%s15677_s24 + $0x1c8] sm:$0xff]   ;;  %v8523_v5 = vsel %vm6875_vm5, %v8520_v43, %v8522_v13  ;;  %v15366_v34 = vld [vmem:[%s15677_s24 + $0x1e0] sm:$0xff]  }
 0x39c   : > { %14828 = vmatprep.mubr.msk.bf16.mxu0 %vm1217_vm2, %v8521_v27  ;;  %v7270_v45 = vpop.f32.mrf.mxu1  ;;  %v6985_v21 = vrot.slane %v15507_v33, 2  ;;  %v6984_v47 = vsel %vm6875_vm5, %v6981_v62, %v6983_v11  ;;  %v8525_v1 = vsel %vm6875_vm5, %v8522_v13, %v8524_v9  ;;  %v15367_v33 = vld [vmem:[%s15677_s24 + $0x1e8] sm:$0xff]  }
 0x39d   : > { %v8809_v32 = vpop.f32.mrf.mxu0  ;;  %v18449_v44 = vadd.f32 %v14730_v49, %v7803_v63  ;;  %v7801_v42 = vadd.f32 %v7270_v45, %v17581_v0 }
 0x39e   : > { %v14593_v27 = vpop.f32.mrf.mxu1  ;;  %v6986_v63 = vsel %vm6875_vm5, %v6983_v11, %v6985_v21 }
 0x39f   : > { %v14731_v16 = vpop.f32.mrf.mxu0  ;;  %v18454_v29 = vadd.f32 %v8809_v32, %v7801_v42  ;;  %v7804_v20 = vadd.f32 %v14593_v27, %v17590_v7  ;;  %v8526_v7 = vrot.slane %v15366_v34, 2  ;;  %v15508_v42 = vld [vmem:[%s15677_s24 + $0x1d0] sm:$0xff]  }
 0x3a0   : > { %v7273_v49 = vpop.f32.mrf.mxu1 }
 0x3a1   : > { %v8812_v17 = vpop.f32.mrf.mxu0  ;;  %v18461_v0 = vadd.f32 %v14731_v16, %v7804_v20  ;;  %v7802_v43 = vadd.f32 %v7273_v49, %v17599_v19  ;;  %v6987_v16 = vrot.slane %v15508_v42, 2  ;;  %v8528_v19 = vrot.slane %v15367_v33, 2 }
 0x3a2   : > { %v14596_v32 = vpop.f32.mrf.mxu1  ;;  %14691 = vmatmul.mubr.msk.bf16.gmra.mxu1 %vm1217_vm2, %v6984_v47 }
 0x3a3   : > { %v14734_v45 = vpop.f32.mrf.mxu0  ;;  %14829 = vmatmul.mubr.msk.bf16.gmra.mxu0 %vm1217_vm2, %v8523_v5  ;;  %v18467_v62 = vadd.f32 %v8812_v17, %v7802_v43  ;;  %v7807_v13 = vadd.f32 %v14596_v32, %v17606_v24  ;;  %14694 = vmatprep.mubr.msk.bf16.mxu1 %vm1217_vm2, %v6986_v63  ;;  %v15509_v5 = vld [vmem:[%s15677_s24 + $0x1d8] sm:$0xff]   ;;  %v8527_v17 = vsel %vm6875_vm5, %v8524_v9, %v8526_v7  ;;  %v15368_v43 = vld [vmem:[%s15677_s24 + $0x1f0] sm:$0xff]  }
 0x3a4   : > { %14832 = vmatprep.mubr.msk.bf16.mxu0 %vm1217_vm2, %v8525_v1  ;;  %v7286_v27 = vpop.f32.mrf.mxu1  ;;  %v6989_v20 = vrot.slane %v15509_v5, 2  ;;  %v6988_v42 = vsel %vm6875_vm5, %v6985_v21, %v6987_v16  ;;  %v8529_v33 = vsel %vm6875_vm5, %v8526_v7, %v8528_v19  ;;  %v15369_v5 = vld [vmem:[%s15677_s24 + $0x1f8] sm:$0xff]  }
 0x3a5   : > { %v8825_v11 = vpop.f32.mrf.mxu0  ;;  %v18473_v49 = vadd.f32 %v14734_v45, %v7807_v13  ;;  %v7805_v47 = vadd.f32 %v7286_v27, %v17618_v14 }
 0x3a6   : > { %v14597_v1 = vpop.f32.mrf.mxu1  ;;  %v6990_v13 = vsel %vm6875_vm5, %v6987_v16, %v6989_v20 }
 0x3a7   : > { %v14735_v34 = vpop.f32.mrf.mxu0  ;;  %v18478_v24 = vadd.f32 %v8825_v11, %v7805_v47  ;;  %v7808_v63 = vadd.f32 %v14597_v1, %v17622_v2  ;;  %v8530_v2 = vrot.slane %v15368_v43, 2  ;;  %v15510_v47 = vld [vmem:[%s15677_s24 + $0x1e0] sm:$0xff]  }
 0x3a8   : > { %v7289_v45 = vpop.f32.mrf.mxu1 }
 0x3a9   : > { %v8828_v32 = vpop.f32.mrf.mxu0  ;;  %v18485_v14 = vadd.f32 %v14735_v34, %v7808_v63  ;;  %v7806_v9 = vadd.f32 %v7289_v45, %v17632_v41  ;;  %v6991_v34 = vrot.slane %v15510_v47, 2  ;;  %v8532_v41 = vrot.slane %v15369_v5, 2 }
 0x3aa   : > { %v14600_v11 = vpop.f32.mrf.mxu1  ;;  %14695 = vmatmul.mubr.msk.bf16.gmra.mxu1 %vm1217_vm2, %v6988_v42 }
 0x3ab   : > { %v14738_v27 = vpop.f32.mrf.mxu0  ;;  %14833 = vmatmul.mubr.msk.bf16.gmra.mxu0 %vm1217_vm2, %v8527_v17  ;;  %v18491_v21 = vadd.f32 %v8828_v32, %v7806_v9  ;;  %v7811_v7 = vadd.f32 %v14600_v11, %v17638_v31  ;;  %14698 = vmatprep.mubr.msk.bf16.mxu1 %vm1217_vm2, %v6990_v13  ;;  %v15511_v17 = vld [vmem:[%s15677_s24 + $0x1e8] sm:$0xff]   ;;  %v8531_v32 = vsel %vm6875_vm5, %v8528_v19, %v8530_v2  ;;  %v15370_v9 = vld [vmem:[%s15677_s24 + $0x200] sm:$0xff]  }
 0x3ac   : > { %14836 = vmatprep.mubr.msk.bf16.mxu0 %vm1217_vm2, %v8529_v33  ;;  %v7302_v1 = vpop.f32.mrf.mxu1  ;;  %v6993_v63 = vrot.slane %v15511_v17, 2  ;;  %v6992_v47 = vsel %vm6875_vm5, %v6989_v20, %v6991_v34  ;;  %v8533_v5 = vsel %vm6875_vm5, %v8530_v2, %v8532_v41  ;;  %v15371_v17 = vld [vmem:[%s15677_s24 + $0x208] sm:$0xff]  }
 0x3ad   : > { %v8841_v16 = vpop.f32.mrf.mxu0  ;;  %v18497_v45 = vadd.f32 %v14738_v27, %v7811_v7  ;;  %v7809_v42 = vadd.f32 %v7302_v1, %v17645_v60 }
 0x3ae   : > { %v14601_v33 = vpop.f32.mrf.mxu1  ;;  %v6994_v7 = vsel %vm6875_vm5, %v6991_v34, %v6993_v63 }
 0x3af   : > { %v14739_v43 = vpop.f32.mrf.mxu0  ;;  %v18502_v31 = vadd.f32 %v8841_v16, %v7809_v42  ;;  %v7812_v13 = vadd.f32 %v14601_v33, %v17654_v18  ;;  %v8534_v18 = vrot.slane %v15370_v9, 2  ;;  %v15512_v42 = vld [vmem:[%s15677_s24 + $0x1f0] sm:$0xff]  }
 0x3b0   : > { %v7305_v27 = vpop.f32.mrf.mxu1 }
 0x3b1   : > { %v8844_v11 = vpop.f32.mrf.mxu0  ;;  %v18509_v60 = vadd.f32 %v14739_v43, %v7812_v13  ;;  %v7810_v19 = vadd.f32 %v7305_v27, %v17663_v28  ;;  %v6995_v43 = vrot.slane %v15512_v42, 2  ;;  %v8536_v28 = vrot.slane %v15371_v17, 2 }
 0x3b2   : > { %v14604_v16 = vpop.f32.mrf.mxu1  ;;  %14699 = vmatmul.mubr.msk.bf16.gmra.mxu1 %vm1217_vm2, %v6992_v47  ;;  %v20669_v47 = vld [vmem:[#allocation92_spill] sm:$0xff] }
 0x3b3   : > { %20666 = vst [vmem:[#allocation70_spill] sm:$0xff] %v18509_v60  ;;  %v14742_v1 = vpop.f32.mrf.mxu0  ;;  %14837 = vmatmul.mubr.msk.bf16.gmra.mxu0 %vm1217_vm2, %v8531_v32  ;;  %v18515_v20 = vadd.f32 %v8844_v11, %v7810_v19  ;;  %v7815_v2 = vadd.f32 %v14604_v16, %v17670_v6  ;;  %14702 = vmatprep.mubr.msk.bf16.mxu1 %vm1217_vm2, %v6994_v7  ;;  %v15513_v32 = vld [vmem:[%s15677_s24 + $0x1f8] sm:$0xff]   ;;  %v15372_v19 = vld [vmem:[%s15677_s24 + $0x210] sm:$0xff]  }
 0x3b4   : > { %14840 = vmatprep.mubr.msk.bf16.mxu0 %vm1217_vm2, %v8533_v5  ;;  %v7318_v33 = vpop.f32.mrf.mxu1  ;;  %v6997_v13 = vrot.slane %v15513_v32, 2  ;;  %v8535_v11 = vsel %vm6875_vm5, %v8532_v41, %v8534_v18  ;;  %v20671_v16 = vld [vmem:[#allocation94_spill] sm:$0xff]  ;;  %v6996_v42 = vsel %vm6875_vm5, %v6993_v63, %v6995_v43  ;;  %v8537_v17 = vsel %vm6875_vm5, %v8534_v18, %v8536_v28  ;;  %v15373_v32 = vld [vmem:[%s15677_s24 + $0x218] sm:$0xff]  }
 0x3b5   : > { %20667 = vst [vmem:[#allocation72_spill] sm:$0xff] %v18515_v20  ;;  %v8857_v34 = vpop.f32.mrf.mxu0  ;;  %v18521_v27 = vadd.f32 %v14742_v1, %v7815_v2  ;;  %v7813_v5 = vadd.f32 %v7318_v33, %v20669_v47  ;;  %v20673_v47 = vld [vmem:[#allocation96_spill] sm:$0xff]  ;;  %v8538_v63 = vrot.slane %v15372_v19, 2  ;;  %v20675_v18 = vld [vmem:[#allocation98_spill] sm:$0xff] }
 0x3b6   : > { %v14605_v60 = vpop.f32.mrf.mxu1  ;;  %v6998_v2 = vsel %vm6875_vm5, %v6995_v43, %v6997_v13 }
 0x3b7   : > { %20668 = vst [vmem:[#allocation74_spill] sm:$0xff] %v18521_v27  ;;  %v14743_v9 = vpop.f32.mrf.mxu0  ;;  %v18526_v6 = vadd.f32 %v8857_v34, %v7813_v5  ;;  %v7816_v7 = vadd.f32 %v14605_v60, %v20671_v16 }
 0x3b8   : > { %v7321_v1 = vpop.f32.mrf.mxu1 }
 0x3b9   : > { %20670 = vst [vmem:[#allocation76_spill] sm:$0xff] %v18526_v6  ;;  %v8860_v20 = vpop.f32.mrf.mxu0  ;;  %v18533_v33 = vadd.f32 %v14743_v9, %v7816_v7  ;;  %v7814_v41 = vadd.f32 %v7321_v1, %v20673_v47  ;;  %v15514_v9 = vld [vmem:[%s15677_s24 + $0x200] sm:$0xff]   ;;  %v8540_v7 = vrot.slane %v15373_v32, 2 }
 0x3ba   : > { %v14608_v34 = vpop.f32.mrf.mxu1  ;;  %14703 = vmatmul.mubr.msk.bf16.gmra.mxu1 %vm1217_vm2, %v6996_v42  ;;  %v6999_v16 = vrot.slane %v15514_v9, 2  ;;  %v20677_v42 = vld [vmem:[#allocation99_spill] sm:$0xff] }
 0x3bb   : > { %20672 = vst [vmem:[#allocation78_spill] sm:$0xff] %v18533_v33  ;;  %v14746_v27 = vpop.f32.mrf.mxu0  ;;  %14841 = vmatmul.mubr.msk.bf16.gmra.mxu0 %vm1217_vm2, %v8535_v11  ;;  %v18539_v60 = vadd.f32 %v8860_v20, %v7814_v41  ;;  %v7819_v5 = vadd.f32 %v14608_v34, %v20675_v18  ;;  %14706 = vmatprep.mubr.msk.bf16.mxu1 %vm1217_vm2, %v6998_v2  ;;  %v15515_v11 = vld [vmem:[%s15677_s24 + $0x208] sm:$0xff]   ;;  %v15374_v41 = vld [vmem:[%s15677_s24 + $0x220] sm:$0xff]  }
 0x3bc   : > { %14844 = vmatprep.mubr.msk.bf16.mxu0 %vm1217_vm2, %v8537_v17  ;;  %v7334_v1 = vpop.f32.mrf.mxu1  ;;  %v7001_v47 = vrot.slane %v15515_v11, 2  ;;  %v8539_v20 = vsel %vm6875_vm5, %v8536_v28, %v8538_v63  ;;  %v20679_v18 = vld [vmem:[#allocation100_spill] sm:$0xff]  ;;  %v7000_v9 = vsel %vm6875_vm5, %v6997_v13, %v6999_v16  ;;  %v8541_v32 = vsel %vm6875_vm5, %v8538_v63, %v8540_v7  ;;  %v18556_v11 = vld [vmem:[%s15677_s24 + $0x228] sm:$0xff]  }
 0x3bd   : > { %20674 = vst [vmem:[#allocation80_spill] sm:$0xff] %v18539_v60  ;;  %v8873_v43 = vpop.f32.mrf.mxu0  ;;  %v18545_v33 = vadd.f32 %v14746_v27, %v7819_v5  ;;  %v7817_v17 = vadd.f32 %v7334_v1, %v20677_v42  ;;  %v20681_v42 = vld [vmem:[#allocation101_spill] sm:$0xff]  ;;  %v8542_v13 = vrot.slane %v15374_v41, 2 }
 0x3be   : > { %v14609_v6 = vpop.f32.mrf.mxu1  ;;  %v7002_v5 = vsel %vm6875_vm5, %v6999_v16, %v7001_v47 }
 0x3bf   : > { %20676 = vst [vmem:[#allocation82_spill] sm:$0xff] %v18545_v33  ;;  %v14747_v19 = vpop.f32.mrf.mxu0  ;;  %v18550_v34 = vadd.f32 %v8873_v43, %v7817_v17  ;;  %v7820_v2 = vadd.f32 %v14609_v6, %v20679_v18  ;;  %v20683_v17 = vld [vmem:[#allocation102_spill] sm:$0xff] }
 0x3c0   : > { %v7337_v27 = vpop.f32.mrf.mxu1 }
 0x3c1   : > { %20678 = vst [vmem:[#allocation84_spill] sm:$0xff] %v18550_v34  ;;  %v8876_v60 = vpop.f32.mrf.mxu0  ;;  %v18559_v1 = vadd.f32 %v14747_v19, %v7820_v2  ;;  %v7818_v28 = vadd.f32 %v7337_v27, %v20681_v42  ;;  %v15516_v19 = vld [vmem:[%s15677_s24 + $0x210] sm:$0xff]   ;;  %v8544_v27 = vrot.slane %v18556_v11, 2  ;;  %v15517_v42 = vld [vmem:[%s15677_s24 + $0x218] sm:$0xff]  }
 0x3c2   : > { %v14612_v6 = vpop.f32.mrf.mxu1  ;;  %14707 = vmatmul.mubr.msk.bf16.gmra.mxu1 %vm1217_vm2, %v7000_v9  ;;  %v7003_v2 = vrot.slane %v15516_v19, 2 }
 0x3c3   : > { %20680 = vst [vmem:[#allocation86_spill] sm:$0xff] %v18559_v1  ;;  %v14750_v43 = vpop.f32.mrf.mxu0  ;;  %14845 = vmatmul.mubr.msk.bf16.gmra.mxu0 %vm1217_vm2, %v8539_v20  ;;  %v18565_v63 = vadd.f32 %v8876_v60, %v7818_v28  ;;  %v7823_v18 = vadd.f32 %v14612_v6, %v20683_v17  ;;  %14710 = vmatprep.mubr.msk.bf16.mxu1 %vm1217_vm2, %v7002_v5  ;;  %v7005_v1 = vrot.slane %v15517_v42, 2  ;;  %v15376_v6 = vld [vmem:[%s15677_s24 + $0x230] sm:$0xff]   ;;  %v18583_v42 = vld [vmem:[%s15677_s24 + $0x238] sm:$0xff]  }
 0x3c4   : > { %14848 = vmatprep.mubr.msk.bf16.mxu0 %vm1217_vm2, %v8541_v32  ;;  %v7350_v20 = vpop.f32.mrf.mxu1  ;;  %v8543_v28 = vsel %vm6875_vm5, %v8540_v7, %v8542_v13  ;;  %v7004_v11 = vsel %vm6875_vm5, %v7001_v47, %v7003_v2 }
 0x3c5   : > { %20682 = vst [vmem:[#allocation88_spill] sm:$0xff] %v18565_v63  ;;  %v8889_v16 = vpop.f32.mrf.mxu0  ;;  %v18572_v9 = vadd.f32 %v14750_v43, %v7823_v18  ;;  %v7821_v41 = vadd.f32 %v7350_v20, %v17741_v26  ;;  %v8545_v63 = vsel %vm6875_vm5, %v8542_v13, %v8544_v27  ;;  %v7006_v26 = vsel %vm6875_vm5, %v7003_v2, %v7005_v1 }
 0x3c6   : > { %v14613_v60 = vpop.f32.mrf.mxu1  ;;  %v8546_v13 = vrot.slane %v15376_v6, 2  ;;  %v9480_v2 = vshrl.u32 %v17770_v52, 16 }
 0x3c7   : > { %20684 = vst [vmem:[#allocation90_spill] sm:$0xff] %v18572_v9  ;;  %v14751_v32 = vpop.f32.mrf.mxu0  ;;  %v18577_v17 = vadd.f32 %v8889_v16, %v7821_v41  ;;  %v7824_v5 = vadd.f32 %v14613_v60, %v17745_v48  ;;  %v15518_v48 = vld [vmem:[%s15677_s24 + $0x220] sm:$0xff]   ;;  %v9483_v41 = vshll.u32 %v17770_v52, 16 }
 0x3c8   : > { %v7353_v43 = vpop.f32.mrf.mxu1  ;;  %v7007_v47 = vrot.slane %v15518_v48, 2 }
 0x3c9   : > { %20685 = vst [vmem:[#allocation92_spill] sm:$0xff] %v18577_v17  ;;  %v8892_v19 = vpop.f32.mrf.mxu0  ;;  %v18586_v18 = vadd.f32 %v14751_v32, %v7824_v5  ;;  %v7822_v7 = vadd.f32 %v7353_v43, %v17752_v54  ;;  %v18602_v43 = vld [vmem:[%s15677_s24 + $0x28] sm:$0xff]  }
 0x3ca   : > { %v14616_v16 = vpop.f32.mrf.mxu1  ;;  %14711 = vmatmul.mubr.msk.bf16.gmra.mxu1 %vm1217_vm2, %v7004_v11  ;;  %v9488_v6 = vshrl.u32 %v18602_v43, 16  ;;  %v9491_v52 = vshll.u32 %v18602_v43, 16 }
 0x3cb   : > { %20686 = vst [vmem:[#allocation94_spill] sm:$0xff] %v18586_v18  ;;  %v14754_v20 = vpop.f32.mrf.mxu0  ;;  %14849 = vmatmul.mubr.msk.bf16.gmra.mxu0 %vm1217_vm2, %v8543_v28  ;;  %v18595_v32 = vadd.f32 %v8892_v19, %v7822_v7  ;;  %v7827_v54 = vadd.f32 %v14616_v16, %v17759_v10  ;;  %14714 = vmatprep.mubr.msk.bf16.mxu1 %vm1217_vm2, %v7006_v26  ;;  %v8548_v28 = vrot.slane %v18583_v42, 2  ;;  %v11019_v19 = vld [vmem:[%s15677_s24 + $0x20] sm:$0x8]  ;;  %v9485_v18 = vrot.slane %v9483_v41, 3 }
 0x3cc   : > { %14852 = vmatprep.mubr.msk.bf16.mxu0 %vm1217_vm2, %v8545_v63  ;;  %v7366_v5 = vpop.f32.mrf.mxu1  ;;  %v15519_v63 = vld [vmem:[%s15677_s24 + $0x228] sm:$0xff]   ;;  %v7008_v26 = vsel %vm6875_vm5, %v7005_v1, %v7007_v47  ;;  %v8547_v42 = vsel %vm6875_vm5, %v8544_v27, %v8546_v13  ;;  %v9490_v1 = vrot.slane %v9488_v6, 2  ;;  %v9493_v33 = vrot.slane %v9491_v52, 3 }
 0x3cd   : > { %20687 = vst [vmem:[#allocation96_spill] sm:$0xff] %v18595_v32  ;;  %v8905_v60 = vpop.f32.mrf.mxu0  ;;  %v7009_v11 = vrot.slane %v15519_v63, 2  ;;  %v18607_v7 = vadd.f32 %v14754_v20, %v7827_v54  ;;  %v7825_v10 = vadd.f32 %v7366_v5, %v17766_v37  ;;  %v15378_v32 = vld [vmem:[%s15677_s24 + $0x240] ss:$0 sps:$4 sm:$0x33]   ;;  %v9482_v63 = vrot.slane %v9480_v2, 2 }
 0x3ce   : > { %v14617_v48 = vpop.f32.mrf.mxu1  ;;  %v8549_v20 = vsel %vm6875_vm5, %v8546_v13, %v8548_v28  ;;  %v15521_v54 = vld [vmem:[%s15677_s24 + $0x24] sm:$0xf]  ;;  %v8550_v13 = vrot.slane %v15378_v32, 2 }
 0x3cf   : > { %20688 = vst [vmem:[#allocation98_spill] sm:$0xff] %v18607_v7  ;;  %v14755_v16 = vpop.f32.mrf.mxu0  ;;  %v18613_v17 = vadd.f32 %v8905_v60, %v7825_v10  ;;  %v7828_v9 = vadd.f32 %v14617_v48, %v17777_v56  ;;  %v13201_v7 = vcombine.low %v11019_v19, %v15521_v54  ;;  %v7010_v5 = vsel %vm6875_vm5, %v7007_v47, %v7009_v11  ;;  %v15522_v60 = vld [vmem:[%s15677_s24 + $0x230] ss:$0 sps:$4 sm:$0x33]  }
 0x3d0   : > { %v7369_v37 = vpop.f32.mrf.mxu1  ;;  %v7011_v56 = vrot.slane %v15522_v60, 2  ;;  %v9486_v19 = vor.u32 %v9485_v18, %v9482_v63  ;;  %v18627_v47 = vld [vmem:[%s15677_s24 + $0x30] sm:$0xff]   ;;  %v18637_v18 = vld [vmem:[%s15677_s24 + $0x38] sm:$0xff]  }
 0x3d1   : > { %v8908_v34 = vpop.f32.mrf.mxu0  ;;  %v18619_v27 = vadd.f32 %v14755_v16, %v7828_v9  ;;  %v7826_v2 = vadd.f32 %v7369_v37, %v17783_v39  ;;  %v9497_v9 = vshrl.u32 %v18627_v47, 16  ;;  %v9500_v6 = vshll.u32 %v18627_v47, 16 }
 0x3d2   : > { %v14620_v10 = vpop.f32.mrf.mxu1  ;;  %14715 = vmatmul.mubr.msk.bf16.gmra.mxu1 %vm1217_vm2, %v7008_v26  ;;  %v11026_v48 = vrot.slane %v13201_v7, 3  ;;  %v11027_v26 = vrot.slane %v18602_v43, 3  ;;  %v9506_v32 = vshrl.u32 %v18637_v18, 16  ;;  %v9509_v63 = vshll.u32 %v18637_v18, 16 }
 0x3d3   : > { %v14758_v41 = vpop.f32.mrf.mxu0  ;;  %14853 = vmatmul.mubr.msk.bf16.gmra.mxu0 %vm1217_vm2, %v8547_v42  ;;  %v18631_v39 = vadd.f32 %v8908_v34, %v7826_v2  ;;  %v7831_v52 = vadd.f32 %v14620_v10, %v17790_v15  ;;  %14718 = vmatprep.mubr.msk.bf16.mxu1 %vm1217_vm2, %v7010_v5  ;;  %v7012_v7 = vsel %vm6875_vm5, %v7009_v11, %v7011_v56  ;;  %v9499_v5 = vrot.slane %v9497_v9, 2 }
 0x3d4   : > { %14856 = vmatprep.mubr.msk.bf16.mxu0 %vm1217_vm2, %v8549_v20  ;;  %v7382_v42 = vpop.f32.mrf.mxu1  ;;  %v9494_v20 = vor.u32 %v9493_v33, %v9490_v1  ;;  %v8551_v43 = vsel %vm6875_vm5, %v8548_v28, %v8550_v13  ;;  %v11028_v60 = vsel %vm11025_vm6, %v11026_v48, %v11027_v26  ;;  %v18659_v13 = vld [vmem:[%s15677_s24 + $0x40] sm:$0xff]  }
 0x3d5   : > { %v8921_v16 = vpop.f32.mrf.mxu0  ;;  %v18641_v54 = vadd.f32 %v14758_v41, %v7831_v52  ;;  %v7829_v34 = vadd.f32 %v7382_v42, %v17795_v8  ;;  %v9502_v41 = vrot.slane %v9500_v6, 3  ;;  %v9508_v52 = vrot.slane %v9506_v32, 2 }
 0x3d6   : > { %v14621_v37 = vpop.f32.mrf.mxu1  ;;  %v9495_v8 = vsel %vm9478_vm7, %v9486_v19, %v9494_v20  ;;  %v9511_v42 = vrot.slane %v9509_v63, 3  ;;  %v9515_v19 = vshrl.u32 %v18659_v13, 16  ;;  %v9518_v9 = vshll.u32 %v18659_v13, 16 }
 0x3d7   : > { %20689 = vst [vmem:[#allocation99_spill] sm:$0xff] %v18641_v54  ;;  %v14759_v15 = vpop.f32.mrf.mxu0  ;;  %v18646_v33 = vadd.f32 %v8921_v16, %v7829_v34  ;;  %v7832_v1 = vadd.f32 %v14621_v37, %v17801_v40  ;;  %v11029_v40 = vrot.slane %v18627_v47, 3  ;;  %v9503_v48 = vor.u32 %v9502_v41, %v9499_v5 }
 0x3d8   : > { %v7385_v10 = vpop.f32.mrf.mxu1  ;;  %v11031_v32 = vrot.slane %v18637_v18, 3  ;;  %v9512_v34 = vor.u32 %v9511_v42, %v9508_v52  ;;  %v9520_v5 = vrot.slane %v9518_v9, 3  ;;  %v18691_v9 = vld [vmem:[%s15677_s24 + $0x50] sm:$0xff]  }
 0x3d9   : > { %v8924_v2 = vpop.f32.mrf.mxu0  ;;  %v18651_v54 = vadd.f32 %v14759_v15, %v7832_v1  ;;  %v7830_v11 = vadd.f32 %v7385_v10, %v17808_v53  ;;  %v18669_v15 = vld [vmem:[%s15677_s24 + $0x48] sm:$0xff]  }
 0x3da   : > { %v14624_v56 = vpop.f32.mrf.mxu1  ;;  %14719 = vmatmul.mubr.msk.bf16.gmra.mxu1 %vm1217_vm2, %v7012_v7  ;;  %v9524_v47 = vshrl.u32 %v18669_v15, 16  ;;  %v9527_v37 = vshll.u32 %v18669_v15, 16  ;;  %v11032_v52 = vsel %vm11025_vm6, %v11029_v40, %v11031_v32 }
 0x3db   : > { %v14762_v28 = vpop.f32.mrf.mxu0  ;;  %14857 = vmatmul.mubr.msk.bf16.gmra.mxu0 %vm1217_vm2, %v8551_v43  ;;  %v18663_v6 = vadd.f32 %v8924_v2, %v7830_v11  ;;  %v7835_v53 = vadd.f32 %v14624_v56, %v17814_v25  ;;  %14862 = vmatprep.mubr.msk.bf16.mxu1 %vm1217_vm2, %v9495_v8  ;;  %v11030_v2 = vsel %vm11025_vm6, %v11027_v26, %v11029_v40  ;;  %v11033_v40 = vrot.slane %v18659_v13, 3 }
 0x3dc   : > { %15000 = vmatprep.mubr.msk.bf16.mxu0 %vm1217_vm2, %v11028_v60  ;;  %v7398_v63 = vpop.f32.mrf.mxu1  ;;  %v9517_v60 = vrot.slane %v9515_v19, 2  ;;  %v9504_v8 = vsel %vm9478_vm7, %v9494_v20, %v9503_v48  ;;  %v9513_v11 = vsel %vm9478_vm7, %v9503_v48, %v9512_v34 }
 0x3dd   : > { %v8937_v16 = vpop.f32.mrf.mxu0  ;;  %v18673_v7 = vadd.f32 %v14762_v28, %v7835_v53  ;;  %v7833_v43 = vadd.f32 %v7398_v63, %v17819_v4  ;;  %v9526_v4 = vrot.slane %v9524_v47, 2  ;;  %v9529_v28 = vrot.slane %v9527_v37, 3 }
 0x3de   : > { %v14625_v25 = vpop.f32.mrf.mxu1  ;;  %v9521_v20 = vor.u32 %v9520_v5, %v9517_v60  ;;  %v9533_v53 = vshrl.u32 %v18691_v9, 16  ;;  %v11035_v63 = vrot.slane %v18669_v15, 3  ;;  %v9536_v47 = vshll.u32 %v18691_v9, 16 }
 0x3df   : > { %v14763_v1 = vpop.f32.mrf.mxu0  ;;  %v18677_v41 = vadd.f32 %v8937_v16, %v7833_v43  ;;  %v7836_v18 = vadd.f32 %v14625_v25, %v17835_v30  ;;  %v9530_v43 = vor.u32 %v9529_v28, %v9526_v4  ;;  %v11034_v15 = vsel %vm11025_vm6, %v11031_v32, %v11033_v40 }
 0x3e0   : > { %v7401_v42 = vpop.f32.mrf.mxu1  ;;  %v9538_v4 = vrot.slane %v9536_v47, 3 }
 0x3e1   : > { %v8940_v10 = vpop.f32.mrf.mxu0  ;;  %v18683_v56 = vadd.f32 %v14763_v1, %v7836_v18  ;;  %v7834_v26 = vadd.f32 %v7401_v42, %v17841_v46  ;;  %v18701_v1 = vld [vmem:[%s15677_s24 + $0x58] sm:$0xff]   ;;  %v9522_v18 = vsel %vm9478_vm7, %v9512_v34, %v9521_v20 }
 0x3e2   : > { %v14628_v30 = vpop.f32.mrf.mxu1  ;;  %14863 = vmatmul.mubr.msk.bf16.vlgmr.msra.gmra.mxu1 %vm1217_vm2, %v9504_v8  ;;  %v9542_v13 = vshrl.u32 %v18701_v1, 16  ;;  %v9545_v25 = vshll.u32 %v18701_v1, 16  ;;  %v20691_v34 = vld [vmem:[#allocation103_spill] sm:$0xff] }
 0x3e3   : > { %v14766_v19 = vpop.f32.mrf.mxu0  ;;  %15001 = vmatmul.mubr.msk.bf16.vlgmr.msra.gmra.mxu0 %vm1217_vm2, %v11030_v2  ;;  %v18694_v16 = vadd.f32 %v8940_v10, %v7834_v26  ;;  %v7839_v46 = vadd.f32 %v14628_v30, %v17849_v59  ;;  %14866 = vmatprep.mubr.msk.bf16.mxu1 %vm1217_vm2, %v9513_v11  ;;  %v9535_v10 = vrot.slane %v9533_v53, 2  ;;  %v11036_v11 = vsel %vm11025_vm6, %v11033_v40, %v11035_v63  ;;  %v18723_v40 = vld [vmem:[%s15677_s24 + $0x60] sm:$0xff]  }
 0x3e4   : > { %15004 = vmatprep.mubr.msk.bf16.mxu0 %vm1217_vm2, %v11032_v52  ;;  %v7414_v37 = vpop.f32.mrf.mxu1  ;;  %v9531_v26 = vsel %vm9478_vm7, %v9521_v20, %v9530_v43  ;;  %v9551_v20 = vshrl.u32 %v18723_v40, 16 }
 0x3e5   : > { %v8953_v48 = vpop.f32.mrf.mxu0  ;;  %v18705_v2 = vadd.f32 %v14766_v19, %v7839_v46  ;;  %v7837_v60 = vadd.f32 %v7414_v37, %v17854_v22  ;;  %v9544_v22 = vrot.slane %v9542_v13, 2  ;;  %v9547_v19 = vrot.slane %v9545_v25, 3  ;;  %v20693_v37 = vld [vmem:[#allocation104_spill] sm:$0xff] }
 0x3e6   : > { %v14629_v5 = vpop.f32.mrf.mxu1 }
 0x3e7   : > { %v14767_v59 = vpop.f32.mrf.mxu0  ;;  %v18710_v8 = vadd.f32 %v8953_v48, %v7837_v60  ;;  %v7840_v52 = vadd.f32 %v14629_v5, %v17861_v36  ;;  %v11037_v36 = vrot.slane %v18691_v9, 3  ;;  %v9554_v48 = vshll.u32 %v18723_v40, 16 }
 0x3e8   : > { %v7417_v28 = vpop.f32.mrf.mxu1  ;;  %v9539_v60 = vor.u32 %v9538_v4, %v9535_v10 }
 0x3e9   : > { %v8956_v42 = vpop.f32.mrf.mxu0  ;;  %v18715_v30 = vadd.f32 %v14767_v59, %v7840_v52  ;;  %v7838_v46 = vadd.f32 %v7417_v28, %v20691_v34  ;;  %v11039_v59 = vrot.slane %v18701_v1, 3  ;;  %v9556_v10 = vrot.slane %v9554_v48, 3  ;;  %v20697_v1 = vld [vmem:[#allocation106_spill] sm:$0xff] }
 0x3ea   : > { %v14632_v53 = vpop.f32.mrf.mxu1  ;;  %14867 = vmatmul.mubr.msk.bf16.gmra.mxu1 %vm1217_vm2, %v9522_v18  ;;  %v9548_v18 = vor.u32 %v9547_v19, %v9544_v22 }
 0x3eb   : > { %20690 = vst [vmem:[#allocation100_spill] sm:$0xff] %v18715_v30  ;;  %v14770_v32 = vpop.f32.mrf.mxu0  ;;  %15005 = vmatmul.mubr.msk.bf16.gmra.mxu0 %vm1217_vm2, %v11034_v15  ;;  %v18727_v47 = vadd.f32 %v8956_v42, %v7838_v46  ;;  %v7843_v13 = vadd.f32 %v14632_v53, %v20693_v37  ;;  %14870 = vmatprep.mubr.msk.bf16.mxu1 %vm1217_vm2, %v9531_v26  ;;  %v18733_v15 = vld [vmem:[%s15677_s24 + $0x68] sm:$0xff]   ;;  %v9553_v26 = vrot.slane %v9551_v20, 2 }
 0x3ec   : > { %15008 = vmatprep.mubr.msk.bf16.mxu0 %vm1217_vm2, %v11036_v11  ;;  %v7430_v5 = vpop.f32.mrf.mxu1  ;;  %v9560_v9 = vshrl.u32 %v18733_v15, 16  ;;  %v9563_v52 = vshll.u32 %v18733_v15, 16  ;;  %v20695_v42 = vld [vmem:[#allocation105_spill] sm:$0xff]  ;;  %v11038_v53 = vsel %vm11025_vm6, %v11035_v63, %v11037_v36  ;;  %v9540_v37 = vsel %vm9478_vm7, %v9530_v43, %v9539_v60  ;;  %v20699_v63 = vld [vmem:[#allocation107_spill] sm:$0xff] }
 0x3ed   : > { %20692 = vst [vmem:[#allocation101_spill] sm:$0xff] %v18727_v47  ;;  %v8969_v25 = vpop.f32.mrf.mxu0  ;;  %v18737_v11 = vadd.f32 %v14770_v32, %v7843_v13  ;;  %v7841_v28 = vadd.f32 %v7430_v5, %v20695_v42  ;;  %v11040_v47 = vsel %vm11025_vm6, %v11037_v36, %v11039_v59  ;;  %v9549_v13 = vsel %vm9478_vm7, %v9539_v60, %v9548_v18 }
 0x3ee   : > { %v14633_v46 = vpop.f32.mrf.mxu1  ;;  %v9562_v5 = vrot.slane %v9560_v9, 2  ;;  %v9565_v42 = vrot.slane %v9563_v52, 3  ;;  %v9557_v43 = vor.u32 %v9556_v10, %v9553_v26  ;;  %v11041_v36 = vrot.slane %v18723_v40, 3  ;;  %v20701_v52 = vld [vmem:[#allocation108_spill] sm:$0xff] }
 0x3ef   : > { %20694 = vst [vmem:[#allocation102_spill] sm:$0xff] %v18737_v11  ;;  %v14771_v34 = vpop.f32.mrf.mxu0  ;;  %v18741_v4 = vadd.f32 %v8969_v25, %v7841_v28  ;;  %v7844_v22 = vadd.f32 %v14633_v46, %v20697_v1  ;;  %v18755_v28 = vld [vmem:[%s15677_s24 + $0x70] sm:$0xff]   ;;  %v18765_v26 = vld [vmem:[%s15677_s24 + $0x78] sm:$0xff]  }
 0x3f0   : > { %v7433_v32 = vpop.f32.mrf.mxu1  ;;  %v9569_v60 = vshrl.u32 %v18755_v28, 16  ;;  %v9572_v1 = vshll.u32 %v18755_v28, 16  ;;  %v9578_v40 = vshrl.u32 %v18765_v26, 16  ;;  %v9581_v10 = vshll.u32 %v18765_v26, 16 }
 0x3f1   : > { %20696 = vst [vmem:[#allocation103_spill] sm:$0xff] %v18741_v4  ;;  %v8972_v19 = vpop.f32.mrf.mxu0  ;;  %v18747_v11 = vadd.f32 %v14771_v34, %v7844_v22  ;;  %v7842_v20 = vadd.f32 %v7433_v32, %v20699_v63 }
 0x3f2   : > { %v14636_v25 = vpop.f32.mrf.mxu1  ;;  %14871 = vmatmul.mubr.msk.bf16.gmra.mxu1 %vm1217_vm2, %v9540_v37  ;;  %v9574_v4 = vrot.slane %v9572_v1, 3 }
 0x3f3   : > { %20698 = vst [vmem:[#allocation104_spill] sm:$0xff] %v18747_v11  ;;  %v14774_v48 = vpop.f32.mrf.mxu0  ;;  %15009 = vmatmul.mubr.msk.bf16.gmra.mxu0 %vm1217_vm2, %v11038_v53  ;;  %v18758_v9 = vadd.f32 %v8972_v19, %v7842_v20  ;;  %v7847_v34 = vadd.f32 %v14636_v25, %v20701_v52  ;;  %14874 = vmatprep.mubr.msk.bf16.mxu1 %vm1217_vm2, %v9549_v13  ;;  %v11043_v53 = vrot.slane %v18733_v15, 3  ;;  %v20703_v19 = vld [vmem:[#allocation109_spill] sm:$0xff]  ;;  %v9571_v25 = vrot.slane %v9569_v60, 2 }
 0x3f4   : > { %15012 = vmatprep.mubr.msk.bf16.mxu0 %vm1217_vm2, %v11040_v47  ;;  %v7446_v22 = vpop.f32.mrf.mxu1  ;;  %v9566_v47 = vor.u32 %v9565_v42, %v9562_v5  ;;  %v9558_v13 = vsel %vm9478_vm7, %v9548_v18, %v9557_v43  ;;  %v11042_v15 = vsel %vm11025_vm6, %v11039_v59, %v11041_v36  ;;  %v20705_v5 = vld [vmem:[#allocation47_spill] sm:$0xff]  ;;  %v20707_v18 = vld [vmem:[#allocation49_spill] sm:$0xff] }
 0x3f5   : > { %20700 = vst [vmem:[#allocation105_spill] sm:$0xff] %v18758_v9  ;;  %v8985_v46 = vpop.f32.mrf.mxu0  ;;  %v18769_v37 = vadd.f32 %v14774_v48, %v7847_v34  ;;  %v7845_v32 = vadd.f32 %v7446_v22, %v20703_v19  ;;  %v11044_v11 = vsel %vm11025_vm6, %v11041_v36, %v11043_v53  ;;  %v9580_v22 = vrot.slane %v9578_v40, 2 }
 0x3f6   : > { %v14637_v20 = vpop.f32.mrf.mxu1  ;;  %v9567_v34 = vsel %vm9478_vm7, %v9557_v43, %v9566_v47  ;;  %v9583_v19 = vrot.slane %v9581_v10, 3  ;;  %v11045_v36 = vrot.slane %v18755_v28, 3  ;;  %v20709_v10 = vld [vmem:[#allocation51_spill] sm:$0xff] }
 0x3f7   : > { %20702 = vst [vmem:[#allocation106_spill] sm:$0xff] %v18769_v37  ;;  %v14775_v63 = vpop.f32.mrf.mxu0  ;;  %v18774_v52 = vadd.f32 %v8985_v46, %v7845_v32  ;;  %v7848_v42 = vadd.f32 %v14637_v20, %v20705_v5  ;;  %v18787_v46 = vld [vmem:[%s15677_s24 + $0x80] sm:$0xff]   ;;  %v9575_v20 = vor.u32 %v9574_v4, %v9571_v25  ;;  %v18797_v5 = vld [vmem:[%s15677_s24 + $0x88] sm:$0xff]  }
 0x3f8   : > { %v7449_v48 = vpop.f32.mrf.mxu1  ;;  %v9587_v43 = vshrl.u32 %v18787_v46, 16  ;;  %v9590_v1 = vshll.u32 %v18787_v46, 16  ;;  %v9596_v28 = vshrl.u32 %v18797_v5, 16 }
 0x3f9   : > { %20704 = vst [vmem:[#allocation107_spill] sm:$0xff] %v18774_v52  ;;  %v8988_v9 = vpop.f32.mrf.mxu0  ;;  %v18779_v37 = vadd.f32 %v14775_v63, %v7848_v42  ;;  %v7846_v30 = vadd.f32 %v7449_v48, %v20707_v18  ;;  %v9599_v42 = vshll.u32 %v18797_v5, 16 }
 0x3fa   : > { %v14640_v60 = vpop.f32.mrf.mxu1  ;;  %14875 = vmatmul.mubr.msk.bf16.gmra.mxu1 %vm1217_vm2, %v9558_v13  ;;  %v11047_v13 = vrot.slane %v18765_v26, 3  ;;  %v9592_v4 = vrot.slane %v9590_v1, 3  ;;  %v20713_v26 = vld [vmem:[#allocation55_spill] sm:$0xff] }
 0x3fb   : > { %20706 = vst [vmem:[#allocation108_spill] sm:$0xff] %v18779_v37  ;;  %v14778_v59 = vpop.f32.mrf.mxu0  ;;  %15013 = vmatmul.mubr.msk.bf16.gmra.mxu0 %vm1217_vm2, %v11042_v15  ;;  %v18791_v40 = vadd.f32 %v8988_v9, %v7846_v30  ;;  %v7851_v32 = vadd.f32 %v14640_v60, %v20709_v10  ;;  %14878 = vmatprep.mubr.msk.bf16.mxu1 %vm1217_vm2, %v9567_v34  ;;  %v20711_v30 = vld [vmem:[#allocation53_spill] sm:$0xff]  ;;  %v9589_v34 = vrot.slane %v9587_v43, 2 }
 0x3fc   : > { %15016 = vmatprep.mubr.msk.bf16.mxu0 %vm1217_vm2, %v11044_v11  ;;  %v7462_v15 = vpop.f32.mrf.mxu1  ;;  %v9584_v11 = vor.u32 %v9583_v19, %v9580_v22  ;;  %v11046_v10 = vsel %vm11025_vm6, %v11043_v53, %v11045_v36  ;;  %v11048_v37 = vsel %vm11025_vm6, %v11045_v36, %v11047_v13  ;;  %v20715_v53 = vld [vmem:[#allocation57_spill] sm:$0xff]  ;;  %v11049_v36 = vrot.slane %v18787_v46, 3 }
 0x3fd   : > { %20708 = vst [vmem:[#allocation109_spill] sm:$0xff] %v18791_v40  ;;  %v9001_v63 = vpop.f32.mrf.mxu0  ;;  %v18801_v48 = vadd.f32 %v14778_v59, %v7851_v32  ;;  %v7849_v9 = vadd.f32 %v7462_v15, %v20711_v30  ;;  %v9576_v40 = vsel %vm9478_vm7, %v9566_v47, %v9575_v20  ;;  %v9598_v15 = vrot.slane %v9596_v28, 2 }
 0x3fe   : > { %v14641_v60 = vpop.f32.mrf.mxu1  ;;  %v9585_v32 = vsel %vm9478_vm7, %v9575_v20, %v9584_v11  ;;  %v9601_v30 = vrot.slane %v9599_v42, 3  ;;  %v9593_v47 = vor.u32 %v9592_v4, %v9589_v34  ;;  %v20717_v42 = vld [vmem:[#allocation59_spill] sm:$0xff] }
 0x3ff   : > { %20710 = vst [vmem:[#allocation47_spill] sm:$0xff] %v18801_v48  ;;  %v14779_v18 = vpop.f32.mrf.mxu0  ;;  %v18805_v25 = vadd.f32 %v9001_v63, %v7849_v9  ;;  %v7852_v22 = vadd.f32 %v14641_v60, %v20713_v26  ;;  %v18819_v9 = vld [vmem:[%s15677_s24 + $0x90] sm:$0xff]   ;;  %v18829_v34 = vld [vmem:[%s15677_s24 + $0x98] sm:$0xff]  }
 0x400   : > { %v7465_v59 = vpop.f32.mrf.mxu1  ;;  %v9605_v20 = vshrl.u32 %v18819_v9, 16  ;;  %v9614_v46 = vshrl.u32 %v18829_v34, 16  ;;  %v9617_v4 = vshll.u32 %v18829_v34, 16 }
 0x401   : > { %20712 = vst [vmem:[#allocation49_spill] sm:$0xff] %v18805_v25  ;;  %v9004_v19 = vpop.f32.mrf.mxu0  ;;  %v18811_v48 = vadd.f32 %v14779_v18, %v7852_v22  ;;  %v7850_v43 = vadd.f32 %v7465_v59, %v20715_v53 }
 0x402   : > { %v14644_v63 = vpop.f32.mrf.mxu1  ;;  %14879 = vmatmul.mubr.msk.bf16.gmra.mxu1 %vm1217_vm2, %v9576_v40  ;;  %v9608_v40 = vshll.u32 %v18819_v9, 16 }
 0x403   : > { %20714 = vst [vmem:[#allocation51_spill] sm:$0xff] %v18811_v48  ;;  %v14782_v1 = vpop.f32.mrf.mxu0  ;;  %15017 = vmatmul.mubr.msk.bf16.gmra.mxu0 %vm1217_vm2, %v11046_v10  ;;  %v18822_v28 = vadd.f32 %v9004_v19, %v7850_v43  ;;  %v7855_v18 = vadd.f32 %v14644_v63, %v20717_v42  ;;  %14882 = vmatprep.mubr.msk.bf16.mxu1 %vm1217_vm2, %v9585_v32  ;;  %v11051_v10 = vrot.slane %v18797_v5, 3  ;;  %v20719_v19 = vld [vmem:[#allocation61_spill] sm:$0xff]  ;;  %v9607_v63 = vrot.slane %v9605_v20, 2 }
 0x404   : > { %15020 = vmatprep.mubr.msk.bf16.mxu0 %vm1217_vm2, %v11048_v37  ;;  %v7478_v26 = vpop.f32.mrf.mxu1  ;;  %v9602_v37 = vor.u32 %v9601_v30, %v9598_v15  ;;  %v9594_v32 = vsel %vm9478_vm7, %v9584_v11, %v9593_v47  ;;  %v11050_v5 = vsel %vm11025_vm6, %v11047_v13, %v11049_v36  ;;  %v20721_v15 = vld [vmem:[#allocation63_spill] sm:$0xff]  ;;  %v9610_v25 = vrot.slane %v9608_v40, 3  ;;  %v20723_v11 = vld [vmem:[#allocation65_spill] sm:$0xff] }
 0x405   : > { %20716 = vst [vmem:[#allocation53_spill] sm:$0xff] %v18822_v28  ;;  %v9017_v60 = vpop.f32.mrf.mxu0  ;;  %v18833_v22 = vadd.f32 %v14782_v1, %v7855_v18  ;;  %v7853_v59 = vadd.f32 %v7478_v26, %v20719_v19  ;;  %v11052_v48 = vsel %vm11025_vm6, %v11049_v36, %v11051_v10  ;;  %v9616_v26 = vrot.slane %v9614_v46, 2 }
 0x406   : > { %v14645_v43 = vpop.f32.mrf.mxu1  ;;  %v9603_v18 = vsel %vm9478_vm7, %v9593_v47, %v9602_v37  ;;  %v9619_v19 = vrot.slane %v9617_v4, 3  ;;  %v11053_v36 = vrot.slane %v18819_v9, 3  ;;  %v20725_v4 = vld [vmem:[#allocation67_spill] sm:$0xff] }
 0x407   : > { %20718 = vst [vmem:[#allocation55_spill] sm:$0xff] %v18833_v22  ;;  %v14783_v53 = vpop.f32.mrf.mxu0  ;;  %v18838_v42 = vadd.f32 %v9017_v60, %v7853_v59  ;;  %v7856_v30 = vadd.f32 %v14645_v43, %v20721_v15  ;;  %v18851_v60 = vld [vmem:[%s15677_s24 + $0xa0] sm:$0xff]   ;;  %v9611_v43 = vor.u32 %v9610_v25, %v9607_v63  ;;  %v18861_v15 = vld [vmem:[%s15677_s24 + $0xa8] sm:$0xff]  }
 0x408   : > { %v7481_v1 = vpop.f32.mrf.mxu1  ;;  %v9623_v47 = vshrl.u32 %v18851_v60, 16  ;;  %v9626_v40 = vshll.u32 %v18851_v60, 16  ;;  %v9632_v9 = vshrl.u32 %v18861_v15, 16 }
 0x409   : > { %20720 = vst [vmem:[#allocation57_spill] sm:$0xff] %v18838_v42  ;;  %v9020_v28 = vpop.f32.mrf.mxu0  ;;  %v18843_v22 = vadd.f32 %v14783_v53, %v7856_v30  ;;  %v7854_v52 = vadd.f32 %v7481_v1, %v20723_v11  ;;  %v9635_v30 = vshll.u32 %v18861_v15, 16 }
 0x40a   : > { %v14648_v20 = vpop.f32.mrf.mxu1  ;;  %14883 = vmatmul.mubr.msk.bf16.gmra.mxu1 %vm1217_vm2, %v9594_v32  ;;  %v11055_v32 = vrot.slane %v18829_v34, 3  ;;  %v9628_v25 = vrot.slane %v9626_v40, 3  ;;  %v20729_v34 = vld [vmem:[#allocation71_spill] sm:$0xff] }
 0x40b   : > { %20722 = vst [vmem:[#allocation59_spill] sm:$0xff] %v18843_v22  ;;  %v14786_v13 = vpop.f32.mrf.mxu0  ;;  %15021 = vmatmul.mubr.msk.bf16.gmra.mxu0 %vm1217_vm2, %v11050_v5  ;;  %v18855_v46 = vadd.f32 %v9020_v28, %v7854_v52  ;;  %v7859_v59 = vadd.f32 %v14648_v20, %v20725_v4  ;;  %14886 = vmatprep.mubr.msk.bf16.mxu1 %vm1217_vm2, %v9603_v18  ;;  %v20727_v52 = vld [vmem:[#allocation69_spill] sm:$0xff]  ;;  %v9625_v18 = vrot.slane %v9623_v47, 2 }
 0x40c   : > { %15024 = vmatprep.mubr.msk.bf16.mxu0 %vm1217_vm2, %v11052_v48  ;;  %v7494_v5 = vpop.f32.mrf.mxu1  ;;  %v9620_v48 = vor.u32 %v9619_v19, %v9616_v26  ;;  %v11054_v4 = vsel %vm11025_vm6, %v11051_v10, %v11053_v36  ;;  %v11056_v22 = vsel %vm11025_vm6, %v11053_v36, %v11055_v32  ;;  %v20731_v10 = vld [vmem:[#allocation73_spill] sm:$0xff]  ;;  %v11057_v36 = vrot.slane %v18851_v60, 3 }
 0x40d   : > { %20724 = vst [vmem:[#allocation61_spill] sm:$0xff] %v18855_v46  ;;  %v9033_v53 = vpop.f32.mrf.mxu0  ;;  %v18865_v1 = vadd.f32 %v14786_v13, %v7859_v59  ;;  %v7857_v28 = vadd.f32 %v7494_v5, %v20727_v52  ;;  %v9612_v46 = vsel %vm9478_vm7, %v9602_v37, %v9611_v43  ;;  %v9634_v5 = vrot.slane %v9632_v9, 2 }
 0x40e   : > { %v14649_v20 = vpop.f32.mrf.mxu1  ;;  %v9621_v59 = vsel %vm9478_vm7, %v9611_v43, %v9620_v48  ;;  %v9637_v52 = vrot.slane %v9635_v30, 3  ;;  %v9629_v37 = vor.u32 %v9628_v25, %v9625_v18  ;;  %v20733_v30 = vld [vmem:[#allocation75_spill] sm:$0xff] }
 0x40f   : > { %20726 = vst [vmem:[#allocation63_spill] sm:$0xff] %v18865_v1  ;;  %v14787_v11 = vpop.f32.mrf.mxu0  ;;  %v18869_v63 = vadd.f32 %v9033_v53, %v7857_v28  ;;  %v7860_v26 = vadd.f32 %v14649_v20, %v20729_v34  ;;  %v18883_v28 = vld [vmem:[%s15677_s24 + $0xb0] sm:$0xff]   ;;  %v18893_v18 = vld [vmem:[%s15677_s24 + $0xb8] sm:$0xff]  }
 0x410   : > { %v7497_v13 = vpop.f32.mrf.mxu1  ;;  %v9641_v43 = vshrl.u32 %v18883_v28, 16  ;;  %v9650_v60 = vshrl.u32 %v18893_v18, 16  ;;  %v9653_v25 = vshll.u32 %v18893_v18, 16 }
 0x411   : > { %20728 = vst [vmem:[#allocation65_spill] sm:$0xff] %v18869_v63  ;;  %v9036_v19 = vpop.f32.mrf.mxu0  ;;  %v18875_v1 = vadd.f32 %v14787_v11, %v7860_v26  ;;  %v7858_v47 = vadd.f32 %v7497_v13, %v20731_v10 }
 0x412   : > { %v14652_v53 = vpop.f32.mrf.mxu1  ;;  %14887 = vmatmul.mubr.msk.bf16.gmra.mxu1 %vm1217_vm2, %v9612_v46  ;;  %v9644_v46 = vshll.u32 %v18883_v28, 16 }
 0x413   : > { %20730 = vst [vmem:[#allocation67_spill] sm:$0xff] %v18875_v1  ;;  %v14790_v40 = vpop.f32.mrf.mxu0  ;;  %15025 = vmatmul.mubr.msk.bf16.gmra.mxu0 %vm1217_vm2, %v11054_v4  ;;  %v18886_v9 = vadd.f32 %v9036_v19, %v7858_v47  ;;  %v7863_v11 = vadd.f32 %v14652_v53, %v20733_v30  ;;  %14890 = vmatprep.mubr.msk.bf16.mxu1 %vm1217_vm2, %v9621_v59  ;;  %v11059_v4 = vrot.slane %v18861_v15, 3  ;;  %v20735_v19 = vld [vmem:[#allocation77_spill] sm:$0xff]  ;;  %v9643_v53 = vrot.slane %v9641_v43, 2 }
 0x414   : > { %15028 = vmatprep.mubr.msk.bf16.mxu0 %vm1217_vm2, %v11056_v22  ;;  %v7510_v34 = vpop.f32.mrf.mxu1  ;;  %v9638_v22 = vor.u32 %v9637_v52, %v9634_v5  ;;  %v9630_v59 = vsel %vm9478_vm7, %v9620_v48, %v9629_v37  ;;  %v11058_v15 = vsel %vm11025_vm6, %v11055_v32, %v11057_v36  ;;  %v20737_v5 = vld [vmem:[#allocation79_spill] sm:$0xff]  ;;  %v9646_v63 = vrot.slane %v9644_v46, 3  ;;  %v20739_v48 = vld [vmem:[#allocation81_spill] sm:$0xff] }
 0x415   : > { %20732 = vst [vmem:[#allocation69_spill] sm:$0xff] %v18886_v9  ;;  %v9049_v20 = vpop.f32.mrf.mxu0  ;;  %v18897_v26 = vadd.f32 %v14790_v40, %v7863_v11  ;;  %v7861_v13 = vadd.f32 %v7510_v34, %v20735_v19  ;;  %v11060_v1 = vsel %vm11025_vm6, %v11057_v36, %v11059_v4  ;;  %v9652_v34 = vrot.slane %v9650_v60, 2 }
 0x416   : > { %v14653_v47 = vpop.f32.mrf.mxu1  ;;  %v9639_v11 = vsel %vm9478_vm7, %v9629_v37, %v9638_v22  ;;  %v9655_v19 = vrot.slane %v9653_v25, 3  ;;  %v11061_v36 = vrot.slane %v18883_v28, 3  ;;  %v20741_v25 = vld [vmem:[#allocation83_spill] sm:$0xff] }
 0x417   : > { %20734 = vst [vmem:[#allocation71_spill] sm:$0xff] %v18897_v26  ;;  %v14791_v10 = vpop.f32.mrf.mxu0  ;;  %v18902_v30 = vadd.f32 %v9049_v20, %v7861_v13  ;;  %v7864_v52 = vadd.f32 %v14653_v47, %v20737_v5  ;;  %v18915_v20 = vld [vmem:[%s15677_s24 + $0xc0] sm:$0xff]   ;;  %v9647_v47 = vor.u32 %v9646_v63, %v9643_v53  ;;  %v18925_v5 = vld [vmem:[%s15677_s24 + $0xc8] sm:$0xff]  }
 0x418   : > { %v7513_v40 = vpop.f32.mrf.mxu1  ;;  %v9659_v37 = vshrl.u32 %v18915_v20, 16  ;;  %v9662_v46 = vshll.u32 %v18915_v20, 16  ;;  %v9668_v28 = vshrl.u32 %v18925_v5, 16 }
 0x419   : > { %20736 = vst [vmem:[#allocation73_spill] sm:$0xff] %v18902_v30  ;;  %v9052_v9 = vpop.f32.mrf.mxu0  ;;  %v18907_v26 = vadd.f32 %v14791_v10, %v7864_v52  ;;  %v7862_v42 = vadd.f32 %v7513_v40, %v20739_v48  ;;  %v9671_v52 = vshll.u32 %v18925_v5, 16 }
 0x41a   : > { %v14656_v43 = vpop.f32.mrf.mxu1  ;;  %14891 = vmatmul.mubr.msk.bf16.gmra.mxu1 %vm1217_vm2, %v9630_v59  ;;  %v11063_v59 = vrot.slane %v18893_v18, 3  ;;  %v9664_v63 = vrot.slane %v9662_v46, 3  ;;  %v20745_v18 = vld [vmem:[#allocation87_spill] sm:$0xff] }
 0x41b   : > { %20738 = vst [vmem:[#allocation75_spill] sm:$0xff] %v18907_v26  ;;  %v14794_v32 = vpop.f32.mrf.mxu0  ;;  %15029 = vmatmul.mubr.msk.bf16.gmra.mxu0 %vm1217_vm2, %v11058_v15  ;;  %v18919_v60 = vadd.f32 %v9052_v9, %v7862_v42  ;;  %v7867_v13 = vadd.f32 %v14656_v43, %v20741_v25  ;;  %14894 = vmatprep.mubr.msk.bf16.mxu1 %vm1217_vm2, %v9639_v11  ;;  %v20743_v42 = vld [vmem:[#allocation85_spill] sm:$0xff]  ;;  %v9661_v11 = vrot.slane %v9659_v37, 2 }
 0x41c   : > { %15032 = vmatprep.mubr.msk.bf16.mxu0 %vm1217_vm2, %v11060_v1  ;;  %v7526_v15 = vpop.f32.mrf.mxu1  ;;  %v9656_v1 = vor.u32 %v9655_v19, %v9652_v34  ;;  %v11062_v25 = vsel %vm11025_vm6, %v11059_v4, %v11061_v36  ;;  %v11064_v26 = vsel %vm11025_vm6, %v11061_v36, %v11063_v59  ;;  %v20747_v4 = vld [vmem:[#allocation89_spill] sm:$0xff]  ;;  %v11065_v36 = vrot.slane %v18915_v20, 3 }
 0x41d   : > { %20740 = vst [vmem:[#allocation77_spill] sm:$0xff] %v18919_v60  ;;  %v9065_v10 = vpop.f32.mrf.mxu0  ;;  %v18929_v40 = vadd.f32 %v14794_v32, %v7867_v13  ;;  %v7865_v9 = vadd.f32 %v7526_v15, %v20743_v42  ;;  %v9648_v60 = vsel %vm9478_vm7, %v9638_v22, %v9647_v47  ;;  %v9670_v15 = vrot.slane %v9668_v28, 2 }
 0x41e   : > { %v14657_v43 = vpop.f32.mrf.mxu1  ;;  %v9657_v13 = vsel %vm9478_vm7, %v9647_v47, %v9656_v1  ;;  %v9673_v42 = vrot.slane %v9671_v52, 3  ;;  %v9665_v22 = vor.u32 %v9664_v63, %v9661_v11  ;;  %v20749_v52 = vld [vmem:[#allocation91_spill] sm:$0xff] }
 0x41f   : > { %20742 = vst [vmem:[#allocation79_spill] sm:$0xff] %v18929_v40  ;;  %v14795_v48 = vpop.f32.mrf.mxu0  ;;  %v18933_v53 = vadd.f32 %v9065_v10, %v7865_v9  ;;  %v7868_v34 = vadd.f32 %v14657_v43, %v20745_v18  ;;  %v18947_v9 = vld [vmem:[%s15677_s24 + $0xd0] sm:$0xff]   ;;  %v18957_v11 = vld [vmem:[%s15677_s24 + $0xd8] sm:$0xff]  }
 0x420   : > { %v7529_v32 = vpop.f32.mrf.mxu1  ;;  %v9677_v47 = vshrl.u32 %v18947_v9, 16  ;;  %v9686_v20 = vshrl.u32 %v18957_v11, 16  ;;  %v9689_v63 = vshll.u32 %v18957_v11, 16 }
 0x421   : > { %20744 = vst [vmem:[#allocation81_spill] sm:$0xff] %v18933_v53  ;;  %v9068_v19 = vpop.f32.mrf.mxu0  ;;  %v18939_v40 = vadd.f32 %v14795_v48, %v7868_v34  ;;  %v7866_v37 = vadd.f32 %v7529_v32, %v20747_v4 }
 0x422   : > { %v14660_v10 = vpop.f32.mrf.mxu1  ;;  %14895 = vmatmul.mubr.msk.bf16.gmra.mxu1 %vm1217_vm2, %v9648_v60  ;;  %v9680_v60 = vshll.u32 %v18947_v9, 16 }
 0x423   : > { %20746 = vst [vmem:[#allocation83_spill] sm:$0xff] %v18939_v40  ;;  %v14798_v46 = vpop.f32.mrf.mxu0  ;;  %15033 = vmatmul.mubr.msk.bf16.gmra.mxu0 %vm1217_vm2, %v11062_v25  ;;  %v18950_v28 = vadd.f32 %v9068_v19, %v7866_v37  ;;  %v7871_v48 = vadd.f32 %v14660_v10, %v20749_v52  ;;  %14898 = vmatprep.mubr.msk.bf16.mxu1 %vm1217_vm2, %v9657_v13  ;;  %v11067_v25 = vrot.slane %v18925_v5, 3  ;;  %v20751_v19 = vld [vmem:[#allocation93_spill] sm:$0xff]  ;;  %v9679_v10 = vrot.slane %v9677_v47, 2 }
 0x424   : > { %15036 = vmatprep.mubr.msk.bf16.mxu0 %vm1217_vm2, %v11064_v26  ;;  %v7542_v18 = vpop.f32.mrf.mxu1  ;;  %v9674_v26 = vor.u32 %v9673_v42, %v9670_v15  ;;  %v9666_v13 = vsel %vm9478_vm7, %v9656_v1, %v9665_v22  ;;  %v11066_v5 = vsel %vm11025_vm6, %v11063_v59, %v11065_v36  ;;  %v20753_v15 = vld [vmem:[#allocation95_spill] sm:$0xff]  ;;  %v9682_v53 = vrot.slane %v9680_v60, 3  ;;  %v20755_v1 = vld [vmem:[#allocation97_spill] sm:$0xff] }
 0x425   : > { %20748 = vst [vmem:[#allocation85_spill] sm:$0xff] %v18950_v28  ;;  %v9081_v43 = vpop.f32.mrf.mxu0  ;;  %v18961_v34 = vadd.f32 %v14798_v46, %v7871_v48  ;;  %v7869_v32 = vadd.f32 %v7542_v18, %v20751_v19  ;;  %v11068_v40 = vsel %vm11025_vm6, %v11065_v36, %v11067_v25  ;;  %v9688_v18 = vrot.slane %v9686_v20, 2 }
 0x426   : > { %v14661_v37 = vpop.f32.mrf.mxu1  ;;  %v9675_v48 = vsel %vm9478_vm7, %v9665_v22, %v9674_v26  ;;  %v9691_v19 = vrot.slane %v9689_v63, 3  ;;  %v11069_v36 = vrot.slane %v18947_v9, 3  ;;  %v20757_v63 = vld [vmem:[#allocation5_spill] sm:$0xff] }
 0x427   : > { %20750 = vst [vmem:[#allocation87_spill] sm:$0xff] %v18961_v34  ;;  %v14799_v4 = vpop.f32.mrf.mxu0  ;;  %v18966_v52 = vadd.f32 %v9081_v43, %v7869_v32  ;;  %v7872_v42 = vadd.f32 %v14661_v37, %v20753_v15  ;;  %v18979_v43 = vld [vmem:[%s15677_s24 + $0xe0] sm:$0xff]   ;;  %v9683_v37 = vor.u32 %v9682_v53, %v9679_v10  ;;  %v18989_v15 = vld [vmem:[%s15677_s24 + $0xe8] sm:$0xff]  }
 0x428   : > { %v7545_v46 = vpop.f32.mrf.mxu1  ;;  %v9695_v22 = vshrl.u32 %v18979_v43, 16  ;;  %v9698_v60 = vshll.u32 %v18979_v43, 16  ;;  %v9704_v9 = vshrl.u32 %v18989_v15, 16 }
 0x429   : > { %20752 = vst [vmem:[#allocation89_spill] sm:$0xff] %v18966_v52  ;;  %v9084_v28 = vpop.f32.mrf.mxu0  ;;  %v18971_v34 = vadd.f32 %v14799_v4, %v7872_v42  ;;  %v7870_v30 = vadd.f32 %v7545_v46, %v20755_v1  ;;  %v9707_v42 = vshll.u32 %v18989_v15, 16 }
 0x42a   : > { %v14664_v47 = vpop.f32.mrf.mxu1  ;;  %14899 = vmatmul.mubr.msk.bf16.gmra.mxu1 %vm1217_vm2, %v9666_v13  ;;  %v11071_v13 = vrot.slane %v18957_v11, 3  ;;  %v9700_v53 = vrot.slane %v9698_v60, 3  ;;  %v20761_v11 = vld [vmem:[#allocation7_spill] sm:$0xff] }
 0x42b   : > { %20754 = vst [vmem:[#allocation91_spill] sm:$0xff] %v18971_v34  ;;  %v14802_v59 = vpop.f32.mrf.mxu0  ;;  %15037 = vmatmul.mubr.msk.bf16.gmra.mxu0 %vm1217_vm2, %v11066_v5  ;;  %v18983_v20 = vadd.f32 %v9084_v28, %v7870_v30  ;;  %v7875_v32 = vadd.f32 %v14664_v47, %v20757_v63  ;;  %14902 = vmatprep.mubr.msk.bf16.mxu1 %vm1217_vm2, %v9675_v48  ;;  %v20759_v30 = vld [vmem:[#allocation6_spill] sm:$0xff]  ;;  %v9697_v48 = vrot.slane %v9695_v22, 2 }
 0x42c   : > { %15040 = vmatprep.mubr.msk.bf16.mxu0 %vm1217_vm2, %v11068_v40  ;;  %v7558_v5 = vpop.f32.mrf.mxu1  ;;  %v9692_v40 = vor.u32 %v9691_v19, %v9688_v18  ;;  %v11070_v63 = vsel %vm11025_vm6, %v11067_v25, %v11069_v36  ;;  %v11072_v34 = vsel %vm11025_vm6, %v11069_v36, %v11071_v13  ;;  %v20763_v25 = vld [vmem:[#allocation8_spill] sm:$0xff]  ;;  %v11073_v36 = vrot.slane %v18979_v43, 3 }
 0x42d   : > { %20756 = vst [vmem:[#allocation93_spill] sm:$0xff] %v18983_v20  ;;  %v9097_v4 = vpop.f32.mrf.mxu0  ;;  %v18993_v46 = vadd.f32 %v14802_v59, %v7875_v32  ;;  %v7873_v28 = vadd.f32 %v7558_v5, %v20759_v30  ;;  %v9684_v20 = vsel %vm9478_vm7, %v9674_v26, %v9683_v37  ;;  %v9706_v5 = vrot.slane %v9704_v9, 2 }
 0x42e   : > { %v14665_v47 = vpop.f32.mrf.mxu1  ;;  %v9693_v32 = vsel %vm9478_vm7, %v9683_v37, %v9692_v40  ;;  %v9709_v30 = vrot.slane %v9707_v42, 3  ;;  %v9701_v26 = vor.u32 %v9700_v53, %v9697_v48  ;;  %v20765_v42 = vld [vmem:[#allocation9_spill] sm:$0xff]  ;;  %v19021_v48 = vld [vmem:[%s15677_s24 + $0xf8] sm:$0xff]  }
 0x42f   : > { %20758 = vst [vmem:[#allocation95_spill] sm:$0xff] %v18993_v46  ;;  %v14803_v1 = vpop.f32.mrf.mxu0  ;;  %v18997_v10 = vadd.f32 %v9097_v4, %v7873_v28  ;;  %v7876_v18 = vadd.f32 %v14665_v47, %v20761_v11  ;;  %v19011_v28 = vld [vmem:[%s15677_s24 + $0xf0] sm:$0xff]   ;;  %v9722_v43 = vshrl.u32 %v19021_v48, 16  ;;  %v9725_v53 = vshll.u32 %v19021_v48, 16 }
 0x430   : > { %v7561_v59 = vpop.f32.mrf.mxu1  ;;  %v9713_v37 = vshrl.u32 %v19011_v28, 16 }
 0x431   : > { %20760 = vst [vmem:[#allocation97_spill] sm:$0xff] %v18997_v10  ;;  %v9100_v19 = vpop.f32.mrf.mxu0  ;;  %v19003_v46 = vadd.f32 %v14803_v1, %v7876_v18  ;;  %v7874_v22 = vadd.f32 %v7561_v59, %v20763_v25 }
 0x432   : > { %v14668_v4 = vpop.f32.mrf.mxu1  ;;  %14903 = vmatmul.mubr.msk.bf16.gmra.mxu1 %vm1217_vm2, %v9684_v20  ;;  %v9716_v20 = vshll.u32 %v19011_v28, 16 }
 0x433   : > { %20762 = vst [vmem:[#allocation5_spill] sm:$0xff] %v19003_v46  ;;  %v14806_v60 = vpop.f32.mrf.mxu0  ;;  %15041 = vmatmul.mubr.msk.bf16.gmra.mxu0 %vm1217_vm2, %v11070_v63  ;;  %v19014_v9 = vadd.f32 %v9100_v19, %v7874_v22  ;;  %v7879_v1 = vadd.f32 %v14668_v4, %v20765_v42  ;;  %14906 = vmatprep.mubr.msk.bf16.mxu1 %vm1217_vm2, %v9693_v32  ;;  %v11075_v63 = vrot.slane %v18989_v15, 3  ;;  %v20767_v19 = vld [vmem:[#allocation10_spill] sm:$0xff]  ;;  %v9715_v4 = vrot.slane %v9713_v37, 2 }
 0x434   : > { %15044 = vmatprep.mubr.msk.bf16.mxu0 %vm1217_vm2, %v11072_v34  ;;  %v7574_v11 = vpop.f32.mrf.mxu1  ;;  %v9710_v34 = vor.u32 %v9709_v30, %v9706_v5  ;;  %v9702_v32 = vsel %vm9478_vm7, %v9692_v40, %v9701_v26  ;;  %v11074_v15 = vsel %vm11025_vm6, %v11071_v13, %v11073_v36  ;;  %v20769_v5 = vld [vmem:[#allocation11_spill] sm:$0xff]  ;;  %v9718_v10 = vrot.slane %v9716_v20, 3  ;;  %v20771_v40 = vld [vmem:[#allocation12_spill] sm:$0xff] }
 0x435   : > { %20764 = vst [vmem:[#allocation6_spill] sm:$0xff] %v19014_v9  ;;  %v9113_v47 = vpop.f32.mrf.mxu0  ;;  %v19025_v18 = vadd.f32 %v14806_v60, %v7879_v1  ;;  %v7877_v59 = vadd.f32 %v7574_v11, %v20767_v19  ;;  %v11076_v46 = vsel %vm11025_vm6, %v11073_v36, %v11075_v63  ;;  %v9724_v11 = vrot.slane %v9722_v43, 2 }
 0x436   : > { %v14669_v22 = vpop.f32.mrf.mxu1  ;;  %v9711_v1 = vsel %vm9478_vm7, %v9701_v26, %v9710_v34  ;;  %v9727_v19 = vrot.slane %v9725_v53, 3  ;;  %v11077_v36 = vrot.slane %v19011_v28, 3  ;;  %v20773_v53 = vld [vmem:[#allocation13_spill] sm:$0xff] }
 0x437   : > { %20766 = vst [vmem:[#allocation7_spill] sm:$0xff] %v19025_v18  ;;  %v14807_v25 = vpop.f32.mrf.mxu0  ;;  %v19030_v42 = vadd.f32 %v9113_v47, %v7877_v59  ;;  %v7880_v30 = vadd.f32 %v14669_v22, %v20769_v5  ;;  %v19043_v47 = vld [vmem:[%s15677_s24 + $0x100] sm:$0xff]   ;;  %v9719_v22 = vor.u32 %v9718_v10, %v9715_v4  ;;  %v19053_v5 = vld [vmem:[%s15677_s24 + $0x108] sm:$0xff]  }
 0x438   : > { %v7577_v60 = vpop.f32.mrf.mxu1  ;;  %v9731_v26 = vshrl.u32 %v19043_v47, 16  ;;  %v9734_v20 = vshll.u32 %v19043_v47, 16  ;;  %v9740_v28 = vshrl.u32 %v19053_v5, 16 }
 0x439   : > { %20768 = vst [vmem:[#allocation8_spill] sm:$0xff] %v19030_v42  ;;  %v9116_v9 = vpop.f32.mrf.mxu0  ;;  %v19035_v18 = vadd.f32 %v14807_v25, %v7880_v30  ;;  %v7878_v52 = vadd.f32 %v7577_v60, %v20771_v40  ;;  %v9743_v30 = vshll.u32 %v19053_v5, 16 }
 0x43a   : > { %v14672_v37 = vpop.f32.mrf.mxu1  ;;  %14907 = vmatmul.mubr.msk.bf16.gmra.mxu1 %vm1217_vm2, %v9702_v32  ;;  %v11079_v32 = vrot.slane %v19021_v48, 3  ;;  %v9736_v10 = vrot.slane %v9734_v20, 3  ;;  %v20777_v48 = vld [vmem:[#allocation15_spill] sm:$0xff] }
 0x43b   : > { %20770 = vst [vmem:[#allocation9_spill] sm:$0xff] %v19035_v18  ;;  %v14810_v13 = vpop.f32.mrf.mxu0  ;;  %15045 = vmatmul.mubr.msk.bf16.gmra.mxu0 %vm1217_vm2, %v11074_v15  ;;  %v19047_v43 = vadd.f32 %v9116_v9, %v7878_v52  ;;  %v7883_v59 = vadd.f32 %v14672_v37, %v20773_v53  ;;  %14910 = vmatprep.mubr.msk.bf16.mxu1 %vm1217_vm2, %v9711_v1  ;;  %v20775_v52 = vld [vmem:[#allocation14_spill] sm:$0xff]  ;;  %v9733_v1 = vrot.slane %v9731_v26, 2 }
 0x43c   : > { %15048 = vmatprep.mubr.msk.bf16.mxu0 %vm1217_vm2, %v11076_v46  ;;  %v7590_v15 = vpop.f32.mrf.mxu1  ;;  %v9728_v46 = vor.u32 %v9727_v19, %v9724_v11  ;;  %v11078_v53 = vsel %vm11025_vm6, %v11075_v63, %v11077_v36  ;;  %v11080_v18 = vsel %vm11025_vm6, %v11077_v36, %v11079_v32  ;;  %v20779_v63 = vld [vmem:[#allocation16_spill] sm:$0xff]  ;;  %v11081_v36 = vrot.slane %v19043_v47, 3 }
 0x43d   : > { %20772 = vst [vmem:[#allocation10_spill] sm:$0xff] %v19047_v43  ;;  %v9129_v25 = vpop.f32.mrf.mxu0  ;;  %v19057_v60 = vadd.f32 %v14810_v13, %v7883_v59  ;;  %v7881_v9 = vadd.f32 %v7590_v15, %v20775_v52  ;;  %v9720_v43 = vsel %vm9478_vm7, %v9710_v34, %v9719_v22  ;;  %v9742_v15 = vrot.slane %v9740_v28, 2 }
 0x43e   : > { %v14673_v37 = vpop.f32.mrf.mxu1  ;;  %v9729_v59 = vsel %vm9478_vm7, %v9719_v22, %v9728_v46  ;;  %v9745_v52 = vrot.slane %v9743_v30, 3  ;;  %v9737_v34 = vor.u32 %v9736_v10, %v9733_v1  ;;  %v20781_v30 = vld [vmem:[#allocation17_spill] sm:$0xff]  ;;  %v19085_v1 = vld [vmem:[%s15677_s24 + $0x118] sm:$0xff]  }
 0x43f   : > { %20774 = vst [vmem:[#allocation11_spill] sm:$0xff] %v19057_v60  ;;  %v14811_v40 = vpop.f32.mrf.mxu0  ;;  %v19061_v4 = vadd.f32 %v9129_v25, %v7881_v9  ;;  %v7884_v11 = vadd.f32 %v14673_v37, %v20777_v48  ;;  %v19075_v9 = vld [vmem:[%s15677_s24 + $0x110] sm:$0xff]   ;;  %v9758_v47 = vshrl.u32 %v19085_v1, 16  ;;  %v9761_v10 = vshll.u32 %v19085_v1, 16 }
 0x440   : > { %v7593_v13 = vpop.f32.mrf.mxu1  ;;  %v9749_v22 = vshrl.u32 %v19075_v9, 16 }
 0x441   : > { %20776 = vst [vmem:[#allocation12_spill] sm:$0xff] %v19061_v4  ;;  %v9132_v19 = vpop.f32.mrf.mxu0  ;;  %v19067_v60 = vadd.f32 %v14811_v40, %v7884_v11  ;;  %v7882_v26 = vadd.f32 %v7593_v13, %v20779_v63 }
 0x442   : > { %v14676_v25 = vpop.f32.mrf.mxu1  ;;  %14911 = vmatmul.mubr.msk.bf16.gmra.mxu1 %vm1217_vm2, %v9720_v43  ;;  %v9752_v43 = vshll.u32 %v19075_v9, 16 }
 0x443   : > { %20778 = vst [vmem:[#allocation13_spill] sm:$0xff] %v19067_v60  ;;  %v14814_v20 = vpop.f32.mrf.mxu0  ;;  %15049 = vmatmul.mubr.msk.bf16.gmra.mxu0 %vm1217_vm2, %v11078_v53  ;;  %v19078_v28 = vadd.f32 %v9132_v19, %v7882_v26  ;;  %v7887_v40 = vadd.f32 %v14676_v25, %v20781_v30  ;;  %14914 = vmatprep.mubr.msk.bf16.mxu1 %vm1217_vm2, %v9729_v59  ;;  %v11083_v53 = vrot.slane %v19053_v5, 3  ;;  %v20783_v19 = vld [vmem:[#allocation18_spill] sm:$0xff]  ;;  %v9751_v25 = vrot.slane %v9749_v22, 2 }
 0x444   : > { %15052 = vmatprep.mubr.msk.bf16.mxu0 %vm1217_vm2, %v11080_v18  ;;  %v7606_v48 = vpop.f32.mrf.mxu1  ;;  %v9746_v18 = vor.u32 %v9745_v52, %v9742_v15  ;;  %v9738_v59 = vsel %vm9478_vm7, %v9728_v46, %v9737_v34  ;;  %v11082_v5 = vsel %vm11025_vm6, %v11079_v32, %v11081_v36  ;;  %v20785_v15 = vld [vmem:[#allocation19_spill] sm:$0xff]  ;;  %v9754_v4 = vrot.slane %v9752_v43, 3  ;;  %v20787_v46 = vld [vmem:[#allocation20_spill] sm:$0xff] }
 0x445   : > { %20780 = vst [vmem:[#allocation14_spill] sm:$0xff] %v19078_v28  ;;  %v9145_v37 = vpop.f32.mrf.mxu0  ;;  %v19089_v11 = vadd.f32 %v14814_v20, %v7887_v40  ;;  %v7885_v13 = vadd.f32 %v7606_v48, %v20783_v19  ;;  %v11084_v60 = vsel %vm11025_vm6, %v11081_v36, %v11083_v53  ;;  %v9760_v48 = vrot.slane %v9758_v47, 2 }
 0x446   : > { %v14677_v26 = vpop.f32.mrf.mxu1  ;;  %v9747_v40 = vsel %vm9478_vm7, %v9737_v34, %v9746_v18  ;;  %v9763_v19 = vrot.slane %v9761_v10, 3  ;;  %v11085_v36 = vrot.slane %v19075_v9, 3  ;;  %v20789_v10 = vld [vmem:[#allocation21_spill] sm:$0xff] }
 0x447   : > { %20782 = vst [vmem:[#allocation15_spill] sm:$0xff] %v19089_v11  ;;  %v14815_v63 = vpop.f32.mrf.mxu0  ;;  %v19094_v30 = vadd.f32 %v9145_v37, %v7885_v13  ;;  %v7888_v52 = vadd.f32 %v14677_v26, %v20785_v15  ;;  %v19107_v37 = vld [vmem:[%s15677_s24 + $0x120] sm:$0xff]   ;;  %v9755_v26 = vor.u32 %v9754_v4, %v9751_v25  ;;  %v19117_v15 = vld [vmem:[%s15677_s24 + $0x128] sm:$0xff]  }
 0x448   : > { %v7609_v20 = vpop.f32.mrf.mxu1  ;;  %v9767_v34 = vshrl.u32 %v19107_v37, 16  ;;  %v9770_v43 = vshll.u32 %v19107_v37, 16  ;;  %v9776_v9 = vshrl.u32 %v19117_v15, 16 }
 0x449   : > { %20784 = vst [vmem:[#allocation16_spill] sm:$0xff] %v19094_v30  ;;  %v9148_v28 = vpop.f32.mrf.mxu0  ;;  %v19099_v11 = vadd.f32 %v14815_v63, %v7888_v52  ;;  %v7886_v42 = vadd.f32 %v7609_v20, %v20787_v46  ;;  %v9779_v52 = vshll.u32 %v19117_v15, 16 }
 0x44a   : > { %v14680_v22 = vpop.f32.mrf.mxu1  ;;  %14915 = vmatmul.mubr.msk.bf16.gmra.mxu1 %vm1217_vm2, %v9738_v59  ;;  %v11087_v59 = vrot.slane %v19085_v1, 3  ;;  %v9772_v4 = vrot.slane %v9770_v43, 3  ;;  %v20793_v1 = vld [vmem:[#allocation23_spill] sm:$0xff] }
 0x44b   : > { %20786 = vst [vmem:[#allocation17_spill] sm:$0xff] %v19099_v11  ;;  %v14818_v32 = vpop.f32.mrf.mxu0  ;;  %15053 = vmatmul.mubr.msk.bf16.gmra.mxu0 %vm1217_vm2, %v11082_v5  ;;  %v19111_v47 = vadd.f32 %v9148_v28, %v7886_v42  ;;  %v7891_v13 = vadd.f32 %v14680_v22, %v20789_v10  ;;  %14918 = vmatprep.mubr.msk.bf16.mxu1 %vm1217_vm2, %v9747_v40  ;;  %v20791_v42 = vld [vmem:[#allocation22_spill] sm:$0xff]  ;;  %v9769_v40 = vrot.slane %v9767_v34, 2 }
 0x44c   : > { %15056 = vmatprep.mubr.msk.bf16.mxu0 %vm1217_vm2, %v11084_v60  ;;  %v7622_v5 = vpop.f32.mrf.mxu1  ;;  %v9764_v60 = vor.u32 %v9763_v19, %v9760_v48  ;;  %v11086_v10 = vsel %vm11025_vm6, %v11083_v53, %v11085_v36  ;;  %v11088_v11 = vsel %vm11025_vm6, %v11085_v36, %v11087_v59  ;;  %v20795_v53 = vld [vmem:[#allocation24_spill] sm:$0xff]  ;;  %v11089_v36 = vrot.slane %v19107_v37, 3 }
 0x44d   : > { %20788 = vst [vmem:[#allocation18_spill] sm:$0xff] %v19111_v47  ;;  %v9161_v63 = vpop.f32.mrf.mxu0  ;;  %v19121_v20 = vadd.f32 %v14818_v32, %v7891_v13  ;;  %v7889_v28 = vadd.f32 %v7622_v5, %v20791_v42  ;;  %v9756_v47 = vsel %vm9478_vm7, %v9746_v18, %v9755_v26  ;;  %v9778_v5 = vrot.slane %v9776_v9, 2 }
 0x44e   : > { %v14681_v22 = vpop.f32.mrf.mxu1  ;;  %v9765_v13 = vsel %vm9478_vm7, %v9755_v26, %v9764_v60  ;;  %v9781_v42 = vrot.slane %v9779_v52, 3  ;;  %v9773_v18 = vor.u32 %v9772_v4, %v9769_v40  ;;  %v20797_v52 = vld [vmem:[#allocation25_spill] sm:$0xff]  ;;  %v19149_v40 = vld [vmem:[%s15677_s24 + $0x138] sm:$0xff]  }
 0x44f   : > { %20790 = vst [vmem:[#allocation19_spill] sm:$0xff] %v19121_v20  ;;  %v14819_v46 = vpop.f32.mrf.mxu0  ;;  %v19125_v25 = vadd.f32 %v9161_v63, %v7889_v28  ;;  %v7892_v48 = vadd.f32 %v14681_v22, %v20793_v1  ;;  %v19139_v28 = vld [vmem:[%s15677_s24 + $0x130] sm:$0xff]   ;;  %v9794_v37 = vshrl.u32 %v19149_v40, 16  ;;  %v9797_v4 = vshll.u32 %v19149_v40, 16 }
 0x450   : > { %v7625_v32 = vpop.f32.mrf.mxu1  ;;  %v9785_v26 = vshrl.u32 %v19139_v28, 16 }
 0x451   : > { %20792 = vst [vmem:[#allocation20_spill] sm:$0xff] %v19125_v25  ;;  %v9164_v19 = vpop.f32.mrf.mxu0  ;;  %v19131_v20 = vadd.f32 %v14819_v46, %v7892_v48  ;;  %v7890_v34 = vadd.f32 %v7625_v32, %v20795_v53 }
 0x452   : > { %v14684_v63 = vpop.f32.mrf.mxu1  ;;  %14919 = vmatmul.mubr.msk.bf16.gmra.mxu1 %vm1217_vm2, %v9756_v47  ;;  %v9788_v47 = vshll.u32 %v19139_v28, 16 }
 0x453   : > { %20794 = vst [vmem:[#allocation21_spill] sm:$0xff] %v19131_v20  ;;  %v14822_v43 = vpop.f32.mrf.mxu0  ;;  %15057 = vmatmul.mubr.msk.bf16.gmra.mxu0 %vm1217_vm2, %v11086_v10  ;;  %v19142_v9 = vadd.f32 %v9164_v19, %v7890_v34  ;;  %v7895_v46 = vadd.f32 %v14684_v63, %v20797_v52  ;;  %14922 = vmatprep.mubr.msk.bf16.mxu1 %vm1217_vm2, %v9765_v13  ;;  %v11091_v10 = vrot.slane %v19117_v15, 3  ;;  %v20799_v19 = vld [vmem:[#allocation26_spill] sm:$0xff]  ;;  %v9787_v63 = vrot.slane %v9785_v26, 2 }
 0x454   : > { %15060 = vmatprep.mubr.msk.bf16.mxu0 %vm1217_vm2, %v11088_v11  ;;  %v7638_v1 = vpop.f32.mrf.mxu1  ;;  %v9782_v11 = vor.u32 %v9781_v42, %v9778_v5  ;;  %v9774_v13 = vsel %vm9478_vm7, %v9764_v60, %v9773_v18  ;;  %v11090_v15 = vsel %vm11025_vm6, %v11087_v59, %v11089_v36  ;;  %v20801_v5 = vld [vmem:[#allocation27_spill] sm:$0xff]  ;;  %v9790_v25 = vrot.slane %v9788_v47, 3  ;;  %v20803_v60 = vld [vmem:[#allocation28_spill] sm:$0xff] }
 0x455   : > { %20796 = vst [vmem:[#allocation22_spill] sm:$0xff] %v19142_v9  ;;  %v9177_v22 = vpop.f32.mrf.mxu0  ;;  %v19153_v48 = vadd.f32 %v14822_v43, %v7895_v46  ;;  %v7893_v32 = vadd.f32 %v7638_v1, %v20799_v19  ;;  %v11092_v20 = vsel %vm11025_vm6, %v11089_v36, %v11091_v10  ;;  %v9796_v1 = vrot.slane %v9794_v37, 2 }
 0x456   : > { %v14685_v34 = vpop.f32.mrf.mxu1  ;;  %v9783_v46 = vsel %vm9478_vm7, %v9773_v18, %v9782_v11  ;;  %v9799_v19 = vrot.slane %v9797_v4, 3  ;;  %v11093_v36 = vrot.slane %v19139_v28, 3  ;;  %v20805_v4 = vld [vmem:[#allocation29_spill] sm:$0xff] }
 0x457   : > { %20798 = vst [vmem:[#allocation23_spill] sm:$0xff] %v19153_v48  ;;  %v14823_v53 = vpop.f32.mrf.mxu0  ;;  %v19158_v52 = vadd.f32 %v9177_v22, %v7893_v32  ;;  %v7896_v42 = vadd.f32 %v14685_v34, %v20801_v5  ;;  %v19171_v22 = vld [vmem:[%s15677_s24 + $0x140] sm:$0xff]   ;;  %v9791_v34 = vor.u32 %v9790_v25, %v9787_v63  ;;  %v19181_v5 = vld [vmem:[%s15677_s24 + $0x148] sm:$0xff]  }
 0x458   : > { %v7641_v43 = vpop.f32.mrf.mxu1  ;;  %v9803_v18 = vshrl.u32 %v19171_v22, 16  ;;  %v9806_v47 = vshll.u32 %v19171_v22, 16  ;;  %v9812_v28 = vshrl.u32 %v19181_v5, 16 }
 0x459   : > { %20800 = vst [vmem:[#allocation24_spill] sm:$0xff] %v19158_v52  ;;  %v9180_v9 = vpop.f32.mrf.mxu0  ;;  %v19163_v48 = vadd.f32 %v14823_v53, %v7896_v42  ;;  %v7894_v30 = vadd.f32 %v7641_v43, %v20803_v60  ;;  %v9815_v42 = vshll.u32 %v19181_v5, 16 }
 0x45a   : > { %v14688_v26 = vpop.f32.mrf.mxu1  ;;  %14923 = vmatmul.mubr.msk.bf16.gmra.mxu1 %vm1217_vm2, %v9774_v13  ;;  %v11095_v13 = vrot.slane %v19149_v40, 3  ;;  %v9808_v25 = vrot.slane %v9806_v47, 3  ;;  %v20809_v40 = vld [vmem:[#allocation31_spill] sm:$0xff] }
 0x45b   : > { %20802 = vst [vmem:[#allocation25_spill] sm:$0xff] %v19163_v48  ;;  %v14826_v59 = vpop.f32.mrf.mxu0  ;;  %15061 = vmatmul.mubr.msk.bf16.gmra.mxu0 %vm1217_vm2, %v11090_v15  ;;  %v19175_v37 = vadd.f32 %v9180_v9, %v7894_v30  ;;  %v7899_v32 = vadd.f32 %v14688_v26, %v20805_v4  ;;  %14926 = vmatprep.mubr.msk.bf16.mxu1 %vm1217_vm2, %v9783_v46  ;;  %v20807_v30 = vld [vmem:[#allocation30_spill] sm:$0xff]  ;;  %v9805_v46 = vrot.slane %v9803_v18, 2 }
 0x45c   : > { %15064 = vmatprep.mubr.msk.bf16.mxu0 %vm1217_vm2, %v11092_v20  ;;  %v7654_v15 = vpop.f32.mrf.mxu1  ;;  %v9800_v20 = vor.u32 %v9799_v19, %v9796_v1  ;;  %v11094_v4 = vsel %vm11025_vm6, %v11091_v10, %v11093_v36  ;;  %v11096_v48 = vsel %vm11025_vm6, %v11093_v36, %v11095_v13  ;;  %v20811_v10 = vld [vmem:[#allocation32_spill] sm:$0xff]  ;;  %v11097_v36 = vrot.slane %v19171_v22, 3 }
 0x45d   : > { %20804 = vst [vmem:[#allocation26_spill] sm:$0xff] %v19175_v37  ;;  %v9193_v53 = vpop.f32.mrf.mxu0  ;;  %v19185_v43 = vadd.f32 %v14826_v59, %v7899_v32  ;;  %v7897_v9 = vadd.f32 %v7654_v15, %v20807_v30  ;;  %v9792_v37 = vsel %vm9478_vm7, %v9782_v11, %v9791_v34  ;;  %v9814_v15 = vrot.slane %v9812_v28, 2 }
 0x45e   : > { %v14689_v26 = vpop.f32.mrf.mxu1  ;;  %v9801_v32 = vsel %vm9478_vm7, %v9791_v34, %v9800_v20  ;;  %v9817_v30 = vrot.slane %v9815_v42, 3  ;;  %v9809_v11 = vor.u32 %v9808_v25, %v9805_v46  ;;  %v20813_v42 = vld [vmem:[#allocation33_spill] sm:$0xff]  ;;  %v19213_v46 = vld [vmem:[%s15677_s24 + $0x158] sm:$0xff]  }
 0x45f   : > { %20806 = vst [vmem:[#allocation27_spill] sm:$0xff] %v19185_v43  ;;  %v14827_v60 = vpop.f32.mrf.mxu0  ;;  %v19189_v63 = vadd.f32 %v9193_v53, %v7897_v9  ;;  %v7900_v1 = vadd.f32 %v14689_v26, %v20809_v40  ;;  %v19203_v9 = vld [vmem:[%s15677_s24 + $0x150] sm:$0xff]   ;;  %v9830_v22 = vshrl.u32 %v19213_v46, 16  ;;  %v9833_v25 = vshll.u32 %v19213_v46, 16 }
 0x460   : > { %v7657_v59 = vpop.f32.mrf.mxu1  ;;  %v9821_v34 = vshrl.u32 %v19203_v9, 16 }
 0x461   : > { %20808 = vst [vmem:[#allocation28_spill] sm:$0xff] %v19189_v63  ;;  %v9196_v19 = vpop.f32.mrf.mxu0  ;;  %v19195_v43 = vadd.f32 %v14827_v60, %v7900_v1  ;;  %v7898_v18 = vadd.f32 %v7657_v59, %v20811_v10 }
 0x462   : > { %v14692_v53 = vpop.f32.mrf.mxu1  ;;  %14927 = vmatmul.mubr.msk.bf16.gmra.mxu1 %vm1217_vm2, %v9792_v37  ;;  %v9824_v37 = vshll.u32 %v19203_v9, 16 }
 0x463   : > { %20810 = vst [vmem:[#allocation29_spill] sm:$0xff] %v19195_v43  ;;  %v14830_v47 = vpop.f32.mrf.mxu0  ;;  %15065 = vmatmul.mubr.msk.bf16.gmra.mxu0 %vm1217_vm2, %v11094_v4  ;;  %v19206_v28 = vadd.f32 %v9196_v19, %v7898_v18  ;;  %v7903_v60 = vadd.f32 %v14692_v53, %v20813_v42  ;;  %14930 = vmatprep.mubr.msk.bf16.mxu1 %vm1217_vm2, %v9801_v32  ;;  %v11099_v4 = vrot.slane %v19181_v5, 3  ;;  %v20815_v19 = vld [vmem:[#allocation34_spill] sm:$0xff]  ;;  %v9823_v53 = vrot.slane %v9821_v34, 2 }
 0x464   : > { %15068 = vmatprep.mubr.msk.bf16.mxu0 %vm1217_vm2, %v11096_v48  ;;  %v7670_v40 = vpop.f32.mrf.mxu1  ;;  %v9818_v48 = vor.u32 %v9817_v30, %v9814_v15  ;;  %v9810_v32 = vsel %vm9478_vm7, %v9800_v20, %v9809_v11  ;;  %v11098_v5 = vsel %vm11025_vm6, %v11095_v13, %v11097_v36  ;;  %v20816_v15 = vld [vmem:[#allocation35_spill] sm:$0xff]  ;;  %v9826_v63 = vrot.slane %v9824_v37, 3  ;;  %v20818_v20 = vld [vmem:[#allocation36_spill] sm:$0xff] }
 0x465   : > { %20812 = vst [vmem:[#allocation30_spill] sm:$0xff] %v19206_v28  ;;  %v9209_v26 = vpop.f32.mrf.mxu0  ;;  %v19217_v1 = vadd.f32 %v14830_v47, %v7903_v60  ;;  %v7901_v59 = vadd.f32 %v7670_v40, %v20815_v19  ;;  %v11100_v43 = vsel %vm11025_vm6, %v11097_v36, %v11099_v4  ;;  %v9832_v40 = vrot.slane %v9830_v22, 2 }
 0x466   : > { %v14693_v18 = vpop.f32.mrf.mxu1  ;;  %v9819_v60 = vsel %vm9478_vm7, %v9809_v11, %v9818_v48  ;;  %v9835_v19 = vrot.slane %v9833_v25, 3  ;;  %v11101_v36 = vrot.slane %v19203_v9, 3  ;;  %v20820_v25 = vld [vmem:[#allocation37_spill] sm:$0xff] }
 0x467   : > { %20814 = vst [vmem:[#allocation31_spill] sm:$0xff] %v19217_v1  ;;  %v14831_v10 = vpop.f32.mrf.mxu0  ;;  %v19222_v42 = vadd.f32 %v9209_v26, %v7901_v59  ;;  %v7904_v30 = vadd.f32 %v14693_v18, %v20816_v15  ;;  %v19235_v26 = vld [vmem:[%s15677_s24 + $0x160] sm:$0xff]   ;;  %v9827_v18 = vor.u32 %v9826_v63, %v9823_v53  ;;  %v19245_v15 = vld [vmem:[%s15677_s24 + $0x168] sm:$0xff]  }
 0x468   : > { %v7673_v47 = vpop.f32.mrf.mxu1  ;;  %v9839_v11 = vshrl.u32 %v19235_v26, 16  ;;  %v9842_v37 = vshll.u32 %v19235_v26, 16  ;;  %v9848_v9 = vshrl.u32 %v19245_v15, 16 }
 0x469   : > { %v9212_v28 = vpop.f32.mrf.mxu0  ;;  %v19227_v1 = vadd.f32 %v14831_v10, %v7904_v30  ;;  %v7902_v52 = vadd.f32 %v7673_v47, %v20818_v20  ;;  %v9851_v30 = vshll.u32 %v19245_v15, 16 }
 0x46a   : > { %v14696_v34 = vpop.f32.mrf.mxu1  ;;  %14931 = vmatmul.mubr.msk.bf16.gmra.mxu1 %vm1217_vm2, %v9810_v32  ;;  %v11103_v32 = vrot.slane %v19213_v46, 3  ;;  %v9844_v63 = vrot.slane %v9842_v37, 3  ;;  %v20823_v46 = vld [vmem:[#allocation38_spill] sm:$0xff] }
 0x46b   : > { %20817 = vst [vmem:[#allocation32_spill] sm:$0xff] %v19227_v1  ;;  %v14834_v13 = vpop.f32.mrf.mxu0  ;;  %15069 = vmatmul.mubr.msk.bf16.gmra.mxu0 %vm1217_vm2, %v11098_v5  ;;  %v19239_v22 = vadd.f32 %v9212_v28, %v7902_v52  ;;  %v7907_v59 = vadd.f32 %v14696_v34, %v20820_v25  ;;  %14934 = vmatprep.mubr.msk.bf16.mxu1 %vm1217_vm2, %v9819_v60  ;;  %v9841_v60 = vrot.slane %v9839_v11, 2 }
 0x46c   : > { %15072 = vmatprep.mubr.msk.bf16.mxu0 %vm1217_vm2, %v11100_v43  ;;  %v7686_v5 = vpop.f32.mrf.mxu1  ;;  %v9836_v43 = vor.u32 %v9835_v19, %v9832_v40  ;;  %v11102_v34 = vsel %vm11025_vm6, %v11099_v4, %v11101_v36  ;;  %v9828_v25 = vsel %vm9478_vm7, %v9818_v48, %v9827_v18  ;;  %v20825_v4 = vld [vmem:[#allocation39_spill] sm:$0xff] }
 0x46d   : > { %20819 = vst [vmem:[#allocation33_spill] sm:$0xff] %v19239_v22  ;;  %v9225_v10 = vpop.f32.mrf.mxu0  ;;  %v19249_v47 = vadd.f32 %v14834_v13, %v7907_v59  ;;  %v7905_v52 = vadd.f32 %v7686_v5, %v18262_v23  ;;  %v11104_v22 = vsel %vm11025_vm6, %v11101_v36, %v11103_v32  ;;  %v9850_v23 = vrot.slane %v9848_v9, 2 }
 0x46e   : > { %v14697_v20 = vpop.f32.mrf.mxu1  ;;  %v9837_v59 = vsel %vm9478_vm7, %v9827_v18, %v9836_v43  ;;  %v9853_v5 = vrot.slane %v9851_v30, 3  ;;  %v9845_v48 = vor.u32 %v9844_v63, %v9841_v60  ;;  %v11105_v36 = vrot.slane %v19235_v26, 3  ;;  %v20827_v30 = vld [vmem:[#allocation40_spill] sm:$0xff] }
 0x46f   : > { %20821 = vst [vmem:[#allocation34_spill] sm:$0xff] %v19249_v47  ;;  %v14835_v28 = vpop.f32.mrf.mxu0  ;;  %v19253_v53 = vadd.f32 %v9225_v10, %v7905_v52  ;;  %v7908_v40 = vadd.f32 %v14697_v20, %v20823_v46  ;;  %v19267_v52 = vld [vmem:[%s15677_s24 + $0x170] sm:$0xff]   ;;  %v19277_v60 = vld [vmem:[%s15677_s24 + $0x178] sm:$0xff]  }
 0x470   : > { %v7689_v13 = vpop.f32.mrf.mxu1  ;;  %v9857_v18 = vshrl.u32 %v19267_v52, 16  ;;  %v9860_v46 = vshll.u32 %v19267_v52, 16  ;;  %v9866_v26 = vshrl.u32 %v19277_v60, 16  ;;  %v9869_v63 = vshll.u32 %v19277_v60, 16 }
 0x471   : > { %20822 = vst [vmem:[#allocation35_spill] sm:$0xff] %v19253_v53  ;;  %v9228_v19 = vpop.f32.mrf.mxu0  ;;  %v19259_v47 = vadd.f32 %v14835_v28, %v7908_v40  ;;  %v7906_v11 = vadd.f32 %v7689_v13, %v20825_v4 }
 0x472   : > { %v14700_v10 = vpop.f32.mrf.mxu1  ;;  %14935 = vmatmul.mubr.msk.bf16.gmra.mxu1 %vm1217_vm2, %v9828_v25  ;;  %v9862_v53 = vrot.slane %v9860_v46, 3 }
 0x473   : > { %20824 = vst [vmem:[#allocation36_spill] sm:$0xff] %v19259_v47  ;;  %v14838_v37 = vpop.f32.mrf.mxu0  ;;  %15073 = vmatmul.mubr.msk.bf16.gmra.mxu0 %vm1217_vm2, %v11102_v34  ;;  %v19270_v9 = vadd.f32 %v9228_v19, %v7906_v11  ;;  %v7911_v28 = vadd.f32 %v14700_v10, %v20827_v30  ;;  %14938 = vmatprep.mubr.msk.bf16.mxu1 %vm1217_vm2, %v9837_v59  ;;  %v11107_v34 = vrot.slane %v19245_v15, 3  ;;  %v20829_v19 = vld [vmem:[#allocation41_spill] sm:$0xff]  ;;  %v9859_v10 = vrot.slane %v9857_v18, 2 }
 0x474   : > { %15076 = vmatprep.mubr.msk.bf16.mxu0 %vm1217_vm2, %v11104_v22  ;;  %v7702_v40 = vpop.f32.mrf.mxu1  ;;  %v9854_v22 = vor.u32 %v9853_v5, %v9850_v23  ;;  %v9846_v59 = vsel %vm9478_vm7, %v9836_v43, %v9845_v48  ;;  %v11106_v15 = vsel %vm11025_vm6, %v11103_v32, %v11105_v36  ;;  %v20831_v23 = vld [vmem:[#allocation42_spill] sm:$0xff]  ;;  %v20833_v43 = vld [vmem:[#allocation43_spill] sm:$0xff] }
 0x475   : > { %20826 = vst [vmem:[#allocation37_spill] sm:$0xff] %v19270_v9  ;;  %v9241_v20 = vpop.f32.mrf.mxu0  ;;  %v19281_v25 = vadd.f32 %v14838_v37, %v7911_v28  ;;  %v7909_v13 = vadd.f32 %v7702_v40, %v20829_v19  ;;  %v11108_v47 = vsel %vm11025_vm6, %v11105_v36, %v11107_v34  ;;  %v9868_v40 = vrot.slane %v9866_v26, 2 }
 0x476   : > { %v14701_v11 = vpop.f32.mrf.mxu1  ;;  %v9855_v28 = vsel %vm9478_vm7, %v9845_v48, %v9854_v22  ;;  %v9871_v19 = vrot.slane %v9869_v63, 3  ;;  %v11109_v36 = vrot.slane %v19267_v52, 3  ;;  %v20835_v63 = vld [vmem:[#allocation44_spill] sm:$0xff] }
 0x477   : > { %20828 = vst [vmem:[#allocation38_spill] sm:$0xff] %v19281_v25  ;;  %v14839_v4 = vpop.f32.mrf.mxu0  ;;  %v19286_v30 = vadd.f32 %v9241_v20, %v7909_v13  ;;  %v7912_v5 = vadd.f32 %v14701_v11, %v20831_v23  ;;  %v19299_v20 = vld [vmem:[%s15677_s24 + $0x180] sm:$0xff]   ;;  %v9863_v11 = vor.u32 %v9862_v53, %v9859_v10  ;;  %v19309_v23 = vld [vmem:[%s15677_s24 + $0x188] sm:$0xff]  }
 0x478   : > { %v7705_v37 = vpop.f32.mrf.mxu1  ;;  %v9875_v48 = vshrl.u32 %v19299_v20, 16  ;;  %v9878_v46 = vshll.u32 %v19299_v20, 16  ;;  %v9884_v52 = vshrl.u32 %v19309_v23, 16 }
 0x479   : > { %20830 = vst [vmem:[#allocation39_spill] sm:$0xff] %v19286_v30  ;;  %v9244_v9 = vpop.f32.mrf.mxu0  ;;  %v19291_v25 = vadd.f32 %v14839_v4, %v7912_v5  ;;  %v7910_v1 = vadd.f32 %v7705_v37, %v20833_v43  ;;  %v9887_v5 = vshll.u32 %v19309_v23, 16 }
 0x47a   : > { %v14704_v18 = vpop.f32.mrf.mxu1  ;;  %14939 = vmatmul.mubr.msk.bf16.gmra.mxu1 %vm1217_vm2, %v9846_v59  ;;  %v11111_v59 = vrot.slane %v19277_v60, 3  ;;  %v9880_v53 = vrot.slane %v9878_v46, 3  ;;  %v20839_v60 = vld [vmem:[#allocation46_spill] sm:$0xff] }
 0x47b   : > { %20832 = vst [vmem:[#allocation40_spill] sm:$0xff] %v19291_v25  ;;  %v14842_v32 = vpop.f32.mrf.mxu0  ;;  %15077 = vmatmul.mubr.msk.bf16.gmra.mxu0 %vm1217_vm2, %v11106_v15  ;;  %v19303_v26 = vadd.f32 %v9244_v9, %v7910_v1  ;;  %v7915_v13 = vadd.f32 %v14704_v18, %v20835_v63  ;;  %14942 = vmatprep.mubr.msk.bf16.mxu1 %vm1217_vm2, %v9855_v28  ;;  %v20837_v1 = vld [vmem:[#allocation45_spill] sm:$0xff]  ;;  %v9877_v28 = vrot.slane %v9875_v48, 2 }
 0x47c   : > { %15080 = vmatprep.mubr.msk.bf16.mxu0 %vm1217_vm2, %v11108_v47  ;;  %v7718_v15 = vpop.f32.mrf.mxu1  ;;  %v9872_v47 = vor.u32 %v9871_v19, %v9868_v40  ;;  %v11110_v63 = vsel %vm11025_vm6, %v11107_v34, %v11109_v36  ;;  %v11112_v25 = vsel %vm11025_vm6, %v11109_v36, %v11111_v59  ;;  %v20841_v34 = vld [vmem:[#allocation48_spill] sm:$0xff]  ;;  %v11113_v36 = vrot.slane %v19299_v20, 3 }
 0x47d   : > { %20834 = vst [vmem:[#allocation41_spill] sm:$0xff] %v19303_v26  ;;  %v9257_v4 = vpop.f32.mrf.mxu0  ;;  %v19313_v37 = vadd.f32 %v14842_v32, %v7915_v13  ;;  %v7913_v9 = vadd.f32 %v7718_v15, %v20837_v1  ;;  %v9864_v26 = vsel %vm9478_vm7, %v9854_v22, %v9863_v11  ;;  %v9886_v15 = vrot.slane %v9884_v52, 2 }
 0x47e   : > { %v14705_v18 = vpop.f32.mrf.mxu1  ;;  %v9873_v13 = vsel %vm9478_vm7, %v9863_v11, %v9872_v47  ;;  %v9889_v1 = vrot.slane %v9887_v5, 3  ;;  %v9881_v22 = vor.u32 %v9880_v53, %v9877_v28  ;;  %v20843_v5 = vld [vmem:[#allocation50_spill] sm:$0xff]  ;;  %v19341_v28 = vld [vmem:[%s15677_s24 + $0x198] sm:$0xff]  }
 0x47f   : > { %20836 = vst [vmem:[#allocation42_spill] sm:$0xff] %v19313_v37  ;;  %v14843_v43 = vpop.f32.mrf.mxu0  ;;  %v19317_v10 = vadd.f32 %v9257_v4, %v7913_v9  ;;  %v7916_v40 = vadd.f32 %v14705_v18, %v20839_v60  ;;  %v19331_v9 = vld [vmem:[%s15677_s24 + $0x190] sm:$0xff]   ;;  %v9902_v20 = vshrl.u32 %v19341_v28, 16  ;;  %v9905_v53 = vshll.u32 %v19341_v28, 16 }
 0x480   : > { %v7721_v32 = vpop.f32.mrf.mxu1  ;;  %v9893_v11 = vshrl.u32 %v19331_v9, 16 }
 0x481   : > { %20838 = vst [vmem:[#allocation43_spill] sm:$0xff] %v19317_v10  ;;  %v9260_v19 = vpop.f32.mrf.mxu0  ;;  %v19323_v37 = vadd.f32 %v14843_v43, %v7916_v40  ;;  %v7914_v48 = vadd.f32 %v7721_v32, %v20841_v34 }
 0x482   : > { %v14708_v4 = vpop.f32.mrf.mxu1  ;;  %14943 = vmatmul.mubr.msk.bf16.gmra.mxu1 %vm1217_vm2, %v9864_v26  ;;  %v9896_v26 = vshll.u32 %v19331_v9, 16 }
 0x483   : > { %20840 = vst [vmem:[#allocation44_spill] sm:$0xff] %v19323_v37  ;;  %v14846_v46 = vpop.f32.mrf.mxu0  ;;  %15081 = vmatmul.mubr.msk.bf16.gmra.mxu0 %vm1217_vm2, %v11110_v63  ;;  %v19334_v52 = vadd.f32 %v9260_v19, %v7914_v48  ;;  %v7919_v43 = vadd.f32 %v14708_v4, %v20843_v5  ;;  %14946 = vmatprep.mubr.msk.bf16.mxu1 %vm1217_vm2, %v9873_v13  ;;  %v11115_v63 = vrot.slane %v19309_v23, 3  ;;  %v20845_v19 = vld [vmem:[#allocation52_spill] sm:$0xff]  ;;  %v9895_v4 = vrot.slane %v9893_v11, 2 }
 0x484   : > { %15084 = vmatprep.mubr.msk.bf16.mxu0 %vm1217_vm2, %v11112_v25  ;;  %v7734_v60 = vpop.f32.mrf.mxu1  ;;  %v9890_v25 = vor.u32 %v9889_v1, %v9886_v15  ;;  %v9882_v13 = vsel %vm9478_vm7, %v9872_v47, %v9881_v22  ;;  %v11114_v23 = vsel %vm11025_vm6, %v11111_v59, %v11113_v36  ;;  %v20846_v15 = vld [vmem:[#allocation54_spill] sm:$0xff]  ;;  %v9898_v10 = vrot.slane %v9896_v26, 3  ;;  %v20847_v47 = vld [vmem:[#allocation56_spill] sm:$0xff] }
 0x485   : > { %20842 = vst [vmem:[#allocation45_spill] sm:$0xff] %v19334_v52  ;;  %v9273_v18 = vpop.f32.mrf.mxu0  ;;  %v19345_v40 = vadd.f32 %v14846_v46, %v7919_v43  ;;  %v7917_v32 = vadd.f32 %v7734_v60, %v20845_v19  ;;  %v11116_v37 = vsel %vm11025_vm6, %v11113_v36, %v11115_v63  ;;  %v9904_v60 = vrot.slane %v9902_v20, 2 }
 0x486   : > { %v14709_v48 = vpop.f32.mrf.mxu1  ;;  %v9891_v43 = vsel %vm9478_vm7, %v9881_v22, %v9890_v25  ;;  %v9907_v19 = vrot.slane %v9905_v53, 3  ;;  %v11117_v36 = vrot.slane %v19331_v9, 3  ;;  %v20849_v53 = vld [vmem:[#allocation58_spill] sm:$0xff] }
 0x487   : > { %20844 = vst [vmem:[#allocation46_spill] sm:$0xff] %v19345_v40  ;;  %v14847_v34 = vpop.f32.mrf.mxu0  ;;  %v19350_v5 = vadd.f32 %v9273_v18, %v7917_v32  ;;  %v7920_v1 = vadd.f32 %v14709_v48, %v20846_v15  ;;  %v19363_v18 = vld [vmem:[%s15677_s24 + $0x1a0] sm:$0xff]   ;;  %v9899_v48 = vor.u32 %v9898_v10, %v9895_v4  ;;  %v19373_v15 = vld [vmem:[%s15677_s24 + $0x1a8] sm:$0xff]  }
 0x488   : > { %v7737_v46 = vpop.f32.mrf.mxu1  ;;  %v9911_v22 = vshrl.u32 %v19363_v18, 16  ;;  %v9914_v26 = vshll.u32 %v19363_v18, 16  ;;  %v9920_v9 = vshrl.u32 %v19373_v15, 16 }
 0x489   : > { %v9276_v52 = vpop.f32.mrf.mxu0  ;;  %v19355_v40 = vadd.f32 %v14847_v34, %v7920_v1  ;;  %v7918_v30 = vadd.f32 %v7737_v46, %v20847_v47  ;;  %v9923_v1 = vshll.u32 %v19373_v15, 16 }
 0x48a   : > { %v14712_v11 = vpop.f32.mrf.mxu1  ;;  %14947 = vmatmul.mubr.msk.bf16.gmra.mxu1 %vm1217_vm2, %v9882_v13  ;;  %v11119_v13 = vrot.slane %v19341_v28, 3  ;;  %v9916_v10 = vrot.slane %v9914_v26, 3  ;;  %v20851_v28 = vld [vmem:[#allocation60_spill] sm:$0xff] }
 0x48b   : > { %v14850_v59 = vpop.f32.mrf.mxu0  ;;  %15085 = vmatmul.mubr.msk.bf16.gmra.mxu0 %vm1217_vm2, %v11114_v23  ;;  %v19367_v20 = vadd.f32 %v9276_v52, %v7918_v30  ;;  %v7923_v32 = vadd.f32 %v14712_v11, %v20849_v53  ;;  %14950 = vmatprep.mubr.msk.bf16.mxu1 %vm1217_vm2, %v9891_v43  ;;  %v11118_v11 = vsel %vm11025_vm6, %v11115_v63, %v11117_v36  ;;  %v9913_v43 = vrot.slane %v9911_v22, 2  ;;  %v20853_v63 = vld [vmem:[#allocation62_spill] sm:$0xff] }
 0x48c   : > { %15088 = vmatprep.mubr.msk.bf16.mxu0 %vm1217_vm2, %v11116_v37  ;;  %v7750_v23 = vpop.f32.mrf.mxu1  ;;  %v9908_v37 = vor.u32 %v9907_v19, %v9904_v60  ;;  %v9900_v53 = vsel %vm9478_vm7, %v9890_v25, %v9899_v48 }
 0x48d   : > { %20848 = vst [vmem:[#allocation48_spill] sm:$0xff] %v19367_v20  ;;  %v9289_v34 = vpop.f32.mrf.mxu0  ;;  %v19377_v46 = vadd.f32 %v14850_v59, %v7923_v32  ;;  %v7921_v30 = vadd.f32 %v7750_v23, %v18358_v55  ;;  %v11120_v20 = vsel %vm11025_vm6, %v11117_v36, %v11119_v13  ;;  %v9922_v55 = vrot.slane %v9920_v9, 2 }
 0x48e   : > { %v14713_v47 = vpop.f32.mrf.mxu1  ;;  %v9909_v32 = vsel %vm9478_vm7, %v9899_v48, %v9908_v37  ;;  %v9925_v23 = vrot.slane %v9923_v1, 3  ;;  %v9917_v25 = vor.u32 %v9916_v10, %v9913_v43  ;;  %v11121_v36 = vrot.slane %v19363_v18, 3  ;;  %v20855_v1 = vld [vmem:[#allocation64_spill] sm:$0xff] }
 0x48f   : > { %20850 = vst [vmem:[#allocation50_spill] sm:$0xff] %v19377_v46  ;;  %v14851_v52 = vpop.f32.mrf.mxu0  ;;  %v19381_v4 = vadd.f32 %v9289_v34, %v7921_v30  ;;  %v7924_v60 = vadd.f32 %v14713_v47, %v20851_v28  ;;  %v19395_v30 = vld [vmem:[%s15677_s24 + $0x1b0] sm:$0xff]   ;;  %v19405_v43 = vld [vmem:[%s15677_s24 + $0x1b8] sm:$0xff]  }
 0x490   : > { %v7753_v59 = vpop.f32.mrf.mxu1  ;;  %v9929_v48 = vshrl.u32 %v19395_v30, 16  ;;  %v9932_v28 = vshll.u32 %v19395_v30, 16  ;;  %v9938_v18 = vshrl.u32 %v19405_v43, 16  ;;  %v9941_v10 = vshll.u32 %v19405_v43, 16 }
 0x491   : > { %v9292_v19 = vpop.f32.mrf.mxu0  ;;  %v19387_v46 = vadd.f32 %v14851_v52, %v7924_v60  ;;  %v7922_v22 = vadd.f32 %v7753_v59, %v20853_v63 }
 0x492   : > { %v14716_v34 = vpop.f32.mrf.mxu1  ;;  %14951 = vmatmul.mubr.msk.bf16.gmra.mxu1 %vm1217_vm2, %v9900_v53 }
 0x493   : > { %20852 = vst [vmem:[#allocation52_spill] sm:$0xff] %v19387_v46  ;;  %v14854_v26 = vpop.f32.mrf.mxu0  ;;  %15089 = vmatmul.mubr.msk.bf16.gmra.mxu0 %vm1217_vm2, %v11118_v11  ;;  %v19398_v9 = vadd.f32 %v9292_v19, %v7922_v22  ;;  %v7927_v52 = vadd.f32 %v14716_v34, %v20855_v1  ;;  %14954 = vmatprep.mubr.msk.bf16.mxu1 %vm1217_vm2, %v9909_v32  ;;  %v11123_v11 = vrot.slane %v19373_v15, 3  ;;  %v9931_v22 = vrot.slane %v9929_v48, 2 }
 0x494   : > { %15092 = vmatprep.mubr.msk.bf16.mxu0 %vm1217_vm2, %v11120_v20  ;;  %v7766_v60 = vpop.f32.mrf.mxu1  ;;  %v9926_v20 = vor.u32 %v9925_v23, %v9922_v55  ;;  %v9918_v32 = vsel %vm9478_vm7, %v9908_v37, %v9917_v25  ;;  %v11122_v15 = vsel %vm11025_vm6, %v11119_v13, %v11121_v36  ;;  %v20857_v55 = vld [vmem:[#allocation66_spill] sm:$0xff]  ;;  %v9934_v46 = vrot.slane %v9932_v28, 3 }
 0x495   : > { %20854 = vst [vmem:[#allocation54_spill] sm:$0xff] %v19398_v9  ;;  %v9305_v47 = vpop.f32.mrf.mxu0  ;;  %v19409_v53 = vadd.f32 %v14854_v26, %v7927_v52  ;;  %v7925_v19 = vadd.f32 %v7766_v60, %v18382_v38  ;;  %v11124_v9 = vsel %vm11025_vm6, %v11121_v36, %v11123_v11  ;;  %v9940_v38 = vrot.slane %v9938_v18, 2 }
 0x496   : > { %v14717_v63 = vpop.f32.mrf.mxu1  ;;  %v9927_v52 = vsel %vm9478_vm7, %v9917_v25, %v9926_v20  ;;  %v9943_v60 = vrot.slane %v9941_v10, 3  ;;  %v11125_v36 = vrot.slane %v19395_v30, 3 }
 0x497   : > { %20856 = vst [vmem:[#allocation56_spill] sm:$0xff] %v19409_v53  ;;  %v14855_v59 = vpop.f32.mrf.mxu0  ;;  %v19414_v34 = vadd.f32 %v9305_v47, %v7925_v19  ;;  %v7928_v23 = vadd.f32 %v14717_v63, %v20857_v55  ;;  %v19427_v47 = vld [vmem:[%s15677_s24 + $0x1c0] sm:$0xff]   ;;  %v9935_v19 = vor.u32 %v9934_v46, %v9931_v22 }
 0x498   : > { %v7769_v26 = vpop.f32.mrf.mxu1  ;;  %v9947_v25 = vshrl.u32 %v19427_v47, 16  ;;  %v9950_v28 = vshll.u32 %v19427_v47, 16  ;;  %v20859_v22 = vld [vmem:[#allocation68_spill] sm:$0xff] }
 0x499   : > { %v9308_v1 = vpop.f32.mrf.mxu0  ;;  %v19419_v53 = vadd.f32 %v14855_v59, %v7928_v23  ;;  %v7926_v37 = vadd.f32 %v7769_v26, %v18395_v61  ;;  %v11127_v59 = vrot.slane %v19405_v43, 3  ;;  %v11126_v26 = vsel %vm11025_vm6, %v11123_v11, %v11125_v36 }
 0x49a   : > { %v14720_v48 = vpop.f32.mrf.mxu1  ;;  %14955 = vmatmul.mubr.msk.bf16.gmra.mxu1 %vm1217_vm2, %v9918_v32  ;;  %v19437_v32 = vld [vmem:[%s15677_s24 + $0x1c8] sm:$0xff]   ;;  %v9952_v46 = vrot.slane %v9950_v28, 3 }
 0x49b   : > { %v14858_v13 = vpop.f32.mrf.mxu0  ;;  %15093 = vmatmul.mubr.msk.bf16.gmra.mxu0 %vm1217_vm2, %v11122_v15  ;;  %v19431_v18 = vadd.f32 %v9308_v1, %v7926_v37  ;;  %v7931_v61 = vadd.f32 %v14720_v48, %v18401_v51  ;;  %14958 = vmatprep.mubr.msk.bf16.mxu1 %vm1217_vm2, %v9927_v52  ;;  %v9956_v30 = vshrl.u32 %v19437_v32, 16  ;;  %v9959_v15 = vshll.u32 %v19437_v32, 16 }
 0x49c   : > { %15096 = vmatprep.mubr.msk.bf16.mxu0 %vm1217_vm2, %v11124_v9  ;;  %v7782_v63 = vpop.f32.mrf.mxu1  ;;  %v9944_v9 = vor.u32 %v9943_v60, %v9940_v38  ;;  %v9949_v52 = vrot.slane %v9947_v25, 2  ;;  %v9936_v37 = vsel %vm9478_vm7, %v9926_v20, %v9935_v19 }
 0x49d   : > { %v9321_v10 = vpop.f32.mrf.mxu0  ;;  %v19441_v55 = vadd.f32 %v14858_v13, %v7931_v61  ;;  %v7929_v23 = vadd.f32 %v7782_v63, %v18406_v12  ;;  %v11128_v13 = vsel %vm11025_vm6, %v11125_v36, %v11127_v59  ;;  %v9958_v61 = vrot.slane %v9956_v30, 2 }
 0x49e   : > { %v14721_v51 = vpop.f32.mrf.mxu1  ;;  %v9945_v12 = vsel %vm9478_vm7, %v9935_v19, %v9944_v9  ;;  %v9961_v63 = vrot.slane %v9959_v15, 3  ;;  %v9953_v20 = vor.u32 %v9952_v46, %v9949_v52  ;;  %v11129_v36 = vrot.slane %v19427_v47, 3  ;;  %v19472_v47 = vld [vmem:[%s15677_s24 + $0x1d8] sm:$0xff]  }
 0x49f   : > { %20858 = vst [vmem:[#allocation58_spill] sm:$0xff] %v19441_v55  ;;  %v14859_v1 = vpop.f32.mrf.mxu0  ;;  %v19445_v43 = vadd.f32 %v9321_v10, %v7929_v23  ;;  %v7932_v38 = vadd.f32 %v14721_v51, %v20859_v22  ;;  %v19460_v10 = vld [vmem:[%s15677_s24 + $0x1d0] sm:$0xff]   ;;  %v19469_v51 = vld [vmem:[#allocation2] ss:$0 sm:$0xff]  ;;  %v9974_v46 = vshrl.u32 %v19472_v47, 16  ;;  %v9977_v22 = vshll.u32 %v19472_v47, 16 }
 0x4a0   : > { %v7785_v48 = vpop.f32.mrf.mxu1  ;;  %v9965_v19 = vshrl.u32 %v19460_v10, 16  ;;  %v9968_v30 = vshll.u32 %v19460_v10, 16  ;;  %v9962_v52 = vor.u32 %v9961_v63, %v9958_v61 }
 0x4a1   : > { %v9324_v60 = vpop.f32.mrf.mxu0  ;;  %v19451_v55 = vadd.f32 %v14859_v1, %v7932_v38  ;;  %v7930_v11 = vadd.f32 %v7785_v48, %v18419_v58  ;;  %v11131_v1 = vrot.slane %v19437_v32, 3  ;;  %v9954_v32 = vsel %vm9478_vm7, %v9944_v9, %v9953_v20 }
 0x4a2   : > { %v14864_v28 = vpop.f32.mrf.mxu1  ;;  %14959 = vmatmul.mubr.msk.bf16.gmra.mxu1 %vm1217_vm2, %v9936_v37  ;;  %v9967_v48 = vrot.slane %v9965_v19, 2 }
 0x4a3   : > { %v15002_v25 = vpop.f32.mrf.mxu0  ;;  %15097 = vmatmul.mubr.msk.bf16.gmra.mxu0 %vm1217_vm2, %v11126_v26  ;;  %v19464_v58 = vadd.f32 %v9324_v60, %v7930_v11  ;;  %v10885_v15 = vadd.f32 %v14864_v28, %v18425_v35  ;;  %14962 = vmatprep.mubr.msk.bf16.mxu1 %vm1217_vm2, %v9945_v12  ;;  %v9970_v12 = vrot.slane %v9968_v30, 3 }
 0x4a4   : > { %15100 = vmatprep.mubr.msk.bf16.mxu0 %vm1217_vm2, %v11128_v13  ;;  %v10340_v26 = vpop.f32.mrf.mxu1  ;;  %v11130_v13 = vsel %vm11025_vm6, %v11127_v59, %v11129_v36 }
 0x4a5   : > { %20860 = vst [vmem:[#allocation60_spill] sm:$0xff] %v19464_v58  ;;  %v11404_v23 = vpop.f32.mrf.mxu0  ;;  %v11949_v38 = vadd.f32 %v15002_v25, %v10885_v15  ;;  %v10883_v60 = vadd.f32 %v10340_v26, %v18430_v3  ;;  %v11132_v25 = vsel %vm11025_vm6, %v11129_v36, %v11131_v1  ;;  %v9963_v15 = vsel %vm9478_vm7, %v9953_v20, %v9962_v52 }
 0x4a6   : > { %v14865_v35 = vpop.f32.mrf.mxu1  ;;  %v9976_v26 = vrot.slane %v9974_v46, 2  ;;  %v9979_v58 = vrot.slane %v9977_v22, 3  ;;  %v9971_v20 = vor.u32 %v9970_v12, %v9967_v48  ;;  %v11133_v36 = vrot.slane %v19460_v10, 3 }
 0x4a7   : > { %v15003_v37 = vpop.f32.mrf.mxu0  ;;  %v12092_v61 = vadd.f32 %v19469_v51, %v11949_v38  ;;  %v11947_v63 = vadd.f32 %v11404_v23, %v10883_v60  ;;  %v10886_v11 = vadd.f32 %v14865_v35, %v18437_v50  ;;  %v19497_v23 = vld [vmem:[%s15677_s24 + $0x1e0] sm:$0xff]   ;;  %v11135_v35 = vrot.slane %v19472_v47, 3 }
 0x4a8   : > { %v10343_v28 = vpop.f32.mrf.mxu1  ;;  %v9983_v46 = vshrl.u32 %v19497_v23, 16  ;;  %v9986_v22 = vshll.u32 %v19497_v23, 16  ;;  %v9972_v47 = vsel %vm9478_vm7, %v9962_v52, %v9971_v20 }
 0x4a9   : > { %v11407_v3 = vpop.f32.mrf.mxu0  ;;  %12228 = vst.msk [vmem:[%s19480_s25 + $0x10] sm:$0xff] %vm1217_vm2, %v12092_v61  ;;  %v12090_v59 = vadd.f32 %v19469_v51, %v11947_v63  ;;  %v11950_v9 = vadd.f32 %v15003_v37, %v10886_v11  ;;  %v10884_v19 = vadd.f32 %v10343_v28, %v18443_v57 }
 0x4aa   : > { %v14868_v50 = vpop.f32.mrf.mxu1  ;;  %14963 = vmatmul.mubr.msk.bf16.gmra.mxu1 %vm1217_vm2, %v9954_v32  ;;  %v9980_v32 = vor.u32 %v9979_v58, %v9976_v26  ;;  %v11134_v58 = vsel %vm11025_vm6, %v11131_v1, %v11133_v36  ;;  %v9988_v28 = vrot.slane %v9986_v22, 3 }
 0x4ab   : > { %v15006_v30 = vpop.f32.mrf.mxu0  ;;  %15101 = vmatmul.mubr.msk.bf16.gmra.mxu0 %vm1217_vm2, %v11130_v13  ;;  %12226 = vst.msk [vmem:[%s19480_s25] sm:$0xff] %vm1217_vm2, %v12090_v59  ;;  %v12093_v57 = vadd.f32 %v19469_v51, %v11950_v9  ;;  %v11948_v38 = vadd.f32 %v11407_v3, %v10884_v19  ;;  %v10889_v60 = vadd.f32 %v14868_v50, %v18449_v44  ;;  %v19508_v13 = vld [vmem:[%s15677_s24 + $0x1e8] sm:$0xff]  }
 0x4ac   : > { %15104 = vmatprep.mubr.msk.bf16.mxu0 %vm1217_vm2, %v11132_v25  ;;  %14966 = vmatprep.mubr.msk.bf16.mxu1 %vm1217_vm2, %v9963_v15  ;;  %v10356_v10 = vpop.f32.mrf.mxu1  ;;  %v9992_v48 = vshrl.u32 %v19508_v13, 16  ;;  %v9995_v12 = vshll.u32 %v19508_v13, 16  ;;  %v9985_v25 = vrot.slane %v9983_v46, 2  ;;  %v11136_v19 = vsel %vm11025_vm6, %v11133_v36, %v11135_v35 }
 0x4ad   : > { %v11420_v37 = vpop.f32.mrf.mxu0  ;;  %12229 = vst.msk [vmem:[%s19480_s25 + $0x18] sm:$0xff] %vm1217_vm2, %v12093_v57  ;;  %v12091_v61 = vadd.f32 %v19469_v51, %v11948_v38  ;;  %v11953_v63 = vadd.f32 %v15006_v30, %v10889_v60  ;;  %v10887_v44 = vadd.f32 %v10356_v10, %v18454_v29  ;;  %v9981_v30 = vsel %vm9478_vm7, %v9971_v20, %v9980_v32  ;;  %v19533_v38 = vld [vmem:[%s15677_s24 + $0x1f0] sm:$0xff]  }
 0x4ae   : > { %v14869_v3 = vpop.f32.mrf.mxu1  ;;  %v9994_v50 = vrot.slane %v9992_v48, 2  ;;  %v9997_v52 = vrot.slane %v9995_v12, 3  ;;  %v9989_v20 = vor.u32 %v9988_v28, %v9985_v25  ;;  %v11137_v36 = vrot.slane %v19497_v23, 3 }
 0x4af   : > { %v15007_v11 = vpop.f32.mrf.mxu0  ;;  %12227 = vst.msk [vmem:[%s19480_s25 + $0x8] sm:$0xff] %vm1217_vm2, %v12091_v61  ;;  %v12096_v15 = vadd.f32 %v19469_v51, %v11953_v63  ;;  %v11951_v26 = vadd.f32 %v11420_v37, %v10887_v44  ;;  %v10890_v59 = vadd.f32 %v14869_v3, %v18461_v0  ;;  %v10001_v60 = vshrl.u32 %v19533_v38, 16  ;;  %v19544_v44 = vld [vmem:[%s15677_s24 + $0x1f8] sm:$0xff]  }
 0x4b0   : > { %v10359_v29 = vpop.f32.mrf.mxu1  ;;  %v10004_v37 = vshll.u32 %v19533_v38, 16  ;;  %v11139_v61 = vrot.slane %v19508_v13, 3  ;;  %v9998_v63 = vor.u32 %v9997_v52, %v9994_v50  ;;  %v10013_v3 = vshll.u32 %v19544_v44, 16 }
 0x4b1   : > { %v11423_v9 = vpop.f32.mrf.mxu0  ;;  %12232 = vst.msk [vmem:[%s19480_s25 + $0x30] sm:$0xff] %vm1217_vm2, %v12096_v15  ;;  %v12094_v1 = vadd.f32 %v19469_v51, %v11951_v26  ;;  %v11954_v46 = vadd.f32 %v15007_v11, %v10890_v59  ;;  %v10888_v22 = vadd.f32 %v10359_v29, %v18467_v62  ;;  %v10010_v11 = vshrl.u32 %v19544_v44, 16 }
 0x4b2   : > { %v14872_v0 = vpop.f32.mrf.mxu1  ;;  %14967 = vmatmul.mubr.msk.bf16.gmra.mxu1 %vm1217_vm2, %v9972_v47  ;;  %v9990_v13 = vsel %vm9478_vm7, %v9980_v32, %v9989_v20  ;;  %v11138_v15 = vsel %vm11025_vm6, %v11135_v35, %v11137_v36  ;;  %v10003_v26 = vrot.slane %v10001_v60, 2  ;;  %v10006_v59 = vrot.slane %v10004_v37, 3 }
 0x4b3   : > { %v15010_v57 = vpop.f32.mrf.mxu0  ;;  %15105 = vmatmul.mubr.msk.bf16.gmra.mxu0 %vm1217_vm2, %v11134_v58  ;;  %12230 = vst.msk [vmem:[%s19480_s25 + $0x20] sm:$0xff] %vm1217_vm2, %v12094_v1  ;;  %v12097_v62 = vadd.f32 %v19469_v51, %v11954_v46  ;;  %v11952_v10 = vadd.f32 %v11423_v9, %v10888_v22  ;;  %v10893_v48 = vadd.f32 %v14872_v0, %v18473_v49  ;;  %v10012_v1 = vrot.slane %v10010_v11, 2  ;;  %v19580_v11 = vld [vmem:[%s15677_s24 + $0x208] sm:$0xff]  }
 0x4b4   : > { %15108 = vmatprep.mubr.msk.bf16.mxu0 %vm1217_vm2, %v11136_v19  ;;  %14970 = vmatprep.mubr.msk.bf16.mxu1 %vm1217_vm2, %v9981_v30  ;;  %v10372_v23 = vpop.f32.mrf.mxu1  ;;  %v11140_v50 = vsel %vm11025_vm6, %v11137_v36, %v11139_v61  ;;  %v9999_v52 = vsel %vm9478_vm7, %v9989_v20, %v9998_v63  ;;  %v10015_v32 = vrot.slane %v10013_v3, 3  ;;  %v10007_v0 = vor.u32 %v10006_v59, %v10003_v26  ;;  %v19569_v36 = vld [vmem:[%s15677_s24 + $0x200] sm:$0xff]  }
 0x4b5   : > { %v11436_v12 = vpop.f32.mrf.mxu0  ;;  %12233 = vst.msk [vmem:[%s19480_s25 + $0x38] sm:$0xff] %vm1217_vm2, %v12097_v62  ;;  %v12095_v47 = vadd.f32 %v19469_v51, %v11952_v10  ;;  %v11957_v58 = vadd.f32 %v15010_v57, %v10893_v48  ;;  %v10891_v49 = vadd.f32 %v10372_v23, %v18478_v24  ;;  %v11141_v20 = vrot.slane %v19533_v38, 3 }
 0x4b6   : > { %v14873_v28 = vpop.f32.mrf.mxu1  ;;  %v10019_v60 = vshrl.u32 %v19569_v36, 16  ;;  %v10022_v37 = vshll.u32 %v19569_v36, 16  ;;  %v10016_v23 = vor.u32 %v10015_v32, %v10012_v1  ;;  %v10028_v3 = vshrl.u32 %v19580_v11, 16  ;;  %v20862_v32 = vld [vmem:[#allocation72_spill] sm:$0xff] }
 0x4b7   : > { %v15011_v25 = vpop.f32.mrf.mxu0  ;;  %12231 = vst.msk [vmem:[%s19480_s25 + $0x28] sm:$0xff] %vm1217_vm2, %v12095_v47  ;;  %v12100_v9 = vadd.f32 %v19469_v51, %v11957_v58  ;;  %v11955_v19 = vadd.f32 %v11436_v12, %v10891_v49  ;;  %v10894_v29 = vadd.f32 %v14873_v28, %v18485_v14  ;;  %v11143_v12 = vrot.slane %v19544_v44, 3 }
 0x4b8   : > { %v10375_v24 = vpop.f32.mrf.mxu1  ;;  %v10031_v47 = vshll.u32 %v19580_v11, 16  ;;  %v10008_v44 = vsel %vm9478_vm7, %v9998_v63, %v10007_v0  ;;  %v10024_v26 = vrot.slane %v10022_v37, 3 }
 0x4b9   : > { %v11439_v30 = vpop.f32.mrf.mxu0  ;;  %12236 = vst.msk [vmem:[%s19480_s25 + $0x50] sm:$0xff] %vm1217_vm2, %v12100_v9  ;;  %v12098_v35 = vadd.f32 %v19469_v51, %v11955_v19  ;;  %v11958_v46 = vadd.f32 %v15011_v25, %v10894_v29  ;;  %v10892_v22 = vadd.f32 %v10375_v24, %v18491_v21  ;;  %v20861_v19 = vld [vmem:[#allocation70_spill] sm:$0xff]  ;;  %v10017_v24 = vsel %vm9478_vm7, %v10007_v0, %v10016_v23 }
 0x4ba   : > { %v14876_v14 = vpop.f32.mrf.mxu1  ;;  %14971 = vmatmul.mubr.msk.bf16.gmra.mxu1 %vm1217_vm2, %v9990_v13  ;;  %v11142_v13 = vsel %vm11025_vm6, %v11139_v61, %v11141_v20  ;;  %v10033_v63 = vrot.slane %v10031_v47, 3  ;;  %v19605_v0 = vld [vmem:[%s15677_s24 + $0x210] sm:$0xff]   ;;  %v19616_v47 = vld [vmem:[%s15677_s24 + $0x218] sm:$0xff]  }
 0x4bb   : > { %v15014_v57 = vpop.f32.mrf.mxu0  ;;  %15109 = vmatmul.mubr.msk.bf16.gmra.mxu0 %vm1217_vm2, %v11138_v15  ;;  %12234 = vst.msk [vmem:[%s19480_s25 + $0x40] sm:$0xff] %vm1217_vm2, %v12098_v35  ;;  %v12101_v21 = vadd.f32 %v19469_v51, %v11958_v46  ;;  %v11956_v62 = vadd.f32 %v11439_v30, %v10892_v22  ;;  %v10897_v10 = vadd.f32 %v14876_v14, %v18497_v45  ;;  %v10021_v15 = vrot.slane %v10019_v60, 2 }
 0x4bc   : > { %15112 = vmatprep.mubr.msk.bf16.mxu0 %vm1217_vm2, %v11140_v50  ;;  %14974 = vmatprep.mubr.msk.bf16.mxu1 %vm1217_vm2, %v9999_v52  ;;  %v10388_v38 = vpop.f32.mrf.mxu1  ;;  %v11144_v50 = vsel %vm11025_vm6, %v11141_v20, %v11143_v12  ;;  %v10030_v52 = vrot.slane %v10028_v3, 2  ;;  %v11145_v14 = vrot.slane %v19569_v36, 3  ;;  %v10037_v20 = vshrl.u32 %v19605_v0, 16 }
 0x4bd   : > { %v11452_v48 = vpop.f32.mrf.mxu0  ;;  %12237 = vst.msk [vmem:[%s19480_s25 + $0x58] sm:$0xff] %vm1217_vm2, %v12101_v21  ;;  %v12099_v58 = vadd.f32 %v19469_v51, %v11956_v62  ;;  %v11961_v49 = vadd.f32 %v15014_v57, %v10897_v10  ;;  %v10895_v45 = vadd.f32 %v10388_v38, %v18502_v31  ;;  %v10025_v57 = vor.u32 %v10024_v26, %v10021_v15  ;;  %v20863_v62 = vld [vmem:[#allocation74_spill] sm:$0xff] }
 0x4be   : > { %v14877_v28 = vpop.f32.mrf.mxu1  ;;  %v10040_v60 = vshll.u32 %v19605_v0, 16  ;;  %v11147_v38 = vrot.slane %v19580_v11, 3  ;;  %v10034_v3 = vor.u32 %v10033_v63, %v10030_v52  ;;  %v11146_v26 = vsel %vm11025_vm6, %v11143_v12, %v11145_v14 }
 0x4bf   : > { %v15015_v25 = vpop.f32.mrf.mxu0  ;;  %12235 = vst.msk [vmem:[%s19480_s25 + $0x48] sm:$0xff] %vm1217_vm2, %v12099_v58  ;;  %v12104_v59 = vadd.f32 %v19469_v51, %v11961_v49  ;;  %v11959_v9 = vadd.f32 %v11452_v48, %v10895_v45  ;;  %v10898_v29 = vadd.f32 %v14877_v28, %v20861_v19  ;;  %v10046_v58 = vshrl.u32 %v19616_v47, 16  ;;  %v20864_v28 = vld [vmem:[#allocation76_spill] sm:$0xff] }
 0x4c0   : > { %v10391_v31 = vpop.f32.mrf.mxu1  ;;  %v10049_v49 = vshll.u32 %v19616_v47, 16  ;;  %v10026_v11 = vsel %vm9478_vm7, %v10016_v23, %v10025_v57  ;;  %v10035_v63 = vsel %vm9478_vm7, %v10025_v57, %v10034_v3 }
 0x4c1   : > { %v11455_v30 = vpop.f32.mrf.mxu0  ;;  %12240 = vst.msk [vmem:[%s19480_s25 + $0x70] sm:$0xff] %vm1217_vm2, %v12104_v59  ;;  %v12102_v61 = vadd.f32 %v19469_v51, %v11959_v9  ;;  %v11962_v1 = vadd.f32 %v15015_v25, %v10898_v29  ;;  %v10896_v35 = vadd.f32 %v10391_v31, %v20862_v32  ;;  %v10039_v59 = vrot.slane %v10037_v20, 2  ;;  %v20866_v32 = vld [vmem:[#allocation80_spill] sm:$0xff] }
 0x4c2   : > { %v14880_v22 = vpop.f32.mrf.mxu1  ;;  %14975 = vmatmul.mubr.msk.bf16.gmra.mxu1 %vm1217_vm2, %v10008_v44  ;;  %v10042_v9 = vrot.slane %v10040_v60, 3  ;;  %v10051_v23 = vrot.slane %v10049_v49, 3  ;;  %v19641_v20 = vld [vmem:[%s15677_s24 + $0x220] sm:$0xff]  }
 0x4c3   : > { %v15018_v46 = vpop.f32.mrf.mxu0  ;;  %15113 = vmatmul.mubr.msk.bf16.gmra.mxu0 %vm1217_vm2, %v11142_v13  ;;  %12238 = vst.msk [vmem:[%s19480_s25 + $0x60] sm:$0xff] %vm1217_vm2, %v12102_v61  ;;  %v12105_v37 = vadd.f32 %v19469_v51, %v11962_v1  ;;  %v11960_v21 = vadd.f32 %v11455_v30, %v10896_v35  ;;  %v10901_v10 = vadd.f32 %v14880_v22, %v20863_v62  ;;  %v20865_v30 = vld [vmem:[#allocation78_spill] sm:$0xff]  ;;  %v10048_v61 = vrot.slane %v10046_v58, 2 }
 0x4c4   : > { %15116 = vmatprep.mubr.msk.bf16.mxu0 %vm1217_vm2, %v11144_v50  ;;  %14978 = vmatprep.mubr.msk.bf16.mxu1 %vm1217_vm2, %v10017_v24  ;;  %v10404_v36 = vpop.f32.mrf.mxu1  ;;  %v11148_v24 = vsel %vm11025_vm6, %v11145_v14, %v11147_v38  ;;  %v10043_v57 = vor.u32 %v10042_v9, %v10039_v59  ;;  %v11149_v14 = vrot.slane %v19605_v0, 3  ;;  %v10055_v60 = vshrl.u32 %v19641_v20, 16 }
 0x4c5   : > { %v11468_v48 = vpop.f32.mrf.mxu0  ;;  %12241 = vst.msk [vmem:[%s19480_s25 + $0x78] sm:$0xff] %vm1217_vm2, %v12105_v37  ;;  %v12103_v45 = vadd.f32 %v19469_v51, %v11960_v21  ;;  %v11965_v25 = vadd.f32 %v15018_v46, %v10901_v10  ;;  %v10899_v44 = vadd.f32 %v10404_v36, %v20864_v28  ;;  %v10058_v37 = vshll.u32 %v19641_v20, 16  ;;  %v20867_v10 = vld [vmem:[#allocation82_spill] sm:$0xff] }
 0x4c6   : > { %v14881_v15 = vpop.f32.mrf.mxu1  ;;  %v11151_v58 = vrot.slane %v19616_v47, 3  ;;  %v10052_v49 = vor.u32 %v10051_v23, %v10048_v61  ;;  %v10044_v47 = vsel %vm9478_vm7, %v10034_v3, %v10043_v57  ;;  %v11150_v9 = vsel %vm11025_vm6, %v11147_v38, %v11149_v14 }
 0x4c7   : > { %v15019_v13 = vpop.f32.mrf.mxu0  ;;  %12239 = vst.msk [vmem:[%s19480_s25 + $0x68] sm:$0xff] %vm1217_vm2, %v12103_v45  ;;  %v12108_v19 = vadd.f32 %v19469_v51, %v11965_v25  ;;  %v11963_v29 = vadd.f32 %v11468_v48, %v10899_v44  ;;  %v10902_v50 = vadd.f32 %v14881_v15, %v20865_v30  ;;  %v19652_v45 = vld [vmem:[%s15677_s24 + $0x228] sm:$0xff]   ;;  %v20868_v15 = vld [vmem:[#allocation84_spill] sm:$0xff] }
 0x4c8   : > { %v10407_v52 = vpop.f32.mrf.mxu1  ;;  %v10064_v25 = vshrl.u32 %v19652_v45, 16  ;;  %v10067_v28 = vshll.u32 %v19652_v45, 16  ;;  %v10053_v23 = vsel %vm9478_vm7, %v10043_v57, %v10052_v49 }
 0x4c9   : > { %v11471_v31 = vpop.f32.mrf.mxu0  ;;  %12244 = vst.msk [vmem:[%s19480_s25 + $0x90] sm:$0xff] %vm1217_vm2, %v12108_v19  ;;  %v12106_v12 = vadd.f32 %v19469_v51, %v11963_v29  ;;  %v11966_v1 = vadd.f32 %v15019_v13, %v10902_v50  ;;  %v10900_v35 = vadd.f32 %v10407_v52, %v20866_v32  ;;  %v10057_v19 = vrot.slane %v10055_v60, 2  ;;  %v20870_v32 = vld [vmem:[#allocation88_spill] sm:$0xff]  ;;  %v19677_v60 = vld [vmem:[%s15677_s24 + $0x230] sm:$0xff]  }
 0x4ca   : > { %v14884_v22 = vpop.f32.mrf.mxu1  ;;  %14979 = vmatmul.mubr.msk.bf16.gmra.mxu1 %vm1217_vm2, %v10026_v11  ;;  %v10060_v29 = vrot.slane %v10058_v37, 3  ;;  %v10069_v3 = vrot.slane %v10067_v28, 3  ;;  %v10073_v37 = vshrl.u32 %v19677_v60, 16 }
 0x4cb   : > { %v15022_v46 = vpop.f32.mrf.mxu0  ;;  %15117 = vmatmul.mubr.msk.bf16.gmra.mxu0 %vm1217_vm2, %v11146_v26  ;;  %12242 = vst.msk [vmem:[%s19480_s25 + $0x80] sm:$0xff] %vm1217_vm2, %v12106_v12  ;;  %v12109_v21 = vadd.f32 %v19469_v51, %v11966_v1  ;;  %v11964_v62 = vadd.f32 %v11471_v31, %v10900_v35  ;;  %v10905_v48 = vadd.f32 %v14884_v22, %v20867_v10  ;;  %v20869_v31 = vld [vmem:[#allocation86_spill] sm:$0xff]  ;;  %v10066_v12 = vrot.slane %v10064_v25, 2 }
 0x4cc   : > { %15120 = vmatprep.mubr.msk.bf16.mxu0 %vm1217_vm2, %v11148_v24  ;;  %14982 = vmatprep.mubr.msk.bf16.mxu1 %vm1217_vm2, %v10035_v63  ;;  %v10420_v0 = vpop.f32.mrf.mxu1  ;;  %v11152_v63 = vsel %vm11025_vm6, %v11149_v14, %v11151_v58  ;;  %v10061_v57 = vor.u32 %v10060_v29, %v10057_v19  ;;  %v11153_v14 = vrot.slane %v19641_v20, 3  ;;  %v11155_v25 = vrot.slane %v19652_v45, 3 }
 0x4cd   : > { %v11484_v36 = vpop.f32.mrf.mxu0  ;;  %12245 = vst.msk [vmem:[%s19480_s25 + $0x98] sm:$0xff] %vm1217_vm2, %v12109_v21  ;;  %v12107_v44 = vadd.f32 %v19469_v51, %v11964_v62  ;;  %v11969_v13 = vadd.f32 %v15022_v46, %v10905_v48  ;;  %v10903_v11 = vadd.f32 %v10420_v0, %v20868_v15  ;;  %v10076_v21 = vshll.u32 %v19677_v60, 16  ;;  %v20871_v48 = vld [vmem:[#allocation90_spill] sm:$0xff] }
 0x4ce   : > { %v14885_v59 = vpop.f32.mrf.mxu1  ;;  %v10070_v28 = vor.u32 %v10069_v3, %v10066_v12  ;;  %v10062_v45 = vsel %vm9478_vm7, %v10052_v49, %v10061_v57  ;;  %v11154_v29 = vsel %vm11025_vm6, %v11151_v58, %v11153_v14  ;;  %v11156_v12 = vsel %vm11025_vm6, %v11153_v14, %v11155_v25 }
 0x4cf   : > { %v15023_v26 = vpop.f32.mrf.mxu0  ;;  %12243 = vst.msk [vmem:[%s19480_s25 + $0x88] sm:$0xff] %vm1217_vm2, %v12107_v44  ;;  %v12112_v30 = vadd.f32 %v19469_v51, %v11969_v13  ;;  %v11967_v50 = vadd.f32 %v11484_v36, %v10903_v11  ;;  %v10906_v24 = vadd.f32 %v14885_v59, %v20869_v31  ;;  %v19688_v44 = vld [vmem:[%s15677_s24 + $0x238] sm:$0xff]   ;;  %v19699_v31 = vld [vmem:[%s15677_s24 + $0x240] ss:$0 sps:$4 sm:$0x77]   ;;  %v11157_v14 = vrot.slane %v19677_v60, 3 }
 0x4d0   : > { %v10423_v61 = vpop.f32.mrf.mxu1  ;;  %v10082_v13 = vshrl.u32 %v19688_v44, 16  ;;  %v10085_v15 = vshll.u32 %v19688_v44, 16  ;;  %v20872_v59 = vld [vmem:[#allocation92_spill] sm:$0xff] }
 0x4d1   : > { %v11487_v52 = vpop.f32.mrf.mxu0  ;;  %12248 = vst.msk [vmem:[%s19480_s25 + $0xb0] sm:$0xff] %vm1217_vm2, %v12112_v30  ;;  %v12110_v38 = vadd.f32 %v19469_v51, %v11967_v50  ;;  %v11970_v1 = vadd.f32 %v15023_v26, %v10906_v24  ;;  %v10904_v35 = vadd.f32 %v10423_v61, %v20870_v32  ;;  %v10075_v30 = vrot.slane %v10073_v37, 2 }
 0x4d2   : > { %v14888_v22 = vpop.f32.mrf.mxu1  ;;  %14983 = vmatmul.mubr.msk.bf16.gmra.mxu1 %vm1217_vm2, %v10044_v47  ;;  %v10078_v50 = vrot.slane %v10076_v21, 3  ;;  %v10084_v49 = vrot.slane %v10082_v13, 2  ;;  %v10087_v58 = vrot.slane %v10085_v15, 3  ;;  %v10091_v21 = vshrl.u32 %v19699_v31, 16 }
 0x4d3   : > { %v15026_v46 = vpop.f32.mrf.mxu0  ;;  %15121 = vmatmul.mubr.msk.bf16.gmra.mxu0 %vm1217_vm2, %v11150_v9  ;;  %12246 = vst.msk [vmem:[%s19480_s25 + $0xa0] sm:$0xff] %vm1217_vm2, %v12110_v38  ;;  %v12113_v62 = vadd.f32 %v19469_v51, %v11970_v1  ;;  %v11968_v10 = vadd.f32 %v11487_v52, %v10904_v35  ;;  %v10909_v36 = vadd.f32 %v14888_v22, %v20871_v48  ;;  %v20874_v35 = vld [vmem:[#allocation96_spill] sm:$0xff]  ;;  %v11159_v13 = vrot.slane %v19688_v44, 3 }
 0x4d4   : > { %15124 = vmatprep.mubr.msk.bf16.mxu0 %vm1217_vm2, %v11152_v63  ;;  %14986 = vmatprep.mubr.msk.bf16.mxu1 %vm1217_vm2, %v10053_v23  ;;  %v10436_v20 = vpop.f32.mrf.mxu1  ;;  %v20873_v63 = vld [vmem:[#allocation94_spill] sm:$0xff]  ;;  %v10071_v38 = vsel %vm9478_vm7, %v10061_v57, %v10070_v28  ;;  %v10079_v57 = vor.u32 %v10078_v50, %v10075_v30 }
 0x4d5   : > { %v11500_v0 = vpop.f32.mrf.mxu0  ;;  %12249 = vst.msk [vmem:[%s19480_s25 + $0xb8] sm:$0xff] %vm1217_vm2, %v12113_v62  ;;  %v12111_v11 = vadd.f32 %v19469_v51, %v11968_v10  ;;  %v11973_v26 = vadd.f32 %v15026_v46, %v10909_v36  ;;  %v10907_v47 = vadd.f32 %v10436_v20, %v20872_v59  ;;  %v10094_v62 = vshll.u32 %v19699_v31, 16  ;;  %v20875_v36 = vld [vmem:[#allocation98_spill] sm:$0xff] }
 0x4d6   : > { %v14889_v19 = vpop.f32.mrf.mxu1 }
 0x4d7   : > { %v15027_v9 = vpop.f32.mrf.mxu0  ;;  %12247 = vst.msk [vmem:[%s19480_s25 + $0xa8] sm:$0xff] %vm1217_vm2, %v12111_v11  ;;  %v12116_v24 = vadd.f32 %v19469_v51, %v11973_v26  ;;  %v11971_v52 = vadd.f32 %v11500_v0, %v10907_v47  ;;  %v10910_v61 = vadd.f32 %v14889_v19, %v20873_v63  ;;  %v10088_v11 = vor.u32 %v10087_v58, %v10084_v49  ;;  %v20876_v58 = vld [vmem:[#allocation99_spill] sm:$0xff] }
 0x4d8   : > { %v10439_v3 = vpop.f32.mrf.mxu1  ;;  %v10080_v19 = vsel %vm9478_vm7, %v10070_v28, %v10079_v57  ;;  %v10096_v30 = vrot.slane %v10094_v62, 3  ;;  %v11160_v63 = vsel %vm11025_vm6, %v11157_v14, %v11159_v13 }
 0x4d9   : > { %v11503_v23 = vpop.f32.mrf.mxu0  ;;  %12252 = vst.msk [vmem:[%s19480_s25 + $0xd0] sm:$0xff] %vm1217_vm2, %v12116_v24  ;;  %v12114_v1 = vadd.f32 %v19469_v51, %v11971_v52  ;;  %v11974_v32 = vadd.f32 %v15027_v9, %v10910_v61  ;;  %v10908_v46 = vadd.f32 %v10439_v3, %v20874_v35  ;;  %v10089_v61 = vsel %vm9478_vm7, %v10079_v57, %v10088_v11 }
 0x4da   : > { %v14892_v37 = vpop.f32.mrf.mxu1  ;;  %14987 = vmatmul.mubr.msk.bf16.gmra.mxu1 %vm1217_vm2, %v10062_v45  ;;  %v11158_v45 = vsel %vm11025_vm6, %v11155_v25, %v11157_v14 }
 0x4db   : > { %v15030_v22 = vpop.f32.mrf.mxu0  ;;  %15125 = vmatmul.mubr.msk.bf16.gmra.mxu0 %vm1217_vm2, %v11154_v29  ;;  %12250 = vst.msk [vmem:[%s19480_s25 + $0xc0] sm:$0xff] %vm1217_vm2, %v12114_v1  ;;  %v12117_v10 = vadd.f32 %v19469_v51, %v11974_v32  ;;  %v11972_v48 = vadd.f32 %v11503_v23, %v10908_v46  ;;  %v10913_v0 = vadd.f32 %v14892_v37, %v20875_v36  ;;  %v10093_v29 = vrot.slane %v10091_v21, 2 }
 0x4dc   : > { %15128 = vmatprep.mubr.msk.bf16.mxu0 %vm1217_vm2, %v11156_v12  ;;  %14990 = vmatprep.mubr.msk.bf16.mxu1 %vm1217_vm2, %v10071_v38  ;;  %v10452_v15 = vpop.f32.mrf.mxu1 }
 0x4dd   : > { %v11516_v20 = vpop.f32.mrf.mxu0  ;;  %12253 = vst.msk [vmem:[%s19480_s25 + $0xd8] sm:$0xff] %vm1217_vm2, %v12117_v10  ;;  %v12115_v60 = vadd.f32 %v19469_v51, %v11972_v48  ;;  %v11977_v26 = vadd.f32 %v15030_v22, %v10913_v0  ;;  %v10911_v59 = vadd.f32 %v10452_v15, %v18613_v17 }
 0x4de   : > { %v14893_v9 = vpop.f32.mrf.mxu1 }
 0x4df   : > { %v15031_v47 = vpop.f32.mrf.mxu0  ;;  %12251 = vst.msk [vmem:[%s19480_s25 + $0xc8] sm:$0xff] %vm1217_vm2, %v12115_v60  ;;  %v12120_v44 = vadd.f32 %v19469_v51, %v11977_v26  ;;  %v11975_v50 = vadd.f32 %v11516_v20, %v10911_v59  ;;  %v10914_v24 = vadd.f32 %v14893_v9, %v18619_v27  ;;  %v11161_v27 = vrot.slane %v19699_v31, 3 }
 0x4e0   : > { %v10455_v17 = vpop.f32.mrf.mxu1 }
 0x4e1   : > { %v11519_v52 = vpop.f32.mrf.mxu0  ;;  %12256 = vst.msk [vmem:[%s19480_s25 + $0xf0] sm:$0xff] %vm1217_vm2, %v12120_v44  ;;  %v12118_v25 = vadd.f32 %v19469_v51, %v11975_v50  ;;  %v11978_v28 = vadd.f32 %v15031_v47, %v10914_v24  ;;  %v10912_v23 = vadd.f32 %v10455_v17, %v18631_v39  ;;  %v10097_v39 = vor.u32 %v10096_v30, %v10093_v29 }
 0x4e2   : > { %v14896_v3 = vpop.f32.mrf.mxu1  ;;  %14991 = vmatmul.mubr.msk.bf16.gmra.mxu1 %vm1217_vm2, %v10080_v19  ;;  %v11162_v14 = vsel %vm11025_vm6, %v11159_v13, %v11161_v27 }
 0x4e3   : > { %v15034_v12 = vpop.f32.mrf.mxu0  ;;  %15129 = vmatmul.mubr.msk.bf16.gmra.mxu0 %vm1217_vm2, %v11158_v45  ;;  %12254 = vst.msk [vmem:[%s19480_s25 + $0xe0] sm:$0xff] %vm1217_vm2, %v12118_v25  ;;  %v12121_v38 = vadd.f32 %v19469_v51, %v11978_v28  ;;  %v11976_v49 = vadd.f32 %v11519_v52, %v10912_v23  ;;  %v10917_v1 = vadd.f32 %v14896_v3, %v20876_v58 }
 0x4e4   : > { %15132 = vmatprep.mubr.msk.bf16.mxu0 %vm1217_vm2, %v11160_v63  ;;  %14994 = vmatprep.mubr.msk.bf16.mxu1 %vm1217_vm2, %v10089_v61  ;;  %v10468_v35 = vpop.f32.mrf.mxu1  ;;  %v10098_v36 = vsel %vm9478_vm7, %v10088_v11, %v10097_v39 }
 0x4e5   : > { %v11532_v32 = vpop.f32.mrf.mxu0  ;;  %12257 = vst.msk [vmem:[%s19480_s25 + $0xf8] sm:$0xff] %vm1217_vm2, %v12121_v38  ;;  %v12119_v46 = vadd.f32 %v19469_v51, %v11976_v49  ;;  %v11981_v22 = vadd.f32 %v15034_v12, %v10917_v1  ;;  %v10915_v31 = vadd.f32 %v10468_v35, %v18646_v33 }
 0x4e6   : > { %v14897_v57 = vpop.f32.mrf.mxu1 }
 0x4e7   : > { %v15035_v37 = vpop.f32.mrf.mxu0  ;;  %12255 = vst.msk [vmem:[%s19480_s25 + $0xe8] sm:$0xff] %vm1217_vm2, %v12119_v46  ;;  %v12124_v21 = vadd.f32 %v19469_v51, %v11981_v22  ;;  %v11979_v62 = vadd.f32 %v11532_v32, %v10915_v31  ;;  %v10918_v10 = vadd.f32 %v14897_v57, %v18651_v54  ;;  %v20877_v32 = vld [vmem:[#allocation100_spill] sm:$0xff]  ;;  %v20878_v31 = vld [vmem:[#allocation101_spill] sm:$0xff] }
 0x4e8   : > { %v10471_v0 = vpop.f32.mrf.mxu1 }
 0x4e9   : > { %v11535_v48 = vpop.f32.mrf.mxu0  ;;  %12260 = vst.msk [vmem:[%s19480_s25 + $0x110] sm:$0xff] %vm1217_vm2, %v12124_v21  ;;  %v12122_v33 = vadd.f32 %v19469_v51, %v11979_v62  ;;  %v11982_v20 = vadd.f32 %v15035_v37, %v10918_v10  ;;  %v10916_v13 = vadd.f32 %v10471_v0, %v18663_v6  ;;  %v20879_v62 = vld [vmem:[#allocation102_spill] sm:$0xff] }
 0x4ea   : > { %v14900_v60 = vpop.f32.mrf.mxu1  ;;  %14995 = vmatmul.mubr.msk.bf16.gmra.mxu1 %vm1217_vm2, %v10098_v36 }
 0x4eb   : > { %v15038_v15 = vpop.f32.mrf.mxu0  ;;  %15133 = vmatmul.mubr.msk.bf16.gmra.mxu0 %vm1217_vm2, %v11162_v14  ;;  %12258 = vst.msk [vmem:[%s19480_s25 + $0x100] sm:$0xff] %vm1217_vm2, %v12122_v33  ;;  %v12125_v54 = vadd.f32 %v19469_v51, %v11982_v20  ;;  %v11980_v11 = vadd.f32 %v11535_v48, %v10916_v13  ;;  %v10921_v26 = vadd.f32 %v14900_v60, %v18673_v7  ;;  %v20880_v20 = vld [vmem:[#allocation103_spill] sm:$0xff] }
 0x4ec   : > { %v10484_v47 = vpop.f32.mrf.mxu1 }
 0x4ed   : > { %v11548_v59 = vpop.f32.mrf.mxu0  ;;  %12261 = vst.msk [vmem:[%s19480_s25 + $0x118] sm:$0xff] %vm1217_vm2, %v12125_v54  ;;  %v12123_v6 = vadd.f32 %v19469_v51, %v11980_v11  ;;  %v11985_v9 = vadd.f32 %v15038_v15, %v10921_v26  ;;  %v10919_v19 = vadd.f32 %v10484_v47, %v18677_v41  ;;  %v20881_v26 = vld [vmem:[#allocation104_spill] sm:$0xff] }
 0x4ee   : > { %v14901_v29 = vpop.f32.mrf.mxu1 }
 0x4ef   : > { %v15039_v45 = vpop.f32.mrf.mxu0  ;;  %12259 = vst.msk [vmem:[%s19480_s25 + $0x108] sm:$0xff] %vm1217_vm2, %v12123_v6  ;;  %v12128_v30 = vadd.f32 %v19469_v51, %v11985_v9  ;;  %v11983_v44 = vadd.f32 %v11548_v59, %v10919_v19  ;;  %v10922_v7 = vadd.f32 %v14901_v29, %v18683_v56 }
 0x4f0   : > { %v10487_v24 = vpop.f32.mrf.mxu1 }
 0x4f1   : > { %v11551_v50 = vpop.f32.mrf.mxu0  ;;  %12264 = vst.msk [vmem:[%s19480_s25 + $0x130] sm:$0xff] %vm1217_vm2, %v12128_v30  ;;  %v12126_v52 = vadd.f32 %v19469_v51, %v11983_v44  ;;  %v11986_v63 = vadd.f32 %v15039_v45, %v10922_v7  ;;  %v10920_v41 = vadd.f32 %v10487_v24, %v18694_v16  ;;  %v20882_v45 = vld [vmem:[#allocation105_spill] sm:$0xff]  ;;  %v20883_v24 = vld [vmem:[#allocation106_spill] sm:$0xff] }
 0x4f2   : > { %v14904_v61 = vpop.f32.mrf.mxu1 }
 0x4f3   : > { %v15042_v17 = vpop.f32.mrf.mxu0  ;;  %12262 = vst.msk [vmem:[%s19480_s25 + $0x120] sm:$0xff] %vm1217_vm2, %v12126_v52  ;;  %v12129_v25 = vadd.f32 %v19469_v51, %v11986_v63  ;;  %v11984_v28 = vadd.f32 %v11551_v50, %v10920_v41  ;;  %v10925_v56 = vadd.f32 %v14904_v61, %v18705_v2 }
 0x4f4   : > { %v10500_v12 = vpop.f32.mrf.mxu1 }
 0x4f5   : > { %v11564_v23 = vpop.f32.mrf.mxu0  ;;  %12265 = vst.msk [vmem:[%s19480_s25 + $0x138] sm:$0xff] %vm1217_vm2, %v12129_v25  ;;  %v12127_v3 = vadd.f32 %v19469_v51, %v11984_v28  ;;  %v11989_v27 = vadd.f32 %v15042_v17, %v10925_v56  ;;  %v10923_v16 = vadd.f32 %v10500_v12, %v18710_v8  ;;  %v20884_v25 = vld [vmem:[#allocation107_spill] sm:$0xff] }
 0x4f6   : > { %v14905_v49 = vpop.f32.mrf.mxu1 }
 0x4f7   : > { %v15043_v38 = vpop.f32.mrf.mxu0  ;;  %12263 = vst.msk [vmem:[%s19480_s25 + $0x128] sm:$0xff] %vm1217_vm2, %v12127_v3  ;;  %v12132_v58 = vadd.f32 %v19469_v51, %v11989_v27  ;;  %v11987_v1 = vadd.f32 %v11564_v23, %v10923_v16  ;;  %v10926_v2 = vadd.f32 %v14905_v49, %v20877_v32  ;;  %v20885_v27 = vld [vmem:[#allocation108_spill] sm:$0xff]  ;;  %v20886_v32 = vld [vmem:[#allocation109_spill] sm:$0xff] }
 0x4f8   : > { %v10503_v35 = vpop.f32.mrf.mxu1 }
 0x4f9   : > { %v11567_v39 = vpop.f32.mrf.mxu0  ;;  %12268 = vst.msk [vmem:[%s19480_s25 + $0x150] sm:$0xff] %vm1217_vm2, %v12132_v58  ;;  %v12130_v46 = vadd.f32 %v19469_v51, %v11987_v1  ;;  %v11990_v22 = vadd.f32 %v15043_v38, %v10926_v2  ;;  %v10924_v8 = vadd.f32 %v10503_v35, %v20878_v31  ;;  %v20887_v31 = vld [vmem:[#allocation47_spill] sm:$0xff] }
 0x4fa   : > { %v14908_v57 = vpop.f32.mrf.mxu1 }
 0x4fb   : > { %v15046_v37 = vpop.f32.mrf.mxu0  ;;  %12266 = vst.msk [vmem:[%s19480_s25 + $0x140] sm:$0xff] %vm1217_vm2, %v12130_v46  ;;  %v12133_v14 = vadd.f32 %v19469_v51, %v11990_v22  ;;  %v11988_v21 = vadd.f32 %v11567_v39, %v10924_v8  ;;  %v10929_v10 = vadd.f32 %v14908_v57, %v20879_v62  ;;  %v20888_v62 = vld [vmem:[#allocation49_spill] sm:$0xff] }
 0x4fc   : > { %v10516_v36 = vpop.f32.mrf.mxu1 }
 0x4fd   : > { %v11580_v48 = vpop.f32.mrf.mxu0  ;;  %12269 = vst.msk [vmem:[%s19480_s25 + $0x158] sm:$0xff] %vm1217_vm2, %v12133_v14  ;;  %v12131_v0 = vadd.f32 %v19469_v51, %v11988_v21  ;;  %v11993_v33 = vadd.f32 %v15046_v37, %v10929_v10  ;;  %v10927_v13 = vadd.f32 %v10516_v36, %v20880_v20  ;;  %v20889_v20 = vld [vmem:[#allocation51_spill] sm:$0xff] }
 0x4fe   : > { %v14909_v60 = vpop.f32.mrf.mxu1 }
 0x4ff   : > { %v15047_v15 = vpop.f32.mrf.mxu0  ;;  %12267 = vst.msk [vmem:[%s19480_s25 + $0x148] sm:$0xff] %vm1217_vm2, %v12131_v0  ;;  %v12136_v54 = vadd.f32 %v19469_v51, %v11993_v33  ;;  %v11991_v11 = vadd.f32 %v11580_v48, %v10927_v13  ;;  %v10930_v59 = vadd.f32 %v14909_v60, %v20881_v26  ;;  %v20890_v26 = vld [vmem:[#allocation53_spill] sm:$0xff] }
 0x500   : > { %v10519_v6 = vpop.f32.mrf.mxu1 }
 0x501   : > { %v11583_v47 = vpop.f32.mrf.mxu0  ;;  %12272 = vst.msk [vmem:[%s19480_s25 + $0x170] sm:$0xff] %vm1217_vm2, %v12136_v54  ;;  %v12134_v9 = vadd.f32 %v19469_v51, %v11991_v11  ;;  %v11994_v19 = vadd.f32 %v15047_v15, %v10930_v59  ;;  %v10928_v29 = vadd.f32 %v10519_v6, %v20882_v45  ;;  %v20891_v45 = vld [vmem:[#allocation55_spill] sm:$0xff] }
 0x502   : > { %v14912_v44 = vpop.f32.mrf.mxu1 }
 0x503   : > { %v15050_v30 = vpop.f32.mrf.mxu0  ;;  %12270 = vst.msk [vmem:[%s19480_s25 + $0x160] sm:$0xff] %vm1217_vm2, %v12134_v9  ;;  %v12137_v7 = vadd.f32 %v19469_v51, %v11994_v19  ;;  %v11992_v50 = vadd.f32 %v11583_v47, %v10928_v29  ;;  %v10933_v52 = vadd.f32 %v14912_v44, %v20883_v24  ;;  %v20892_v24 = vld [vmem:[#allocation57_spill] sm:$0xff] }
 0x504   : > { %v10532_v41 = vpop.f32.mrf.mxu1 }
 0x505   : > { %v11596_v63 = vpop.f32.mrf.mxu0  ;;  %12273 = vst.msk [vmem:[%s19480_s25 + $0x178] sm:$0xff] %vm1217_vm2, %v12137_v7  ;;  %v12135_v17 = vadd.f32 %v19469_v51, %v11992_v50  ;;  %v11997_v61 = vadd.f32 %v15050_v30, %v10933_v52  ;;  %v10931_v28 = vadd.f32 %v10532_v41, %v20884_v25  ;;  %v20893_v25 = vld [vmem:[#allocation59_spill] sm:$0xff] }
 0x506   : > { %v14913_v23 = vpop.f32.mrf.mxu1 }
 0x507   : > { %v15051_v56 = vpop.f32.mrf.mxu0  ;;  %12271 = vst.msk [vmem:[%s19480_s25 + $0x168] sm:$0xff] %vm1217_vm2, %v12135_v17  ;;  %v12140_v12 = vadd.f32 %v19469_v51, %v11997_v61  ;;  %v11995_v3 = vadd.f32 %v11596_v63, %v10931_v28  ;;  %v10934_v16 = vadd.f32 %v14913_v23, %v20885_v27  ;;  %v20894_v27 = vld [vmem:[#allocation61_spill] sm:$0xff] }
 0x508   : > { %v10535_v49 = vpop.f32.mrf.mxu1 }
 0x509   : > { %v11599_v38 = vpop.f32.mrf.mxu0  ;;  %12276 = vst.msk [vmem:[%s19480_s25 + $0x190] sm:$0xff] %vm1217_vm2, %v12140_v12  ;;  %v12138_v58 = vadd.f32 %v19469_v51, %v11995_v3  ;;  %v11998_v1 = vadd.f32 %v15051_v56, %v10934_v16  ;;  %v10932_v2 = vadd.f32 %v10535_v49, %v20886_v32 }
 0x50a   : > { %v14916_v35 = vpop.f32.mrf.mxu1 }
 0x50b   : > { %v15054_v39 = vpop.f32.mrf.mxu0  ;;  %12274 = vst.msk [vmem:[%s19480_s25 + $0x180] sm:$0xff] %vm1217_vm2, %v12138_v58  ;;  %v12141_v46 = vadd.f32 %v19469_v51, %v11998_v1  ;;  %v11996_v22 = vadd.f32 %v11599_v38, %v10932_v2  ;;  %v10937_v8 = vadd.f32 %v14916_v35, %v20887_v31  ;;  %v19862_v58 = vld [vmem:[#allocation2] ss:$0 sm:$0xff]  ;;  %v20895_v2 = vld [vmem:[#allocation63_spill] sm:$0xff]  ;;  %v20896_v31 = vld [vmem:[#allocation65_spill] sm:$0xff] }
 0x50c   : > { %v10548_v57 = vpop.f32.mrf.mxu1 }
 0x50d   : > { %v11612_v37 = vpop.f32.mrf.mxu0  ;;  %12277 = vst.msk [vmem:[%s19480_s25 + $0x198] sm:$0xff] %vm1217_vm2, %v12141_v46  ;;  %v12139_v14 = vadd.f32 %v19469_v51, %v11996_v22  ;;  %v12001_v21 = vadd.f32 %v15054_v39, %v10937_v8  ;;  %v10935_v10 = vadd.f32 %v10548_v57, %v20888_v62  ;;  %v20897_v62 = vld [vmem:[#allocation67_spill] sm:$0xff] }
 0x50e   : > { %v14917_v36 = vpop.f32.mrf.mxu1 }
 0x50f   : > { %v15055_v48 = vpop.f32.mrf.mxu0  ;;  %12275 = vst.msk [vmem:[%s19480_s25 + $0x188] sm:$0xff] %vm1217_vm2, %v12139_v14  ;;  %v12144_v0 = vadd.f32 %v19469_v51, %v12001_v21  ;;  %v11999_v33 = vadd.f32 %v11612_v37, %v10935_v10  ;;  %v10938_v13 = vadd.f32 %v14917_v36, %v20889_v20  ;;  %v20898_v20 = vld [vmem:[#allocation69_spill] sm:$0xff] }
 0x510   : > { %v10551_v60 = vpop.f32.mrf.mxu1 }
 0x511   : > { %v11615_v15 = vpop.f32.mrf.mxu0  ;;  %12280 = vst.msk [vmem:[%s19480_s25 + $0x1b0] sm:$0xff] %vm1217_vm2, %v12144_v0  ;;  %v12142_v54 = vadd.f32 %v19469_v51, %v11999_v33  ;;  %v12002_v11 = vadd.f32 %v15055_v48, %v10938_v13  ;;  %v10936_v59 = vadd.f32 %v10551_v60, %v20890_v26  ;;  %v20899_v26 = vld [vmem:[#allocation71_spill] sm:$0xff] }
 0x512   : > { %v14920_v6 = vpop.f32.mrf.mxu1 }
 0x513   : > { %v15058_v47 = vpop.f32.mrf.mxu0  ;;  %12278 = vst.msk [vmem:[%s19480_s25 + $0x1a0] sm:$0xff] %vm1217_vm2, %v12142_v54  ;;  %v12145_v9 = vadd.f32 %v19469_v51, %v12002_v11  ;;  %v12000_v19 = vadd.f32 %v11615_v15, %v10936_v59  ;;  %v10941_v29 = vadd.f32 %v14920_v6, %v20891_v45  ;;  %v20900_v45 = vld [vmem:[#allocation73_spill] sm:$0xff] }
 0x514   : > { %v10564_v44 = vpop.f32.mrf.mxu1 }
 0x515   : > { %v11628_v30 = vpop.f32.mrf.mxu0  ;;  %12281 = vst.msk [vmem:[%s19480_s25 + $0x1b8] sm:$0xff] %vm1217_vm2, %v12145_v9  ;;  %v12143_v7 = vadd.f32 %v19469_v51, %v12000_v19  ;;  %v12005_v50 = vadd.f32 %v15058_v47, %v10941_v29  ;;  %v10939_v52 = vadd.f32 %v10564_v44, %v20892_v24  ;;  %v20901_v24 = vld [vmem:[#allocation75_spill] sm:$0xff] }
 0x516   : > { %v14921_v41 = vpop.f32.mrf.mxu1 }
 0x517   : > { %v15059_v63 = vpop.f32.mrf.mxu0  ;;  %12279 = vst.msk [vmem:[%s19480_s25 + $0x1a8] sm:$0xff] %vm1217_vm2, %v12143_v7  ;;  %v12148_v17 = vadd.f32 %v19469_v51, %v12005_v50  ;;  %v12003_v61 = vadd.f32 %v11628_v30, %v10939_v52  ;;  %v10942_v28 = vadd.f32 %v14921_v41, %v20893_v25  ;;  %v20902_v25 = vld [vmem:[#allocation77_spill] sm:$0xff] }
 0x518   : > { %v10567_v23 = vpop.f32.mrf.mxu1 }
 0x519   : > { %v11631_v56 = vpop.f32.mrf.mxu0  ;;  %12284 = vst.msk [vmem:[%s19480_s25 + $0x1d0] sm:$0xff] %vm1217_vm2, %v12148_v17  ;;  %v12146_v12 = vadd.f32 %v19469_v51, %v12003_v61  ;;  %v12006_v3 = vadd.f32 %v15059_v63, %v10942_v28  ;;  %v10940_v16 = vadd.f32 %v10567_v23, %v20894_v27  ;;  %v20903_v27 = vld [vmem:[#allocation79_spill] sm:$0xff] }
 0x51a   : > { %v14924_v49 = vpop.f32.mrf.mxu1 }
 0x51b   : > { %v15062_v38 = vpop.f32.mrf.mxu0  ;;  %12282 = vst.msk [vmem:[%s19480_s25 + $0x1c0] sm:$0xff] %vm1217_vm2, %v12146_v12  ;;  %v12149_v1 = vadd.f32 %v19862_v58, %v12006_v3  ;;  %v12004_v32 = vadd.f32 %v11631_v56, %v10940_v16  ;;  %v10945_v39 = vadd.f32 %v14924_v49, %v20895_v2  ;;  %v20904_v2 = vld [vmem:[#allocation81_spill] sm:$0xff] }
 0x51c   : > { %v10580_v46 = vpop.f32.mrf.mxu1 }
 0x51d   : > { %v11644_v35 = vpop.f32.mrf.mxu0  ;;  %12285 = vst.msk [vmem:[%s19480_s25 + $0x1d8] sm:$0xff] %vm1217_vm2, %v12149_v1  ;;  %v12147_v51 = vadd.f32 %v19862_v58, %v12004_v32  ;;  %v12009_v22 = vadd.f32 %v15062_v38, %v10945_v39  ;;  %v10943_v8 = vadd.f32 %v10580_v46, %v20896_v31  ;;  %v20905_v31 = vld [vmem:[#allocation83_spill] sm:$0xff] }
 0x51e   : > { %v14925_v57 = vpop.f32.mrf.mxu1 }
 0x51f   : > { %v15063_v37 = vpop.f32.mrf.mxu0  ;;  %12283 = vst.msk [vmem:[%s19480_s25 + $0x1c8] sm:$0xff] %vm1217_vm2, %v12147_v51  ;;  %v12152_v14 = vadd.f32 %v19862_v58, %v12009_v22  ;;  %v12007_v21 = vadd.f32 %v11644_v35, %v10943_v8  ;;  %v10946_v10 = vadd.f32 %v14925_v57, %v20897_v62  ;;  %v20906_v62 = vld [vmem:[#allocation85_spill] sm:$0xff] }
 0x520   : > { %v10583_v36 = vpop.f32.mrf.mxu1 }
 0x521   : > { %v11647_v48 = vpop.f32.mrf.mxu0  ;;  %12288 = vst.msk [vmem:[%s19480_s25 + $0x1f0] sm:$0xff] %vm1217_vm2, %v12152_v14  ;;  %v12150_v0 = vadd.f32 %v19862_v58, %v12007_v21  ;;  %v12010_v33 = vadd.f32 %v15063_v37, %v10946_v10  ;;  %v10944_v13 = vadd.f32 %v10583_v36, %v20898_v20  ;;  %v20907_v20 = vld [vmem:[#allocation87_spill] sm:$0xff] }
 0x522   : > { %v14928_v60 = vpop.f32.mrf.mxu1 }
 0x523   : > { %v15066_v15 = vpop.f32.mrf.mxu0  ;;  %12286 = vst.msk [vmem:[%s19480_s25 + $0x1e0] sm:$0xff] %vm1217_vm2, %v12150_v0  ;;  %v12153_v54 = vadd.f32 %v19862_v58, %v12010_v33  ;;  %v12008_v11 = vadd.f32 %v11647_v48, %v10944_v13  ;;  %v10949_v59 = vadd.f32 %v14928_v60, %v20899_v26  ;;  %v20908_v26 = vld [vmem:[#allocation89_spill] sm:$0xff] }
 0x524   : > { %v10596_v6 = vpop.f32.mrf.mxu1 }
 0x525   : > { %v11660_v47 = vpop.f32.mrf.mxu0  ;;  %12289 = vst.msk [vmem:[%s19480_s25 + $0x1f8] sm:$0xff] %vm1217_vm2, %v12153_v54  ;;  %v12151_v9 = vadd.f32 %v19862_v58, %v12008_v11  ;;  %v12013_v19 = vadd.f32 %v15066_v15, %v10949_v59  ;;  %v10947_v29 = vadd.f32 %v10596_v6, %v20900_v45  ;;  %v20909_v45 = vld [vmem:[#allocation91_spill] sm:$0xff] }
 0x526   : > { %v14929_v44 = vpop.f32.mrf.mxu1 }
 0x527   : > { %v15067_v30 = vpop.f32.mrf.mxu0  ;;  %12287 = vst.msk [vmem:[%s19480_s25 + $0x1e8] sm:$0xff] %vm1217_vm2, %v12151_v9  ;;  %v12156_v7 = vadd.f32 %v19862_v58, %v12013_v19  ;;  %v12011_v50 = vadd.f32 %v11660_v47, %v10947_v29  ;;  %v10950_v52 = vadd.f32 %v14929_v44, %v20901_v24  ;;  %v20910_v24 = vld [vmem:[#allocation93_spill] sm:$0xff] }
 0x528   : > { %v10599_v41 = vpop.f32.mrf.mxu1 }
 0x529   : > { %v11663_v63 = vpop.f32.mrf.mxu0  ;;  %12292 = vst.msk [vmem:[%s19480_s25 + $0x210] sm:$0xff] %vm1217_vm2, %v12156_v7  ;;  %v12154_v17 = vadd.f32 %v19862_v58, %v12011_v50  ;;  %v12014_v61 = vadd.f32 %v15067_v30, %v10950_v52  ;;  %v10948_v28 = vadd.f32 %v10599_v41, %v20902_v25  ;;  %v20911_v25 = vld [vmem:[#allocation95_spill] sm:$0xff] }
 0x52a   : > { %v14932_v23 = vpop.f32.mrf.mxu1 }
 0x52b   : > { %v15070_v56 = vpop.f32.mrf.mxu0  ;;  %12290 = vst.msk [vmem:[%s19480_s25 + $0x200] sm:$0xff] %vm1217_vm2, %v12154_v17  ;;  %v12157_v12 = vadd.f32 %v19862_v58, %v12014_v61  ;;  %v12012_v3 = vadd.f32 %v11663_v63, %v10948_v28  ;;  %v10953_v16 = vadd.f32 %v14932_v23, %v20903_v27  ;;  %v20912_v27 = vld [vmem:[#allocation97_spill] sm:$0xff] }
 0x52c   : > { %v10612_v49 = vpop.f32.mrf.mxu1 }
 0x52d   : > { %v11676_v38 = vpop.f32.mrf.mxu0  ;;  %12293 = vst.msk [vmem:[%s19480_s25 + $0x218] sm:$0xff] %vm1217_vm2, %v12157_v12  ;;  %v12155_v1 = vadd.f32 %v19862_v58, %v12012_v3  ;;  %v12017_v32 = vadd.f32 %v15070_v56, %v10953_v16  ;;  %v10951_v39 = vadd.f32 %v10612_v49, %v20904_v2  ;;  %v20913_v2 = vld [vmem:[#allocation5_spill] sm:$0xff] }
 0x52e   : > { %v14933_v46 = vpop.f32.mrf.mxu1 }
 0x52f   : > { %v15071_v35 = vpop.f32.mrf.mxu0  ;;  %12291 = vst.msk [vmem:[%s19480_s25 + $0x208] sm:$0xff] %vm1217_vm2, %v12155_v1  ;;  %v12160_v51 = vadd.f32 %v19862_v58, %v12017_v32  ;;  %v12015_v22 = vadd.f32 %v11676_v38, %v10951_v39  ;;  %v10954_v8 = vadd.f32 %v14933_v46, %v20905_v31  ;;  %v20914_v31 = vld [vmem:[#allocation6_spill] sm:$0xff] }
 0x530   : > { %v10615_v57 = vpop.f32.mrf.mxu1 }
 0x531   : > { %v11679_v37 = vpop.f32.mrf.mxu0  ;;  %12296 = vst.msk [vmem:[%s19480_s25 + $0x230] sm:$0xff] %vm1217_vm2, %v12160_v51  ;;  %v12158_v14 = vadd.f32 %v19862_v58, %v12015_v22  ;;  %v12018_v21 = vadd.f32 %v15071_v35, %v10954_v8  ;;  %v10952_v10 = vadd.f32 %v10615_v57, %v20906_v62  ;;  %v20915_v62 = vld [vmem:[#allocation7_spill] sm:$0xff] }
 0x532   : > { %v14936_v36 = vpop.f32.mrf.mxu1 }
 0x533   : > { %v15074_v48 = vpop.f32.mrf.mxu0  ;;  %12294 = vst.msk [vmem:[%s19480_s25 + $0x220] sm:$0xff] %vm1217_vm2, %v12158_v14  ;;  %v12161_v0 = vadd.f32 %v19862_v58, %v12018_v21  ;;  %v12016_v33 = vadd.f32 %v11679_v37, %v10952_v10  ;;  %v10957_v13 = vadd.f32 %v14936_v36, %v20907_v20  ;;  %v20916_v20 = vld [vmem:[#allocation8_spill] sm:$0xff] }
 0x534   : > { %v10628_v60 = vpop.f32.mrf.mxu1 }
 0x535   : > { %v11692_v15 = vpop.f32.mrf.mxu0  ;;  %12297 = vst.msk [vmem:[%s19480_s25 + $0x238] sm:$0xff] %vm1217_vm2, %v12161_v0  ;;  %v12159_v54 = vadd.f32 %v19862_v58, %v12016_v33  ;;  %v12021_v11 = vadd.f32 %v15074_v48, %v10957_v13  ;;  %v10955_v59 = vadd.f32 %v10628_v60, %v20908_v26  ;;  %v20917_v26 = vld [vmem:[#allocation9_spill] sm:$0xff] }
 0x536   : > { %v14937_v6 = vpop.f32.mrf.mxu1 }
 0x537   : > { %v15075_v47 = vpop.f32.mrf.mxu0  ;;  %12295 = vst.msk [vmem:[%s19480_s25 + $0x228] sm:$0xff] %vm1217_vm2, %v12159_v54  ;;  %v12164_v9 = vadd.f32 %v19862_v58, %v12021_v11  ;;  %v12019_v19 = vadd.f32 %v11692_v15, %v10955_v59  ;;  %v10958_v29 = vadd.f32 %v14937_v6, %v20909_v45  ;;  %v20918_v45 = vld [vmem:[#allocation10_spill] sm:$0xff] }
 0x538   : > { %v10631_v44 = vpop.f32.mrf.mxu1 }
 0x539   : > { %v11695_v30 = vpop.f32.mrf.mxu0  ;;  %12300 = vst.msk [vmem:[%s19480_s25 + $0x250] sm:$0xff] %vm1217_vm2, %v12164_v9  ;;  %v12162_v7 = vadd.f32 %v19862_v58, %v12019_v19  ;;  %v12022_v50 = vadd.f32 %v15075_v47, %v10958_v29  ;;  %v10956_v52 = vadd.f32 %v10631_v44, %v20910_v24  ;;  %v20919_v24 = vld [vmem:[#allocation11_spill] sm:$0xff] }
 0x53a   : > { %v14940_v41 = vpop.f32.mrf.mxu1 }
 0x53b   : > { %v15078_v63 = vpop.f32.mrf.mxu0  ;;  %12298 = vst.msk [vmem:[%s19480_s25 + $0x240] sm:$0xff] %vm1217_vm2, %v12162_v7  ;;  %v12165_v17 = vadd.f32 %v19862_v58, %v12022_v50  ;;  %v12020_v61 = vadd.f32 %v11695_v30, %v10956_v52  ;;  %v10961_v28 = vadd.f32 %v14940_v41, %v20911_v25  ;;  %v20920_v25 = vld [vmem:[#allocation12_spill] sm:$0xff] }
 0x53c   : > { %v10644_v23 = vpop.f32.mrf.mxu1 }
 0x53d   : > { %v11708_v56 = vpop.f32.mrf.mxu0  ;;  %12301 = vst.msk [vmem:[%s19480_s25 + $0x258] sm:$0xff] %vm1217_vm2, %v12165_v17  ;;  %v12163_v12 = vadd.f32 %v19862_v58, %v12020_v61  ;;  %v12025_v3 = vadd.f32 %v15078_v63, %v10961_v28  ;;  %v10959_v16 = vadd.f32 %v10644_v23, %v20912_v27  ;;  %v20921_v27 = vld [vmem:[#allocation13_spill] sm:$0xff] }
 0x53e   : > { %v14941_v49 = vpop.f32.mrf.mxu1 }
 0x53f   : > { %v15079_v38 = vpop.f32.mrf.mxu0  ;;  %12299 = vst.msk [vmem:[%s19480_s25 + $0x248] sm:$0xff] %vm1217_vm2, %v12163_v12  ;;  %v12168_v1 = vadd.f32 %v19862_v58, %v12025_v3  ;;  %v12023_v32 = vadd.f32 %v11708_v56, %v10959_v16  ;;  %v10962_v39 = vadd.f32 %v14941_v49, %v20913_v2  ;;  %v20922_v2 = vld [vmem:[#allocation14_spill] sm:$0xff] }
 0x540   : > { %v10647_v46 = vpop.f32.mrf.mxu1 }
 0x541   : > { %v11711_v35 = vpop.f32.mrf.mxu0  ;;  %12304 = vst.msk [vmem:[%s19480_s25 + $0x270] sm:$0xff] %vm1217_vm2, %v12168_v1  ;;  %v12166_v51 = vadd.f32 %v19862_v58, %v12023_v32  ;;  %v12026_v22 = vadd.f32 %v15079_v38, %v10962_v39  ;;  %v10960_v8 = vadd.f32 %v10647_v46, %v20914_v31  ;;  %v20923_v31 = vld [vmem:[#allocation15_spill] sm:$0xff] }
 0x542   : > { %v14944_v57 = vpop.f32.mrf.mxu1 }
 0x543   : > { %v15082_v37 = vpop.f32.mrf.mxu0  ;;  %12302 = vst.msk [vmem:[%s19480_s25 + $0x260] sm:$0xff] %vm1217_vm2, %v12166_v51  ;;  %v12169_v14 = vadd.f32 %v19862_v58, %v12026_v22  ;;  %v12024_v21 = vadd.f32 %v11711_v35, %v10960_v8  ;;  %v10965_v10 = vadd.f32 %v14944_v57, %v20915_v62  ;;  %v20924_v62 = vld [vmem:[#allocation16_spill] sm:$0xff] }
 0x544   : > { %v10660_v36 = vpop.f32.mrf.mxu1 }
 0x545   : > { %v11724_v48 = vpop.f32.mrf.mxu0  ;;  %12305 = vst.msk [vmem:[%s19480_s25 + $0x278] sm:$0xff] %vm1217_vm2, %v12169_v14  ;;  %v12167_v0 = vadd.f32 %v19862_v58, %v12024_v21  ;;  %v12029_v33 = vadd.f32 %v15082_v37, %v10965_v10  ;;  %v10963_v13 = vadd.f32 %v10660_v36, %v20916_v20  ;;  %v20925_v20 = vld [vmem:[#allocation17_spill] sm:$0xff] }
 0x546   : > { %v14945_v60 = vpop.f32.mrf.mxu1 }
 0x547   : > { %v15083_v15 = vpop.f32.mrf.mxu0  ;;  %12303 = vst.msk [vmem:[%s19480_s25 + $0x268] sm:$0xff] %vm1217_vm2, %v12167_v0  ;;  %v12172_v54 = vadd.f32 %v19862_v58, %v12029_v33  ;;  %v12027_v11 = vadd.f32 %v11724_v48, %v10963_v13  ;;  %v10966_v59 = vadd.f32 %v14945_v60, %v20917_v26  ;;  %v20926_v26 = vld [vmem:[#allocation18_spill] sm:$0xff] }
 0x548   : > { %v10663_v6 = vpop.f32.mrf.mxu1 }
 0x549   : > { %v11727_v47 = vpop.f32.mrf.mxu0  ;;  %12308 = vst.msk [vmem:[%s19480_s25 + $0x290] sm:$0xff] %vm1217_vm2, %v12172_v54  ;;  %v12170_v9 = vadd.f32 %v19862_v58, %v12027_v11  ;;  %v12030_v19 = vadd.f32 %v15083_v15, %v10966_v59  ;;  %v10964_v29 = vadd.f32 %v10663_v6, %v20918_v45  ;;  %v20927_v45 = vld [vmem:[#allocation19_spill] sm:$0xff] }
 0x54a   : > { %v14948_v44 = vpop.f32.mrf.mxu1 }
 0x54b   : > { %v15086_v30 = vpop.f32.mrf.mxu0  ;;  %12306 = vst.msk [vmem:[%s19480_s25 + $0x280] sm:$0xff] %vm1217_vm2, %v12170_v9  ;;  %v12173_v7 = vadd.f32 %v19862_v58, %v12030_v19  ;;  %v12028_v50 = vadd.f32 %v11727_v47, %v10964_v29  ;;  %v10969_v52 = vadd.f32 %v14948_v44, %v20919_v24  ;;  %v20928_v24 = vld [vmem:[#allocation20_spill] sm:$0xff] }
 0x54c   : > { %v10676_v41 = vpop.f32.mrf.mxu1 }
 0x54d   : > { %v11740_v63 = vpop.f32.mrf.mxu0  ;;  %12309 = vst.msk [vmem:[%s19480_s25 + $0x298] sm:$0xff] %vm1217_vm2, %v12173_v7  ;;  %v12171_v17 = vadd.f32 %v19862_v58, %v12028_v50  ;;  %v12033_v61 = vadd.f32 %v15086_v30, %v10969_v52  ;;  %v10967_v28 = vadd.f32 %v10676_v41, %v20920_v25  ;;  %v20929_v25 = vld [vmem:[#allocation21_spill] sm:$0xff] }
 0x54e   : > { %v14949_v23 = vpop.f32.mrf.mxu1 }
 0x54f   : > { %v15087_v56 = vpop.f32.mrf.mxu0  ;;  %12307 = vst.msk [vmem:[%s19480_s25 + $0x288] sm:$0xff] %vm1217_vm2, %v12171_v17  ;;  %v12176_v12 = vadd.f32 %v19862_v58, %v12033_v61  ;;  %v12031_v3 = vadd.f32 %v11740_v63, %v10967_v28  ;;  %v10970_v16 = vadd.f32 %v14949_v23, %v20921_v27  ;;  %v20930_v27 = vld [vmem:[#allocation22_spill] sm:$0xff] }
 0x550   : > { %v10679_v49 = vpop.f32.mrf.mxu1 }
 0x551   : > { %v11743_v38 = vpop.f32.mrf.mxu0  ;;  %12312 = vst.msk [vmem:[%s19480_s25 + $0x2b0] sm:$0xff] %vm1217_vm2, %v12176_v12  ;;  %v12174_v1 = vadd.f32 %v19862_v58, %v12031_v3  ;;  %v12034_v32 = vadd.f32 %v15087_v56, %v10970_v16  ;;  %v10968_v39 = vadd.f32 %v10679_v49, %v20922_v2  ;;  %v20931_v2 = vld [vmem:[#allocation23_spill] sm:$0xff] }
 0x552   : > { %v14952_v46 = vpop.f32.mrf.mxu1 }
 0x553   : > { %v15090_v35 = vpop.f32.mrf.mxu0  ;;  %12310 = vst.msk [vmem:[%s19480_s25 + $0x2a0] sm:$0xff] %vm1217_vm2, %v12174_v1  ;;  %v12177_v51 = vadd.f32 %v19862_v58, %v12034_v32  ;;  %v12032_v22 = vadd.f32 %v11743_v38, %v10968_v39  ;;  %v10973_v8 = vadd.f32 %v14952_v46, %v20923_v31  ;;  %v20932_v31 = vld [vmem:[#allocation24_spill] sm:$0xff] }
 0x554   : > { %v10692_v57 = vpop.f32.mrf.mxu1 }
 0x555   : > { %v11756_v37 = vpop.f32.mrf.mxu0  ;;  %12313 = vst.msk [vmem:[%s19480_s25 + $0x2b8] sm:$0xff] %vm1217_vm2, %v12177_v51  ;;  %v12175_v14 = vadd.f32 %v19862_v58, %v12032_v22  ;;  %v12037_v21 = vadd.f32 %v15090_v35, %v10973_v8  ;;  %v10971_v10 = vadd.f32 %v10692_v57, %v20924_v62  ;;  %v20933_v62 = vld [vmem:[#allocation25_spill] sm:$0xff] }
 0x556   : > { %v14953_v36 = vpop.f32.mrf.mxu1 }
 0x557   : > { %v15091_v48 = vpop.f32.mrf.mxu0  ;;  %12311 = vst.msk [vmem:[%s19480_s25 + $0x2a8] sm:$0xff] %vm1217_vm2, %v12175_v14  ;;  %v12180_v0 = vadd.f32 %v19862_v58, %v12037_v21  ;;  %v12035_v33 = vadd.f32 %v11756_v37, %v10971_v10  ;;  %v10974_v13 = vadd.f32 %v14953_v36, %v20925_v20  ;;  %v20934_v20 = vld [vmem:[#allocation26_spill] sm:$0xff] }
 0x558   : > { %v10695_v60 = vpop.f32.mrf.mxu1 }
 0x559   : > { %v11759_v15 = vpop.f32.mrf.mxu0  ;;  %12316 = vst.msk [vmem:[%s19480_s25 + $0x2d0] sm:$0xff] %vm1217_vm2, %v12180_v0  ;;  %v12178_v54 = vadd.f32 %v19862_v58, %v12035_v33  ;;  %v12038_v11 = vadd.f32 %v15091_v48, %v10974_v13  ;;  %v10972_v59 = vadd.f32 %v10695_v60, %v20926_v26  ;;  %v20935_v26 = vld [vmem:[#allocation27_spill] sm:$0xff] }
 0x55a   : > { %v14956_v6 = vpop.f32.mrf.mxu1 }
 0x55b   : > { %v15094_v47 = vpop.f32.mrf.mxu0  ;;  %12314 = vst.msk [vmem:[%s19480_s25 + $0x2c0] sm:$0xff] %vm1217_vm2, %v12178_v54  ;;  %v12181_v9 = vadd.f32 %v19862_v58, %v12038_v11  ;;  %v12036_v19 = vadd.f32 %v11759_v15, %v10972_v59  ;;  %v10977_v29 = vadd.f32 %v14956_v6, %v20927_v45  ;;  %v20936_v45 = vld [vmem:[#allocation28_spill] sm:$0xff] }
 0x55c   : > { %v10708_v44 = vpop.f32.mrf.mxu1 }
 0x55d   : > { %v11772_v30 = vpop.f32.mrf.mxu0  ;;  %12317 = vst.msk [vmem:[%s19480_s25 + $0x2d8] sm:$0xff] %vm1217_vm2, %v12181_v9  ;;  %v12179_v7 = vadd.f32 %v19862_v58, %v12036_v19  ;;  %v12041_v50 = vadd.f32 %v15094_v47, %v10977_v29  ;;  %v10975_v52 = vadd.f32 %v10708_v44, %v20928_v24  ;;  %v20937_v24 = vld [vmem:[#allocation29_spill] sm:$0xff] }
 0x55e   : > { %v14957_v41 = vpop.f32.mrf.mxu1 }
 0x55f   : > { %v15095_v63 = vpop.f32.mrf.mxu0  ;;  %12315 = vst.msk [vmem:[%s19480_s25 + $0x2c8] sm:$0xff] %vm1217_vm2, %v12179_v7  ;;  %v12184_v17 = vadd.f32 %v19862_v58, %v12041_v50  ;;  %v12039_v61 = vadd.f32 %v11772_v30, %v10975_v52  ;;  %v10978_v28 = vadd.f32 %v14957_v41, %v20929_v25  ;;  %v20938_v25 = vld [vmem:[#allocation30_spill] sm:$0xff] }
 0x560   : > { %v10711_v23 = vpop.f32.mrf.mxu1 }
 0x561   : > { %v11775_v56 = vpop.f32.mrf.mxu0  ;;  %12320 = vst.msk [vmem:[%s19480_s25 + $0x2f0] sm:$0xff] %vm1217_vm2, %v12184_v17  ;;  %v12182_v12 = vadd.f32 %v19862_v58, %v12039_v61  ;;  %v12042_v3 = vadd.f32 %v15095_v63, %v10978_v28  ;;  %v10976_v16 = vadd.f32 %v10711_v23, %v20930_v27  ;;  %v20939_v27 = vld [vmem:[#allocation31_spill] sm:$0xff] }
 0x562   : > { %v14960_v49 = vpop.f32.mrf.mxu1 }
 0x563   : > { %v15098_v38 = vpop.f32.mrf.mxu0  ;;  %12318 = vst.msk [vmem:[%s19480_s25 + $0x2e0] sm:$0xff] %vm1217_vm2, %v12182_v12  ;;  %v12185_v1 = vadd.f32 %v19862_v58, %v12042_v3  ;;  %v12040_v32 = vadd.f32 %v11775_v56, %v10976_v16  ;;  %v10981_v39 = vadd.f32 %v14960_v49, %v20931_v2 }
 0x564   : > { %v10724_v46 = vpop.f32.mrf.mxu1 }
 0x565   : > { %v11788_v35 = vpop.f32.mrf.mxu0  ;;  %12321 = vst.msk [vmem:[%s19480_s25 + $0x2f8] sm:$0xff] %vm1217_vm2, %v12185_v1  ;;  %v12183_v51 = vadd.f32 %v19862_v58, %v12040_v32  ;;  %v12045_v22 = vadd.f32 %v15098_v38, %v10981_v39  ;;  %v10979_v8 = vadd.f32 %v10724_v46, %v20932_v31 }
 0x566   : > { %v14961_v57 = vpop.f32.mrf.mxu1 }
 0x567   : > { %v15099_v37 = vpop.f32.mrf.mxu0  ;;  %12319 = vst.msk [vmem:[%s19480_s25 + $0x2e8] sm:$0xff] %vm1217_vm2, %v12183_v51  ;;  %v12188_v14 = vadd.f32 %v19862_v58, %v12045_v22  ;;  %v12043_v21 = vadd.f32 %v11788_v35, %v10979_v8  ;;  %v10982_v10 = vadd.f32 %v14961_v57, %v20933_v62  ;;  %v20940_v22 = vld [vmem:[#allocation32_spill] sm:$0xff] }
 0x568   : > { %v10727_v36 = vpop.f32.mrf.mxu1 }
 0x569   : > { %v11791_v48 = vpop.f32.mrf.mxu0  ;;  %12324 = vst.msk [vmem:[%s19480_s25 + $0x310] sm:$0xff] %vm1217_vm2, %v12188_v14  ;;  %v12186_v0 = vadd.f32 %v19862_v58, %v12043_v21  ;;  %v12046_v33 = vadd.f32 %v15099_v37, %v10982_v10  ;;  %v10980_v13 = vadd.f32 %v10727_v36, %v20934_v20  ;;  %v20941_v21 = vld [vmem:[#allocation33_spill] sm:$0xff] }
 0x56a   : > { %v14964_v60 = vpop.f32.mrf.mxu1 }
 0x56b   : > { %v15102_v15 = vpop.f32.mrf.mxu0  ;;  %12322 = vst.msk [vmem:[%s19480_s25 + $0x300] sm:$0xff] %vm1217_vm2, %v12186_v0  ;;  %v12189_v54 = vadd.f32 %v19862_v58, %v12046_v33  ;;  %v12044_v11 = vadd.f32 %v11791_v48, %v10980_v13  ;;  %v10985_v59 = vadd.f32 %v14964_v60, %v20935_v26  ;;  %v20942_v0 = vld [vmem:[#allocation34_spill] sm:$0xff] }
 0x56c   : > { %v10740_v6 = vpop.f32.mrf.mxu1 }
 0x56d   : > { %v11804_v47 = vpop.f32.mrf.mxu0  ;;  %12325 = vst.msk [vmem:[%s19480_s25 + $0x318] sm:$0xff] %vm1217_vm2, %v12189_v54  ;;  %v12187_v9 = vadd.f32 %v19862_v58, %v12044_v11  ;;  %v12049_v19 = vadd.f32 %v15102_v15, %v10985_v59  ;;  %v10983_v29 = vadd.f32 %v10740_v6, %v20936_v45  ;;  %v20943_v54 = vld [vmem:[#allocation35_spill] sm:$0xff] }
 0x56e   : > { %v14965_v44 = vpop.f32.mrf.mxu1 }
 0x56f   : > { %v15103_v30 = vpop.f32.mrf.mxu0  ;;  %12323 = vst.msk [vmem:[%s19480_s25 + $0x308] sm:$0xff] %vm1217_vm2, %v12187_v9  ;;  %v12192_v7 = vadd.f32 %v19862_v58, %v12049_v19  ;;  %v12047_v50 = vadd.f32 %v11804_v47, %v10983_v29  ;;  %v10986_v52 = vadd.f32 %v14965_v44, %v20937_v24  ;;  %v20944_v9 = vld [vmem:[#allocation36_spill] sm:$0xff] }
 0x570   : > { %v10743_v41 = vpop.f32.mrf.mxu1 }
 0x571   : > { %v11807_v63 = vpop.f32.mrf.mxu0  ;;  %12328 = vst.msk [vmem:[%s19480_s25 + $0x330] sm:$0xff] %vm1217_vm2, %v12192_v7  ;;  %v12190_v17 = vadd.f32 %v19862_v58, %v12047_v50  ;;  %v12050_v61 = vadd.f32 %v15103_v30, %v10986_v52  ;;  %v10984_v28 = vadd.f32 %v10743_v41, %v20938_v25  ;;  %v20945_v7 = vld [vmem:[#allocation37_spill] sm:$0xff] }
 0x572   : > { %v14968_v23 = vpop.f32.mrf.mxu1 }
 0x573   : > { %v15106_v56 = vpop.f32.mrf.mxu0  ;;  %12326 = vst.msk [vmem:[%s19480_s25 + $0x320] sm:$0xff] %vm1217_vm2, %v12190_v17  ;;  %v12193_v12 = vadd.f32 %v19862_v58, %v12050_v61  ;;  %v12048_v3 = vadd.f32 %v11807_v63, %v10984_v28  ;;  %v10989_v16 = vadd.f32 %v14968_v23, %v20939_v27  ;;  %v20946_v17 = vld [vmem:[#allocation38_spill] sm:$0xff] }
 0x574   : > { %v10756_v49 = vpop.f32.mrf.mxu1 }
 0x575   : > { %v11820_v38 = vpop.f32.mrf.mxu0  ;;  %12329 = vst.msk [vmem:[%s19480_s25 + $0x338] sm:$0xff] %vm1217_vm2, %v12193_v12  ;;  %v12191_v1 = vadd.f32 %v19862_v58, %v12048_v3  ;;  %v12053_v32 = vadd.f32 %v15106_v56, %v10989_v16  ;;  %v10987_v2 = vadd.f32 %v10756_v49, %v19222_v42  ;;  %v20947_v12 = vld [vmem:[#allocation39_spill] sm:$0xff] }
 0x576   : > { %v14969_v35 = vpop.f32.mrf.mxu1 }
 0x577   : > { %v15107_v39 = vpop.f32.mrf.mxu0  ;;  %12327 = vst.msk [vmem:[%s19480_s25 + $0x328] sm:$0xff] %vm1217_vm2, %v12191_v1  ;;  %v12196_v46 = vadd.f32 %v19862_v58, %v12053_v32  ;;  %v12051_v51 = vadd.f32 %v11820_v38, %v10987_v2  ;;  %v10990_v31 = vadd.f32 %v14969_v35, %v20940_v22  ;;  %v20948_v1 = vld [vmem:[#allocation40_spill] sm:$0xff] }
 0x578   : > { %v10759_v37 = vpop.f32.mrf.mxu1 }
 0x579   : > { %v11823_v8 = vpop.f32.mrf.mxu0  ;;  %12332 = vst.msk [vmem:[%s19480_s25 + $0x350] sm:$0xff] %vm1217_vm2, %v12196_v46  ;;  %v12194_v57 = vadd.f32 %v19862_v58, %v12051_v51  ;;  %v12054_v14 = vadd.f32 %v15107_v39, %v10990_v31  ;;  %v10988_v42 = vadd.f32 %v10759_v37, %v20941_v21  ;;  %v20949_v51 = vld [vmem:[#allocation41_spill] sm:$0xff] }
 0x57a   : > { %v14972_v10 = vpop.f32.mrf.mxu1 }
 0x57b   : > { %v15110_v62 = vpop.f32.mrf.mxu0  ;;  %12330 = vst.msk [vmem:[%s19480_s25 + $0x340] sm:$0xff] %vm1217_vm2, %v12194_v57  ;;  %v12197_v48 = vadd.f32 %v19862_v58, %v12054_v14  ;;  %v12052_v36 = vadd.f32 %v11823_v8, %v10988_v42  ;;  %v10993_v33 = vadd.f32 %v14972_v10, %v20942_v0  ;;  %v20950_v14 = vld [vmem:[#allocation42_spill] sm:$0xff] }
 0x57c   : > { %v10772_v13 = vpop.f32.mrf.mxu1 }
 0x57d   : > { %v11836_v20 = vpop.f32.mrf.mxu0  ;;  %12333 = vst.msk [vmem:[%s19480_s25 + $0x358] sm:$0xff] %vm1217_vm2, %v12197_v48  ;;  %v12195_v15 = vadd.f32 %v19862_v58, %v12052_v36  ;;  %v12057_v60 = vadd.f32 %v15110_v62, %v10993_v33  ;;  %v10991_v11 = vadd.f32 %v10772_v13, %v20943_v54  ;;  %v20951_v36 = vld [vmem:[#allocation43_spill] sm:$0xff] }
 0x57e   : > { %v14973_v59 = vpop.f32.mrf.mxu1 }
 0x57f   : > { %v15111_v26 = vpop.f32.mrf.mxu0  ;;  %12331 = vst.msk [vmem:[%s19480_s25 + $0x348] sm:$0xff] %vm1217_vm2, %v12195_v15  ;;  %v12200_v47 = vadd.f32 %v19862_v58, %v12057_v60  ;;  %v12055_v6 = vadd.f32 %v11836_v20, %v10991_v11  ;;  %v10994_v19 = vadd.f32 %v14973_v59, %v20944_v9  ;;  %v20952_v60 = vld [vmem:[#allocation44_spill] sm:$0xff] }
 0x580   : > { %v10775_v29 = vpop.f32.mrf.mxu1 }
 0x581   : > { %v11839_v45 = vpop.f32.mrf.mxu0  ;;  %12336 = vst.msk [vmem:[%s19480_s25 + $0x370] sm:$0xff] %vm1217_vm2, %v12200_v47  ;;  %v12198_v30 = vadd.f32 %v19862_v58, %v12055_v6  ;;  %v12058_v44 = vadd.f32 %v15111_v26, %v10994_v19  ;;  %v10992_v50 = vadd.f32 %v10775_v29, %v20945_v7  ;;  %v20953_v6 = vld [vmem:[#allocation45_spill] sm:$0xff] }
 0x582   : > { %v14976_v52 = vpop.f32.mrf.mxu1 }
 0x583   : > { %v15114_v24 = vpop.f32.mrf.mxu0  ;;  %12334 = vst.msk [vmem:[%s19480_s25 + $0x360] sm:$0xff] %vm1217_vm2, %v12198_v30  ;;  %v12201_v63 = vadd.f32 %v19862_v58, %v12058_v44  ;;  %v12056_v41 = vadd.f32 %v11839_v45, %v10992_v50  ;;  %v10997_v61 = vadd.f32 %v14976_v52, %v20946_v17  ;;  %v20954_v44 = vld [vmem:[#allocation46_spill] sm:$0xff] }
 0x584   : > { %v10788_v28 = vpop.f32.mrf.mxu1 }
 0x585   : > { %v11852_v25 = vpop.f32.mrf.mxu0  ;;  %12337 = vst.msk [vmem:[%s19480_s25 + $0x378] sm:$0xff] %vm1217_vm2, %v12201_v63  ;;  %v12199_v56 = vadd.f32 %v19862_v58, %v12056_v41  ;;  %v12061_v23 = vadd.f32 %v15114_v24, %v10997_v61  ;;  %v10995_v3 = vadd.f32 %v10788_v28, %v20947_v12 }
 0x586   : > { %v14977_v16 = vpop.f32.mrf.mxu1 }
 0x587   : > { %v15115_v27 = vpop.f32.mrf.mxu0  ;;  %12335 = vst.msk [vmem:[%s19480_s25 + $0x368] sm:$0xff] %vm1217_vm2, %v12199_v56  ;;  %v12204_v38 = vadd.f32 %v19862_v58, %v12061_v23  ;;  %v12059_v49 = vadd.f32 %v11852_v25, %v10995_v3  ;;  %v10998_v32 = vadd.f32 %v14977_v16, %v20948_v1  ;;  %v20955_v16 = vld [vmem:[#allocation48_spill] sm:$0xff] }
 0x588   : > { %v10791_v39 = vpop.f32.mrf.mxu1 }
 0x589   : > { %v11855_v2 = vpop.f32.mrf.mxu0  ;;  %12340 = vst.msk [vmem:[%s19480_s25 + $0x390] sm:$0xff] %vm1217_vm2, %v12204_v38  ;;  %v12202_v35 = vadd.f32 %v19862_v58, %v12059_v49  ;;  %v12062_v46 = vadd.f32 %v15115_v27, %v10998_v32  ;;  %v10996_v22 = vadd.f32 %v10791_v39, %v20949_v51 }
 0x58a   : > { %v14980_v8 = vpop.f32.mrf.mxu1 }
 0x58b   : > { %v15118_v31 = vpop.f32.mrf.mxu0  ;;  %12338 = vst.msk [vmem:[%s19480_s25 + $0x380] sm:$0xff] %vm1217_vm2, %v12202_v35  ;;  %v12205_v37 = vadd.f32 %v19862_v58, %v12062_v46  ;;  %v12060_v57 = vadd.f32 %v11855_v2, %v10996_v22  ;;  %v11001_v21 = vadd.f32 %v14980_v8, %v20950_v14  ;;  %v20956_v2 = vld [vmem:[#allocation50_spill] sm:$0xff]  ;;  %v20957_v14 = vld [vmem:[#allocation52_spill] sm:$0xff] }
 0x58c   : > { %v10804_v62 = vpop.f32.mrf.mxu1 }
 0x58d   : > { %v11868_v42 = vpop.f32.mrf.mxu0  ;;  %12341 = vst.msk [vmem:[%s19480_s25 + $0x398] sm:$0xff] %vm1217_vm2, %v12205_v37  ;;  %v12203_v10 = vadd.f32 %v19862_v58, %v12060_v57  ;;  %v12065_v48 = vadd.f32 %v15118_v31, %v11001_v21  ;;  %v10999_v0 = vadd.f32 %v10804_v62, %v20951_v36  ;;  %v20958_v36 = vld [vmem:[#allocation54_spill] sm:$0xff] }
 0x58e   : > { %v14981_v20 = vpop.f32.mrf.mxu1 }
 0x58f   : > { %v15119_v33 = vpop.f32.mrf.mxu0  ;;  %12339 = vst.msk [vmem:[%s19480_s25 + $0x388] sm:$0xff] %vm1217_vm2, %v12203_v10  ;;  %v12208_v13 = vadd.f32 %v19862_v58, %v12065_v48  ;;  %v12063_v15 = vadd.f32 %v11868_v42, %v10999_v0  ;;  %v11002_v54 = vadd.f32 %v14981_v20, %v20952_v60 }
 0x590   : > { %v10807_v26 = vpop.f32.mrf.mxu1 }
 0x591   : > { %v11871_v11 = vpop.f32.mrf.mxu0  ;;  %12344 = vst.msk [vmem:[%s19480_s25 + $0x3b0] sm:$0xff] %vm1217_vm2, %v12208_v13  ;;  %v12206_v59 = vadd.f32 %v19862_v58, %v12063_v15  ;;  %v12066_v47 = vadd.f32 %v15119_v33, %v11002_v54  ;;  %v11000_v9 = vadd.f32 %v10807_v26, %v20953_v6  ;;  %v20959_v15 = vld [vmem:[#allocation56_spill] sm:$0xff] }
 0x592   : > { %v14984_v45 = vpop.f32.mrf.mxu1 }
 0x593   : > { %v15122_v19 = vpop.f32.mrf.mxu0  ;;  %12342 = vst.msk [vmem:[%s19480_s25 + $0x3a0] sm:$0xff] %vm1217_vm2, %v12206_v59  ;;  %v12209_v29 = vadd.f32 %v19862_v58, %v12066_v47  ;;  %v12064_v30 = vadd.f32 %v11871_v11, %v11000_v9  ;;  %v11005_v7 = vadd.f32 %v14984_v45, %v20954_v44 }
 0x594   : > { %v10820_v24 = vpop.f32.mrf.mxu1 }
 0x595   : > { %v11884_v50 = vpop.f32.mrf.mxu0  ;;  %12345 = vst.msk [vmem:[%s19480_s25 + $0x3b8] sm:$0xff] %vm1217_vm2, %v12209_v29  ;;  %v12207_v52 = vadd.f32 %v19862_v58, %v12064_v30  ;;  %v12069_v63 = vadd.f32 %v15122_v19, %v11005_v7  ;;  %v11003_v41 = vadd.f32 %v10820_v24, %v19350_v5 }
 0x596   : > { %v14985_v61 = vpop.f32.mrf.mxu1 }
 0x597   : > { %v15123_v17 = vpop.f32.mrf.mxu0  ;;  %12343 = vst.msk [vmem:[%s19480_s25 + $0x3a8] sm:$0xff] %vm1217_vm2, %v12207_v52  ;;  %v12212_v25 = vadd.f32 %v19862_v58, %v12069_v63  ;;  %v12067_v28 = vadd.f32 %v11884_v50, %v11003_v41  ;;  %v11006_v56 = vadd.f32 %v14985_v61, %v19355_v40 }
 0x598   : > { %v10823_v12 = vpop.f32.mrf.mxu1 }
 0x599   : > { %v11887_v23 = vpop.f32.mrf.mxu0  ;;  %12348 = vst.msk [vmem:[%s19480_s25 + $0x3d0] sm:$0xff] %vm1217_vm2, %v12212_v25  ;;  %v12210_v3 = vadd.f32 %v19862_v58, %v12067_v28  ;;  %v12070_v27 = vadd.f32 %v15123_v17, %v11006_v56  ;;  %v11004_v5 = vadd.f32 %v10823_v12, %v20955_v16  ;;  %v20960_v17 = vld [vmem:[#allocation58_spill] sm:$0xff] }
 0x59a   : > { %v14988_v49 = vpop.f32.mrf.mxu1 }
 0x59b   : > { %v15126_v38 = vpop.f32.mrf.mxu0  ;;  %12346 = vst.msk [vmem:[%s19480_s25 + $0x3c0] sm:$0xff] %vm1217_vm2, %v12210_v3  ;;  %v12213_v1 = vadd.f32 %v19862_v58, %v12070_v27  ;;  %v12068_v32 = vadd.f32 %v11887_v23, %v11004_v5  ;;  %v11009_v40 = vadd.f32 %v14988_v49, %v20956_v2 }
 0x59c   : > { %v10836_v35 = vpop.f32.mrf.mxu1 }
 0x59d   : > { %v11900_v39 = vpop.f32.mrf.mxu0  ;;  %12349 = vst.msk [vmem:[%s19480_s25 + $0x3d8] sm:$0xff] %vm1217_vm2, %v12213_v1  ;;  %v12211_v46 = vadd.f32 %v19862_v58, %v12068_v32  ;;  %v12073_v51 = vadd.f32 %v15126_v38, %v11009_v40  ;;  %v11007_v22 = vadd.f32 %v10836_v35, %v19381_v4  ;;  %v20961_v32 = vld [vmem:[#allocation60_spill] sm:$0xff] }
 0x59e   : > { %v14989_v8 = vpop.f32.mrf.mxu1 }
 0x59f   : > { %v15127_v31 = vpop.f32.mrf.mxu0  ;;  %12347 = vst.msk [vmem:[%s19480_s25 + $0x3c8] sm:$0xff] %vm1217_vm2, %v12211_v46  ;;  %v12216_v37 = vadd.f32 %v19862_v58, %v12073_v51  ;;  %v12071_v57 = vadd.f32 %v11900_v39, %v11007_v22  ;;  %v11010_v21 = vadd.f32 %v14989_v8, %v20957_v14 }
 0x5a0   : > { %v10839_v62 = vpop.f32.mrf.mxu1 }
 0x5a1   : > { %v11903_v42 = vpop.f32.mrf.mxu0  ;;  %12352 = vst.msk [vmem:[%s19480_s25 + $0x3f0] sm:$0xff] %vm1217_vm2, %v12216_v37  ;;  %v12214_v10 = vadd.f32 %v19862_v58, %v12071_v57  ;;  %v12074_v48 = vadd.f32 %v15127_v31, %v11010_v21  ;;  %v11008_v4 = vadd.f32 %v10839_v62, %v20958_v36 }
 0x5a2   : > { %v14992_v33 = vpop.f32.mrf.mxu1 }
 0x5a3   : > { %v15130_v0 = vpop.f32.mrf.mxu0  ;;  %12350 = vst.msk [vmem:[%s19480_s25 + $0x3e0] sm:$0xff] %vm1217_vm2, %v12214_v10  ;;  %v12217_v20 = vadd.f32 %v19862_v58, %v12074_v48  ;;  %v12072_v13 = vadd.f32 %v11903_v42, %v11008_v4  ;;  %v11013_v60 = vadd.f32 %v14992_v33, %v20959_v15 }
 0x5a4   : > { %v10852_v11 = vpop.f32.mrf.mxu1 }
 0x5a5   : > { %v11916_v54 = vpop.f32.mrf.mxu0  ;;  %12353 = vst.msk [vmem:[%s19480_s25 + $0x3f8] sm:$0xff] %vm1217_vm2, %v12217_v20  ;;  %v12215_v26 = vadd.f32 %v19862_v58, %v12072_v13  ;;  %v12077_v59 = vadd.f32 %v15130_v0, %v11013_v60  ;;  %v11011_v47 = vadd.f32 %v10852_v11, %v19414_v34 }
 0x5a6   : > { %v14993_v9 = vpop.f32.mrf.mxu1 }
 0x5a7   : > { %v15131_v6 = vpop.f32.mrf.mxu0  ;;  %12351 = vst.msk [vmem:[%s19480_s25 + $0x3e8] sm:$0xff] %vm1217_vm2, %v12215_v26  ;;  %v12220_v19 = vadd.f32 %v19862_v58, %v12077_v59  ;;  %v12075_v45 = vadd.f32 %v11916_v54, %v11011_v47  ;;  %v11014_v29 = vadd.f32 %v14993_v9, %v19419_v53 }
 0x5a8   : > { %v10855_v44 = vpop.f32.mrf.mxu1 }
 0x5a9   : > { %v11919_v30 = vpop.f32.mrf.mxu0  ;;  %12356 = vst.msk [vmem:[%s19480_s25 + $0x410] sm:$0xff] %vm1217_vm2, %v12220_v19  ;;  %v12218_v7 = vadd.f32 %v19862_v58, %v12075_v45  ;;  %v12078_v50 = vadd.f32 %v15131_v6, %v11014_v29  ;;  %v11012_v34 = vadd.f32 %v10855_v44, %v19431_v18 }
 0x5aa   : > { %v14996_v52 = vpop.f32.mrf.mxu1 }
 0x5ab   : > { %v15134_v24 = vpop.f32.mrf.mxu0  ;;  %12354 = vst.msk [vmem:[%s19480_s25 + $0x400] sm:$0xff] %vm1217_vm2, %v12218_v7  ;;  %v12221_v63 = vadd.f32 %v19862_v58, %v12078_v50  ;;  %v12076_v41 = vadd.f32 %v11919_v30, %v11012_v34  ;;  %v11017_v53 = vadd.f32 %v14996_v52, %v20960_v17 }
 0x5ac   : > { %v10868_v25 = vpop.f32.mrf.mxu1 }
 0x5ad   : > { %v11932_v61 = vpop.f32.mrf.mxu0  ;;  %12357 = vst.msk [vmem:[%s19480_s25 + $0x418] sm:$0xff] %vm1217_vm2, %v12221_v63  ;;  %v12219_v28 = vadd.f32 %v19862_v58, %v12076_v41  ;;  %v12081_v56 = vadd.f32 %v15134_v24, %v11017_v53  ;;  %v11015_v18 = vadd.f32 %v10868_v25, %v19445_v43 }
 0x5ae   : > { %v14997_v12 = vpop.f32.mrf.mxu1 }
 0x5af   : > { %v15135_v23 = vpop.f32.mrf.mxu0  ;;  %12355 = vst.msk [vmem:[%s19480_s25 + $0x408] sm:$0xff] %vm1217_vm2, %v12219_v28  ;;  %v12224_v3 = vadd.f32 %v19862_v58, %v12081_v56  ;;  %v12079_v27 = vadd.f32 %v11932_v61, %v11015_v18  ;;  %v11018_v16 = vadd.f32 %v14997_v12, %v19451_v55 }
 0x5b0   : > { %v10871_v5 = vpop.f32.mrf.mxu1 }
 0x5b1   : > { %v11935_v38 = vpop.f32.mrf.mxu0  ;;  %12360 = vst.msk [vmem:[%s19480_s25 + $0x430] sm:$0xff] %vm1217_vm2, %v12224_v3  ;;  %v12222_v49 = vadd.f32 %v19862_v58, %v12079_v27  ;;  %v12082_v1 = vadd.f32 %v15135_v23, %v11018_v16  ;;  %v11016_v43 = vadd.f32 %v10871_v5, %v20961_v32 }
 0x5b3   : > { %12358 = vst.msk [vmem:[%s19480_s25 + $0x420] sm:$0xff] %vm1217_vm2, %v12222_v49  ;;  %v12225_v2 = vadd.f32 %v19862_v58, %v12082_v1  ;;  %v12080_v40 = vadd.f32 %v11935_v38, %v11016_v43 }
 0x5b5   : > { %12361 = vst.msk [vmem:[%s19480_s25 + $0x438] sm:$0xff] %vm1217_vm2, %v12225_v2  ;;  %v12223_v39 = vadd.f32 %v19862_v58, %v12080_v40 }
 0x5b7   : > { %12359 = vst.msk [vmem:[%s19480_s25 + $0x428] sm:$0xff] %vm1217_vm2, %v12223_v39 }
 0x5b8 PF: > { %s14_s12 = sadd.s32 1, %s15626_s12  }
 0x5b9   : > { %p11_p1 = scmp.ge.s32.totalorder %s14_s12, 4  }
 0x5bb   :  { %13 = sbr.rel (!%p11_p1) target bundleno = 1 (0x1), region = 75 }
 0x5c0   :  { %12383 = vsyncpa [#allocation3], 1 }
 0x5c1   :  { %12385 = vsyncpa [#allocation3 + $0x1], 1 }

</bundles_post_ra>
